<compile_context>
chip_gen: v5e
topology: v5e:2x2
jax: 0.10.0
libtpu: 0.0.40
codegen_flags: <defaults>
</compile_context>

<pallas_src>
import functools

import jax
import jax.numpy as jnp
from jax import lax
from jax.experimental import pallas as pl
from jax.experimental.pallas import tpu as pltpu

NEG_BIG = -9e8                      # matches the -900000000.0 masks in the PyTorch code
MATMUL_DTYPE = jnp.bfloat16         # MXU inputs only; all elementwise math stays f32


# ----------------------------- in-kernel math helpers ------------------------------

def _mm(a, w):
    """MXU matmul: operands in MATMUL_DTYPE, f32 accumulation."""
    return jnp.dot(a.astype(w.dtype), w, preferred_element_type=jnp.float32)


def _leaky_relu(x, slope=0.01):
    return jnp.where(x > 0, x, slope * x)


def _elu(x):
    # exp only on the clamped branch so the unselected lane never produces inf
    return jnp.where(x > 0, x, jnp.exp(jnp.minimum(x, 0.0)) - 1.0)


def _gru(x, h, w_ihT, w_hhT, b_ih, b_hh, F):
    """nn.GRUCell with merged-gate matmuls: two (rows, 3F) MXU calls instead of six."""
    gi = _mm(x, w_ihT) + b_ih                     # (rows, 3F): [r | z | n]
    gh = _mm(h, w_hhT) + b_hh
    r = jax.nn.sigmoid(gi[:, :F] + gh[:, :F])
    z = jax.nn.sigmoid(gi[:, F:2 * F] + gh[:, F:2 * F])
    n = jnp.tanh(gi[:, 2 * F:] + r * gh[:, 2 * F:])
    return (1.0 - z) * n + z * h


def _grouped_softmax(logits, col, ranges):
    """Disjoint-range masked softmaxes sharing one exp pass (per-range max shift)."""
    shift = jnp.zeros_like(logits)
    sels = []
    for lo, hi in ranges:
        selb = (col >= lo) & (col < hi)
        sel = selb.astype(jnp.float32)
        rmax = jnp.max(jnp.where(selb, logits, NEG_BIG), axis=-1, keepdims=True)
        shift = shift + sel * rmax
        sels.append(sel)
    e = jnp.exp(jnp.minimum(logits - shift, 0.0))   # clamp keeps unselected columns finite
    out = jnp.zeros_like(logits)
    for sel in sels:
        es = e * sel
        out = out + es / jnp.sum(es, axis=-1, keepdims=True)
    return out


def _atom_decoder(logits):
    col = lax.broadcasted_iota(jnp.int32, logits.shape, 1)
    out = _grouped_softmax(logits, col, [(0, 16), (16, 22), (24, 30), (31, 36), (37, 39)])
    m24 = (col == 24).astype(jnp.float32)
    out = out + jnp.maximum(logits * m24, 0.0) * m24
    m30 = (col == 30).astype(jnp.float32)
    out = out + jax.nn.sigmoid(logits * m30) * m30
    m36 = (col == 36).astype(jnp.float32)
    out = out + jax.nn.sigmoid(logits * m36) * m36
    return out


def _bond_decoder(logits):
    col = lax.broadcasted_iota(jnp.int32, logits.shape, 1)
    out = _grouped_softmax(logits, col, [(0, 4), (6, 10)])
    m4 = (col == 4).astype(jnp.float32)
    out = out + jax.nn.sigmoid(logits * m4) * m4
    m5 = (col == 5).astype(jnp.float32)
    out = out + jax.nn.sigmoid(logits * m5) * m5
    return out


# ----------------------------------- fused kernel ----------------------------------

def grn_fused_kernel(mol_ref, mfp_ref, act_ref, amask_ref, attm_ref, smask_ref, oh_ref,
                     *rest, TB, L, N, F, DA, DB, radius):
    w = [r[...] for r in rest[:-2]]
    atom_out_ref, bond_out_ref = rest[-2], rest[-1]
    rows = TB * L

    # graph-structure tensors (precomputed in the wrapper from atom_degree_list / atom_mask)
    amask = amask_ref[...].reshape(rows, 1)                      # atom_mask
    mol_neg = jnp.where(amask == 0.0, NEG_BIG, 0.0)              # mol_softmax_mask
    attm = attm_ref[...].reshape(rows, N)                        # attend_mask
    smask = smask_ref[...].reshape(rows, N)                      # softmax_mask
    oh_all = oh_ref[...]                                         # (TB, N, L, L) one-hot(deg)

    act0_mol = act_ref[...]                                      # (TB, L, F)
    act0 = act0_mol.reshape(rows, F)
    mf_b = jnp.broadcast_to(mol_ref[...], (TB, L, F))            # mol_feature_expand
    mfp_rows = jnp.broadcast_to(mfp_ref[...], (TB, L, F)).reshape(rows, F)  # mf @ w_ma1^T

    # weights (flat list, see _pack_weights for the ordering)
    (w_ma2T, b_ma, w_mtT, b_mt, w_m_ihT, w_m_hhT, b_m_ih, b_m_hh) = w[:8]
    per_d = w[8:8 + 9 * (radius - 1)]
    (w_afT, b_af, w_bf1T, w_bf2T, b_bf) = w[8 + 9 * (radius - 1):]

    # ---- stage 1: molecule-level super-attention ----------------------------------
    # The reference T-loop is loop-invariant (inputs and the GRU hidden never change
    # inside it), so one evaluation is exactly equivalent for any T >= 1.
    giT = (mf_b * act0_mol).reshape(rows, F)
    v = _leaky_relu(mfp_rows + _mm(act0, w_ma2T) + b_ma)         # mol_align(concat)
    v = (v + mol_neg) * amask
    ctx = _elu(_mm(v * act0, w_mtT) + b_mt)                      # dropout == identity
    act = jnp.maximum(_gru(ctx, giT, w_m_ihT, w_m_hhT, b_m_ih, b_m_hh, F), 0.0)

    lane_n = lax.broadcasted_iota(jnp.int32, (1, N), 1)

    # ---- stage 2: (radius - 1) rounds of neighbor attention + GRU ------------------
    for d in range(radius - 1):
        (w_al1, w_al2, b_al, w_atT, b_at, w_ihT, w_hhT, b_ih, b_hh) = per_d[9 * d:9 * (d + 1)]
        act_mol = act.reshape(TB, L, F)

        # attend-transform of every atom (single big matmul, gather happens later)
        t_mol = (_mm(act, w_atT) + b_at).reshape(TB, L, F)
        # align score, self half (per atom)
        s_self = jnp.sum(act * w_al1, axis=-1, keepdims=True)    # (rows, 1)
        # align score, neighbor half, laid out with atoms in lanes so the one-hot gather
        # becomes a broadcast-multiply + lane reduction
        s_nbr_lane = jnp.einsum('mqf,mjf->mqj',
                                jnp.broadcast_to(w_al2.reshape(1, 1, F), (TB, 1, F)),
                                act_mol.astype(w_al2.dtype),
                                preferred_element_type=jnp.float32)        # (TB, 1, L)

        score_nbr = jnp.zeros((rows, N), jnp.float32)
        for n in range(N):                                       # static, N is small
            g = jnp.sum(oh_all[:, n] * s_nbr_lane, axis=-1, keepdims=True).reshape(rows, 1)
            score_nbr = score_nbr + g * (lane_n == n).astype(jnp.float32)

        score = _leaky_relu(score_nbr + s_self + b_al) + smask
        score = score - jnp.max(score, axis=-1, keepdims=True)
        e = jnp.exp(score)
        att = (e / jnp.sum(e, axis=-1, keepdims=True)) * attm    # (rows, N)

        # attention-weighted adjacency, then a single batched matmul for the context
        adj = jnp.zeros((TB, L, L), jnp.float32)
        for n in range(N):
            adj = adj + att[:, n:n + 1].reshape(TB, L, 1) * oh_all[:, n]
        ctx_mol = jnp.einsum('mlj,mjf->mlf',
                             adj.astype(MATMUL_DTYPE), t_mol.astype(MATMUL_DTYPE),
                             preferred_element_type=jnp.float32)
        ctx = _elu(ctx_mol.reshape(rows, F))
        act = jnp.maximum(_gru(ctx, act, w_ihT, w_hhT, b_ih, b_hh, F), 0.0)

    # ---- stage 3: output heads + masked decoders -----------------------------------
    atom_logits = _mm(act, w_afT) + b_af                         # (rows, DA)
    atom_out_ref[...] = _atom_decoder(atom_logits).reshape(TB, L, DA)

    bond_self = _mm(act, w_bf1T)                                 # (rows, DB)
    s_bf2_mol = _mm(act, w_bf2T).reshape(TB, L, DB)              # (TB, L, DB)
    for n in range(N):                                           # static, N is small
        g_n = jnp.einsum('mlj,mjd->mld',
                         oh_all[:, n].astype(MATMUL_DTYPE), s_bf2_mol.astype(MATMUL_DTYPE),
                         preferred_element_type=jnp.float32)     # gathered neighbor half
        logits_n = bond_self + g_n.reshape(rows, DB) + b_bf
        bond_out_ref[:, :, n, :] = _bond_decoder(logits_n).reshape(TB, L, DB)


# --------------------------------- glue / wrapper -----------------------------------

def _block_batch(B, L, target_rows=1024):
    """Molecules per grid step: fill the MXU M dim, but keep >= 2 grid steps (v7x has two
    TensorCores) whenever the batch allows it, and make the block divide B."""
    tb = max(1, min(B, max(1, target_rows // max(L, 1))))
    while tb > 1 and (B // tb) < 2:
        tb //= 2
    while B % tb:
        tb -= 1
    return tb


def _pack_weights(params, F, radius, dtype):
    """Pre-transpose / pre-split all weights (MXU operands cast to `dtype`, biases f32)."""
    wc = lambda x: x.astype(dtype)
    w_ma, b_ma = params["mol_align"]                 # (F, 2F), (1, F)
    w_mt, b_mt = params["mol_attend"]
    w_m_ih, w_m_hh, b_m_ih, b_m_hh = params["mol_gru"]
    flat = [wc(w_ma[:, F:].T), b_ma, wc(w_mt.T), b_mt,
            wc(w_m_ih.T), wc(w_m_hh.T), b_m_ih, b_m_hh]
    for d in range(radius - 1):
        w_al, b_al = params["align"][d]              # (1, 2F), (1, 1)
        w_at, b_at = params["attend"][d]
        w_ih, w_hh, b_ih, b_hh = params["gru"][d]
        flat += [wc(w_al[:, :F]), wc(w_al[:, F:]), b_al,
                 wc(w_at.T), b_at,
                 wc(w_ih.T), wc(w_hh.T), b_ih, b_hh]
    w_af, b_af = params["atom_fc"]
    w_bf, b_bf = params["bond_fc"]                   # (DB, 2F), (1, DB)
    flat += [wc(w_af.T), b_af, wc(w_bf[:, :F].T), wc(w_bf[:, F:].T), b_bf]
    return flat, w_ma[:, :F]                         # w_ma1 for the hoisted mol-side matmul


def init_params(key, radius, F, DA, DB):
    keys = iter(jax.random.split(key, 64))

    def lin(out_d, in_d):
        bound = 1.0 / jnp.sqrt(jnp.float32(in_d))
        w = jax.random.uniform(next(keys), (out_d, in_d), jnp.float32, -bound, bound)
        b = jax.random.uniform(next(keys), (1, out_d), jnp.float32, -bound, bound)
        return w, b

    def gru():
        w_ih, b_ih = lin(3 * F, F)
        w_hh, b_hh = lin(3 * F, F)
        return w_ih, w_hh, b_ih, b_hh

    return {
        "atom_fc": lin(DA, F),
        "bond_fc": lin(DB, 2 * F),
        "mol_align": lin(F, 2 * F),
        "mol_attend": lin(F, F),
        "mol_gru": gru(),
        "align": [lin(1, 2 * F) for _ in range(radius)],
        "attend": [lin(F, F) for _ in range(radius)],
        "gru": [gru() for _ in range(radius)],
    }


def grn_forward(params, atom_list, bond_list, atom_degree_list, bond_degree_list,
                atom_mask, mol_feature, activated_features, *, radius, T, block_b=None):
    del atom_list, bond_list, bond_degree_list      # dead inputs in the reference forward
    assert T >= 1 and radius >= 1
    B, L, F = activated_features.shape
    N = atom_degree_list.shape[-1]
    DA = params["atom_fc"][0].shape[0]
    DB = params["bond_fc"][0].shape[0]
    assert DA >= 39 and DB >= 10                    # column ranges hard-coded in the reference

    act0 = activated_features.astype(jnp.float32)
    mol = mol_feature.astype(jnp.float32).reshape(B, 1, F)
    amask = atom_mask.astype(jnp.float32).reshape(B, L, 1)

    deg = atom_degree_list.astype(jnp.int32)
    attend_mask = jnp.where(deg != L - 1, 1.0, 0.0).astype(jnp.float32)        # (B, L, N)
    softmax_mask = jnp.where(deg == L - 1, NEG_BIG, 0.0).astype(jnp.float32)   # (B, L, N)
    # one-hot of the neighbour indices, laid out (B, N, L, L) so slicing neighbour n inside
    # the kernel keeps the (L, L) minor tile intact
    onehot = (deg[..., None] == jnp.arange(L, dtype=jnp.int32)).astype(jnp.float32)
    onehot = jnp.transpose(onehot, (0, 2, 1, 3))                               # (B, N, L, L)

    weights, w_ma1 = _pack_weights(params, F, radius, MATMUL_DTYPE)
    # hoisted: molecule-side half of mol_align (one row per molecule, not per atom)
    mfp = (mol_feature.astype(jnp.float32) @ w_ma1.T).reshape(B, 1, F)

    TB = block_b or _block_batch(B, L)
    grid = (B // TB,)

    def bspec(shape):                                # batch-blocked leading dim
        nd = len(shape)
        return pl.BlockSpec((TB,) + tuple(shape[1:]),
                            lambda b, _n=nd: (b,) + (0,) * (_n - 1))

    def wspec(shape):                                # whole (replicated) tensor
        nd = len(shape)
        return pl.BlockSpec(tuple(shape), lambda b, _n=nd: (0,) * _n)

    data_in = [mol, mfp, act0, amask, attend_mask, softmax_mask, onehot]
    in_specs = [bspec(x.shape) for x in data_in] + [wspec(w.shape) for w in weights]

    kernel = functools.partial(grn_fused_kernel, TB=TB, L=L, N=N, F=F, DA=DA, DB=DB,
                               radius=radius)
    atom_out, bond_out = pl.pallas_call(
        kernel,
        out_shape=(jax.ShapeDtypeStruct((B, L, DA), jnp.float32),
                   jax.ShapeDtypeStruct((B, L, N, DB), jnp.float32)),
        grid=grid,
        in_specs=in_specs,
        out_specs=(bspec((B, L, DA)), bspec((B, L, N, DB))),
        compiler_params=pltpu.CompilerParams(
            dimension_semantics=("parallel",),
            vmem_limit_bytes=32 * 1024 * 1024),
    )(*data_in, *weights)
    return atom_out, bond_out


if __name__ == "__main__":
    B, L, N, F = 8, 8, 4, 32                 # batch, mol_length, max_neighbor_num, fingerprint_dim
    NUM_ATOM_FEAT, NUM_BOND_FEAT = 16, 10
    RADIUS, T = 2, 2
    DA, DB = 39, 10                          # output_atom_dim >= 39, output_bond_dim >= 10

    key = jax.random.PRNGKey(0)
    k = jax.random.split(key, 10)
    params = init_params(k[0], RADIUS, F, DA, DB)

    atom_list = jax.random.normal(k[1], (B, L, NUM_ATOM_FEAT), jnp.float32)
    bond_list = jax.random.normal(k[2], (B, L, NUM_BOND_FEAT), jnp.float32)
    atom_degree_list = jax.random.randint(k[3], (B, L, N), 0, L)      # L-1 == padding sentinel
    bond_degree_list = jax.random.randint(k[4], (B, L, N), 0, L)
    atom_mask = (jax.random.uniform(k[5], (B, L)) > 0.25).astype(jnp.float32)
    mol_feature = jax.random.normal(k[6], (B, F), jnp.float32)
    activated_features = jax.nn.relu(jax.random.normal(k[7], (B, L, F), jnp.float32))

    atom_out, bond_out = grn_forward(
        params, atom_list, bond_list, atom_degree_list, bond_degree_list,
        atom_mask, mol_feature, activated_features, radius=RADIUS, T=T)
    jax.block_until_ready((atom_out, bond_out))
    assert atom_out.shape == (B, L, DA) and bond_out.shape == (B, L, N, DB)
    assert bool(jnp.isfinite(atom_out).all()) and bool(jnp.isfinite(bond_out).all())
    print("KERNEL_OK")
</pallas_src>

<mosaic_0001>
module attributes {stable_mosaic.version = 11 : i64} {
  func.func @grn_fused_kernel(%arg0: i32, %arg1: memref<4x1x32xf32, #tpu.memory_space<vmem>>, %arg2: memref<4x1x32xf32, #tpu.memory_space<vmem>>, %arg3: memref<4x8x32xf32, #tpu.memory_space<vmem>>, %arg4: memref<4x8x1xf32, #tpu.memory_space<vmem>>, %arg5: memref<4x8x4xf32, #tpu.memory_space<vmem>>, %arg6: memref<4x8x4xf32, #tpu.memory_space<vmem>>, %arg7: memref<4x4x8x8xf32, #tpu.memory_space<vmem>>, %arg8: memref<32x32xbf16, #tpu.memory_space<vmem>>, %arg9: memref<1x32xf32, #tpu.memory_space<vmem>>, %arg10: memref<32x32xbf16, #tpu.memory_space<vmem>>, %arg11: memref<1x32xf32, #tpu.memory_space<vmem>>, %arg12: memref<32x96xbf16, #tpu.memory_space<vmem>>, %arg13: memref<32x96xbf16, #tpu.memory_space<vmem>>, %arg14: memref<1x96xf32, #tpu.memory_space<vmem>>, %arg15: memref<1x96xf32, #tpu.memory_space<vmem>>, %arg16: memref<1x32xbf16, #tpu.memory_space<vmem>>, %arg17: memref<1x32xbf16, #tpu.memory_space<vmem>>, %arg18: memref<1x1xf32, #tpu.memory_space<vmem>>, %arg19: memref<32x32xbf16, #tpu.memory_space<vmem>>, %arg20: memref<1x32xf32, #tpu.memory_space<vmem>>, %arg21: memref<32x96xbf16, #tpu.memory_space<vmem>>, %arg22: memref<32x96xbf16, #tpu.memory_space<vmem>>, %arg23: memref<1x96xf32, #tpu.memory_space<vmem>>, %arg24: memref<1x96xf32, #tpu.memory_space<vmem>>, %arg25: memref<32x39xbf16, #tpu.memory_space<vmem>>, %arg26: memref<1x39xf32, #tpu.memory_space<vmem>>, %arg27: memref<32x10xbf16, #tpu.memory_space<vmem>>, %arg28: memref<32x10xbf16, #tpu.memory_space<vmem>>, %arg29: memref<1x10xf32, #tpu.memory_space<vmem>>, %arg30: memref<4x8x39xf32, #tpu.memory_space<vmem>>, %arg31: memref<4x8x4x10xf32, #tpu.memory_space<vmem>>) attributes {dimension_semantics = [#tpu.dimension_semantics<parallel>], iteration_bounds = array<i64: 2>, scalar_prefetch = 0 : i64, scratch_operands = 0 : i64, tpu.core_type = #tpu.core_type<tc>, window_params = [{transform_indices = @transform_0, window_bounds = array<i64: 4, 1, 32>}, {transform_indices = @transform_1, window_bounds = array<i64: 4, 1, 32>}, {transform_indices = @transform_2, window_bounds = array<i64: 4, 8, 32>}, {transform_indices = @transform_3, window_bounds = array<i64: 4, 8, 1>}, {transform_indices = @transform_4, window_bounds = array<i64: 4, 8, 4>}, {transform_indices = @transform_5, window_bounds = array<i64: 4, 8, 4>}, {transform_indices = @transform_6, window_bounds = array<i64: 4, 4, 8, 8>}, {pipeline_mode = #tpu.pipeline_mode<synchronous>, transform_indices = @transform_7, window_bounds = array<i64: 32, 32>}, {pipeline_mode = #tpu.pipeline_mode<synchronous>, transform_indices = @transform_8, window_bounds = array<i64: 1, 32>}, {pipeline_mode = #tpu.pipeline_mode<synchronous>, transform_indices = @transform_9, window_bounds = array<i64: 32, 32>}, {pipeline_mode = #tpu.pipeline_mode<synchronous>, transform_indices = @transform_10, window_bounds = array<i64: 1, 32>}, {pipeline_mode = #tpu.pipeline_mode<synchronous>, transform_indices = @transform_11, window_bounds = array<i64: 32, 96>}, {pipeline_mode = #tpu.pipeline_mode<synchronous>, transform_indices = @transform_12, window_bounds = array<i64: 32, 96>}, {pipeline_mode = #tpu.pipeline_mode<synchronous>, transform_indices = @transform_13, window_bounds = array<i64: 1, 96>}, {pipeline_mode = #tpu.pipeline_mode<synchronous>, transform_indices = @transform_14, window_bounds = array<i64: 1, 96>}, {pipeline_mode = #tpu.pipeline_mode<synchronous>, transform_indices = @transform_15, window_bounds = array<i64: 1, 32>}, {pipeline_mode = #tpu.pipeline_mode<synchronous>, transform_indices = @transform_16, window_bounds = array<i64: 1, 32>}, {pipeline_mode = #tpu.pipeline_mode<synchronous>, transform_indices = @transform_17, window_bounds = array<i64: 1, 1>}, {pipeline_mode = #tpu.pipeline_mode<synchronous>, transform_indices = @transform_18, window_bounds = array<i64: 32, 32>}, {pipeline_mode = #tpu.pipeline_mode<synchronous>, transform_indices = @transform_19, window_bounds = array<i64: 1, 32>}, {pipeline_mode = #tpu.pipeline_mode<synchronous>, transform_indices = @transform_20, window_bounds = array<i64: 32, 96>}, {pipeline_mode = #tpu.pipeline_mode<synchronous>, transform_indices = @transform_21, window_bounds = array<i64: 32, 96>}, {pipeline_mode = #tpu.pipeline_mode<synchronous>, transform_indices = @transform_22, window_bounds = array<i64: 1, 96>}, {pipeline_mode = #tpu.pipeline_mode<synchronous>, transform_indices = @transform_23, window_bounds = array<i64: 1, 96>}, {pipeline_mode = #tpu.pipeline_mode<synchronous>, transform_indices = @transform_24, window_bounds = array<i64: 32, 39>}, {pipeline_mode = #tpu.pipeline_mode<synchronous>, transform_indices = @transform_25, window_bounds = array<i64: 1, 39>}, {pipeline_mode = #tpu.pipeline_mode<synchronous>, transform_indices = @transform_26, window_bounds = array<i64: 32, 10>}, {pipeline_mode = #tpu.pipeline_mode<synchronous>, transform_indices = @transform_27, window_bounds = array<i64: 32, 10>}, {pipeline_mode = #tpu.pipeline_mode<synchronous>, transform_indices = @transform_28, window_bounds = array<i64: 1, 10>}, {transform_indices = @transform_29, window_bounds = array<i64: 4, 8, 39>}, {transform_indices = @transform_30, window_bounds = array<i64: 4, 8, 4, 10>}]} {
    %c0 = arith.constant 0 : index
    %c0_0 = arith.constant 0 : index
    %0 = vector.load %arg8[%c0, %c0_0] : memref<32x32xbf16, #tpu.memory_space<vmem>>, vector<32x32xbf16>
    %c0_1 = arith.constant 0 : index
    %c0_2 = arith.constant 0 : index
    %1 = vector.load %arg9[%c0_1, %c0_2] : memref<1x32xf32, #tpu.memory_space<vmem>>, vector<1x32xf32>
    %c0_3 = arith.constant 0 : index
    %c0_4 = arith.constant 0 : index
    %2 = vector.load %arg10[%c0_3, %c0_4] : memref<32x32xbf16, #tpu.memory_space<vmem>>, vector<32x32xbf16>
    %c0_5 = arith.constant 0 : index
    %c0_6 = arith.constant 0 : index
    %3 = vector.load %arg11[%c0_5, %c0_6] : memref<1x32xf32, #tpu.memory_space<vmem>>, vector<1x32xf32>
    %c0_7 = arith.constant 0 : index
    %c0_8 = arith.constant 0 : index
    %4 = vector.load %arg12[%c0_7, %c0_8] : memref<32x96xbf16, #tpu.memory_space<vmem>>, vector<32x96xbf16>
    %c0_9 = arith.constant 0 : index
    %c0_10 = arith.constant 0 : index
    %5 = vector.load %arg13[%c0_9, %c0_10] : memref<32x96xbf16, #tpu.memory_space<vmem>>, vector<32x96xbf16>
    %c0_11 = arith.constant 0 : index
    %c0_12 = arith.constant 0 : index
    %6 = vector.load %arg14[%c0_11, %c0_12] : memref<1x96xf32, #tpu.memory_space<vmem>>, vector<1x96xf32>
    %c0_13 = arith.constant 0 : index
    %c0_14 = arith.constant 0 : index
    %7 = vector.load %arg15[%c0_13, %c0_14] : memref<1x96xf32, #tpu.memory_space<vmem>>, vector<1x96xf32>
    %c0_15 = arith.constant 0 : index
    %c0_16 = arith.constant 0 : index
    %8 = vector.load %arg16[%c0_15, %c0_16] : memref<1x32xbf16, #tpu.memory_space<vmem>>, vector<1x32xbf16>
    %c0_17 = arith.constant 0 : index
    %c0_18 = arith.constant 0 : index
    %9 = vector.load %arg17[%c0_17, %c0_18] : memref<1x32xbf16, #tpu.memory_space<vmem>>, vector<1x32xbf16>
    %c0_19 = arith.constant 0 : index
    %c0_20 = arith.constant 0 : index
    %10 = vector.load %arg18[%c0_19, %c0_20] : memref<1x1xf32, #tpu.memory_space<vmem>>, vector<1x1xf32>
    %c0_21 = arith.constant 0 : index
    %c0_22 = arith.constant 0 : index
    %11 = vector.load %arg19[%c0_21, %c0_22] : memref<32x32xbf16, #tpu.memory_space<vmem>>, vector<32x32xbf16>
    %c0_23 = arith.constant 0 : index
    %c0_24 = arith.constant 0 : index
    %12 = vector.load %arg20[%c0_23, %c0_24] : memref<1x32xf32, #tpu.memory_space<vmem>>, vector<1x32xf32>
    %c0_25 = arith.constant 0 : index
    %c0_26 = arith.constant 0 : index
    %13 = vector.load %arg21[%c0_25, %c0_26] : memref<32x96xbf16, #tpu.memory_space<vmem>>, vector<32x96xbf16>
    %c0_27 = arith.constant 0 : index
    %c0_28 = arith.constant 0 : index
    %14 = vector.load %arg22[%c0_27, %c0_28] : memref<32x96xbf16, #tpu.memory_space<vmem>>, vector<32x96xbf16>
    %c0_29 = arith.constant 0 : index
    %c0_30 = arith.constant 0 : index
    %15 = vector.load %arg23[%c0_29, %c0_30] : memref<1x96xf32, #tpu.memory_space<vmem>>, vector<1x96xf32>
    %c0_31 = arith.constant 0 : index
    %c0_32 = arith.constant 0 : index
    %16 = vector.load %arg24[%c0_31, %c0_32] : memref<1x96xf32, #tpu.memory_space<vmem>>, vector<1x96xf32>
    %c0_33 = arith.constant 0 : index
    %c0_34 = arith.constant 0 : index
    %17 = vector.load %arg25[%c0_33, %c0_34] : memref<32x39xbf16, #tpu.memory_space<vmem>>, vector<32x39xbf16>
    %c0_35 = arith.constant 0 : index
    %c0_36 = arith.constant 0 : index
    %18 = vector.load %arg26[%c0_35, %c0_36] : memref<1x39xf32, #tpu.memory_space<vmem>>, vector<1x39xf32>
    %c0_37 = arith.constant 0 : index
    %c0_38 = arith.constant 0 : index
    %19 = vector.load %arg27[%c0_37, %c0_38] : memref<32x10xbf16, #tpu.memory_space<vmem>>, vector<32x10xbf16>
    %c0_39 = arith.constant 0 : index
    %c0_40 = arith.constant 0 : index
    %20 = vector.load %arg28[%c0_39, %c0_40] : memref<32x10xbf16, #tpu.memory_space<vmem>>, vector<32x10xbf16>
    %c0_41 = arith.constant 0 : index
    %c0_42 = arith.constant 0 : index
    %21 = vector.load %arg29[%c0_41, %c0_42] : memref<1x10xf32, #tpu.memory_space<vmem>>, vector<1x10xf32>
    %c0_43 = arith.constant 0 : index
    %c0_44 = arith.constant 0 : index
    %c0_45 = arith.constant 0 : index
    %22 = vector.load %arg4[%c0_43, %c0_44, %c0_45] : memref<4x8x1xf32, #tpu.memory_space<vmem>>, vector<4x8x1xf32>
    %23 = vector.shape_cast %22 : vector<4x8x1xf32> to vector<32x1xf32>
    %cst = arith.constant 0.000000e+00 : f32
    %24 = vector.broadcast %cst : f32 to vector<32x1xf32>
    %25 = arith.cmpf oeq, %23, %24 : vector<32x1xf32>
    %cst_46 = arith.constant -9.000000e+08 : f32
    %cst_47 = arith.constant 0.000000e+00 : f32
    %26 = vector.broadcast %cst_46 : f32 to vector<32x1xf32>
    %27 = vector.broadcast %cst_47 : f32 to vector<32x1xf32>
    %28 = arith.select %25, %26, %27 : vector<32x1xi1>, vector<32x1xf32>
    %c0_48 = arith.constant 0 : index
    %c0_49 = arith.constant 0 : index
    %c0_50 = arith.constant 0 : index
    %29 = vector.load %arg5[%c0_48, %c0_49, %c0_50] : memref<4x8x4xf32, #tpu.memory_space<vmem>>, vector<4x8x4xf32>
    %30 = vector.shape_cast %29 : vector<4x8x4xf32> to vector<32x4xf32>
    %c0_51 = arith.constant 0 : index
    %c0_52 = arith.constant 0 : index
    %c0_53 = arith.constant 0 : index
    %31 = vector.load %arg6[%c0_51, %c0_52, %c0_53] : memref<4x8x4xf32, #tpu.memory_space<vmem>>, vector<4x8x4xf32>
    %32 = vector.shape_cast %31 : vector<4x8x4xf32> to vector<32x4xf32>
    %c0_54 = arith.constant 0 : index
    %c0_55 = arith.constant 0 : index
    %c0_56 = arith.constant 0 : index
    %c0_57 = arith.constant 0 : index
    %33 = vector.load %arg7[%c0_54, %c0_55, %c0_56, %c0_57] : memref<4x4x8x8xf32, #tpu.memory_space<vmem>>, vector<4x4x8x8xf32>
    %c0_58 = arith.constant 0 : index
    %c0_59 = arith.constant 0 : index
    %c0_60 = arith.constant 0 : index
    %34 = vector.load %arg3[%c0_58, %c0_59, %c0_60] : memref<4x8x32xf32, #tpu.memory_space<vmem>>, vector<4x8x32xf32>
    %35 = vector.shape_cast %34 : vector<4x8x32xf32> to vector<32x32xf32>
    %c0_61 = arith.constant 0 : index
    %c0_62 = arith.constant 0 : index
    %c0_63 = arith.constant 0 : index
    %36 = vector.load %arg1[%c0_61, %c0_62, %c0_63] : memref<4x1x32xf32, #tpu.memory_space<vmem>>, vector<4x1x32xf32>
    %37 = vector.shape_cast %36 : vector<4x1x32xf32> to vector<4x1x32xf32>
    %38 = vector.broadcast %37 : vector<4x1x32xf32> to vector<4x8x32xf32>
    %c0_64 = arith.constant 0 : index
    %c0_65 = arith.constant 0 : index
    %c0_66 = arith.constant 0 : index
    %39 = vector.load %arg2[%c0_64, %c0_65, %c0_66] : memref<4x1x32xf32, #tpu.memory_space<vmem>>, vector<4x1x32xf32>
    %40 = vector.shape_cast %39 : vector<4x1x32xf32> to vector<4x1x32xf32>
    %41 = vector.broadcast %40 : vector<4x1x32xf32> to vector<4x8x32xf32>
    %42 = vector.shape_cast %41 : vector<4x8x32xf32> to vector<32x32xf32>
    %43 = arith.mulf %38, %34 : vector<4x8x32xf32>
    %44 = vector.shape_cast %43 : vector<4x8x32xf32> to vector<32x32xf32>
    %45 = arith.truncf %35 : vector<32x32xf32> to vector<32x32xbf16>
    %cst_67 = arith.constant dense<0.000000e+00> : vector<32x32xf32>
    %46 = tpu.matmul %45, %0, %cst_67 {dimension_numbers = #tpu.dot_dimension_numbers<[1], [0], [0], [1], [0, 0, 1, 1], [], []>} : vector<32x32xbf16>, vector<32x32xbf16>, vector<32x32xf32> -> vector<32x32xf32>
    %47 = arith.addf %42, %46 : vector<32x32xf32>
    %48 = vector.broadcast %1 : vector<1x32xf32> to vector<32x32xf32>
    %49 = arith.addf %47, %48 : vector<32x32xf32>
    %cst_68 = arith.constant 0.000000e+00 : f32
    %50 = vector.broadcast %cst_68 : f32 to vector<32x32xf32>
    %51 = arith.cmpf ogt, %49, %50 : vector<32x32xf32>
    %cst_69 = arith.constant 0.00999999977 : f32
    %52 = vector.broadcast %cst_69 : f32 to vector<32x32xf32>
    %53 = arith.mulf %52, %49 : vector<32x32xf32>
    %54 = arith.select %51, %49, %53 : vector<32x32xi1>, vector<32x32xf32>
    %55 = vector.broadcast %28 : vector<32x1xf32> to vector<32x32xf32>
    %56 = arith.addf %54, %55 : vector<32x32xf32>
    %57 = vector.broadcast %23 : vector<32x1xf32> to vector<32x32xf32>
    %58 = arith.mulf %56, %57 : vector<32x32xf32>
    %59 = arith.mulf %58, %35 : vector<32x32xf32>
    %60 = arith.truncf %59 : vector<32x32xf32> to vector<32x32xbf16>
    %cst_70 = arith.constant dense<0.000000e+00> : vector<32x32xf32>
    %61 = tpu.matmul %60, %2, %cst_70 {dimension_numbers = #tpu.dot_dimension_numbers<[1], [0], [0], [1], [0, 0, 1, 1], [], []>} : vector<32x32xbf16>, vector<32x32xbf16>, vector<32x32xf32> -> vector<32x32xf32>
    %62 = vector.broadcast %3 : vector<1x32xf32> to vector<32x32xf32>
    %63 = arith.addf %61, %62 : vector<32x32xf32>
    %cst_71 = arith.constant 0.000000e+00 : f32
    %64 = vector.broadcast %cst_71 : f32 to vector<32x32xf32>
    %65 = arith.cmpf ogt, %63, %64 : vector<32x32xf32>
    %cst_72 = arith.constant 0.000000e+00 : f32
    %66 = vector.broadcast %cst_72 : f32 to vector<32x32xf32>
    %67 = arith.minimumf %63, %66 : vector<32x32xf32>
    %68 = math.exp %67 : vector<32x32xf32>
    %cst_73 = arith.constant 1.000000e+00 : f32
    %69 = vector.broadcast %cst_73 : f32 to vector<32x32xf32>
    %70 = arith.subf %68, %69 : vector<32x32xf32>
    %71 = arith.select %65, %63, %70 : vector<32x32xi1>, vector<32x32xf32>
    %72 = arith.truncf %71 : vector<32x32xf32> to vector<32x32xbf16>
    %cst_74 = arith.constant dense<0.000000e+00> : vector<32x96xf32>
    %73 = tpu.matmul %72, %4, %cst_74 {dimension_numbers = #tpu.dot_dimension_numbers<[1], [0], [0], [1], [0, 0, 1, 1], [], []>} : vector<32x32xbf16>, vector<32x96xbf16>, vector<32x96xf32> -> vector<32x96xf32>
    %74 = vector.broadcast %6 : vector<1x96xf32> to vector<32x96xf32>
    %75 = arith.addf %73, %74 : vector<32x96xf32>
    %76 = arith.truncf %44 : vector<32x32xf32> to vector<32x32xbf16>
    %cst_75 = arith.constant dense<0.000000e+00> : vector<32x96xf32>
    %77 = tpu.matmul %76, %5, %cst_75 {dimension_numbers = #tpu.dot_dimension_numbers<[1], [0], [0], [1], [0, 0, 1, 1], [], []>} : vector<32x32xbf16>, vector<32x96xbf16>, vector<32x96xf32> -> vector<32x96xf32>
    %78 = vector.broadcast %7 : vector<1x96xf32> to vector<32x96xf32>
    %79 = arith.addf %77, %78 : vector<32x96xf32>
    %80 = vector.extract_strided_slice %75 {offsets = [0, 0], sizes = [32, 32], strides = [1, 1]} : vector<32x96xf32> to vector<32x32xf32>
    %81 = vector.extract_strided_slice %79 {offsets = [0, 0], sizes = [32, 32], strides = [1, 1]} : vector<32x96xf32> to vector<32x32xf32>
    %82 = arith.addf %80, %81 : vector<32x32xf32>
    %83 = arith.negf %82 : vector<32x32xf32>
    %84 = math.exp %83 : vector<32x32xf32>
    %cst_76 = arith.constant 1.000000e+00 : f32
    %85 = vector.broadcast %cst_76 : f32 to vector<32x32xf32>
    %86 = arith.addf %85, %84 : vector<32x32xf32>
    %87 = arith.divf %85, %86 : vector<32x32xf32>
    %88 = vector.extract_strided_slice %75 {offsets = [0, 32], sizes = [32, 32], strides = [1, 1]} : vector<32x96xf32> to vector<32x32xf32>
    %89 = vector.extract_strided_slice %79 {offsets = [0, 32], sizes = [32, 32], strides = [1, 1]} : vector<32x96xf32> to vector<32x32xf32>
    %90 = arith.addf %88, %89 : vector<32x32xf32>
    %91 = arith.negf %90 : vector<32x32xf32>
    %92 = math.exp %91 : vector<32x32xf32>
    %cst_77 = arith.constant 1.000000e+00 : f32
    %93 = vector.broadcast %cst_77 : f32 to vector<32x32xf32>
    %94 = arith.addf %93, %92 : vector<32x32xf32>
    %95 = arith.divf %93, %94 : vector<32x32xf32>
    %96 = vector.extract_strided_slice %75 {offsets = [0, 64], sizes = [32, 32], strides = [1, 1]} : vector<32x96xf32> to vector<32x32xf32>
    %97 = vector.extract_strided_slice %79 {offsets = [0, 64], sizes = [32, 32], strides = [1, 1]} : vector<32x96xf32> to vector<32x32xf32>
    %98 = arith.mulf %87, %97 : vector<32x32xf32>
    %99 = arith.addf %96, %98 : vector<32x32xf32>
    %100 = math.tanh %99 : vector<32x32xf32>
    %cst_78 = arith.constant 1.000000e+00 : f32
    %101 = vector.broadcast %cst_78 : f32 to vector<32x32xf32>
    %102 = arith.subf %101, %95 : vector<32x32xf32>
    %103 = arith.mulf %102, %100 : vector<32x32xf32>
    %104 = arith.mulf %95, %44 : vector<32x32xf32>
    %105 = arith.addf %103, %104 : vector<32x32xf32>
    %cst_79 = arith.constant 0.000000e+00 : f32
    %106 = vector.broadcast %cst_79 : f32 to vector<32x32xf32>
    %107 = arith.maximumf %105, %106 : vector<32x32xf32>
    %108 = tpu.iota {dimensions = array<i32: 1>} : vector<1x4xi32>
    %109 = vector.shape_cast %107 : vector<32x32xf32> to vector<4x8x32xf32>
    %110 = arith.truncf %107 : vector<32x32xf32> to vector<32x32xbf16>
    %cst_80 = arith.constant dense<0.000000e+00> : vector<32x32xf32>
    %111 = tpu.matmul %110, %11, %cst_80 {dimension_numbers = #tpu.dot_dimension_numbers<[1], [0], [0], [1], [0, 0, 1, 1], [], []>} : vector<32x32xbf16>, vector<32x32xbf16>, vector<32x32xf32> -> vector<32x32xf32>
    %112 = vector.broadcast %12 : vector<1x32xf32> to vector<32x32xf32>
    %113 = arith.addf %111, %112 : vector<32x32xf32>
    %114 = vector.shape_cast %113 : vector<32x32xf32> to vector<4x8x32xf32>
    %115 = arith.extf %8 : vector<1x32xbf16> to vector<1x32xf32>
    %116 = vector.broadcast %115 : vector<1x32xf32> to vector<32x32xf32>
    %117 = arith.mulf %107, %116 : vector<32x32xf32>
    %cst_81 = arith.constant dense<0.000000e+00> : vector<32xf32>
    %118 = vector.multi_reduction <add>, %117, %cst_81 [1] : vector<32x32xf32> to vector<32xf32>
    %119 = vector.shape_cast %118 : vector<32xf32> to vector<32x1xf32>
    %120 = vector.shape_cast %9 : vector<1x32xbf16> to vector<1x1x32xbf16>
    %121 = vector.shape_cast %120 : vector<1x1x32xbf16> to vector<1x1x32xbf16>
    %122 = vector.broadcast %121 : vector<1x1x32xbf16> to vector<4x1x32xbf16>
    %123 = arith.truncf %109 : vector<4x8x32xf32> to vector<4x8x32xbf16>
    "tpu.trace_start"() <{level = 10 : i32, message = "mqf,mjf->mqj"}> : () -> ()
    %cst_82 = arith.constant dense<0.000000e+00> : vector<4x1x8xf32>
    %124 = tpu.matmul %122, %123, %cst_82 {dimension_numbers = #tpu.dot_dimension_numbers<[2], [2], [1], [1], [0, 0, 0, 1, 1, 1], [0], [0]>} : vector<4x1x32xbf16>, vector<4x8x32xbf16>, vector<4x1x8xf32> -> vector<4x1x8xf32>
    %cst_83 = arith.constant 0.000000e+00 : f32
    "tpu.trace_stop"() : () -> ()
    %125 = vector.broadcast %cst_83 : f32 to vector<32x4xf32>
    %126 = vector.extract_strided_slice %33 {offsets = [0, 0, 0, 0], sizes = [4, 1, 8, 8], strides = [1, 1, 1, 1]} : vector<4x4x8x8xf32> to vector<4x1x8x8xf32>
    %127 = vector.shape_cast %126 : vector<4x1x8x8xf32> to vector<4x8x8xf32>
    %128 = vector.broadcast %124 : vector<4x1x8xf32> to vector<4x8x8xf32>
    %129 = arith.mulf %127, %128 : vector<4x8x8xf32>
    %cst_84 = arith.constant dense<0.000000e+00> : vector<4x8xf32>
    %130 = vector.multi_reduction <add>, %129, %cst_84 [2] : vector<4x8x8xf32> to vector<4x8xf32>
    %131 = vector.shape_cast %130 : vector<4x8xf32> to vector<4x8x1xf32>
    %132 = vector.shape_cast %131 : vector<4x8x1xf32> to vector<32x1xf32>
    %c0_i32 = arith.constant 0 : i32
    %133 = vector.broadcast %c0_i32 : i32 to vector<1x4xi32>
    %134 = arith.cmpi eq, %108, %133 : vector<1x4xi32>
    %135 = arith.extui %134 : vector<1x4xi1> to vector<1x4xi32>
    %136 = arith.sitofp %135 : vector<1x4xi32> to vector<1x4xf32>
    %137 = vector.broadcast %132 : vector<32x1xf32> to vector<32x4xf32>
    %138 = vector.broadcast %136 : vector<1x4xf32> to vector<32x4xf32>
    %139 = arith.mulf %137, %138 : vector<32x4xf32>
    %140 = arith.addf %125, %139 : vector<32x4xf32>
    %141 = vector.extract_strided_slice %33 {offsets = [0, 1, 0, 0], sizes = [4, 1, 8, 8], strides = [1, 1, 1, 1]} : vector<4x4x8x8xf32> to vector<4x1x8x8xf32>
    %142 = vector.shape_cast %141 : vector<4x1x8x8xf32> to vector<4x8x8xf32>
    %143 = vector.broadcast %124 : vector<4x1x8xf32> to vector<4x8x8xf32>
    %144 = arith.mulf %142, %143 : vector<4x8x8xf32>
    %cst_85 = arith.constant dense<0.000000e+00> : vector<4x8xf32>
    %145 = vector.multi_reduction <add>, %144, %cst_85 [2] : vector<4x8x8xf32> to vector<4x8xf32>
    %146 = vector.shape_cast %145 : vector<4x8xf32> to vector<4x8x1xf32>
    %147 = vector.shape_cast %146 : vector<4x8x1xf32> to vector<32x1xf32>
    %c1_i32 = arith.constant 1 : i32
    %148 = vector.broadcast %c1_i32 : i32 to vector<1x4xi32>
    %149 = arith.cmpi eq, %108, %148 : vector<1x4xi32>
    %150 = arith.extui %149 : vector<1x4xi1> to vector<1x4xi32>
    %151 = arith.sitofp %150 : vector<1x4xi32> to vector<1x4xf32>
    %152 = vector.broadcast %147 : vector<32x1xf32> to vector<32x4xf32>
    %153 = vector.broadcast %151 : vector<1x4xf32> to vector<32x4xf32>
    %154 = arith.mulf %152, %153 : vector<32x4xf32>
    %155 = arith.addf %140, %154 : vector<32x4xf32>
    %156 = vector.extract_strided_slice %33 {offsets = [0, 2, 0, 0], sizes = [4, 1, 8, 8], strides = [1, 1, 1, 1]} : vector<4x4x8x8xf32> to vector<4x1x8x8xf32>
    %157 = vector.shape_cast %156 : vector<4x1x8x8xf32> to vector<4x8x8xf32>
    %158 = vector.broadcast %124 : vector<4x1x8xf32> to vector<4x8x8xf32>
    %159 = arith.mulf %157, %158 : vector<4x8x8xf32>
    %cst_86 = arith.constant dense<0.000000e+00> : vector<4x8xf32>
    %160 = vector.multi_reduction <add>, %159, %cst_86 [2] : vector<4x8x8xf32> to vector<4x8xf32>
    %161 = vector.shape_cast %160 : vector<4x8xf32> to vector<4x8x1xf32>
    %162 = vector.shape_cast %161 : vector<4x8x1xf32> to vector<32x1xf32>
    %c2_i32 = arith.constant 2 : i32
    %163 = vector.broadcast %c2_i32 : i32 to vector<1x4xi32>
    %164 = arith.cmpi eq, %108, %163 : vector<1x4xi32>
    %165 = arith.extui %164 : vector<1x4xi1> to vector<1x4xi32>
    %166 = arith.sitofp %165 : vector<1x4xi32> to vector<1x4xf32>
    %167 = vector.broadcast %162 : vector<32x1xf32> to vector<32x4xf32>
    %168 = vector.broadcast %166 : vector<1x4xf32> to vector<32x4xf32>
    %169 = arith.mulf %167, %168 : vector<32x4xf32>
    %170 = arith.addf %155, %169 : vector<32x4xf32>
    %171 = vector.extract_strided_slice %33 {offsets = [0, 3, 0, 0], sizes = [4, 1, 8, 8], strides = [1, 1, 1, 1]} : vector<4x4x8x8xf32> to vector<4x1x8x8xf32>
    %172 = vector.shape_cast %171 : vector<4x1x8x8xf32> to vector<4x8x8xf32>
    %173 = vector.broadcast %124 : vector<4x1x8xf32> to vector<4x8x8xf32>
    %174 = arith.mulf %172, %173 : vector<4x8x8xf32>
    %cst_87 = arith.constant dense<0.000000e+00> : vector<4x8xf32>
    %175 = vector.multi_reduction <add>, %174, %cst_87 [2] : vector<4x8x8xf32> to vector<4x8xf32>
    %176 = vector.shape_cast %175 : vector<4x8xf32> to vector<4x8x1xf32>
    %177 = vector.shape_cast %176 : vector<4x8x1xf32> to vector<32x1xf32>
    %c3_i32 = arith.constant 3 : i32
    %178 = vector.broadcast %c3_i32 : i32 to vector<1x4xi32>
    %179 = arith.cmpi eq, %108, %178 : vector<1x4xi32>
    %180 = arith.extui %179 : vector<1x4xi1> to vector<1x4xi32>
    %181 = arith.sitofp %180 : vector<1x4xi32> to vector<1x4xf32>
    %182 = vector.broadcast %177 : vector<32x1xf32> to vector<32x4xf32>
    %183 = vector.broadcast %181 : vector<1x4xf32> to vector<32x4xf32>
    %184 = arith.mulf %182, %183 : vector<32x4xf32>
    %185 = arith.addf %170, %184 : vector<32x4xf32>
    %186 = vector.broadcast %119 : vector<32x1xf32> to vector<32x4xf32>
    %187 = arith.addf %185, %186 : vector<32x4xf32>
    %188 = vector.broadcast %10 : vector<1x1xf32> to vector<32x4xf32>
    %189 = arith.addf %187, %188 : vector<32x4xf32>
    %cst_88 = arith.constant 0.000000e+00 : f32
    %190 = vector.broadcast %cst_88 : f32 to vector<32x4xf32>
    %191 = arith.cmpf ogt, %189, %190 : vector<32x4xf32>
    %cst_89 = arith.constant 0.00999999977 : f32
    %192 = vector.broadcast %cst_89 : f32 to vector<32x4xf32>
    %193 = arith.mulf %192, %189 : vector<32x4xf32>
    %194 = arith.select %191, %189, %193 : vector<32x4xi1>, vector<32x4xf32>
    %195 = arith.addf %194, %32 : vector<32x4xf32>
    %cst_90 = arith.constant dense<0xFF800000> : vector<32xf32>
    %196 = vector.multi_reduction <maximumf>, %195, %cst_90 [1] : vector<32x4xf32> to vector<32xf32>
    %197 = vector.shape_cast %196 : vector<32xf32> to vector<32x1xf32>
    %198 = vector.broadcast %197 : vector<32x1xf32> to vector<32x4xf32>
    %199 = arith.subf %195, %198 : vector<32x4xf32>
    %200 = math.exp %199 : vector<32x4xf32>
    %cst_91 = arith.constant dense<0.000000e+00> : vector<32xf32>
    %201 = vector.multi_reduction <add>, %200, %cst_91 [1] : vector<32x4xf32> to vector<32xf32>
    %202 = vector.shape_cast %201 : vector<32xf32> to vector<32x1xf32>
    %203 = vector.broadcast %202 : vector<32x1xf32> to vector<32x4xf32>
    %204 = arith.divf %200, %203 : vector<32x4xf32>
    %205 = arith.mulf %204, %30 : vector<32x4xf32>
    %cst_92 = arith.constant 0.000000e+00 : f32
    %206 = vector.broadcast %cst_92 : f32 to vector<4x8x8xf32>
    %207 = vector.extract_strided_slice %205 {offsets = [0, 0], sizes = [32, 1], strides = [1, 1]} : vector<32x4xf32> to vector<32x1xf32>
    %208 = vector.shape_cast %207 : vector<32x1xf32> to vector<4x8x1xf32>
    %209 = vector.extract_strided_slice %33 {offsets = [0, 0, 0, 0], sizes = [4, 1, 8, 8], strides = [1, 1, 1, 1]} : vector<4x4x8x8xf32> to vector<4x1x8x8xf32>
    %210 = vector.shape_cast %209 : vector<4x1x8x8xf32> to vector<4x8x8xf32>
    %211 = vector.broadcast %208 : vector<4x8x1xf32> to vector<4x8x8xf32>
    %212 = arith.mulf %211, %210 : vector<4x8x8xf32>
    %213 = arith.addf %206, %212 : vector<4x8x8xf32>
    %214 = vector.extract_strided_slice %205 {offsets = [0, 1], sizes = [32, 1], strides = [1, 1]} : vector<32x4xf32> to vector<32x1xf32>
    %215 = vector.shape_cast %214 : vector<32x1xf32> to vector<4x8x1xf32>
    %216 = vector.extract_strided_slice %33 {offsets = [0, 1, 0, 0], sizes = [4, 1, 8, 8], strides = [1, 1, 1, 1]} : vector<4x4x8x8xf32> to vector<4x1x8x8xf32>
    %217 = vector.shape_cast %216 : vector<4x1x8x8xf32> to vector<4x8x8xf32>
    %218 = vector.broadcast %215 : vector<4x8x1xf32> to vector<4x8x8xf32>
    %219 = arith.mulf %218, %217 : vector<4x8x8xf32>
    %220 = arith.addf %213, %219 : vector<4x8x8xf32>
    %221 = vector.extract_strided_slice %205 {offsets = [0, 2], sizes = [32, 1], strides = [1, 1]} : vector<32x4xf32> to vector<32x1xf32>
    %222 = vector.shape_cast %221 : vector<32x1xf32> to vector<4x8x1xf32>
    %223 = vector.extract_strided_slice %33 {offsets = [0, 2, 0, 0], sizes = [4, 1, 8, 8], strides = [1, 1, 1, 1]} : vector<4x4x8x8xf32> to vector<4x1x8x8xf32>
    %224 = vector.shape_cast %223 : vector<4x1x8x8xf32> to vector<4x8x8xf32>
    %225 = vector.broadcast %222 : vector<4x8x1xf32> to vector<4x8x8xf32>
    %226 = arith.mulf %225, %224 : vector<4x8x8xf32>
    %227 = arith.addf %220, %226 : vector<4x8x8xf32>
    %228 = vector.extract_strided_slice %205 {offsets = [0, 3], sizes = [32, 1], strides = [1, 1]} : vector<32x4xf32> to vector<32x1xf32>
    %229 = vector.shape_cast %228 : vector<32x1xf32> to vector<4x8x1xf32>
    %230 = vector.extract_strided_slice %33 {offsets = [0, 3, 0, 0], sizes = [4, 1, 8, 8], strides = [1, 1, 1, 1]} : vector<4x4x8x8xf32> to vector<4x1x8x8xf32>
    %231 = vector.shape_cast %230 : vector<4x1x8x8xf32> to vector<4x8x8xf32>
    %232 = vector.broadcast %229 : vector<4x8x1xf32> to vector<4x8x8xf32>
    %233 = arith.mulf %232, %231 : vector<4x8x8xf32>
    %234 = arith.addf %227, %233 : vector<4x8x8xf32>
    %235 = arith.truncf %234 : vector<4x8x8xf32> to vector<4x8x8xbf16>
    %236 = arith.truncf %114 : vector<4x8x32xf32> to vector<4x8x32xbf16>
    "tpu.trace_start"() <{level = 10 : i32, message = "mlj,mjf->mlf"}> : () -> ()
    %cst_93 = arith.constant dense<0.000000e+00> : vector<4x8x32xf32>
    %237 = tpu.matmul %235, %236, %cst_93 {dimension_numbers = #tpu.dot_dimension_numbers<[2], [1], [1], [2], [0, 0, 0, 1, 1, 2], [0], [0]>} : vector<4x8x8xbf16>, vector<4x8x32xbf16>, vector<4x8x32xf32> -> vector<4x8x32xf32>
    "tpu.trace_stop"() : () -> ()
    %238 = vector.shape_cast %237 : vector<4x8x32xf32> to vector<32x32xf32>
    %cst_94 = arith.constant 0.000000e+00 : f32
    %239 = vector.broadcast %cst_94 : f32 to vector<32x32xf32>
    %240 = arith.cmpf ogt, %238, %239 : vector<32x32xf32>
    %cst_95 = arith.constant 0.000000e+00 : f32
    %241 = vector.broadcast %cst_95 : f32 to vector<32x32xf32>
    %242 = arith.minimumf %238, %241 : vector<32x32xf32>
    %243 = math.exp %242 : vector<32x32xf32>
    %cst_96 = arith.constant 1.000000e+00 : f32
    %244 = vector.broadcast %cst_96 : f32 to vector<32x32xf32>
    %245 = arith.subf %243, %244 : vector<32x32xf32>
    %246 = arith.select %240, %238, %245 : vector<32x32xi1>, vector<32x32xf32>
    %247 = arith.truncf %246 : vector<32x32xf32> to vector<32x32xbf16>
    %cst_97 = arith.constant dense<0.000000e+00> : vector<32x96xf32>
    %248 = tpu.matmul %247, %13, %cst_97 {dimension_numbers = #tpu.dot_dimension_numbers<[1], [0], [0], [1], [0, 0, 1, 1], [], []>} : vector<32x32xbf16>, vector<32x96xbf16>, vector<32x96xf32> -> vector<32x96xf32>
    %249 = vector.broadcast %15 : vector<1x96xf32> to vector<32x96xf32>
    %250 = arith.addf %248, %249 : vector<32x96xf32>
    %251 = arith.truncf %107 : vector<32x32xf32> to vector<32x32xbf16>
    %cst_98 = arith.constant dense<0.000000e+00> : vector<32x96xf32>
    %252 = tpu.matmul %251, %14, %cst_98 {dimension_numbers = #tpu.dot_dimension_numbers<[1], [0], [0], [1], [0, 0, 1, 1], [], []>} : vector<32x32xbf16>, vector<32x96xbf16>, vector<32x96xf32> -> vector<32x96xf32>
    %253 = vector.broadcast %16 : vector<1x96xf32> to vector<32x96xf32>
    %254 = arith.addf %252, %253 : vector<32x96xf32>
    %255 = vector.extract_strided_slice %250 {offsets = [0, 0], sizes = [32, 32], strides = [1, 1]} : vector<32x96xf32> to vector<32x32xf32>
    %256 = vector.extract_strided_slice %254 {offsets = [0, 0], sizes = [32, 32], strides = [1, 1]} : vector<32x96xf32> to vector<32x32xf32>
    %257 = arith.addf %255, %256 : vector<32x32xf32>
    %258 = arith.negf %257 : vector<32x32xf32>
    %259 = math.exp %258 : vector<32x32xf32>
    %cst_99 = arith.constant 1.000000e+00 : f32
    %260 = vector.broadcast %cst_99 : f32 to vector<32x32xf32>
    %261 = arith.addf %260, %259 : vector<32x32xf32>
    %262 = arith.divf %260, %261 : vector<32x32xf32>
    %263 = vector.extract_strided_slice %250 {offsets = [0, 32], sizes = [32, 32], strides = [1, 1]} : vector<32x96xf32> to vector<32x32xf32>
    %264 = vector.extract_strided_slice %254 {offsets = [0, 32], sizes = [32, 32], strides = [1, 1]} : vector<32x96xf32> to vector<32x32xf32>
    %265 = arith.addf %263, %264 : vector<32x32xf32>
    %266 = arith.negf %265 : vector<32x32xf32>
    %267 = math.exp %266 : vector<32x32xf32>
    %cst_100 = arith.constant 1.000000e+00 : f32
    %268 = vector.broadcast %cst_100 : f32 to vector<32x32xf32>
    %269 = arith.addf %268, %267 : vector<32x32xf32>
    %270 = arith.divf %268, %269 : vector<32x32xf32>
    %271 = vector.extract_strided_slice %250 {offsets = [0, 64], sizes = [32, 32], strides = [1, 1]} : vector<32x96xf32> to vector<32x32xf32>
    %272 = vector.extract_strided_slice %254 {offsets = [0, 64], sizes = [32, 32], strides = [1, 1]} : vector<32x96xf32> to vector<32x32xf32>
    %273 = arith.mulf %262, %272 : vector<32x32xf32>
    %274 = arith.addf %271, %273 : vector<32x32xf32>
    %275 = math.tanh %274 : vector<32x32xf32>
    %cst_101 = arith.constant 1.000000e+00 : f32
    %276 = vector.broadcast %cst_101 : f32 to vector<32x32xf32>
    %277 = arith.subf %276, %270 : vector<32x32xf32>
    %278 = arith.mulf %277, %275 : vector<32x32xf32>
    %279 = arith.mulf %270, %107 : vector<32x32xf32>
    %280 = arith.addf %278, %279 : vector<32x32xf32>
    %cst_102 = arith.constant 0.000000e+00 : f32
    %281 = vector.broadcast %cst_102 : f32 to vector<32x32xf32>
    %282 = arith.maximumf %280, %281 : vector<32x32xf32>
    %283 = arith.truncf %282 : vector<32x32xf32> to vector<32x32xbf16>
    %cst_103 = arith.constant dense<0.000000e+00> : vector<32x39xf32>
    %284 = tpu.matmul %283, %17, %cst_103 {dimension_numbers = #tpu.dot_dimension_numbers<[1], [0], [0], [1], [0, 0, 1, 1], [], []>} : vector<32x32xbf16>, vector<32x39xbf16>, vector<32x39xf32> -> vector<32x39xf32>
    %285 = vector.broadcast %18 : vector<1x39xf32> to vector<32x39xf32>
    %286 = arith.addf %284, %285 : vector<32x39xf32>
    %287 = tpu.iota {dimensions = array<i32: 1>} : vector<32x39xi32>
    %cst_104 = arith.constant 0.000000e+00 : f32
    %288 = vector.broadcast %cst_104 : f32 to vector<32x39xf32>
    %c0_i32_105 = arith.constant 0 : i32
    %289 = vector.broadcast %c0_i32_105 : i32 to vector<32x39xi32>
    %290 = arith.cmpi sge, %287, %289 : vector<32x39xi32>
    %c16_i32 = arith.constant 16 : i32
    %291 = vector.broadcast %c16_i32 : i32 to vector<32x39xi32>
    %292 = arith.cmpi slt, %287, %291 : vector<32x39xi32>
    %293 = arith.andi %290, %292 : vector<32x39xi1>
    %294 = arith.extui %293 : vector<32x39xi1> to vector<32x39xi32>
    %295 = arith.sitofp %294 : vector<32x39xi32> to vector<32x39xf32>
    %cst_106 = arith.constant -9.000000e+08 : f32
    %296 = vector.broadcast %cst_106 : f32 to vector<32x39xf32>
    %297 = arith.select %293, %286, %296 : vector<32x39xi1>, vector<32x39xf32>
    %cst_107 = arith.constant dense<0xFF800000> : vector<32xf32>
    %298 = vector.multi_reduction <maximumf>, %297, %cst_107 [1] : vector<32x39xf32> to vector<32xf32>
    %299 = vector.shape_cast %298 : vector<32xf32> to vector<32x1xf32>
    %300 = vector.broadcast %299 : vector<32x1xf32> to vector<32x39xf32>
    %301 = arith.mulf %295, %300 : vector<32x39xf32>
    %302 = arith.addf %288, %301 : vector<32x39xf32>
    %c16_i32_108 = arith.constant 16 : i32
    %303 = vector.broadcast %c16_i32_108 : i32 to vector<32x39xi32>
    %304 = arith.cmpi sge, %287, %303 : vector<32x39xi32>
    %c22_i32 = arith.constant 22 : i32
    %305 = vector.broadcast %c22_i32 : i32 to vector<32x39xi32>
    %306 = arith.cmpi slt, %287, %305 : vector<32x39xi32>
    %307 = arith.andi %304, %306 : vector<32x39xi1>
    %308 = arith.extui %307 : vector<32x39xi1> to vector<32x39xi32>
    %309 = arith.sitofp %308 : vector<32x39xi32> to vector<32x39xf32>
    %cst_109 = arith.constant -9.000000e+08 : f32
    %310 = vector.broadcast %cst_109 : f32 to vector<32x39xf32>
    %311 = arith.select %307, %286, %310 : vector<32x39xi1>, vector<32x39xf32>
    %cst_110 = arith.constant dense<0xFF800000> : vector<32xf32>
    %312 = vector.multi_reduction <maximumf>, %311, %cst_110 [1] : vector<32x39xf32> to vector<32xf32>
    %313 = vector.shape_cast %312 : vector<32xf32> to vector<32x1xf32>
    %314 = vector.broadcast %313 : vector<32x1xf32> to vector<32x39xf32>
    %315 = arith.mulf %309, %314 : vector<32x39xf32>
    %316 = arith.addf %302, %315 : vector<32x39xf32>
    %c24_i32 = arith.constant 24 : i32
    %317 = vector.broadcast %c24_i32 : i32 to vector<32x39xi32>
    %318 = arith.cmpi sge, %287, %317 : vector<32x39xi32>
    %c30_i32 = arith.constant 30 : i32
    %319 = vector.broadcast %c30_i32 : i32 to vector<32x39xi32>
    %320 = arith.cmpi slt, %287, %319 : vector<32x39xi32>
    %321 = arith.andi %318, %320 : vector<32x39xi1>
    %322 = arith.extui %321 : vector<32x39xi1> to vector<32x39xi32>
    %323 = arith.sitofp %322 : vector<32x39xi32> to vector<32x39xf32>
    %cst_111 = arith.constant -9.000000e+08 : f32
    %324 = vector.broadcast %cst_111 : f32 to vector<32x39xf32>
    %325 = arith.select %321, %286, %324 : vector<32x39xi1>, vector<32x39xf32>
    %cst_112 = arith.constant dense<0xFF800000> : vector<32xf32>
    %326 = vector.multi_reduction <maximumf>, %325, %cst_112 [1] : vector<32x39xf32> to vector<32xf32>
    %327 = vector.shape_cast %326 : vector<32xf32> to vector<32x1xf32>
    %328 = vector.broadcast %327 : vector<32x1xf32> to vector<32x39xf32>
    %329 = arith.mulf %323, %328 : vector<32x39xf32>
    %330 = arith.addf %316, %329 : vector<32x39xf32>
    %c31_i32 = arith.constant 31 : i32
    %331 = vector.broadcast %c31_i32 : i32 to vector<32x39xi32>
    %332 = arith.cmpi sge, %287, %331 : vector<32x39xi32>
    %c36_i32 = arith.constant 36 : i32
    %333 = vector.broadcast %c36_i32 : i32 to vector<32x39xi32>
    %334 = arith.cmpi slt, %287, %333 : vector<32x39xi32>
    %335 = arith.andi %332, %334 : vector<32x39xi1>
    %336 = arith.extui %335 : vector<32x39xi1> to vector<32x39xi32>
    %337 = arith.sitofp %336 : vector<32x39xi32> to vector<32x39xf32>
    %cst_113 = arith.constant -9.000000e+08 : f32
    %338 = vector.broadcast %cst_113 : f32 to vector<32x39xf32>
    %339 = arith.select %335, %286, %338 : vector<32x39xi1>, vector<32x39xf32>
    %cst_114 = arith.constant dense<0xFF800000> : vector<32xf32>
    %340 = vector.multi_reduction <maximumf>, %339, %cst_114 [1] : vector<32x39xf32> to vector<32xf32>
    %341 = vector.shape_cast %340 : vector<32xf32> to vector<32x1xf32>
    %342 = vector.broadcast %341 : vector<32x1xf32> to vector<32x39xf32>
    %343 = arith.mulf %337, %342 : vector<32x39xf32>
    %344 = arith.addf %330, %343 : vector<32x39xf32>
    %c37_i32 = arith.constant 37 : i32
    %345 = vector.broadcast %c37_i32 : i32 to vector<32x39xi32>
    %346 = arith.cmpi sge, %287, %345 : vector<32x39xi32>
    %c39_i32 = arith.constant 39 : i32
    %347 = vector.broadcast %c39_i32 : i32 to vector<32x39xi32>
    %348 = arith.cmpi slt, %287, %347 : vector<32x39xi32>
    %349 = arith.andi %346, %348 : vector<32x39xi1>
    %350 = arith.extui %349 : vector<32x39xi1> to vector<32x39xi32>
    %351 = arith.sitofp %350 : vector<32x39xi32> to vector<32x39xf32>
    %cst_115 = arith.constant -9.000000e+08 : f32
    %352 = vector.broadcast %cst_115 : f32 to vector<32x39xf32>
    %353 = arith.select %349, %286, %352 : vector<32x39xi1>, vector<32x39xf32>
    %cst_116 = arith.constant dense<0xFF800000> : vector<32xf32>
    %354 = vector.multi_reduction <maximumf>, %353, %cst_116 [1] : vector<32x39xf32> to vector<32xf32>
    %355 = vector.shape_cast %354 : vector<32xf32> to vector<32x1xf32>
    %356 = vector.broadcast %355 : vector<32x1xf32> to vector<32x39xf32>
    %357 = arith.mulf %351, %356 : vector<32x39xf32>
    %358 = arith.addf %344, %357 : vector<32x39xf32>
    %359 = arith.subf %286, %358 : vector<32x39xf32>
    %cst_117 = arith.constant 0.000000e+00 : f32
    %360 = vector.broadcast %cst_117 : f32 to vector<32x39xf32>
    %361 = arith.minimumf %359, %360 : vector<32x39xf32>
    %362 = math.exp %361 : vector<32x39xf32>
    %cst_118 = arith.constant 0.000000e+00 : f32
    %363 = vector.broadcast %cst_118 : f32 to vector<32x39xf32>
    %364 = arith.mulf %362, %295 : vector<32x39xf32>
    %cst_119 = arith.constant dense<0.000000e+00> : vector<32xf32>
    %365 = vector.multi_reduction <add>, %364, %cst_119 [1] : vector<32x39xf32> to vector<32xf32>
    %366 = vector.shape_cast %365 : vector<32xf32> to vector<32x1xf32>
    %367 = vector.broadcast %366 : vector<32x1xf32> to vector<32x39xf32>
    %368 = arith.divf %364, %367 : vector<32x39xf32>
    %369 = arith.addf %363, %368 : vector<32x39xf32>
    %370 = arith.mulf %362, %309 : vector<32x39xf32>
    %cst_120 = arith.constant dense<0.000000e+00> : vector<32xf32>
    %371 = vector.multi_reduction <add>, %370, %cst_120 [1] : vector<32x39xf32> to vector<32xf32>
    %372 = vector.shape_cast %371 : vector<32xf32> to vector<32x1xf32>
    %373 = vector.broadcast %372 : vector<32x1xf32> to vector<32x39xf32>
    %374 = arith.divf %370, %373 : vector<32x39xf32>
    %375 = arith.addf %369, %374 : vector<32x39xf32>
    %376 = arith.mulf %362, %323 : vector<32x39xf32>
    %cst_121 = arith.constant dense<0.000000e+00> : vector<32xf32>
    %377 = vector.multi_reduction <add>, %376, %cst_121 [1] : vector<32x39xf32> to vector<32xf32>
    %378 = vector.shape_cast %377 : vector<32xf32> to vector<32x1xf32>
    %379 = vector.broadcast %378 : vector<32x1xf32> to vector<32x39xf32>
    %380 = arith.divf %376, %379 : vector<32x39xf32>
    %381 = arith.addf %375, %380 : vector<32x39xf32>
    %382 = arith.mulf %362, %337 : vector<32x39xf32>
    %cst_122 = arith.constant dense<0.000000e+00> : vector<32xf32>
    %383 = vector.multi_reduction <add>, %382, %cst_122 [1] : vector<32x39xf32> to vector<32xf32>
    %384 = vector.shape_cast %383 : vector<32xf32> to vector<32x1xf32>
    %385 = vector.broadcast %384 : vector<32x1xf32> to vector<32x39xf32>
    %386 = arith.divf %382, %385 : vector<32x39xf32>
    %387 = arith.addf %381, %386 : vector<32x39xf32>
    %388 = arith.mulf %362, %351 : vector<32x39xf32>
    %cst_123 = arith.constant dense<0.000000e+00> : vector<32xf32>
    %389 = vector.multi_reduction <add>, %388, %cst_123 [1] : vector<32x39xf32> to vector<32xf32>
    %390 = vector.shape_cast %389 : vector<32xf32> to vector<32x1xf32>
    %391 = vector.broadcast %390 : vector<32x1xf32> to vector<32x39xf32>
    %392 = arith.divf %388, %391 : vector<32x39xf32>
    %393 = arith.addf %387, %392 : vector<32x39xf32>
    %c24_i32_124 = arith.constant 24 : i32
    %394 = vector.broadcast %c24_i32_124 : i32 to vector<32x39xi32>
    %395 = arith.cmpi eq, %287, %394 : vector<32x39xi32>
    %396 = arith.extui %395 : vector<32x39xi1> to vector<32x39xi32>
    %397 = arith.sitofp %396 : vector<32x39xi32> to vector<32x39xf32>
    %398 = arith.mulf %286, %397 : vector<32x39xf32>
    %cst_125 = arith.constant 0.000000e+00 : f32
    %399 = vector.broadcast %cst_125 : f32 to vector<32x39xf32>
    %400 = arith.maximumf %398, %399 : vector<32x39xf32>
    %401 = arith.mulf %400, %397 : vector<32x39xf32>
    %402 = arith.addf %393, %401 : vector<32x39xf32>
    %c30_i32_126 = arith.constant 30 : i32
    %403 = vector.broadcast %c30_i32_126 : i32 to vector<32x39xi32>
    %404 = arith.cmpi eq, %287, %403 : vector<32x39xi32>
    %405 = arith.extui %404 : vector<32x39xi1> to vector<32x39xi32>
    %406 = arith.sitofp %405 : vector<32x39xi32> to vector<32x39xf32>
    %407 = arith.mulf %286, %406 : vector<32x39xf32>
    %408 = arith.negf %407 : vector<32x39xf32>
    %409 = math.exp %408 : vector<32x39xf32>
    %cst_127 = arith.constant 1.000000e+00 : f32
    %410 = vector.broadcast %cst_127 : f32 to vector<32x39xf32>
    %411 = arith.addf %410, %409 : vector<32x39xf32>
    %412 = arith.divf %410, %411 : vector<32x39xf32>
    %413 = arith.mulf %412, %406 : vector<32x39xf32>
    %414 = arith.addf %402, %413 : vector<32x39xf32>
    %c36_i32_128 = arith.constant 36 : i32
    %415 = vector.broadcast %c36_i32_128 : i32 to vector<32x39xi32>
    %416 = arith.cmpi eq, %287, %415 : vector<32x39xi32>
    %417 = arith.extui %416 : vector<32x39xi1> to vector<32x39xi32>
    %418 = arith.sitofp %417 : vector<32x39xi32> to vector<32x39xf32>
    %419 = arith.mulf %286, %418 : vector<32x39xf32>
    %420 = arith.negf %419 : vector<32x39xf32>
    %421 = math.exp %420 : vector<32x39xf32>
    %cst_129 = arith.constant 1.000000e+00 : f32
    %422 = vector.broadcast %cst_129 : f32 to vector<32x39xf32>
    %423 = arith.addf %422, %421 : vector<32x39xf32>
    %424 = arith.divf %422, %423 : vector<32x39xf32>
    %425 = arith.mulf %424, %418 : vector<32x39xf32>
    %426 = arith.addf %414, %425 : vector<32x39xf32>
    %427 = vector.shape_cast %426 : vector<32x39xf32> to vector<4x8x39xf32>
    %c0_130 = arith.constant 0 : index
    %c0_131 = arith.constant 0 : index
    %c0_132 = arith.constant 0 : index
    %428 = vector.load %arg30[%c0_130, %c0_131, %c0_132] : memref<4x8x39xf32, #tpu.memory_space<vmem>>, vector<4x8x39xf32>
    tpu.vector_store %arg30[%c0_130, %c0_131, %c0_132], %427 {strides = array<i32>} : memref<4x8x39xf32, #tpu.memory_space<vmem>>, vector<4x8x39xf32>,
    %429 = arith.truncf %282 : vector<32x32xf32> to vector<32x32xbf16>
    %cst_133 = arith.constant dense<0.000000e+00> : vector<32x10xf32>
    %430 = tpu.matmul %429, %19, %cst_133 {dimension_numbers = #tpu.dot_dimension_numbers<[1], [0], [0], [1], [0, 0, 1, 1], [], []>} : vector<32x32xbf16>, vector<32x10xbf16>, vector<32x10xf32> -> vector<32x10xf32>
    %431 = arith.truncf %282 : vector<32x32xf32> to vector<32x32xbf16>
    %cst_134 = arith.constant dense<0.000000e+00> : vector<32x10xf32>
    %432 = tpu.matmul %431, %20, %cst_134 {dimension_numbers = #tpu.dot_dimension_numbers<[1], [0], [0], [1], [0, 0, 1, 1], [], []>} : vector<32x32xbf16>, vector<32x10xbf16>, vector<32x10xf32> -> vector<32x10xf32>
    %433 = vector.shape_cast %432 : vector<32x10xf32> to vector<4x8x10xf32>
    %434 = vector.extract_strided_slice %33 {offsets = [0, 0, 0, 0], sizes = [4, 1, 8, 8], strides = [1, 1, 1, 1]} : vector<4x4x8x8xf32> to vector<4x1x8x8xf32>
    %435 = vector.shape_cast %434 : vector<4x1x8x8xf32> to vector<4x8x8xf32>
    %436 = arith.truncf %435 : vector<4x8x8xf32> to vector<4x8x8xbf16>
    %437 = arith.truncf %433 : vector<4x8x10xf32> to vector<4x8x10xbf16>
    "tpu.trace_start"() <{level = 10 : i32, message = "mlj,mjd->mld"}> : () -> ()
    %cst_135 = arith.constant dense<0.000000e+00> : vector<4x8x10xf32>
    %438 = tpu.matmul %436, %437, %cst_135 {dimension_numbers = #tpu.dot_dimension_numbers<[2], [1], [1], [2], [0, 0, 0, 1, 1, 2], [0], [0]>} : vector<4x8x8xbf16>, vector<4x8x10xbf16>, vector<4x8x10xf32> -> vector<4x8x10xf32>
    "tpu.trace_stop"() : () -> ()
    %439 = vector.shape_cast %438 : vector<4x8x10xf32> to vector<32x10xf32>
    %440 = arith.addf %430, %439 : vector<32x10xf32>
    %441 = vector.broadcast %21 : vector<1x10xf32> to vector<32x10xf32>
    %442 = arith.addf %440, %441 : vector<32x10xf32>
    %443 = tpu.iota {dimensions = array<i32: 1>} : vector<32x10xi32>
    %cst_136 = arith.constant 0.000000e+00 : f32
    %444 = vector.broadcast %cst_136 : f32 to vector<32x10xf32>
    %c0_i32_137 = arith.constant 0 : i32
    %445 = vector.broadcast %c0_i32_137 : i32 to vector<32x10xi32>
    %446 = arith.cmpi sge, %443, %445 : vector<32x10xi32>
    %c4_i32 = arith.constant 4 : i32
    %447 = vector.broadcast %c4_i32 : i32 to vector<32x10xi32>
    %448 = arith.cmpi slt, %443, %447 : vector<32x10xi32>
    %449 = arith.andi %446, %448 : vector<32x10xi1>
    %450 = arith.extui %449 : vector<32x10xi1> to vector<32x10xi32>
    %451 = arith.sitofp %450 : vector<32x10xi32> to vector<32x10xf32>
    %cst_138 = arith.constant -9.000000e+08 : f32
    %452 = vector.broadcast %cst_138 : f32 to vector<32x10xf32>
    %453 = arith.select %449, %442, %452 : vector<32x10xi1>, vector<32x10xf32>
    %cst_139 = arith.constant dense<0xFF800000> : vector<32xf32>
    %454 = vector.multi_reduction <maximumf>, %453, %cst_139 [1] : vector<32x10xf32> to vector<32xf32>
    %455 = vector.shape_cast %454 : vector<32xf32> to vector<32x1xf32>
    %456 = vector.broadcast %455 : vector<32x1xf32> to vector<32x10xf32>
    %457 = arith.mulf %451, %456 : vector<32x10xf32>
    %458 = arith.addf %444, %457 : vector<32x10xf32>
    %c6_i32 = arith.constant 6 : i32
    %459 = vector.broadcast %c6_i32 : i32 to vector<32x10xi32>
    %460 = arith.cmpi sge, %443, %459 : vector<32x10xi32>
    %c10_i32 = arith.constant 10 : i32
    %461 = vector.broadcast %c10_i32 : i32 to vector<32x10xi32>
    %462 = arith.cmpi slt, %443, %461 : vector<32x10xi32>
    %463 = arith.andi %460, %462 : vector<32x10xi1>
    %464 = arith.extui %463 : vector<32x10xi1> to vector<32x10xi32>
    %465 = arith.sitofp %464 : vector<32x10xi32> to vector<32x10xf32>
    %cst_140 = arith.constant -9.000000e+08 : f32
    %466 = vector.broadcast %cst_140 : f32 to vector<32x10xf32>
    %467 = arith.select %463, %442, %466 : vector<32x10xi1>, vector<32x10xf32>
    %cst_141 = arith.constant dense<0xFF800000> : vector<32xf32>
    %468 = vector.multi_reduction <maximumf>, %467, %cst_141 [1] : vector<32x10xf32> to vector<32xf32>
    %469 = vector.shape_cast %468 : vector<32xf32> to vector<32x1xf32>
    %470 = vector.broadcast %469 : vector<32x1xf32> to vector<32x10xf32>
    %471 = arith.mulf %465, %470 : vector<32x10xf32>
    %472 = arith.addf %458, %471 : vector<32x10xf32>
    %473 = arith.subf %442, %472 : vector<32x10xf32>
    %cst_142 = arith.constant 0.000000e+00 : f32
    %474 = vector.broadcast %cst_142 : f32 to vector<32x10xf32>
    %475 = arith.minimumf %473, %474 : vector<32x10xf32>
    %476 = math.exp %475 : vector<32x10xf32>
    %cst_143 = arith.constant 0.000000e+00 : f32
    %477 = vector.broadcast %cst_143 : f32 to vector<32x10xf32>
    %478 = arith.mulf %476, %451 : vector<32x10xf32>
    %cst_144 = arith.constant dense<0.000000e+00> : vector<32xf32>
    %479 = vector.multi_reduction <add>, %478, %cst_144 [1] : vector<32x10xf32> to vector<32xf32>
    %480 = vector.shape_cast %479 : vector<32xf32> to vector<32x1xf32>
    %481 = vector.broadcast %480 : vector<32x1xf32> to vector<32x10xf32>
    %482 = arith.divf %478, %481 : vector<32x10xf32>
    %483 = arith.addf %477, %482 : vector<32x10xf32>
    %484 = arith.mulf %476, %465 : vector<32x10xf32>
    %cst_145 = arith.constant dense<0.000000e+00> : vector<32xf32>
    %485 = vector.multi_reduction <add>, %484, %cst_145 [1] : vector<32x10xf32> to vector<32xf32>
    %486 = vector.shape_cast %485 : vector<32xf32> to vector<32x1xf32>
    %487 = vector.broadcast %486 : vector<32x1xf32> to vector<32x10xf32>
    %488 = arith.divf %484, %487 : vector<32x10xf32>
    %489 = arith.addf %483, %488 : vector<32x10xf32>
    %c4_i32_146 = arith.constant 4 : i32
    %490 = vector.broadcast %c4_i32_146 : i32 to vector<32x10xi32>
    %491 = arith.cmpi eq, %443, %490 : vector<32x10xi32>
    %492 = arith.extui %491 : vector<32x10xi1> to vector<32x10xi32>
    %493 = arith.sitofp %492 : vector<32x10xi32> to vector<32x10xf32>
    %494 = arith.mulf %442, %493 : vector<32x10xf32>
    %495 = arith.negf %494 : vector<32x10xf32>
    %496 = math.exp %495 : vector<32x10xf32>
    %cst_147 = arith.constant 1.000000e+00 : f32
    %497 = vector.broadcast %cst_147 : f32 to vector<32x10xf32>
    %498 = arith.addf %497, %496 : vector<32x10xf32>
    %499 = arith.divf %497, %498 : vector<32x10xf32>
    %500 = arith.mulf %499, %493 : vector<32x10xf32>
    %501 = arith.addf %489, %500 : vector<32x10xf32>
    %c5_i32 = arith.constant 5 : i32
    %502 = vector.broadcast %c5_i32 : i32 to vector<32x10xi32>
    %503 = arith.cmpi eq, %443, %502 : vector<32x10xi32>
    %504 = arith.extui %503 : vector<32x10xi1> to vector<32x10xi32>
    %505 = arith.sitofp %504 : vector<32x10xi32> to vector<32x10xf32>
    %506 = arith.mulf %442, %505 : vector<32x10xf32>
    %507 = arith.negf %506 : vector<32x10xf32>
    %508 = math.exp %507 : vector<32x10xf32>
    %cst_148 = arith.constant 1.000000e+00 : f32
    %509 = vector.broadcast %cst_148 : f32 to vector<32x10xf32>
    %510 = arith.addf %509, %508 : vector<32x10xf32>
    %511 = arith.divf %509, %510 : vector<32x10xf32>
    %512 = arith.mulf %511, %505 : vector<32x10xf32>
    %513 = arith.addf %501, %512 : vector<32x10xf32>
    %514 = vector.shape_cast %513 : vector<32x10xf32> to vector<4x8x10xf32>
    %c0_149 = arith.constant 0 : index
    %c0_150 = arith.constant 0 : index
    %c0_151 = arith.constant 0 : index
    %c0_152 = arith.constant 0 : index
    %515 = vector.load %arg31[%c0_149, %c0_150, %c0_151, %c0_152] : memref<4x8x4x10xf32, #tpu.memory_space<vmem>>, vector<4x8x1x10xf32>
    %516 = vector.shape_cast %515 : vector<4x8x1x10xf32> to vector<4x8x10xf32>
    %517 = vector.shape_cast %514 : vector<4x8x10xf32> to vector<4x8x1x10xf32>
    tpu.vector_store %arg31[%c0_149, %c0_150, %c0_151, %c0_152], %517 {strides = array<i32>} : memref<4x8x4x10xf32, #tpu.memory_space<vmem>>, vector<4x8x1x10xf32>,
    %518 = vector.extract_strided_slice %33 {offsets = [0, 1, 0, 0], sizes = [4, 1, 8, 8], strides = [1, 1, 1, 1]} : vector<4x4x8x8xf32> to vector<4x1x8x8xf32>
    %519 = vector.shape_cast %518 : vector<4x1x8x8xf32> to vector<4x8x8xf32>
    %520 = arith.truncf %519 : vector<4x8x8xf32> to vector<4x8x8xbf16>
    %521 = arith.truncf %433 : vector<4x8x10xf32> to vector<4x8x10xbf16>
    "tpu.trace_start"() <{level = 10 : i32, message = "mlj,mjd->mld"}> : () -> ()
    %cst_153 = arith.constant dense<0.000000e+00> : vector<4x8x10xf32>
    %522 = tpu.matmul %520, %521, %cst_153 {dimension_numbers = #tpu.dot_dimension_numbers<[2], [1], [1], [2], [0, 0, 0, 1, 1, 2], [0], [0]>} : vector<4x8x8xbf16>, vector<4x8x10xbf16>, vector<4x8x10xf32> -> vector<4x8x10xf32>
    "tpu.trace_stop"() : () -> ()
    %523 = vector.shape_cast %522 : vector<4x8x10xf32> to vector<32x10xf32>
    %524 = arith.addf %430, %523 : vector<32x10xf32>
    %525 = vector.broadcast %21 : vector<1x10xf32> to vector<32x10xf32>
    %526 = arith.addf %524, %525 : vector<32x10xf32>
    %527 = tpu.iota {dimensions = array<i32: 1>} : vector<32x10xi32>
    %cst_154 = arith.constant 0.000000e+00 : f32
    %528 = vector.broadcast %cst_154 : f32 to vector<32x10xf32>
    %c0_i32_155 = arith.constant 0 : i32
    %529 = vector.broadcast %c0_i32_155 : i32 to vector<32x10xi32>
    %530 = arith.cmpi sge, %527, %529 : vector<32x10xi32>
    %c4_i32_156 = arith.constant 4 : i32
    %531 = vector.broadcast %c4_i32_156 : i32 to vector<32x10xi32>
    %532 = arith.cmpi slt, %527, %531 : vector<32x10xi32>
    %533 = arith.andi %530, %532 : vector<32x10xi1>
    %534 = arith.extui %533 : vector<32x10xi1> to vector<32x10xi32>
    %535 = arith.sitofp %534 : vector<32x10xi32> to vector<32x10xf32>
    %cst_157 = arith.constant -9.000000e+08 : f32
    %536 = vector.broadcast %cst_157 : f32 to vector<32x10xf32>
    %537 = arith.select %533, %526, %536 : vector<32x10xi1>, vector<32x10xf32>
    %cst_158 = arith.constant dense<0xFF800000> : vector<32xf32>
    %538 = vector.multi_reduction <maximumf>, %537, %cst_158 [1] : vector<32x10xf32> to vector<32xf32>
    %539 = vector.shape_cast %538 : vector<32xf32> to vector<32x1xf32>
    %540 = vector.broadcast %539 : vector<32x1xf32> to vector<32x10xf32>
    %541 = arith.mulf %535, %540 : vector<32x10xf32>
    %542 = arith.addf %528, %541 : vector<32x10xf32>
    %c6_i32_159 = arith.constant 6 : i32
    %543 = vector.broadcast %c6_i32_159 : i32 to vector<32x10xi32>
    %544 = arith.cmpi sge, %527, %543 : vector<32x10xi32>
    %c10_i32_160 = arith.constant 10 : i32
    %545 = vector.broadcast %c10_i32_160 : i32 to vector<32x10xi32>
    %546 = arith.cmpi slt, %527, %545 : vector<32x10xi32>
    %547 = arith.andi %544, %546 : vector<32x10xi1>
    %548 = arith.extui %547 : vector<32x10xi1> to vector<32x10xi32>
    %549 = arith.sitofp %548 : vector<32x10xi32> to vector<32x10xf32>
    %cst_161 = arith.constant -9.000000e+08 : f32
    %550 = vector.broadcast %cst_161 : f32 to vector<32x10xf32>
    %551 = arith.select %547, %526, %550 : vector<32x10xi1>, vector<32x10xf32>
    %cst_162 = arith.constant dense<0xFF800000> : vector<32xf32>
    %552 = vector.multi_reduction <maximumf>, %551, %cst_162 [1] : vector<32x10xf32> to vector<32xf32>
    %553 = vector.shape_cast %552 : vector<32xf32> to vector<32x1xf32>
    %554 = vector.broadcast %553 : vector<32x1xf32> to vector<32x10xf32>
    %555 = arith.mulf %549, %554 : vector<32x10xf32>
    %556 = arith.addf %542, %555 : vector<32x10xf32>
    %557 = arith.subf %526, %556 : vector<32x10xf32>
    %cst_163 = arith.constant 0.000000e+00 : f32
    %558 = vector.broadcast %cst_163 : f32 to vector<32x10xf32>
    %559 = arith.minimumf %557, %558 : vector<32x10xf32>
    %560 = math.exp %559 : vector<32x10xf32>
    %cst_164 = arith.constant 0.000000e+00 : f32
    %561 = vector.broadcast %cst_164 : f32 to vector<32x10xf32>
    %562 = arith.mulf %560, %535 : vector<32x10xf32>
    %cst_165 = arith.constant dense<0.000000e+00> : vector<32xf32>
    %563 = vector.multi_reduction <add>, %562, %cst_165 [1] : vector<32x10xf32> to vector<32xf32>
    %564 = vector.shape_cast %563 : vector<32xf32> to vector<32x1xf32>
    %565 = vector.broadcast %564 : vector<32x1xf32> to vector<32x10xf32>
    %566 = arith.divf %562, %565 : vector<32x10xf32>
    %567 = arith.addf %561, %566 : vector<32x10xf32>
    %568 = arith.mulf %560, %549 : vector<32x10xf32>
    %cst_166 = arith.constant dense<0.000000e+00> : vector<32xf32>
    %569 = vector.multi_reduction <add>, %568, %cst_166 [1] : vector<32x10xf32> to vector<32xf32>
    %570 = vector.shape_cast %569 : vector<32xf32> to vector<32x1xf32>
    %571 = vector.broadcast %570 : vector<32x1xf32> to vector<32x10xf32>
    %572 = arith.divf %568, %571 : vector<32x10xf32>
    %573 = arith.addf %567, %572 : vector<32x10xf32>
    %c4_i32_167 = arith.constant 4 : i32
    %574 = vector.broadcast %c4_i32_167 : i32 to vector<32x10xi32>
    %575 = arith.cmpi eq, %527, %574 : vector<32x10xi32>
    %576 = arith.extui %575 : vector<32x10xi1> to vector<32x10xi32>
    %577 = arith.sitofp %576 : vector<32x10xi32> to vector<32x10xf32>
    %578 = arith.mulf %526, %577 : vector<32x10xf32>
    %579 = arith.negf %578 : vector<32x10xf32>
    %580 = math.exp %579 : vector<32x10xf32>
    %cst_168 = arith.constant 1.000000e+00 : f32
    %581 = vector.broadcast %cst_168 : f32 to vector<32x10xf32>
    %582 = arith.addf %581, %580 : vector<32x10xf32>
    %583 = arith.divf %581, %582 : vector<32x10xf32>
    %584 = arith.mulf %583, %577 : vector<32x10xf32>
    %585 = arith.addf %573, %584 : vector<32x10xf32>
    %c5_i32_169 = arith.constant 5 : i32
    %586 = vector.broadcast %c5_i32_169 : i32 to vector<32x10xi32>
    %587 = arith.cmpi eq, %527, %586 : vector<32x10xi32>
    %588 = arith.extui %587 : vector<32x10xi1> to vector<32x10xi32>
    %589 = arith.sitofp %588 : vector<32x10xi32> to vector<32x10xf32>
    %590 = arith.mulf %526, %589 : vector<32x10xf32>
    %591 = arith.negf %590 : vector<32x10xf32>
    %592 = math.exp %591 : vector<32x10xf32>
    %cst_170 = arith.constant 1.000000e+00 : f32
    %593 = vector.broadcast %cst_170 : f32 to vector<32x10xf32>
    %594 = arith.addf %593, %592 : vector<32x10xf32>
    %595 = arith.divf %593, %594 : vector<32x10xf32>
    %596 = arith.mulf %595, %589 : vector<32x10xf32>
    %597 = arith.addf %585, %596 : vector<32x10xf32>
    %598 = vector.shape_cast %597 : vector<32x10xf32> to vector<4x8x10xf32>
    %c0_171 = arith.constant 0 : index
    %c0_172 = arith.constant 0 : index
    %c1 = arith.constant 1 : index
    %c0_173 = arith.constant 0 : index
    %599 = vector.load %arg31[%c0_171, %c0_172, %c1, %c0_173] : memref<4x8x4x10xf32, #tpu.memory_space<vmem>>, vector<4x8x1x10xf32>
    %600 = vector.shape_cast %599 : vector<4x8x1x10xf32> to vector<4x8x10xf32>
    %601 = vector.shape_cast %598 : vector<4x8x10xf32> to vector<4x8x1x10xf32>
    tpu.vector_store %arg31[%c0_171, %c0_172, %c1, %c0_173], %601 {strides = array<i32>} : memref<4x8x4x10xf32, #tpu.memory_space<vmem>>, vector<4x8x1x10xf32>,
    %602 = vector.extract_strided_slice %33 {offsets = [0, 2, 0, 0], sizes = [4, 1, 8, 8], strides = [1, 1, 1, 1]} : vector<4x4x8x8xf32> to vector<4x1x8x8xf32>
    %603 = vector.shape_cast %602 : vector<4x1x8x8xf32> to vector<4x8x8xf32>
    %604 = arith.truncf %603 : vector<4x8x8xf32> to vector<4x8x8xbf16>
    %605 = arith.truncf %433 : vector<4x8x10xf32> to vector<4x8x10xbf16>
    "tpu.trace_start"() <{level = 10 : i32, message = "mlj,mjd->mld"}> : () -> ()
    %cst_174 = arith.constant dense<0.000000e+00> : vector<4x8x10xf32>
    %606 = tpu.matmul %604, %605, %cst_174 {dimension_numbers = #tpu.dot_dimension_numbers<[2], [1], [1], [2], [0, 0, 0, 1, 1, 2], [0], [0]>} : vector<4x8x8xbf16>, vector<4x8x10xbf16>, vector<4x8x10xf32> -> vector<4x8x10xf32>
    "tpu.trace_stop"() : () -> ()
    %607 = vector.shape_cast %606 : vector<4x8x10xf32> to vector<32x10xf32>
    %608 = arith.addf %430, %607 : vector<32x10xf32>
    %609 = vector.broadcast %21 : vector<1x10xf32> to vector<32x10xf32>
    %610 = arith.addf %608, %609 : vector<32x10xf32>
    %611 = tpu.iota {dimensions = array<i32: 1>} : vector<32x10xi32>
    %cst_175 = arith.constant 0.000000e+00 : f32
    %612 = vector.broadcast %cst_175 : f32 to vector<32x10xf32>
    %c0_i32_176 = arith.constant 0 : i32
    %613 = vector.broadcast %c0_i32_176 : i32 to vector<32x10xi32>
    %614 = arith.cmpi sge, %611, %613 : vector<32x10xi32>
    %c4_i32_177 = arith.constant 4 : i32
    %615 = vector.broadcast %c4_i32_177 : i32 to vector<32x10xi32>
    %616 = arith.cmpi slt, %611, %615 : vector<32x10xi32>
    %617 = arith.andi %614, %616 : vector<32x10xi1>
    %618 = arith.extui %617 : vector<32x10xi1> to vector<32x10xi32>
    %619 = arith.sitofp %618 : vector<32x10xi32> to vector<32x10xf32>
    %cst_178 = arith.constant -9.000000e+08 : f32
    %620 = vector.broadcast %cst_178 : f32 to vector<32x10xf32>
    %621 = arith.select %617, %610, %620 : vector<32x10xi1>, vector<32x10xf32>
    %cst_179 = arith.constant dense<0xFF800000> : vector<32xf32>
    %622 = vector.multi_reduction <maximumf>, %621, %cst_179 [1] : vector<32x10xf32> to vector<32xf32>
    %623 = vector.shape_cast %622 : vector<32xf32> to vector<32x1xf32>
    %624 = vector.broadcast %623 : vector<32x1xf32> to vector<32x10xf32>
    %625 = arith.mulf %619, %624 : vector<32x10xf32>
    %626 = arith.addf %612, %625 : vector<32x10xf32>
    %c6_i32_180 = arith.constant 6 : i32
    %627 = vector.broadcast %c6_i32_180 : i32 to vector<32x10xi32>
    %628 = arith.cmpi sge, %611, %627 : vector<32x10xi32>
    %c10_i32_181 = arith.constant 10 : i32
    %629 = vector.broadcast %c10_i32_181 : i32 to vector<32x10xi32>
    %630 = arith.cmpi slt, %611, %629 : vector<32x10xi32>
    %631 = arith.andi %628, %630 : vector<32x10xi1>
    %632 = arith.extui %631 : vector<32x10xi1> to vector<32x10xi32>
    %633 = arith.sitofp %632 : vector<32x10xi32> to vector<32x10xf32>
    %cst_182 = arith.constant -9.000000e+08 : f32
    %634 = vector.broadcast %cst_182 : f32 to vector<32x10xf32>
    %635 = arith.select %631, %610, %634 : vector<32x10xi1>, vector<32x10xf32>
    %cst_183 = arith.constant dense<0xFF800000> : vector<32xf32>
    %636 = vector.multi_reduction <maximumf>, %635, %cst_183 [1] : vector<32x10xf32> to vector<32xf32>
    %637 = vector.shape_cast %636 : vector<32xf32> to vector<32x1xf32>
    %638 = vector.broadcast %637 : vector<32x1xf32> to vector<32x10xf32>
    %639 = arith.mulf %633, %638 : vector<32x10xf32>
    %640 = arith.addf %626, %639 : vector<32x10xf32>
    %641 = arith.subf %610, %640 : vector<32x10xf32>
    %cst_184 = arith.constant 0.000000e+00 : f32
    %642 = vector.broadcast %cst_184 : f32 to vector<32x10xf32>
    %643 = arith.minimumf %641, %642 : vector<32x10xf32>
    %644 = math.exp %643 : vector<32x10xf32>
    %cst_185 = arith.constant 0.000000e+00 : f32
    %645 = vector.broadcast %cst_185 : f32 to vector<32x10xf32>
    %646 = arith.mulf %644, %619 : vector<32x10xf32>
    %cst_186 = arith.constant dense<0.000000e+00> : vector<32xf32>
    %647 = vector.multi_reduction <add>, %646, %cst_186 [1] : vector<32x10xf32> to vector<32xf32>
    %648 = vector.shape_cast %647 : vector<32xf32> to vector<32x1xf32>
    %649 = vector.broadcast %648 : vector<32x1xf32> to vector<32x10xf32>
    %650 = arith.divf %646, %649 : vector<32x10xf32>
    %651 = arith.addf %645, %650 : vector<32x10xf32>
    %652 = arith.mulf %644, %633 : vector<32x10xf32>
    %cst_187 = arith.constant dense<0.000000e+00> : vector<32xf32>
    %653 = vector.multi_reduction <add>, %652, %cst_187 [1] : vector<32x10xf32> to vector<32xf32>
    %654 = vector.shape_cast %653 : vector<32xf32> to vector<32x1xf32>
    %655 = vector.broadcast %654 : vector<32x1xf32> to vector<32x10xf32>
    %656 = arith.divf %652, %655 : vector<32x10xf32>
    %657 = arith.addf %651, %656 : vector<32x10xf32>
    %c4_i32_188 = arith.constant 4 : i32
    %658 = vector.broadcast %c4_i32_188 : i32 to vector<32x10xi32>
    %659 = arith.cmpi eq, %611, %658 : vector<32x10xi32>
    %660 = arith.extui %659 : vector<32x10xi1> to vector<32x10xi32>
    %661 = arith.sitofp %660 : vector<32x10xi32> to vector<32x10xf32>
    %662 = arith.mulf %610, %661 : vector<32x10xf32>
    %663 = arith.negf %662 : vector<32x10xf32>
    %664 = math.exp %663 : vector<32x10xf32>
    %cst_189 = arith.constant 1.000000e+00 : f32
    %665 = vector.broadcast %cst_189 : f32 to vector<32x10xf32>
    %666 = arith.addf %665, %664 : vector<32x10xf32>
    %667 = arith.divf %665, %666 : vector<32x10xf32>
    %668 = arith.mulf %667, %661 : vector<32x10xf32>
    %669 = arith.addf %657, %668 : vector<32x10xf32>
    %c5_i32_190 = arith.constant 5 : i32
    %670 = vector.broadcast %c5_i32_190 : i32 to vector<32x10xi32>
    %671 = arith.cmpi eq, %611, %670 : vector<32x10xi32>
    %672 = arith.extui %671 : vector<32x10xi1> to vector<32x10xi32>
    %673 = arith.sitofp %672 : vector<32x10xi32> to vector<32x10xf32>
    %674 = arith.mulf %610, %673 : vector<32x10xf32>
    %675 = arith.negf %674 : vector<32x10xf32>
    %676 = math.exp %675 : vector<32x10xf32>
    %cst_191 = arith.constant 1.000000e+00 : f32
    %677 = vector.broadcast %cst_191 : f32 to vector<32x10xf32>
    %678 = arith.addf %677, %676 : vector<32x10xf32>
    %679 = arith.divf %677, %678 : vector<32x10xf32>
    %680 = arith.mulf %679, %673 : vector<32x10xf32>
    %681 = arith.addf %669, %680 : vector<32x10xf32>
    %682 = vector.shape_cast %681 : vector<32x10xf32> to vector<4x8x10xf32>
    %c0_192 = arith.constant 0 : index
    %c0_193 = arith.constant 0 : index
    %c2 = arith.constant 2 : index
    %c0_194 = arith.constant 0 : index
    %683 = vector.load %arg31[%c0_192, %c0_193, %c2, %c0_194] : memref<4x8x4x10xf32, #tpu.memory_space<vmem>>, vector<4x8x1x10xf32>
    %684 = vector.shape_cast %683 : vector<4x8x1x10xf32> to vector<4x8x10xf32>
    %685 = vector.shape_cast %682 : vector<4x8x10xf32> to vector<4x8x1x10xf32>
    tpu.vector_store %arg31[%c0_192, %c0_193, %c2, %c0_194], %685 {strides = array<i32>} : memref<4x8x4x10xf32, #tpu.memory_space<vmem>>, vector<4x8x1x10xf32>,
    %686 = vector.extract_strided_slice %33 {offsets = [0, 3, 0, 0], sizes = [4, 1, 8, 8], strides = [1, 1, 1, 1]} : vector<4x4x8x8xf32> to vector<4x1x8x8xf32>
    %687 = vector.shape_cast %686 : vector<4x1x8x8xf32> to vector<4x8x8xf32>
    %688 = arith.truncf %687 : vector<4x8x8xf32> to vector<4x8x8xbf16>
    %689 = arith.truncf %433 : vector<4x8x10xf32> to vector<4x8x10xbf16>
    "tpu.trace_start"() <{level = 10 : i32, message = "mlj,mjd->mld"}> : () -> ()
    %cst_195 = arith.constant dense<0.000000e+00> : vector<4x8x10xf32>
    %690 = tpu.matmul %688, %689, %cst_195 {dimension_numbers = #tpu.dot_dimension_numbers<[2], [1], [1], [2], [0, 0, 0, 1, 1, 2], [0], [0]>} : vector<4x8x8xbf16>, vector<4x8x10xbf16>, vector<4x8x10xf32> -> vector<4x8x10xf32>
    "tpu.trace_stop"() : () -> ()
    %691 = vector.shape_cast %690 : vector<4x8x10xf32> to vector<32x10xf32>
    %692 = arith.addf %430, %691 : vector<32x10xf32>
    %693 = vector.broadcast %21 : vector<1x10xf32> to vector<32x10xf32>
    %694 = arith.addf %692, %693 : vector<32x10xf32>
    %695 = tpu.iota {dimensions = array<i32: 1>} : vector<32x10xi32>
    %cst_196 = arith.constant 0.000000e+00 : f32
    %696 = vector.broadcast %cst_196 : f32 to vector<32x10xf32>
    %c0_i32_197 = arith.constant 0 : i32
    %697 = vector.broadcast %c0_i32_197 : i32 to vector<32x10xi32>
    %698 = arith.cmpi sge, %695, %697 : vector<32x10xi32>
    %c4_i32_198 = arith.constant 4 : i32
    %699 = vector.broadcast %c4_i32_198 : i32 to vector<32x10xi32>
    %700 = arith.cmpi slt, %695, %699 : vector<32x10xi32>
    %701 = arith.andi %698, %700 : vector<32x10xi1>
    %702 = arith.extui %701 : vector<32x10xi1> to vector<32x10xi32>
    %703 = arith.sitofp %702 : vector<32x10xi32> to vector<32x10xf32>
    %cst_199 = arith.constant -9.000000e+08 : f32
    %704 = vector.broadcast %cst_199 : f32 to vector<32x10xf32>
    %705 = arith.select %701, %694, %704 : vector<32x10xi1>, vector<32x10xf32>
    %cst_200 = arith.constant dense<0xFF800000> : vector<32xf32>
    %706 = vector.multi_reduction <maximumf>, %705, %cst_200 [1] : vector<32x10xf32> to vector<32xf32>
    %707 = vector.shape_cast %706 : vector<32xf32> to vector<32x1xf32>
    %708 = vector.broadcast %707 : vector<32x1xf32> to vector<32x10xf32>
    %709 = arith.mulf %703, %708 : vector<32x10xf32>
    %710 = arith.addf %696, %709 : vector<32x10xf32>
    %c6_i32_201 = arith.constant 6 : i32
    %711 = vector.broadcast %c6_i32_201 : i32 to vector<32x10xi32>
    %712 = arith.cmpi sge, %695, %711 : vector<32x10xi32>
    %c10_i32_202 = arith.constant 10 : i32
    %713 = vector.broadcast %c10_i32_202 : i32 to vector<32x10xi32>
    %714 = arith.cmpi slt, %695, %713 : vector<32x10xi32>
    %715 = arith.andi %712, %714 : vector<32x10xi1>
    %716 = arith.extui %715 : vector<32x10xi1> to vector<32x10xi32>
    %717 = arith.sitofp %716 : vector<32x10xi32> to vector<32x10xf32>
    %cst_203 = arith.constant -9.000000e+08 : f32
    %718 = vector.broadcast %cst_203 : f32 to vector<32x10xf32>
    %719 = arith.select %715, %694, %718 : vector<32x10xi1>, vector<32x10xf32>
    %cst_204 = arith.constant dense<0xFF800000> : vector<32xf32>
    %720 = vector.multi_reduction <maximumf>, %719, %cst_204 [1] : vector<32x10xf32> to vector<32xf32>
    %721 = vector.shape_cast %720 : vector<32xf32> to vector<32x1xf32>
    %722 = vector.broadcast %721 : vector<32x1xf32> to vector<32x10xf32>
    %723 = arith.mulf %717, %722 : vector<32x10xf32>
    %724 = arith.addf %710, %723 : vector<32x10xf32>
    %725 = arith.subf %694, %724 : vector<32x10xf32>
    %cst_205 = arith.constant 0.000000e+00 : f32
    %726 = vector.broadcast %cst_205 : f32 to vector<32x10xf32>
    %727 = arith.minimumf %725, %726 : vector<32x10xf32>
    %728 = math.exp %727 : vector<32x10xf32>
    %cst_206 = arith.constant 0.000000e+00 : f32
    %729 = vector.broadcast %cst_206 : f32 to vector<32x10xf32>
    %730 = arith.mulf %728, %703 : vector<32x10xf32>
    %cst_207 = arith.constant dense<0.000000e+00> : vector<32xf32>
    %731 = vector.multi_reduction <add>, %730, %cst_207 [1] : vector<32x10xf32> to vector<32xf32>
    %732 = vector.shape_cast %731 : vector<32xf32> to vector<32x1xf32>
    %733 = vector.broadcast %732 : vector<32x1xf32> to vector<32x10xf32>
    %734 = arith.divf %730, %733 : vector<32x10xf32>
    %735 = arith.addf %729, %734 : vector<32x10xf32>
    %736 = arith.mulf %728, %717 : vector<32x10xf32>
    %cst_208 = arith.constant dense<0.000000e+00> : vector<32xf32>
    %737 = vector.multi_reduction <add>, %736, %cst_208 [1] : vector<32x10xf32> to vector<32xf32>
    %738 = vector.shape_cast %737 : vector<32xf32> to vector<32x1xf32>
    %739 = vector.broadcast %738 : vector<32x1xf32> to vector<32x10xf32>
    %740 = arith.divf %736, %739 : vector<32x10xf32>
    %741 = arith.addf %735, %740 : vector<32x10xf32>
    %c4_i32_209 = arith.constant 4 : i32
    %742 = vector.broadcast %c4_i32_209 : i32 to vector<32x10xi32>
    %743 = arith.cmpi eq, %695, %742 : vector<32x10xi32>
    %744 = arith.extui %743 : vector<32x10xi1> to vector<32x10xi32>
    %745 = arith.sitofp %744 : vector<32x10xi32> to vector<32x10xf32>
    %746 = arith.mulf %694, %745 : vector<32x10xf32>
    %747 = arith.negf %746 : vector<32x10xf32>
    %748 = math.exp %747 : vector<32x10xf32>
    %cst_210 = arith.constant 1.000000e+00 : f32
    %749 = vector.broadcast %cst_210 : f32 to vector<32x10xf32>
    %750 = arith.addf %749, %748 : vector<32x10xf32>
    %751 = arith.divf %749, %750 : vector<32x10xf32>
    %752 = arith.mulf %751, %745 : vector<32x10xf32>
    %753 = arith.addf %741, %752 : vector<32x10xf32>
    %c5_i32_211 = arith.constant 5 : i32
    %754 = vector.broadcast %c5_i32_211 : i32 to vector<32x10xi32>
    %755 = arith.cmpi eq, %695, %754 : vector<32x10xi32>
    %756 = arith.extui %755 : vector<32x10xi1> to vector<32x10xi32>
    %757 = arith.sitofp %756 : vector<32x10xi32> to vector<32x10xf32>
    %758 = arith.mulf %694, %757 : vector<32x10xf32>
    %759 = arith.negf %758 : vector<32x10xf32>
    %760 = math.exp %759 : vector<32x10xf32>
    %cst_212 = arith.constant 1.000000e+00 : f32
    %761 = vector.broadcast %cst_212 : f32 to vector<32x10xf32>
    %762 = arith.addf %761, %760 : vector<32x10xf32>
    %763 = arith.divf %761, %762 : vector<32x10xf32>
    %764 = arith.mulf %763, %757 : vector<32x10xf32>
    %765 = arith.addf %753, %764 : vector<32x10xf32>
    %766 = vector.shape_cast %765 : vector<32x10xf32> to vector<4x8x10xf32>
    %c0_213 = arith.constant 0 : index
    %c0_214 = arith.constant 0 : index
    %c3 = arith.constant 3 : index
    %c0_215 = arith.constant 0 : index
    %767 = vector.load %arg31[%c0_213, %c0_214, %c3, %c0_215] : memref<4x8x4x10xf32, #tpu.memory_space<vmem>>, vector<4x8x1x10xf32>
    %768 = vector.shape_cast %767 : vector<4x8x1x10xf32> to vector<4x8x10xf32>
    %769 = vector.shape_cast %766 : vector<4x8x10xf32> to vector<4x8x1x10xf32>
    tpu.vector_store %arg31[%c0_213, %c0_214, %c3, %c0_215], %769 {strides = array<i32>} : memref<4x8x4x10xf32, #tpu.memory_space<vmem>>, vector<4x8x1x10xf32>,
    return
  }
  func.func @transform_0(%arg0: i32) -> (i32, i32, i32) {
    %c0_i32 = arith.constant 0 : i32
    %c0_i32_0 = arith.constant 0 : i32
    %c0_i32_1 = arith.constant 0 : i32
    return %arg0, %c0_i32, %c0_i32_0 : i32, i32, i32
  }
  func.func @transform_1(%arg0: i32) -> (i32, i32, i32) {
    %c0_i32 = arith.constant 0 : i32
    %c0_i32_0 = arith.constant 0 : i32
    %c0_i32_1 = arith.constant 0 : i32
    return %arg0, %c0_i32, %c0_i32_0 : i32, i32, i32
  }
  func.func @transform_2(%arg0: i32) -> (i32, i32, i32) {
    %c0_i32 = arith.constant 0 : i32
    %c0_i32_0 = arith.constant 0 : i32
    %c0_i32_1 = arith.constant 0 : i32
    return %arg0, %c0_i32, %c0_i32_0 : i32, i32, i32
  }
  func.func @transform_3(%arg0: i32) -> (i32, i32, i32) {
    %c0_i32 = arith.constant 0 : i32
    %c0_i32_0 = arith.constant 0 : i32
    %c0_i32_1 = arith.constant 0 : i32
    return %arg0, %c0_i32, %c0_i32_0 : i32, i32, i32
  }
  func.func @transform_4(%arg0: i32) -> (i32, i32, i32) {
    %c0_i32 = arith.constant 0 : i32
    %c0_i32_0 = arith.constant 0 : i32
    %c0_i32_1 = arith.constant 0 : i32
    return %arg0, %c0_i32, %c0_i32_0 : i32, i32, i32
  }
  func.func @transform_5(%arg0: i32) -> (i32, i32, i32) {
    %c0_i32 = arith.constant 0 : i32
    %c0_i32_0 = arith.constant 0 : i32
    %c0_i32_1 = arith.constant 0 : i32
    return %arg0, %c0_i32, %c0_i32_0 : i32, i32, i32
  }
  func.func @transform_6(%arg0: i32) -> (i32, i32, i32, i32) {
    %c0_i32 = arith.constant 0 : i32
    %c0_i32_0 = arith.constant 0 : i32
    %c0_i32_1 = arith.constant 0 : i32
    %c0_i32_2 = arith.constant 0 : i32
    return %arg0, %c0_i32, %c0_i32_0, %c0_i32_1 : i32, i32, i32, i32
  }
  func.func @transform_7(%arg0: i32) -> (i32, i32) {
    %c0_i32 = arith.constant 0 : i32
    %c0_i32_0 = arith.constant 0 : i32
    %c0_i32_1 = arith.constant 0 : i32
    return %c0_i32, %c0_i32_0 : i32, i32
  }
  func.func @transform_8(%arg0: i32) -> (i32, i32) {
    %c0_i32 = arith.constant 0 : i32
    %c0_i32_0 = arith.constant 0 : i32
    %c0_i32_1 = arith.constant 0 : i32
    return %c0_i32, %c0_i32_0 : i32, i32
  }
  func.func @transform_9(%arg0: i32) -> (i32, i32) {
    %c0_i32 = arith.constant 0 : i32
    %c0_i32_0 = arith.constant 0 : i32
    %c0_i32_1 = arith.constant 0 : i32
    return %c0_i32, %c0_i32_0 : i32, i32
  }
  func.func @transform_10(%arg0: i32) -> (i32, i32) {
    %c0_i32 = arith.constant 0 : i32
    %c0_i32_0 = arith.constant 0 : i32
    %c0_i32_1 = arith.constant 0 : i32
    return %c0_i32, %c0_i32_0 : i32, i32
  }
  func.func @transform_11(%arg0: i32) -> (i32, i32) {
    %c0_i32 = arith.constant 0 : i32
    %c0_i32_0 = arith.constant 0 : i32
    %c0_i32_1 = arith.constant 0 : i32
    return %c0_i32, %c0_i32_0 : i32, i32
  }
  func.func @transform_12(%arg0: i32) -> (i32, i32) {
    %c0_i32 = arith.constant 0 : i32
    %c0_i32_0 = arith.constant 0 : i32
    %c0_i32_1 = arith.constant 0 : i32
    return %c0_i32, %c0_i32_0 : i32, i32
  }
  func.func @transform_13(%arg0: i32) -> (i32, i32) {
    %c0_i32 = arith.constant 0 : i32
    %c0_i32_0 = arith.constant 0 : i32
    %c0_i32_1 = arith.constant 0 : i32
    return %c0_i32, %c0_i32_0 : i32, i32
  }
  func.func @transform_14(%arg0: i32) -> (i32, i32) {
    %c0_i32 = arith.constant 0 : i32
    %c0_i32_0 = arith.constant 0 : i32
    %c0_i32_1 = arith.constant 0 : i32
    return %c0_i32, %c0_i32_0 : i32, i32
  }
  func.func @transform_15(%arg0: i32) -> (i32, i32) {
    %c0_i32 = arith.constant 0 : i32
    %c0_i32_0 = arith.constant 0 : i32
    %c0_i32_1 = arith.constant 0 : i32
    return %c0_i32, %c0_i32_0 : i32, i32
  }
  func.func @transform_16(%arg0: i32) -> (i32, i32) {
    %c0_i32 = arith.constant 0 : i32
    %c0_i32_0 = arith.constant 0 : i32
    %c0_i32_1 = arith.constant 0 : i32
    return %c0_i32, %c0_i32_0 : i32, i32
  }
  func.func @transform_17(%arg0: i32) -> (i32, i32) {
    %c0_i32 = arith.constant 0 : i32
    %c0_i32_0 = arith.constant 0 : i32
    %c0_i32_1 = arith.constant 0 : i32
    return %c0_i32, %c0_i32_0 : i32, i32
  }
  func.func @transform_18(%arg0: i32) -> (i32, i32) {
    %c0_i32 = arith.constant 0 : i32
    %c0_i32_0 = arith.constant 0 : i32
    %c0_i32_1 = arith.constant 0 : i32
    return %c0_i32, %c0_i32_0 : i32, i32
  }
  func.func @transform_19(%arg0: i32) -> (i32, i32) {
    %c0_i32 = arith.constant 0 : i32
    %c0_i32_0 = arith.constant 0 : i32
    %c0_i32_1 = arith.constant 0 : i32
    return %c0_i32, %c0_i32_0 : i32, i32
  }
  func.func @transform_20(%arg0: i32) -> (i32, i32) {
    %c0_i32 = arith.constant 0 : i32
    %c0_i32_0 = arith.constant 0 : i32
    %c0_i32_1 = arith.constant 0 : i32
    return %c0_i32, %c0_i32_0 : i32, i32
  }
  func.func @transform_21(%arg0: i32) -> (i32, i32) {
    %c0_i32 = arith.constant 0 : i32
    %c0_i32_0 = arith.constant 0 : i32
    %c0_i32_1 = arith.constant 0 : i32
    return %c0_i32, %c0_i32_0 : i32, i32
  }
  func.func @transform_22(%arg0: i32) -> (i32, i32) {
    %c0_i32 = arith.constant 0 : i32
    %c0_i32_0 = arith.constant 0 : i32
    %c0_i32_1 = arith.constant 0 : i32
    return %c0_i32, %c0_i32_0 : i32, i32
  }
  func.func @transform_23(%arg0: i32) -> (i32, i32) {
    %c0_i32 = arith.constant 0 : i32
    %c0_i32_0 = arith.constant 0 : i32
    %c0_i32_1 = arith.constant 0 : i32
    return %c0_i32, %c0_i32_0 : i32, i32
  }
  func.func @transform_24(%arg0: i32) -> (i32, i32) {
    %c0_i32 = arith.constant 0 : i32
    %c0_i32_0 = arith.constant 0 : i32
    %c0_i32_1 = arith.constant 0 : i32
    return %c0_i32, %c0_i32_0 : i32, i32
  }
  func.func @transform_25(%arg0: i32) -> (i32, i32) {
    %c0_i32 = arith.constant 0 : i32
    %c0_i32_0 = arith.constant 0 : i32
    %c0_i32_1 = arith.constant 0 : i32
    return %c0_i32, %c0_i32_0 : i32, i32
  }
  func.func @transform_26(%arg0: i32) -> (i32, i32) {
    %c0_i32 = arith.constant 0 : i32
    %c0_i32_0 = arith.constant 0 : i32
    %c0_i32_1 = arith.constant 0 : i32
    return %c0_i32, %c0_i32_0 : i32, i32
  }
  func.func @transform_27(%arg0: i32) -> (i32, i32) {
    %c0_i32 = arith.constant 0 : i32
    %c0_i32_0 = arith.constant 0 : i32
    %c0_i32_1 = arith.constant 0 : i32
    return %c0_i32, %c0_i32_0 : i32, i32
  }
  func.func @transform_28(%arg0: i32) -> (i32, i32) {
    %c0_i32 = arith.constant 0 : i32
    %c0_i32_0 = arith.constant 0 : i32
    %c0_i32_1 = arith.constant 0 : i32
    return %c0_i32, %c0_i32_0 : i32, i32
  }
  func.func @transform_29(%arg0: i32) -> (i32, i32, i32) {
    %c0_i32 = arith.constant 0 : i32
    %c0_i32_0 = arith.constant 0 : i32
    %c0_i32_1 = arith.constant 0 : i32
    return %arg0, %c0_i32, %c0_i32_0 : i32, i32, i32
  }
  func.func @transform_30(%arg0: i32) -> (i32, i32, i32, i32) {
    %c0_i32 = arith.constant 0 : i32
    %c0_i32_0 = arith.constant 0 : i32
    %c0_i32_1 = arith.constant 0 : i32
    %c0_i32_2 = arith.constant 0 : i32
    return %arg0, %c0_i32, %c0_i32_0, %c0_i32_1 : i32, i32, i32, i32
  }
}

</mosaic_0001>

<bundles_post_ra>
// kernel: tpu_custom_call.1
= control target key start
LH: loop header
LB: loop body
LE: loop exit
PB: predicated region body
PF: predicated region fallthrough
CT: control target
= control target key end

     0   :  { %s6868_s6 = smov 1   ;;  %s6869_s10 = smov 2   ;;  %s11465_s0 = inlined_call_operand.smem [shape: u32[31], index: -1, kind: input, shape index: {}] }
   0x1   :  { %s6919_s5 = sld [smem:[%s11465_s0]]   ;;  %s6870_s14 = smov 3  }
   0x2   :  { %s6924_s9 = sld [smem:[%s11465_s0 + %s6868_s6]]   ;;  %s6871_s18 = smov 4  }
   0x3   :  { %s6929_s13 = sld [smem:[%s11465_s0 + %s6869_s10]]   ;;  %s6872_s22 = smov 5  }
   0x4   :  { %s6934_s17 = sld [smem:[%s11465_s0 + %s6870_s14]]   ;;  %s6873_s26 = smov 6  }
   0x5   :  { %s6939_s21 = sld [smem:[%s11465_s0 + %s6871_s18]]   ;;  %s6874_s30 = smov 7  }
   0x6   :  { %s6944_s25 = sld [smem:[%s11465_s0 + %s6872_s22]]   ;;  %s6875_s4 = smov 8  }
   0x7   :  { %11657 = sst [smem:[#allocation12_spill]] %s6919_s5  ;;  %s6876_s10 = smov 9  }
   0x8   :  { %s6949_s29 = sld [smem:[%s11465_s0 + %s6873_s26]]   ;;  %s6877_s15 = smov 10  }
   0x9   :  { %s6954_s3 = sld [smem:[%s11465_s0 + %s6874_s30]]   ;;  %s6878_s20 = smov 11  }
   0xa   :  { %s6959_s8 = sld [smem:[%s11465_s0 + %s6875_s4]]   ;;  %s6879_s26 = smov 12  }
   0xb   :  { %11658 = sst [smem:[#allocation13_spill]] %s6939_s21  ;;  %s6880_s1 = smov 13  }
   0xc   :  { %11659 = sst [smem:[#allocation14_spill]] %s6944_s25  ;;  %s6881_s7 = smov 14  }
   0xd   :  { %s6964_s14 = sld [smem:[%s11465_s0 + %s6876_s10]]   ;;  %s6883_s22 = smov 16  }
   0xe   :  { %s6969_s19 = sld [smem:[%s11465_s0 + %s6877_s15]]   ;;  %s6882_s15 = smov 15  }
   0xf   :  { %11660 = sst [smem:[#allocation15_spill]] %s6954_s3  ;;  %s6884_s28 = smov 17  }
  0x10   :  { %s6974_s24 = sld [smem:[%s11465_s0 + %s6878_s20]]   ;;  %s6885_s10 = smov 18  }
  0x11   :  { %s6979_s30 = sld [smem:[%s11465_s0 + %s6879_s26]]   ;;  %s6886_s16 = smov 19  }
  0x12   :  { %s6984_s6 = sld [smem:[%s11465_s0 + %s6880_s1]]   ;;  %s6887_s23 = smov 20  }
  0x13   :  { %s6989_s12 = sld [smem:[%s11465_s0 + %s6881_s7]]   ;;  %s6888_s1 = smov 21  }
  0x14   :  { %s6994_s20 = sld [smem:[%s11465_s0 + %s6882_s15]]   ;;  %s6893_s7 = smov 26  }
  0x15   :  { %s6999_s27 = sld [smem:[%s11465_s0 + %s6883_s22]]  }
  0x16   :  { %s5943_s4 = sld [smem:[%s11465_s0 + %s6884_s28]]  }
  0x17   :  { %s7007_s21 = sld [smem:[%s11465_s0 + %s6885_s10]]   ;;  %s6889_s10 = smov 22  }
  0x18   :  { %11661 = sst [smem:[#allocation16_spill]] %s6984_s6 }
  0x19   :  { %s7012_s25 = sld [smem:[%s11465_s0 + %s6886_s16]]   ;;  %s6890_s16 = smov 23  }
  0x1a   :  { %11662 = sst [smem:[#allocation17_spill]] %s6994_s20 }
  0x1b   :  { %11663 = sst [smem:[#allocation18_spill]] %s6999_s27 }
  0x1c   :  { %s7017_s27 = sld [smem:[%s11465_s0 + %s6887_s23]]   ;;  %v67_v0 = vstv %s5943_s4  ;;  %s6891_s23 = smov 24  }
  0x1d   :  { %11664 = sst [smem:[#allocation19_spill]] %s7007_s21  ;;  %68 = vst [vmem:[#allocation2] sm:$0x1] %v67_v0  ;;  %s6894_s4 = smov 27  }
  0x1e   :  { %s7022_s20 = sld [smem:[%s11465_s0 + %s6888_s1]]   ;;  %s6892_s1 = smov 25  }
  0x1f   :  { %11665 = sst [smem:[#allocation20_spill]] %s7012_s25 }
  0x20   :  { %s7027_s21 = sld [smem:[%s11465_s0 + %s6889_s10]]  }
  0x21   :  { %s7032_s25 = sld [smem:[%s11465_s0 + %s6890_s16]]  }
  0x22   :  { %11666 = sst [smem:[#allocation21_spill]] %s7017_s27  ;;  %s6896_s27 = smov 29  }
  0x23   :  { %s7037_s28 = sld [smem:[%s11465_s0 + %s6891_s23]]   ;;  %s6895_s23 = smov 28  }
  0x24   :  { %s7042_s10 = sld [smem:[%s11465_s0 + %s6892_s1]]  }
  0x25   :  { %s7047_s16 = sld [smem:[%s11465_s0 + %s6893_s7]]  }
  0x26   :  { %11667 = sst [smem:[#allocation22_spill]] %s7027_s21  ;;  %s6897_s21 = smov 30  }
  0x27   :  { %11668 = sst [smem:[#allocation23_spill]] %s7032_s25 }
  0x28   :  { %s7052_s22 = sld [smem:[%s11465_s0 + %s6894_s4]]  }
  0x29   :  { %11669 = sst [smem:[#allocation24_spill]] %s7037_s28 }
  0x2a   :  { %11670 = sst [smem:[#allocation25_spill]] %s7042_s10 }
  0x2b   :  { %11671 = sst [smem:[#allocation26_spill]] %s7047_s16 }
  0x2c   :  { %s7057_s25 = sld [smem:[%s11465_s0 + %s6895_s23]]  }
  0x2d   :  { %s7062_s10 = sld [smem:[%s11465_s0 + %s6896_s27]]  }
  0x2e   :  { %s7067_s16 = sld [smem:[%s11465_s0 + %s6897_s21]]  }
  0x32   :  { %11672 = sst [smem:[#allocation27_spill]] %s7057_s25 }
  0x33   :  { %11673 = sst [smem:[#allocation28_spill]] %s7062_s10 }
  0x34   :  { %11674 = sst [smem:[#allocation29_spill]] %s7067_s16 }
  0x35   :  { %69 = vsyncpa [#allocation4], 0 }
  0x36   :  { %71 = vsyncpa [#allocation4 + $0x1], 0 }
  0x37   :  { %72 = vsyncpa [#allocation5], 0 }
  0x38   :  { %74 = vsyncpa [#allocation5 + $0x1], 0 }
  0x39   :  { %75 = vsyncpa [#allocation8], 0 }
  0x3a   :  { %77 = vsyncpa [#allocation8 + $0x1], 0  ;;  %s7069_s28 = smov 0   ;;  %s7071_s4 = smov 0  }
  0x3b   :  { %s7073_s15 = smov 0   ;;  %s7075_s18 = smov 0  }
  0x3c LB: > { %s11675_s3 = sld [smem:[#allocation15_spill]]  ;;  %s7090_s0 = sadd.s32 4294967295, %s6866_s18   ;;  %s6854_s28 = sphi %s7069_s28, %s12243_s28   ;;  %s6866_s18 = sphi %s7075_s18, %s12240_s18   ;;  %s6862_s15 = sphi %s7073_s15, %s12242_s15   ;;  %s6858_s4 = sphi %s7071_s4, %s12244_s4  }
  0x3d   : > { %11676 = sst [smem:[#allocation30_spill]] %s6854_s28  ;;  %s5958_s23 = sadd.s32 4294967294, %s6866_s18  }
  0x3e   : > { %11677 = sst [smem:[#allocation31_spill]] %s6862_s15  ;;  %s7094_s26 = sadd.s32 1, %s6866_s18  }
  0x3f   : > { %11678 = sst [smem:[#allocation32_spill]] %s7094_s26  ;;  %s246_s27 = sadd.s32 1, %s6862_s15 }
  0x40   : > { %s243_s1 = ssub.s32 %s6866_s18, %s7094_s26  ;;  %p253_p0 = scmp.ne.s32.totalorder %s6862_s15, %s6858_s4 }
  0x41   : > { %p244_p1 = scmp.eq.s32.totalorder %s243_s1, 0  ;;  %p254_p2 = scmp.eq.s32.totalorder %s6866_s18, 0 }
  0x42   : > { %p259_p3 = scmp.ne.s32.totalorder %s6858_s4, %s6854_s28  ;;  %p260_p4 = scmp.eq.s32.totalorder %s7090_s0, 0 }
  0x43   : > { %s7106_s2 = scalar_select %p244_p1, %s6862_s15, %s246_s27  }
  0x44   : > { %p7108_p5 = por %p254_p2, %p253_p0  ;;  %p7112_p6 = por %p260_p4, %p259_p3 }
  0x45   : > { %11679 = sst [smem:[#allocation33_spill]] %s7106_s2  ;;  %p745_p7 = scmp.eq.s32.totalorder %s7090_s0, 1 }
  0x46   : > { %p751_p8 = scmp.eq.s32.totalorder %s5958_s23, 1  ;;  %p6226_p10 = scmp.lt.s32.totalorder %s6866_s18, 2 }
  0x47   : > { %p7119_p11 = por %p745_p7, %p253_p0  ;;  %s915_s1 = sand.u32 1, %s6862_s15  }
  0x48   : > { %p7123_p12 = por %p751_p8, %p259_p3  ;;  %s6185_s2 = sshll.u32 %s6866_s18, 7 }
  0x49   : > { %s11682_s11 = scalar_select %p7119_p11, 1, 0 }
  0x4a   : > { %s11684_s27 = scalar_select %p7123_p12, 1, 0 }
  0x4b   : > { %11683 = sst [smem:[#allocation34_spill]] %s11682_s11  ;;  %s5961_s26 = sshll.u32 %s915_s1, 7 }
  0x4c   : > { %11685 = sst [smem:[#allocation35_spill]] %s11684_s27  ;;  %s925_s28 = scalar_lea.hbm %s6949_s29, %s6185_s2 }
  0x4d   : > { %s926_s16 = sshll.u32 %s925_s28, 4  ;;  %s919_s10 = scalar_lea.vmem [#allocation3], %s5961_s26  ;;  %s927_s16 = int_to_ptr.hbm [resolvable:$true] %s926_s16 }
  0x4e   : > { %s928_s23 = sshll.u32 %s919_s10, 4  ;;  %p7132_p13 = pnand %p6226_p10, %p7108_p5  ;;  %s929_s23 = int_to_ptr.vmem [resolvable:$true] %s928_s23 }
  0x4f   : > { %p5965_p0 = scmp.ge.s32.totalorder %s6866_s18, 1  ;;  %p936_p1 = scmp.lt.s32.totalorder %s6866_s18, 3 }
  0x50   : > { %s916_s27 = scalar_lea.sflag [#allocation4], %s915_s1  ;;  %s6738_s15 = sshra.s32 %s927_s16, 4  ;;  %s6739_s15 = int_to_ptr.hbm [resolvable:$true] %s6738_s15 }
  0x51   : > { %s6740_s11 = scalar_lea.hbm %s6739_s15, 128  ;;  %p6742_p3 = pneg %p7132_p13 }
  0x52   : > { %p6741_p2 = scmp.ne.s32.totalorder %s6739_s15, %s6740_s11  ;;  %s6745_s10 = scalar_lea.hbm %s6949_s29, 256 }
  0x53   : > { %p6746_p8 = scmp.lt.s32.totalorder %s6739_s15, %s6949_s29  ;;  %p6747_p9 = scmp.lt.s32.totalorder %s6745_s10, %s6740_s11 }
  0x54   : > { %p6743_p4 = pnand %p6742_p3, %p6741_p2 }
  0x55   : > { %p6748_p12 = por %p6747_p9, %p6746_p8 }
  0x56   : > { %p6744_p7 = pneg %p6743_p4 }
  0x58   : > { %p6749_p5 = pnand %p6748_p12, %p6744_p7 }
  0x5a   : > { %6752 = shalt.err (!%p6749_p5)
}
  0x5b   : > { %s6898_s28 = smov 128   ;;  %s6899_s26 = smov 8  }
  0x5c   : > { %6218 = dma.hbm_to_vmem [thread:$0]  (!%p7132_p13), %s927_s16, 2048, %s929_s23, %s916_s27, %s6898_s28, %s6898_s28, %s6899_s26  }
  0x5d   : > { %p937_p10 = pnand %p5965_p0, %p936_p1 }
  0x5f   : > { %940 = sbr.rel (%p937_p10) target bundleno = 3146 (0xc4a), region = 136 }
  0x64   : > { %s7149_s2 = sand.u32 1, %s6858_s4  }
  0x65   : > { %s5966_s15 = sshll.u32 %s7149_s2, 7  ;;  %s943_s21 = scalar_lea.sflag [#allocation4], %s7149_s2 }
  0x66   : > { %s7155_s11 = scalar_lea.vmem [#allocation3], %s5966_s15 }
  0x67   : > { %6841 = dma.done.wait (%p7112_p6), %s943_s21, 2048  }
  0x68   : > { %6843 = vsyncadd (%p7112_p6), %s943_s21, 4294965248  ;;  %s5969_s25 = sshll.u32 %s7090_s0, 2  ;;  %v6900_v1 = vmov 0   ;;  %v6187_v2 = vld [vmem:[%s11675_s3 + $0x8] sm:$0xff]  ;;  %v6186_v3 = vld [vmem:[%s11675_s3] sm:$0xff]  ;;  %v11479_v9 = vmov 0.0  }
  0x69   : > { %p1058_p9 = scmp.lt.s32.totalorder %s5969_s25, 7  ;;  %6303 = vset.pattern.permute.xlu0 %v6900_v1  ;;  %6304 = vset.pattern.permute.xlu1 %v6900_v1  ;;  %vm1237_vm2 = vcmask 261120   ;;  %s11687_s5 = sld [smem:[#allocation12_spill]]  ;;  %v6189_v19 = vld [vmem:[%s6964_s14 + $0x8] sm:$0xff]  ;;  %v6188_v20 = vld [vmem:[%s6964_s14] sm:$0xff] }
  0x6a   : > { %6305 = vset.pattern.permute.xlu2 %v6900_v1  ;;  %1250 = vmatpush.bf16.msra.mxu0 %v6187_v2  ;;  %v6321_v22 = vld [vmem:[%s6959_s8] ss:$0 sm:$0xff]  ;;  %v6193_v31 = vld [vmem:[%s6979_s30 + $0x8] sm:$0xff]  ;;  %s11654_s10 = smov 64   ;;  %s11688_s6 = sld [smem:[#allocation16_spill]] }
  0x6b   : > { %s12246_s25 = smov (!%p1058_p9, %s5969_s25), 7  ;;  %1367 = vmatpush.bf16.msra.mxu1 %v6189_v19  ;;  %1475 = vmatpush.bf16.msra.mxu3 %v6193_v31  ;;  %v6192_v36 = vld [vmem:[%s6979_s30] sm:$0xff]  ;;  %s6903_s28 = smov 32  }
  0x6c   : > { %s7168_s16 = sshll.u32 %s12246_s25, 3  ;;  %s7188_s1 = scalar_lea.vmem %s6924_s9, %s12246_s25 }
  0x6d   : > { %s7172_s7 = scalar_lea.vmem %s6929_s13, %s7168_s16  ;;  %s1077_s27 = scalar_lea.vmem %s6934_s17, %s7168_s16  ;;  %v6320_v21 = vld [vmem:[%s7188_s1] ss:$0 sm:$0xff]  ;;  %v6322_v28 = vld [vmem:[%s7188_s1 + $0x1] ss:$0 sm:$0xff]  ;;  %v6323_v42 = vld [vmem:[%s7188_s1 + $0x2] ss:$0 sm:$0xff] }
  0x6e   : > { %v7179_v4 = vld [vmem:[%s7172_s7] sm:$0xff]  ;;  %v7182_v6 = vld [vmem:[%s7172_s7 + $0x8] sm:$0xff]  ;;  %v1149_v8 = vld [vmem:[%s1077_s27 + $0x10] sm:$0xff]  ;;  %1251 = vmatpush.bf16.msra.mxu0 %v6186_v3  ;;  %s6904_s26 = smov 96   ;;  %s11689_s21 = sld [smem:[#allocation17_spill]] }
  0x6f   : > { %v1147_v5 = vld [vmem:[%s1077_s27] sm:$0xff]  ;;  %v1148_v7 = vld [vmem:[%s1077_s27 + $0x8] sm:$0xff]  ;;  %vm1153_vm1 = vcmp.eq.f32.partialorder %v1149_v8, 0.0  ;;  %v1150_v11 = vld [vmem:[%s1077_s27 + $0x18] sm:$0xff]  ;;  %v1223_v13 = vpack.c.bf16 %v7182_v6, %v7179_v4  ;;  %s7206_s23 = scalar_lea.vmem %s11687_s5, %s12246_s25  ;;  %1368 = vmatpush.bf16.msra.mxu1 %v6188_v20  ;;  %1476 = vmatpush.bf16.msra.mxu3 %v6192_v36  ;;  %s11690_s25 = sld [smem:[#allocation18_spill]] }
  0x70   : > { %vm1151_vm0 = vcmp.eq.f32.partialorder %v1147_v5, 0.0  ;;  %1312 = vperm.xlu1 %6304, %v1147_v5   ;;  %v1157_v12 = vsel %vm1153_vm1, -9e+08, %v11479_v9  ;;  %vm1152_vm3 = vcmp.eq.f32.partialorder %v1148_v7, 0.0  ;;  %vm1154_vm4 = vcmp.eq.f32.partialorder %v1150_v11, 0.0  ;;  %v7196_v16 = vld [vmem:[%s7172_s7 + $0x10] sm:$0xff] }
  0x71   : > { %v1155_v10 = vsel %vm1151_vm0, -9e+08, %v11479_v9  ;;  %1298 = vperm.xlu2 %6305, %v1157_v12   ;;  %5987 = vmatmul.msk.bf16.vlgmr.msra.gmra.mxu0 %vm1237_vm2, %v1223_v13  ;;  %v1156_v14 = vsel %vm1152_vm3, -9e+08, %v11479_v9  ;;  %v1158_v15 = vsel %vm1154_vm4, -9e+08, %v11479_v9 }
  0x72   : > { %1288 = vperm.xlu0 %6303, %v1155_v10   ;;  %v7199_v17 = vld [vmem:[%s7172_s7 + $0x18] sm:$0xff]  ;;  %v6325_v32 = vld [vmem:[%s7206_s23] ss:$0 sm:$0xff]  ;;  %v6326_v35 = vld [vmem:[%s7206_s23 + $0x1] ss:$0 sm:$0xff]  ;;  %s11691_s7 = sld [smem:[#allocation19_spill]] }
  0x73   : > { %v1224_v18 = vpack.c.bf16 %v7199_v17, %v7196_v16  ;;  %v7218_v37 = vmul.f32 %v6325_v32, %v7179_v4  ;;  %v7221_v39 = vmul.f32 %v6326_v35, %v7182_v6  ;;  %v6324_v54 = vld [vmem:[%s7188_s1 + $0x3] ss:$0 sm:$0xff]  ;;  %v6327_v58 = vld [vmem:[%s7206_s23 + $0x2] ss:$0 sm:$0xff]  ;;  %v6191_v20 = vld [vmem:[%s6974_s24 + $0x8] sm:$0xff]  ;;  %s11692_s27 = sld [smem:[#allocation14_spill]] }
  0x74   : > { %v6328_v59 = vld [vmem:[%s7206_s23 + $0x3] ss:$0 sm:$0xff]  ;;  %v7234_v0 = vmul.f32 %v6327_v58, %v7196_v16  ;;  %1433 = vmatpush.bf16.msra.mxu2 %v6191_v20  ;;  %s11693_s23 = sld [smem:[#allocation20_spill]] }
  0x75   : > { %v1446_v43 = vpack.c.bf16 %v7221_v39, %v7218_v37  ;;  %v7237_v2 = vmul.f32 %v6328_v59, %v7199_v17 }
  0x77   : > { %6021 = vmatmul.msk.bf16.vlgmr.msra.gmra.mxu3 %vm1237_vm2, %v1446_v43 }
  0x78   : > { %1317 = vperm.xlu1 %6304, %v1148_v7   ;;  %v1447_v7 = vpack.c.bf16 %v7237_v2, %v7234_v0 }
  0x79   : > { %1303 = vperm.xlu2 %6305, %v1158_v15   ;;  %s7457_s1 = scalar_lea.vmem %s11692_s27, %s7168_s16  ;;  %s11697_s27 = sld [smem:[#allocation22_spill]] }
  0x7a   : > { %1293 = vperm.xlu0 %6303, %v1156_v14  }
  0x80   : > { %1327 = vperm.xlu1 %6304, %v1150_v11  }
  0x81   : > { %5988 = vmatmul.msk.bf16.gmra.mxu0 %vm1237_vm2, %v1224_v18 }
  0x82   : > { %1322 = vperm.xlu0 %6303, %v1149_v8  }
  0x87   : > { %6022 = vmatmul.msk.bf16.gmra.mxu3 %vm1237_vm2, %v1447_v7 }
  0xcb   : > { %v1299_v53 = vpop.permute.xlu2 %1298 }
  0xe2   : > { %v1313_v29 = vpop.permute.xlu1 %1312 }
  0xe4   : > { %v1289_v26 = vpop.permute.xlu0 %1288 }
  0xea   : > { %v1318_v49 = vpop.permute.xlu1 %1317 }
  0xec   : > { %v1294_v44 = vpop.permute.xlu0 %1293 }
  0xee   : > { %v1253_v23 = vpop.f32.mrf.mxu0 }
  0xef   : > { %v1263_v24 = vadd.f32 %v6320_v21, %v1253_v23  ;;  %v6190_v21 = vld [vmem:[%s6974_s24] sm:$0xff] }
  0xf0   : > { %1434 = vmatpush.bf16.msra.mxu2 %v6190_v21 }
  0xf1   : > { %v1270_v25 = vadd.f32 %v6321_v22, %v1263_v24 }
  0xf2   : > { %v1328_v13 = vpop.permute.xlu1 %1327 }
  0xf3   : > { %v1278_v27 = vmul.f32 0.01, %v1270_v25  ;;  %vm1274_vm5 = vcmp.gt.f32.partialorder %v1270_v25, 0.0 }
  0xf4   : > { %v1323_v8 = vpop.permute.xlu0 %1322 }
  0xf5   : > { %v1282_v33 = vsel %vm1274_vm5, %v1270_v25, %v1278_v27 }
  0xf6   : > { %v1255_v30 = vpop.f32.mrf.mxu0  ;;  %v1306_v40 = vadd.f32 %v1289_v26, %v1282_v33 }
  0xf7   : > { %v1264_v34 = vadd.f32 %v6322_v28, %v1255_v30 }
  0xf8   : > { %v1330_v48 = vmul.f32 %v1313_v29, %v1306_v40 }
  0xf9   : > { %v1271_v38 = vadd.f32 %v6321_v22, %v1264_v34 }
  0xfa   : > { %v1334_v55 = vmul.f32 %v1330_v48, %v7179_v4  ;;  %v1478_v30 = vpop.f32.mrf.mxu3 }
  0xfb   : > { %vm1275_vm6 = vcmp.gt.f32.partialorder %v1271_v38, 0.0  ;;  %v1279_v41 = vmul.f32 0.01, %v1271_v38 }
  0xfd   : > { %v1283_v45 = vsel %vm1275_vm6, %v1271_v38, %v1279_v41 }
  0xfe   : > { %v1307_v46 = vadd.f32 %v1294_v44, %v1283_v45  ;;  %v1258_v47 = vpop.f32.mrf.mxu0 }
  0xff   : > { %v1265_v50 = vadd.f32 %v6323_v42, %v1258_v47 }
 0x100   : > { %v1331_v51 = vmul.f32 %v1318_v49, %v1307_v46 }
 0x101   : > { %v1272_v52 = vadd.f32 %v6321_v22, %v1265_v50 }
 0x102   : > { %v1335_v56 = vmul.f32 %v1331_v51, %v7182_v6  ;;  %v1304_v6 = vpop.permute.xlu2 %1303  ;;  %v1480_v36 = vpop.f32.mrf.mxu3 }
 0x103   : > { %v1280_v57 = vmul.f32 0.01, %v1272_v52  ;;  %vm1276_vm7 = vcmp.gt.f32.partialorder %v1272_v52, 0.0 }
 0x104   : > { %v1338_v60 = vpack.c.bf16 %v1335_v56, %v1334_v55 }
 0x105   : > { %v1284_v62 = vsel %vm1276_vm7, %v1272_v52, %v1280_v57 }
 0x106   : > { %v1260_v61 = vpop.f32.mrf.mxu0  ;;  %5997 = vmatmul.msk.bf16.vlgmr.msra.gmra.mxu1 %vm1237_vm2, %v1338_v60  ;;  %v1308_v4 = vadd.f32 %v1299_v53, %v1284_v62  ;;  %v6331_v62 = vld [vmem:[%s11688_s6] ss:$0 sm:$0xff] }
 0x107   : > { %v1266_v63 = vadd.f32 %v6324_v54, %v1260_v61 }
 0x108   : > { %v1332_v11 = vmul.f32 %v1323_v8, %v1308_v4 }
 0x109   : > { %v1273_v3 = vadd.f32 %v6321_v22, %v1266_v63  ;;  %v6329_v22 = vld [vmem:[%s6969_s19] ss:$0 sm:$0xff] }
 0x10a   : > { %v1336_v15 = vmul.f32 %v1332_v11, %v7196_v16  ;;  %v6330_v16 = vld [vmem:[%s6989_s12] ss:$0 sm:$0xff]  ;;  %v1483_v50 = vpop.f32.mrf.mxu3 }
 0x10b   : > { %v1281_v5 = vmul.f32 0.01, %v1273_v3  ;;  %vm1277_vm8 = vcmp.gt.f32.partialorder %v1273_v3, 0.0  ;;  %v1479_v31 = vadd.f32 %v6330_v16, %v1478_v30  ;;  %v1481_v40 = vadd.f32 %v6330_v16, %v1480_v36 }
 0x10c   : > { %v1484_v51 = vadd.f32 %v6330_v16, %v1483_v50 }
 0x10d   : > { %v1285_v10 = vsel %vm1277_vm8, %v1273_v3, %v1281_v5  ;;  %1572 = vrot.lane.b32.xlu0 %v1479_v31, %s11654_s10  ;;  %1574 = vrot.lane.b32.xlu2 %v1481_v40, %s11654_s10 }
 0x10e   : > { %v1309_v12 = vadd.f32 %v1304_v6, %v1285_v10  ;;  %1576 = vrot.lane.b32.xlu1 %v1484_v51, %s11654_s10 }
 0x110   : > { %v1333_v14 = vmul.f32 %v1328_v13, %v1309_v12 }
 0x112   : > { %v1337_v18 = vmul.f32 %v1333_v14, %v7199_v17  ;;  %v1485_v54 = vpop.f32.mrf.mxu3 }
 0x113   : > { %v1486_v56 = vadd.f32 %v6330_v16, %v1485_v54 }
 0x114   : > { %v1339_v19 = vpack.c.bf16 %v1337_v18, %v1336_v15 }
 0x115   : > { %1578 = vrot.lane.b32.xlu2 %v1486_v56, %s11654_s10 }
 0x116   : > { %5998 = vmatmul.msk.bf16.gmra.mxu1 %vm1237_vm2, %v1339_v19 }
 0x183   : > { %v1370_v23 = vpop.f32.mrf.mxu1 }
 0x184   : > { %v1371_v24 = vadd.f32 %v6329_v22, %v1370_v23 }
 0x186   : > { %v1384_v25 = vmin.f32 %v1371_v24, 0.0  ;;  %vm1380_vm9 = vcmp.gt.f32.partialorder %v1371_v24, 0.0 }
 0x188   : > { %v1388_v26 = vmul.f32 1.442695, %v1384_v25 }
 0x18a   : > { %6338 = vpow2.f32 %v1388_v26 }
 0x18b   : > { %v1372_v27 = vpop.f32.mrf.mxu1 }
 0x18c   : > { %v1373_v28 = vadd.f32 %v6329_v22, %v1372_v27 }
 0x18e   : > { %v1385_v29 = vmin.f32 %v1373_v28, 0.0  ;;  %vm1381_vm10 = vcmp.gt.f32.partialorder %v1373_v28, 0.0 }
 0x190   : > { %v1390_v17 = vmul.f32 1.442695, %v1385_v29  ;;  %v6339_v33 = vpop.eup %6338 }
 0x191   : > { %v5999_v38 = vadd.f32 -1.0, %v6339_v33  ;;  %v1573_v33 = vpop.permute.xlu0 %1572 }
 0x192   : > { %6340 = vpow2.f32 %v1390_v17 }
 0x193   : > { %v1375_v32 = vpop.f32.mrf.mxu1  ;;  %v1400_v45 = vsel %vm1380_vm9, %v1371_v24, %v5999_v38 }
 0x194   : > { %v1376_v34 = vadd.f32 %v6329_v22, %v1375_v32 }
 0x196   : > { %v1386_v35 = vmin.f32 %v1376_v34, 0.0  ;;  %vm1382_vm11 = vcmp.gt.f32.partialorder %v1376_v34, 0.0 }
 0x198   : > { %v6341_v41 = vpop.eup %6340  ;;  %v1392_v43 = vmul.f32 1.442695, %v1386_v35 }
 0x199   : > { %v6000_v42 = vadd.f32 -1.0, %v6341_v41 }
 0x19a   : > { %6342 = vpow2.f32 %v1392_v43 }
 0x19b   : > { %v1377_v44 = vpop.f32.mrf.mxu1  ;;  %v1401_v46 = vsel %vm1381_vm10, %v1373_v28, %v6000_v42 }
 0x19c   : > { %v1378_v47 = vadd.f32 %v6329_v22, %v1377_v44  ;;  %v1404_v48 = vpack.c.bf16 %v1401_v46, %v1400_v45 }
 0x19e   : > { %v1387_v49 = vmin.f32 %v1378_v47, 0.0  ;;  %6011 = vmatmul.msk.bf16.vlgmr.msra.gmra.mxu2 %vm1237_vm2, %v1404_v48  ;;  %vm1383_vm12 = vcmp.gt.f32.partialorder %v1378_v47, 0.0 }
 0x1a0   : > { %v1394_v52 = vmul.f32 1.442695, %v1387_v49  ;;  %v6343_v53 = vpop.eup %6342 }
 0x1a1   : > { %v6001_v55 = vadd.f32 -1.0, %v6343_v53 }
 0x1a2   : > { %6344 = vpow2.f32 %v1394_v52  ;;  %v1575_v52 = vpop.permute.xlu2 %1574 }
 0x1a3   : > { %v1402_v59 = vsel %vm1382_vm11, %v1376_v34, %v6001_v55 }
 0x1a8   : > { %v6345_v57 = vpop.eup %6344 }
 0x1a9   : > { %v6002_v58 = vadd.f32 -1.0, %v6345_v57 }
 0x1ab   : > { %v1403_v60 = vsel %vm1383_vm12, %v1378_v47, %v6002_v58 }
 0x1ac   : > { %v1405_v61 = vpack.c.bf16 %v1403_v60, %v1402_v59 }
 0x1ae   : > { %6012 = vmatmul.msk.bf16.gmra.mxu2 %vm1237_vm2, %v1405_v61  ;;  %v1577_v61 = vpop.permute.xlu1 %1576 }
 0x221   : > { %v1436_v63 = vpop.f32.mrf.mxu2 }
 0x222   : > { %v7256_v3 = vadd.f32 %v6331_v62, %v1436_v63 }
 0x224   : > { %v1488_v4 = vadd.f32 %v1479_v31, %v7256_v3 }
 0x226   : > { %v6023_v5 = vmul.f32 -1.442695, %v1488_v4 }
 0x228   : > { %6346 = vpow2.f32 %v6023_v5 }
 0x229   : > { %v1438_v6 = vpop.f32.mrf.mxu2 }
 0x22a   : > { %v7259_v7 = vadd.f32 %v6331_v62, %v1438_v6 }
 0x22c   : > { %v1489_v8 = vadd.f32 %v1481_v40, %v7259_v7 }
 0x22e   : > { %v6347_v10 = vpop.eup %6346  ;;  %v6024_v11 = vmul.f32 -1.442695, %v1489_v8 }
 0x22f   : > { %v1504_v12 = vadd.f32 1.0, %v6347_v10 }
 0x230   : > { %6348 = vpow2.f32 %v6024_v11 }
 0x231   : > { %6350 = vrcp.f32 %v1504_v12  ;;  %v1441_v13 = vpop.f32.mrf.mxu2  ;;  %v1519_v26 = vand.u32 2147483648, %v1504_v12  ;;  %v1517_v29 = vand.u32 2147483647, %v1504_v12  ;;  %vm1513_vm14 = vweird.f32 %v1504_v12 }
 0x232   : > { %v7262_v14 = vadd.f32 %v6331_v62, %v1441_v13 }
 0x233   : > { %v1520_v34 = vor.u32 1.1754944e-38, %v1519_v26  ;;  %vm1518_vm0 = vcmp.eq.f32.partialorder %v1517_v29, 8.507059e+37 }
 0x234   : > { %v1490_v15 = vadd.f32 %v1484_v51, %v7262_v14 }
 0x236   : > { %v6349_v18 = vpop.eup %6348  ;;  %v6025_v19 = vmul.f32 -1.442695, %v1490_v15  ;;  %v1579_v15 = vpop.permute.xlu2 %1578 }
 0x237   : > { %v6351_v20 = vpop.eup %6350  ;;  %v1505_v21 = vadd.f32 1.0, %v6349_v18 }
 0x238   : > { %6352 = vpow2.f32 %v6025_v19  ;;  %v1509_v22 = vmul.f32 %v6351_v20, %v1504_v12  ;;  %vm1514_vm13 = vweird.f32 %v6351_v20 }
 0x239   : > { %6354 = vrcp.f32 %v1505_v21  ;;  %v1443_v23 = vpop.f32.mrf.mxu2  ;;  %vm1515_vm15 = vmor %vm1513_vm14, %vm1514_vm13  ;;  %v1534_v42 = vand.u32 2147483648, %v1505_v21  ;;  %v1532_v44 = vand.u32 2147483647, %v1505_v21  ;;  %vm1528_vm3 = vweird.f32 %v1505_v21 }
 0x23a   : > { %v7265_v24 = vadd.f32 %v6331_v62, %v1443_v23  ;;  %v1510_v25 = vsub.f32 1.0, %v1509_v22  ;;  %vm1851_vm14 = vcmask 64512  }
 0x23b   : > { %v1535_v48 = vor.u32 1.1754944e-38, %v1534_v42  ;;  %vm1533_vm5 = vcmp.eq.f32.partialorder %v1532_v44, 8.507059e+37 }
 0x23c   : > { %v1491_v27 = vadd.f32 %v1486_v56, %v7265_v24  ;;  %v1511_v28 = vmul.f32 %v6351_v20, %v1510_v25 }
 0x23e   : > { %v6353_v16 = vpop.eup %6352  ;;  %v6026_v30 = vmul.f32 -1.442695, %v1491_v27  ;;  %v1512_v17 = vadd.f32 %v6351_v20, %v1511_v28 }
 0x23f   : > { %v6355_v31 = vpop.eup %6354  ;;  %v1506_v32 = vadd.f32 1.0, %v6353_v16 }
 0x240   : > { %v1524_v35 = vmul.f32 %v6355_v31, %v1505_v21  ;;  %6356 = vpow2.f32 %v6026_v30  ;;  %v1516_v36 = vsel %vm1515_vm15, %v6351_v20, %v1512_v17  ;;  %vm1529_vm1 = vweird.f32 %v6355_v31 }
 0x241   : > { %6358 = vrcp.f32 %v1506_v32  ;;  %v7268_v38 = vsel %vm1518_vm0, %v1520_v34, %v1516_v36  ;;  %vm1530_vm4 = vmor %vm1528_vm3, %vm1529_vm1  ;;  %v1549_v56 = vand.u32 2147483648, %v1506_v32  ;;  %v1547_v58 = vand.u32 2147483647, %v1506_v32 }
 0x242   : > { %v1525_v40 = vsub.f32 1.0, %v1524_v35  ;;  %v1584_v41 = vmul.f32 %v1573_v33, %v7268_v38  ;;  %vm1543_vm7 = vweird.f32 %v1506_v32 }
 0x243   : > { %v1550_v62 = vor.u32 1.1754944e-38, %v1549_v56  ;;  %vm1548_vm9 = vcmp.eq.f32.partialorder %v1547_v58, 8.507059e+37 }
 0x244   : > { %v1526_v43 = vmul.f32 %v6355_v31, %v1525_v40  ;;  %1592 = vrot.lane.b32.xlu1 %v1584_v41, %s11654_s10 }
 0x246   : > { %v6357_v45 = vpop.eup %6356  ;;  %v1527_v46 = vadd.f32 %v6355_v31, %v1526_v43  ;;  %v1612_v43 = vsub.f32 1.0, %v7268_v38 }
 0x247   : > { %v6359_v47 = vpop.eup %6358  ;;  %v1507_v49 = vadd.f32 1.0, %v6357_v45 }
 0x248   : > { %v1531_v50 = vsel %vm1530_vm4, %v6355_v31, %v1527_v46  ;;  %v1539_v51 = vmul.f32 %v6359_v47, %v1506_v32  ;;  %vm1544_vm6 = vweird.f32 %v6359_v47 }
 0x249   : > { %v7272_v53 = vsel %vm1533_vm5, %v1535_v48, %v1531_v50  ;;  %6360 = vrcp.f32 %v1507_v49  ;;  %vm1545_vm8 = vmor %vm1543_vm7, %vm1544_vm6  ;;  %v1564_v10 = vand.u32 2147483648, %v1507_v49  ;;  %v1562_v12 = vand.u32 2147483647, %v1507_v49 }
 0x24a   : > { %v1585_v54 = vmul.f32 %v1575_v52, %v7272_v53  ;;  %v1540_v55 = vsub.f32 1.0, %v1539_v51  ;;  %vm1558_vm11 = vweird.f32 %v1507_v49  ;;  %v1613_v32 = vsub.f32 1.0, %v7272_v53 }
 0x24b   : > { %v1565_v18 = vor.u32 1.1754944e-38, %v1564_v10  ;;  %vm1563_vm13 = vcmp.eq.f32.partialorder %v1562_v12, 8.507059e+37  ;;  %vm1986_vm5 = vcmask 31744  }
 0x24c   : > { %1594 = vrot.lane.b32.xlu0 %v1585_v54, %s11654_s10  ;;  %v1541_v57 = vmul.f32 %v6359_v47, %v1540_v55 }
 0x24e   : > { %v1542_v59 = vadd.f32 %v6359_v47, %v1541_v57 }
 0x24f   : > { %v6361_v60 = vpop.eup %6360 }
 0x250   : > { %v1546_v63 = vsel %vm1545_vm8, %v6359_v47, %v1542_v59  ;;  %v1554_v4 = vmul.f32 %v6361_v60, %v1507_v49  ;;  %vm1559_vm10 = vweird.f32 %v6361_v60 }
 0x251   : > { %v1551_v5 = vsel %vm1548_vm9, %v1550_v62, %v1546_v63  ;;  %vm1560_vm12 = vmor %vm1558_vm11, %vm1559_vm10  ;;  %vm2198_vm9 = vcmask 1043456  }
 0x252   : > { %v1586_v6 = vmul.f32 %v1577_v61, %v1551_v5  ;;  %v1555_v8 = vsub.f32 1.0, %v1554_v4  ;;  %v1614_v31 = vsub.f32 1.0, %v1551_v5  ;;  %v1115_v61 = vld [vmem:[%s11689_s21] sm:$0x1] }
 0x254   : > { %1596 = vrot.lane.b32.xlu2 %v1586_v6, %s11654_s10  ;;  %v1556_v11 = vmul.f32 %v6361_v60, %v1555_v8 }
 0x256   : > { %v1557_v13 = vadd.f32 %v6361_v60, %v1556_v11 }
 0x258   : > { %v1561_v19 = vsel %vm1560_vm12, %v6361_v60, %v1557_v13 }
 0x259   : > { %v7277_v20 = vsel %vm1563_vm13, %v1565_v18, %v1561_v19 }
 0x25a   : > { %v1587_v21 = vmul.f32 %v1579_v15, %v7277_v20  ;;  %v1615_v56 = vsub.f32 1.0, %v7277_v20  ;;  %v1116_v15 = vld [vmem:[%s11690_s25] sm:$0x1]  ;;  %s11696_s25 = sld [smem:[#allocation23_spill]] }
 0x25c   : > { %1598 = vrot.lane.b32.xlu0 %v1587_v21, %s11654_s10  ;;  %1642 = vrot.lane.b32.xlu2 %v7221_v39, %s6903_s28 }
 0x2ae   : > { %v1597_v22 = vpop.permute.xlu2 %1596 }
 0x2af   : > { %v1606_v23 = vadd.f32 %v1597_v22, %v7262_v14 }
 0x2b1   : > { %6362 = vtanh.f32 %v1606_v23 }
 0x2b6   : > { %v1593_v25 = vpop.permute.xlu1 %1592  ;;  %v1643_v30 = vpop.permute.xlu2 %1642 }
 0x2b7   : > { %v6363_v26 = vpop.eup %6362  ;;  %v1604_v27 = vadd.f32 %v1593_v25, %v7256_v3 }
 0x2b8   : > { %1624 = vrot.lane.b32.xlu2 %v6363_v26, %s6904_s26 }
 0x2b9   : > { %6364 = vtanh.f32 %v1604_v27 }
 0x2be   : > { %v1595_v28 = vpop.permute.xlu0 %1594 }
 0x2bf   : > { %v6365_v29 = vpop.eup %6364  ;;  %v1605_v16 = vadd.f32 %v1595_v28, %v7259_v7 }
 0x2c0   : > { %1620 = vrot.lane.b32.xlu0 %v6365_v29, %s6904_s26  ;;  %1646 = vrot.lane.b32.xlu2 %v7237_v2, %s6903_s28 }
 0x2c1   : > { %6366 = vtanh.f32 %v1605_v16 }
 0x2c7   : > { %v6367_v39 = vpop.eup %6366 }
 0x2c8   : > { %1622 = vrot.lane.b32.xlu1 %v6367_v39, %s6904_s26  ;;  %1644 = vrot.lane.b32.xlu0 %v7234_v0, %s6903_s28  ;;  %v1653_v0 = vmul.f32 %v1643_v30, %v7272_v53 }
 0x2ce   : > { %v1599_v3 = vpop.permute.xlu0 %1598 }
 0x2cf   : > { %v1607_v14 = vadd.f32 %v1599_v3, %v7265_v24 }
 0x2d0   : > { %1640 = vrot.lane.b32.xlu1 %v7218_v37, %s6903_s28 }
 0x2d1   : > { %6368 = vtanh.f32 %v1607_v14 }
 0x2d7   : > { %v6369_v7 = vpop.eup %6368 }
 0x2d8   : > { %1626 = vrot.lane.b32.xlu1 %v6369_v7, %s6904_s26 }
 0x312   : > { %v1625_v2 = vpop.permute.xlu2 %1624 }
 0x313   : > { %v1634_v35 = vmul.f32 %v1625_v2, %v1614_v31  ;;  %v7345_v2 = vld [vmem:[%s7155_s11 + $0x20] sm:$0xff] }
 0x31a   : > { %v1647_v55 = vpop.permute.xlu2 %1646 }
 0x332   : > { %v1621_v17 = vpop.permute.xlu0 %1620 }
 0x333   : > { %v1632_v47 = vmul.f32 %v1621_v17, %v1612_v43 }
 0x33a   : > { %v1623_v33 = vpop.permute.xlu1 %1622  ;;  %v1645_v34 = vpop.permute.xlu0 %1644 }
 0x33b   : > { %v1633_v36 = vmul.f32 %v1623_v33, %v1613_v32  ;;  %v1654_v24 = vmul.f32 %v1645_v34, %v1551_v5  ;;  %v1714_v5 = vunpack.c.l.bf16 %v1115_v61  ;;  %v7348_v33 = vld [vmem:[%s7155_s11] sm:$0xff]  ;;  %v7351_v34 = vld [vmem:[%s7155_s11 + $0x8] sm:$0xff] }
 0x33d   : > { %v1657_v40 = vadd.f32 %v1653_v0, %v1633_v36  ;;  %v1658_v41 = vadd.f32 %v1654_v24, %v1634_v35  ;;  %v1715_v8 = vperm.slane %v1714_v5, 0  ;;  %v7355_v36 = vld [vmem:[%s7155_s11 + $0x30] sm:$0xff]  ;;  %v7388_v5 = vld [vmem:[%s7155_s11 + $0x48] sm:$0xff] }
 0x33f   : > { %v7299_v37 = vmax.f32 %v1657_v40, 0.0  ;;  %v7301_v42 = vmax.f32 %v1658_v41, 0.0 }
 0x341   : > { %v1753_v44 = vpack.c.bf16 %v7299_v37, %v7299_v37  ;;  %v1754_v45 = vpack.c.bf16 %v7301_v42, %v7301_v42 }
 0x342   : > { %v1641_v46 = vpop.permute.xlu1 %1640 }
 0x343   : > { %v1652_v48 = vmul.f32 %v1641_v46, %v7268_v38  ;;  %v1781_v49 = vunpack.c.l.b16 %v1753_v44  ;;  %v1802_v50 = vunpack.c.l.b16 %v1754_v45  ;;  %v1655_v38 = vmul.f32 %v1647_v55, %v7277_v20  ;;  %v7364_v46 = vld [vmem:[%s7155_s11 + $0x10] sm:$0xff]  ;;  %v7373_v55 = vld [vmem:[%s7155_s11 + $0x40] sm:$0xff] }
 0x345   : > { %v1656_v51 = vadd.f32 %v1652_v48, %v1632_v47  ;;  %v1782_v52 = vpack.c.b16 %v1781_v49, %v1781_v49  ;;  %v1803_v53 = vpack.c.b16 %v1802_v50, %v1802_v50  ;;  %v7367_v47 = vld [vmem:[%s7155_s11 + $0x18] sm:$0xff] }
 0x347   : > { %v7309_v54 = vmax.f32 %v1656_v51, 0.0  ;;  %1783 = vrot.lane.b32.xlu0 %v1782_v52, %s6904_s26  ;;  %1804 = vrot.lane.b32.xlu2 %v1803_v53, %s6904_s26 }
 0x349   : > { %v1752_v57 = vpack.c.bf16 %v7309_v54, %v7309_v54 }
 0x34a   : > { %v1627_v58 = vpop.permute.xlu1 %1626 }
 0x34b   : > { %v1635_v59 = vmul.f32 %v1627_v58, %v1615_v56  ;;  %v1757_v60 = vunpack.c.l.b16 %v1752_v57  ;;  %v7376_v56 = vld [vmem:[%s7155_s11 + $0x38] sm:$0xff]  ;;  %v7379_v57 = vld [vmem:[%s7155_s11 + $0x28] sm:$0xff] }
 0x34d   : > { %v1659_v62 = vadd.f32 %v1655_v38, %v1635_v59  ;;  %v1758_v63 = vpack.c.b16 %v1757_v60, %v1757_v60 }
 0x34f   : > { %v7318_v4 = vmax.f32 %v1659_v62, 0.0  ;;  %1759 = vrot.lane.b32.xlu1 %v1758_v63, %s6904_s26 }
 0x351   : > { %v1755_v6 = vpack.c.bf16 %v7318_v4, %v7318_v4 }
 0x353   : > { %v1823_v10 = vunpack.c.l.b16 %v1755_v6 }
 0x355   : > { %v1824_v11 = vpack.c.b16 %v1823_v10, %v1823_v10 }
 0x357   : > { %1717 = vrot.lane.b32.xlu1 %v1715_v8, %s6903_s28  ;;  %1825 = vrot.lane.b32.xlu0 %v1824_v11, %s6904_s26  ;;  %v7393_v11 = vld [vmem:[%s7155_s11 + $0x60] sm:$0xff]  ;;  %s11694_s28 = sld [smem:[#allocation13_spill]] }
 0x35d   : > { %s7508_s21 = scalar_lea.vmem %s11694_s28, %s7168_s16  ;;  %s11695_s16 = sld [smem:[#allocation21_spill]] }
 0x35e   : > { %s11700_s28 = sld [smem:[#allocation25_spill]] }
 0x3a1   : > { %v1805_v12 = vpop.permute.xlu2 %1804 }
 0x3a2   : > { %v1807_v13 = vsel %vm1237_vm2, %v1805_v12, 0 }
 0x3a3   : > { %1816 = vmatpush.bf16.xpose.msrb.mxu3 %v1807_v13 }
 0x3aa   : > { %6039 = vmatmul.msk.bf16.vlgmr.msrb.gmra.mxu3 %vm1237_vm2, %v1116_v15 }
 0x3b9   : > { %v1784_v18 = vpop.permute.xlu0 %1783 }
 0x3ba   : > { %v1786_v19 = vsel %vm1237_vm2, %v1784_v18, 0 }
 0x3bb   : > { %1795 = vmatpush.bf16.xpose.msrb.mxu2 %v1786_v19  ;;  %v7399_v19 = vld [vmem:[%s7155_s11 + $0x50] sm:$0xff] }
 0x3c1   : > { %v1760_v20 = vpop.permute.xlu1 %1759 }
 0x3c2   : > { %6038 = vmatmul.msk.bf16.vlgmr.msrb.gmra.mxu2 %vm1237_vm2, %v1116_v15  ;;  %v1765_v21 = vsel %vm1237_vm2, %v1760_v20, 0 }
 0x3c3   : > { %1774 = vmatpush.bf16.xpose.msrb.mxu1 %v1765_v21  ;;  %v7403_v21 = vld [vmem:[%s7155_s11 + $0x68] sm:$0xff] }
 0x3c9   : > { %v1718_v22 = vpop.permute.xlu1 %1717  ;;  %v1826_v23 = vpop.permute.xlu0 %1825 }
 0x3ca   : > { %v1828_v25 = vsel %vm1237_vm2, %v1826_v23, 0  ;;  %6037 = vmatmul.msk.bf16.vlgmr.msrb.gmra.mxu1 %vm1237_vm2, %v1116_v15  ;;  %v1720_v26 = vmul.f32 %v1718_v22, %v7309_v54  ;;  %v1722_v27 = vmul.f32 %v1718_v22, %v7301_v42  ;;  %v1721_v28 = vmul.f32 %v1718_v22, %v7299_v37 }
 0x3cb   : > { %1837 = vmatpush.bf16.xpose.msra.mxu1 %v1828_v25  ;;  %v1723_v29 = vmul.f32 %v1718_v22, %v7318_v4 }
 0x3cc   : > { %1728 = vrot.lane.b32.xlu2 %v1720_v26, %s6904_s26  ;;  %1732 = vrot.lane.b32.xlu1 %v1722_v27, %s6904_s26  ;;  %v7410_v27 = vld [vmem:[%s7155_s11 + $0x58] sm:$0xff] }
 0x3cd   : > { %1730 = vrot.lane.b32.xlu0 %v1721_v28, %s6904_s26  ;;  %v6332_v28 = vld [vmem:[#allocation2] ss:$0 sm:$0xff] }
 0x3d4   : > { %1734 = vrot.lane.b32.xlu2 %v1723_v29, %s6904_s26 }
 0x3da   : > { %6040 = vmatmul.msk.bf16.vlgmr.msra.gmra.mxu1 %vm1237_vm2, %v1116_v15 }
 0x426   : > { %v1729_v16 = vpop.permute.xlu2 %1728 }
 0x427   : > { %v1740_v39 = vsel %vm1237_vm2, %v1729_v16, 0.0 }
 0x428   : > { %1741 = vadd.xlane.f32.xlu1 %v1740_v39 }
 0x42d   : > { %v1818_v3 = vpop.f32.mrf.mxu3 }
 0x42e   : > { %v1845_v53 = vperm.slane %v1818_v3, 0  ;;  %v1735_v16 = vpop.permute.xlu2 %1734 }
 0x42f   : > { %v1749_v39 = vsel %vm1237_vm2, %v1735_v16, 0.0 }
 0x430   : > { %v1849_v59 = vmul.f32 %v1845_v53, %v7373_v55  ;;  %v1877_v12 = vmul.f32 %v1845_v53, %v7388_v5  ;;  %v1904_v22 = vmul.f32 %v1845_v53, %v7399_v19  ;;  %v1931_v29 = vmul.f32 %v1845_v53, %v7410_v27 }
 0x432   : > { %v1858_v63 = vsel %vm1851_vm14, %v1849_v59, 0.0  ;;  %v1885_v18 = vsel %vm1851_vm14, %v1877_v12, 0.0  ;;  %v1912_v25 = vsel %vm1851_vm14, %v1904_v22, 0.0  ;;  %v1939_v3 = vsel %vm1851_vm14, %v1931_v29, 0.0 }
 0x435   : > { %v1820_v14 = vpop.f32.mrf.mxu3 }
 0x43e   : > { %v1733_v14 = vpop.permute.xlu1 %1732 }
 0x43f   : > { %v1731_v7 = vpop.permute.xlu0 %1730 }
 0x440   : > { %v1743_v30 = vsel %vm1237_vm2, %v1731_v7, 0.0  ;;  %v7416_v7 = vld [vmem:[%s7155_s11 + $0x78] sm:$0xff] }
 0x441   : > { %1744 = vadd.xlane.f32.xlu2 %v1743_v30 }
 0x445   : > { %v1797_v17 = vpop.f32.mrf.mxu2 }
 0x446   : > { %v1844_v31 = vperm.slane %v1797_v17, 0  ;;  %v1746_v17 = vsel %vm1237_vm2, %v1733_v14, 0.0 }
 0x447   : > { %v1776_v32 = vpop.f32.mrf.mxu1 }
 0x448   : > { %v1843_v0 = vperm.slane %v1776_v32, 0  ;;  %v1848_v35 = vmul.f32 %v1844_v31, %v7345_v2  ;;  %v1903_v45 = vmul.f32 %v1844_v31, %v7355_v36  ;;  %v1930_v60 = vmul.f32 %v1844_v31, %v7376_v56  ;;  %v7422_v32 = vld [vmem:[%s7155_s11 + $0x70] sm:$0xff] }
 0x449   : > { %v1876_v61 = vmul.f32 %v1844_v31, %v7379_v57 }
 0x44a   : > { %v1855_v24 = vsel %vm1851_vm14, %v1848_v35, 0.0  ;;  %v1847_v40 = vmul.f32 %v1843_v0, %v7348_v33  ;;  %v1875_v41 = vmul.f32 %v1843_v0, %v7351_v34  ;;  %v1909_v50 = vsel %vm1851_vm14, %v1903_v45, 0.0 }
 0x44b   : > { %1856 = vadd.xlane.f32.xlu1 %v1855_v24  ;;  %v1902_v51 = vmul.f32 %v1843_v0, %v7364_v46  ;;  %v1929_v52 = vmul.f32 %v1843_v0, %v7367_v47  ;;  %v1936_v6 = vsel %vm1851_vm14, %v1930_v60, 0.0  ;;  %v1882_v8 = vsel %vm1851_vm14, %v1876_v61, 0.0  ;;  %v6195_v60 = vld [vmem:[%s11691_s7 + $0x8] sm:$0xff] }
 0x44c   : > { %v1852_v43 = vsel %vm1851_vm14, %v1847_v40, 0.0  ;;  %v1879_v44 = vsel %vm1851_vm14, %v1875_v41, 0.0  ;;  %v1666_v0 = vpack.c.bf16 %v7299_v37, %v7309_v54  ;;  %1701 = vmatpush.bf16.msrb.mxu0 %v6195_v60 }
 0x44d   : > { %1853 = vadd.xlane.f32.xlu0 %v1852_v43  ;;  %1880 = vadd.xlane.f32.xlu2 %v1879_v44  ;;  %v1799_v48 = vpop.f32.mrf.mxu2  ;;  %v1906_v58 = vsel %vm1851_vm14, %v1902_v51, 0.0  ;;  %v1933_v38 = vsel %vm1851_vm14, %v1929_v52, 0.0 }
 0x44e   : > { %v1664_v48 = vlaneseq }
 0x44f   : > { %v1778_v49 = vpop.f32.mrf.mxu1 }
 0x450   : > { %v7429_v51 = vand.u32 127, %v1664_v48 }
 0x452   : > { %vm1864_vm15 = vcmp.eq.s32.totalorder %v7429_v51, 0  ;;  %vm1891_vm0 = vcmp.eq.s32.totalorder %v7429_v51, 1  ;;  %vm1918_vm1 = vcmp.eq.s32.totalorder %v7429_v51, 2  ;;  %vm1945_vm3 = vcmp.eq.s32.totalorder %v7429_v51, 3 }
 0x453   : > { %1910 = vadd.xlane.f32.xlu1 %v1909_v50  ;;  %v7438_v59 = vsel %vm1891_vm0, 1.0, %v11479_v9  ;;  %v6044_v22 = vsel %vm1945_vm3, 1.0, %v11479_v9 }
 0x455   : > { %1907 = vadd.xlane.f32.xlu0 %v1906_v58  ;;  %1934 = vadd.xlane.f32.xlu2 %v1933_v38  ;;  %v7435_v38 = vsel %vm1864_vm15, 1.0, %v11479_v9 }
 0x457   : > { %v1839_v62 = vpop.f32.mrf.mxu1 }
 0x458   : > { %v1846_v10 = vperm.slane %v1839_v62, 0 }
 0x45a   : > { %v1850_v13 = vmul.f32 %v1846_v10, %v7393_v11  ;;  %v1878_v23 = vmul.f32 %v1846_v10, %v7403_v21  ;;  %v1932_v30 = vmul.f32 %v1846_v10, %v7416_v7  ;;  %v1905_v35 = vmul.f32 %v1846_v10, %v7422_v32  ;;  %v6194_v10 = vld [vmem:[%s11691_s7] sm:$0xff] }
 0x45b   : > { %1859 = vadd.xlane.f32.xlu1 %v1858_v63  ;;  %v7444_v63 = vsel %vm1918_vm1, 1.0, %v11479_v9  ;;  %1702 = vmatpush.bf16.msrb.mxu0 %v6194_v10 }
 0x45c   : > { %v1861_v20 = vsel %vm1851_vm14, %v1850_v13, 0.0  ;;  %v1888_v26 = vsel %vm1851_vm14, %v1878_v23, 0.0  ;;  %v1942_v31 = vsel %vm1851_vm14, %v1932_v30, 0.0  ;;  %v1915_v24 = vsel %vm1851_vm14, %v1905_v35, 0.0 }
 0x45d   : > { %1937 = vadd.xlane.f32.xlu0 %v1936_v6  ;;  %1883 = vadd.xlane.f32.xlu2 %v1882_v8 }
 0x45f   : > { %v1841_v15 = vpop.f32.mrf.mxu1 }
 0x463   : > { %1886 = vadd.xlane.f32.xlu1 %v1885_v18 }
 0x465   : > { %1862 = vadd.xlane.f32.xlu2 %v1861_v20 }
 0x46b   : > { %1913 = vadd.xlane.f32.xlu1 %v1912_v25 }
 0x46d   : > { %1889 = vadd.xlane.f32.xlu2 %v1888_v26 }
 0x471   : > { %1963 = vperm.xlu0 %6303, %v6332_v28  }
 0x473   : > { %1750 = vadd.xlane.f32.xlu1 %v1749_v39 }
 0x475   : > { %1940 = vadd.xlane.f32.xlu2 %v1939_v3 }
 0x47b   : > { %1943 = vadd.xlane.f32.xlu1 %v1942_v31 }
 0x47d   : > { %1747 = vadd.xlane.f32.xlu2 %v1746_v17 }
 0x495   : > { %1673 = vrot.lane.b32.xlu2 %v1666_v0, %s6904_s26 }
 0x49b   : > { %1916 = vadd.xlane.f32.xlu0 %v1915_v24  ;;  %v1742_v40 = vpop.xlane.xlu1 %1741 }
 0x4b4   : > { %v1745_v41 = vpop.xlane.xlu2 %1744 }
 0x4be   : > { %v1857_v43 = vpop.xlane.xlu1 %1856 }
 0x4bf   : > { %v1868_v61 = vmul.f32 %v7435_v38, %v1857_v43 }
 0x4c0   : > { %v1881_v44 = vpop.xlane.xlu2 %1880  ;;  %v1854_v45 = vpop.xlane.xlu0 %1853 }
 0x4c1   : > { %v1867_v6 = vmul.f32 %v7435_v38, %v1854_v45  ;;  %v1894_v8 = vmul.f32 %v7438_v59, %v1881_v44 }
 0x4c3   : > { %v1898_v15 = vadd.f32 %v1894_v8, %v1867_v6 }
 0x4c6   : > { %v1911_v49 = vpop.xlane.xlu1 %1910 }
 0x4c7   : > { %v1922_v18 = vmul.f32 %v7444_v63, %v1911_v49  ;;  %v1163_v49 = vld [vmem:[%s7457_s1] sm:$0xff] }
 0x4c8   : > { %v1935_v50 = vpop.xlane.xlu2 %1934  ;;  %v1908_v52 = vpop.xlane.xlu0 %1907 }
 0x4c9   : > { %v1921_v12 = vmul.f32 %v7444_v63, %v1908_v52  ;;  %v1948_v29 = vmul.f32 %v6044_v22, %v1935_v50 }
 0x4cb   : > { %v1925_v25 = vadd.f32 %v1921_v12, %v1898_v15 }
 0x4cd   : > { %v1952_v39 = vadd.f32 %v1948_v29, %v1925_v25  ;;  %v1165_v25 = vld [vmem:[%s7457_s1 + $0x10] sm:$0xff] }
 0x4ce   : > { %v1860_v53 = vpop.xlane.xlu1 %1859 }
 0x4cf   : > { %v1869_v30 = vmul.f32 %v7435_v38, %v1860_v53  ;;  %v1956_v31 = vadd.f32 %v1952_v39, %v1742_v40 }
 0x4d0   : > { %v1884_v58 = vpop.xlane.xlu2 %1883  ;;  %v1938_v23 = vpop.xlane.xlu0 %1937 }
 0x4d1   : > { %v1895_v62 = vmul.f32 %v7438_v59, %v1884_v58  ;;  %v1949_v16 = vmul.f32 %v6044_v22, %v1938_v23 }
 0x4d3   : > { %v1899_v13 = vadd.f32 %v1895_v62, %v1868_v61  ;;  %v1164_v62 = vld [vmem:[%s7457_s1 + $0x8] sm:$0xff] }
 0x4d5   : > { %v1926_v26 = vadd.f32 %v1922_v18, %v1899_v13 }
 0x4d6   : > { %v1887_v28 = vpop.xlane.xlu1 %1886 }
 0x4d7   : > { %v1953_v3 = vadd.f32 %v1949_v16, %v1926_v26  ;;  %v1896_v17 = vmul.f32 %v7438_v59, %v1887_v28 }
 0x4d8   : > { %v1863_v20 = vpop.xlane.xlu2 %1862 }
 0x4d9   : > { %v1957_v0 = vadd.f32 %v1953_v3, %v1745_v41  ;;  %v1900_v45 = vadd.f32 %v1896_v17, %v1869_v30  ;;  %v1870_v3 = vmul.f32 %v7435_v38, %v1863_v20  ;;  %v1667_v17 = vpack.c.bf16 %v7318_v4, %v7301_v42 }
 0x4de   : > { %v1914_v24 = vpop.xlane.xlu1 %1913 }
 0x4df   : > { %v1923_v48 = vmul.f32 %v7444_v63, %v1914_v24 }
 0x4e0   : > { %v1890_v14 = vpop.xlane.xlu2 %1889 }
 0x4e1   : > { %v1927_v40 = vadd.f32 %v1923_v48, %v1900_v45  ;;  %v1897_v30 = vmul.f32 %v7438_v59, %v1890_v14 }
 0x4e3   : > { %v1964_v35 = vpop.permute.xlu0 %1963 }
 0x4e4   : > { %v1966_v43 = vadd.f32 %v1964_v35, %v1956_v31  ;;  %v1967_v44 = vadd.f32 %v1964_v35, %v1957_v0  ;;  %v1901_v0 = vadd.f32 %v1897_v30, %v1870_v3 }
 0x4e6   : > { %vm1970_vm4 = vcmp.gt.f32.partialorder %v1966_v43, 0.0  ;;  %v1974_v50 = vmul.f32 0.01, %v1966_v43  ;;  %v1975_v58 = vmul.f32 0.01, %v1967_v44  ;;  %vm1971_vm6 = vcmp.gt.f32.partialorder %v1967_v44, 0.0  ;;  %v1751_v39 = vpop.xlane.xlu1 %1750 }
 0x4e8   : > { %v1941_v52 = vpop.xlane.xlu2 %1940  ;;  %v1978_v53 = vsel %vm1970_vm4, %v1966_v43, %v1974_v50  ;;  %v1979_v6 = vsel %vm1971_vm6, %v1967_v44, %v1975_v58 }
 0x4e9   : > { %v1950_v41 = vmul.f32 %v6044_v22, %v1941_v52  ;;  %v1982_v60 = vadd.f32 %v1978_v53, %v1163_v49  ;;  %v1983_v10 = vadd.f32 %v1979_v6, %v1164_v62  ;;  %v1166_v52 = vld [vmem:[%s7457_s1 + $0x18] sm:$0xff]  ;;  %s11698_s1 = sld [smem:[#allocation24_spill]] }
 0x4eb   : > { %v1987_v61 = vsel %vm1986_vm5, %v1982_v60, -inf  ;;  %v1954_v8 = vadd.f32 %v1950_v41, %v1927_v40  ;;  %v1990_v18 = vsel %vm1986_vm5, %v1983_v10, -inf }
 0x4ec   : > { %1988 = vmax.xlane.f32.xlu1 %v1987_v61 }
 0x4ee   : > { %v1944_v31 = vpop.xlane.xlu1 %1943 }
 0x4ef   : > { %v1951_v44 = vmul.f32 %v6044_v22, %v1944_v31 }
 0x4f0   : > { %v1748_v12 = vpop.xlane.xlu2 %1747 }
 0x4f1   : > { %v1958_v13 = vadd.f32 %v1954_v8, %v1748_v12 }
 0x4f3   : > { %v1968_v15 = vadd.f32 %v1964_v35, %v1958_v13  ;;  %v7487_v13 = vld [vmem:[%s11693_s23] ss:$0 sm:$0xff]  ;;  %s11699_s23 = sld [smem:[#allocation26_spill]] }
 0x4f4   : > { %1991 = vmax.xlane.f32.xlu1 %v1990_v18 }
 0x4f5   : > { %v1976_v23 = vmul.f32 0.01, %v1968_v15  ;;  %vm1972_vm7 = vcmp.gt.f32.partialorder %v1968_v15, 0.0 }
 0x4f7   : > { %v1980_v26 = vsel %vm1972_vm7, %v1968_v15, %v1976_v23 }
 0x4f8   : > { %v7465_v28 = vpop.permute.xlu2 %1673  ;;  %v1984_v29 = vadd.f32 %v1980_v26, %v1165_v25 }
 0x4f9   : > { %6035 = vmatmul.msk.bf16.vlgmr.msrb.gmra.mxu0 %vm1237_vm2, %v7465_v28 }
 0x4fa   : > { %v1993_v16 = vsel %vm1986_vm5, %v1984_v29, -inf }
 0x4fb   : > { %1994 = vmax.xlane.f32.xlu0 %v1993_v16 }
 0x50d   : > { %1675 = vrot.lane.b32.xlu1 %v1667_v17, %s6904_s26 }
 0x50e   : > { %v1917_v24 = vpop.xlane.xlu0 %1916 }
 0x50f   : > { %v1924_v43 = vmul.f32 %v7444_v63, %v1917_v24 }
 0x511   : > { %v1928_v45 = vadd.f32 %v1924_v43, %v1901_v0 }
 0x513   : > { %v1955_v48 = vadd.f32 %v1951_v44, %v1928_v45  ;;  %v6905_v44 = vmov 1  }
 0x514   : > { %6307 = vset.pattern.permute.xlu1 %v6905_v44 }
 0x515   : > { %v1959_v49 = vadd.f32 %v1955_v48, %v1751_v39 }
 0x517   : > { %v1969_v50 = vadd.f32 %v1964_v35, %v1959_v49 }
 0x519   : > { %vm1973_vm8 = vcmp.gt.f32.partialorder %v1969_v50, 0.0  ;;  %v1977_v38 = vmul.f32 0.01, %v1969_v50 }
 0x51b   : > { %v1981_v20 = vsel %vm1973_vm8, %v1969_v50, %v1977_v38 }
 0x51c   : > { %v1985_v59 = vadd.f32 %v1981_v20, %v1166_v52 }
 0x51e   : > { %v1996_v14 = vsel %vm1986_vm5, %v1985_v59, -inf }
 0x51f   : > { %1997 = vmax.xlane.f32.xlu2 %v1996_v14 }
 0x55f   : > { %v1989_v53 = vpop.xlane.xlu1 %1988 }
 0x560   : > { %v1999_v58 = vsub.f32 %v1982_v60, %v1989_v53 }
 0x562   : > { %v2003_v40 = vmul.f32 1.442695, %v1999_v58 }
 0x564   : > { %6370 = vpow2.f32 %v2003_v40 }
 0x567   : > { %v1992_v41 = vpop.xlane.xlu1 %1991 }
 0x568   : > { %v2000_v63 = vsub.f32 %v1983_v10, %v1992_v41 }
 0x56a   : > { %v7478_v22 = vpop.eup %6370  ;;  %v2005_v61 = vmul.f32 1.442695, %v2000_v63 }
 0x56b   : > { %v2011_v35 = vsel %vm1986_vm5, %v7478_v22, 0.0 }
 0x56c   : > { %6372 = vpow2.f32 %v2005_v61  ;;  %2012 = vadd.xlane.f32.xlu0 %v2011_v35  ;;  %v1159_v61 = vld [vmem:[%s7508_s21] sm:$0xff] }
 0x56e   : > { %v1995_v62 = vpop.xlane.xlu0 %1994 }
 0x56f   : > { %v2001_v6 = vsub.f32 %v1984_v29, %v1995_v62 }
 0x571   : > { %v2007_v8 = vmul.f32 1.442695, %v2001_v6 }
 0x572   : > { %v7482_v12 = vpop.eup %6372 }
 0x573   : > { %6374 = vpow2.f32 %v2007_v8  ;;  %v2014_v60 = vsel %vm1986_vm5, %v7482_v12, 0.0 }
 0x574   : > { %2015 = vadd.xlane.f32.xlu0 %v2014_v60 }
 0x576   : > { %v1704_v10 = vpop.f32.mrf.mxu0 }
 0x577   : > { %v1705_v15 = vadd.f32 %v7487_v13, %v1704_v10 }
 0x579   : > { %v7490_v18 = vpop.eup %6374  ;;  %v2191_v23 = vpack.c.bf16 %v1705_v15, %v1705_v15 }
 0x57a   : > { %v2017_v25 = vsel %vm1986_vm5, %v7490_v18, 0.0 }
 0x57b   : > { %v2200_v26 = vsel %vm2198_vm9, %v2191_v23, 0  ;;  %2018 = vadd.xlane.f32.xlu1 %v2017_v25 }
 0x57c   : > { %2209 = vmatpush.bf16.msra.mxu2 %v2200_v26 }
 0x57e   : > { %v1706_v29 = vpop.f32.mrf.mxu0 }
 0x57f   : > { %v1707_v16 = vadd.f32 %v7487_v13, %v1706_v29  ;;  %v7496_v39 = vpop.permute.xlu1 %1675 }
 0x580   : > { %6036 = vmatmul.msk.bf16.gmra.mxu0 %vm1237_vm2, %v7496_v39 }
 0x581   : > { %v2192_v3 = vpack.c.bf16 %v1707_v16, %v1707_v16 }
 0x583   : > { %v2219_v30 = vsel %vm2198_vm9, %v2192_v3, 0  ;;  %v1160_v3 = vld [vmem:[%s7508_s21 + $0x8] sm:$0xff] }
 0x584   : > { %2228 = vmatpush.bf16.msra.mxu3 %v2219_v30 }
 0x592   : > { %v1998_v17 = vpop.xlane.xlu2 %1997 }
 0x593   : > { %v2002_v31 = vsub.f32 %v1985_v59, %v1998_v17 }
 0x595   : > { %v2009_v0 = vmul.f32 1.442695, %v2002_v31 }
 0x597   : > { %6376 = vpow2.f32 %v2009_v0 }
 0x59d   : > { %v7501_v24 = vpop.eup %6376 }
 0x59e   : > { %v2020_v43 = vsel %vm1986_vm5, %v7501_v24, 0.0 }
 0x59f   : > { %2021 = vadd.xlane.f32.xlu0 %v2020_v43 }
 0x5df   : > { %v2013_v45 = vpop.xlane.xlu0 %2012 }
 0x5e0   : > { %6378 = vrcp.f32 %v2013_v45  ;;  %v2034_v38 = vand.u32 2147483648, %v2013_v45  ;;  %v2032_v59 = vand.u32 2147483647, %v2013_v45  ;;  %vm2028_vm11 = vweird.f32 %v2013_v45 }
 0x5e2   : > { %v2035_v58 = vor.u32 1.1754944e-38, %v2034_v38  ;;  %vm2033_vm13 = vcmp.eq.f32.partialorder %v2032_v59, 8.507059e+37 }
 0x5e6   : > { %v6379_v48 = vpop.eup %6378 }
 0x5e7   : > { %v2024_v49 = vmul.f32 %v6379_v48, %v2013_v45  ;;  %v2016_v50 = vpop.xlane.xlu0 %2015  ;;  %vm2029_vm10 = vweird.f32 %v6379_v48 }
 0x5e8   : > { %6380 = vrcp.f32 %v2016_v50  ;;  %vm2030_vm12 = vmor %vm2028_vm11, %vm2029_vm10  ;;  %v2049_v8 = vand.u32 2147483648, %v2016_v50  ;;  %v2047_v10 = vand.u32 2147483647, %v2016_v50  ;;  %vm2043_vm0 = vweird.f32 %v2016_v50 }
 0x5e9   : > { %v2025_v52 = vsub.f32 1.0, %v2024_v49 }
 0x5ea   : > { %v2050_v26 = vor.u32 1.1754944e-38, %v2049_v8  ;;  %vm2048_vm3 = vcmp.eq.f32.partialorder %v2047_v10, 8.507059e+37 }
 0x5eb   : > { %v2026_v20 = vmul.f32 %v6379_v48, %v2025_v52 }
 0x5ed   : > { %v2027_v14 = vadd.f32 %v6379_v48, %v2026_v20  ;;  %v6906_v20 = vmov 2  }
 0x5ee   : > { %v6381_v53 = vpop.eup %6380  ;;  %v2019_v40 = vpop.xlane.xlu1 %2018 }
 0x5ef   : > { %v2031_v41 = vsel %vm2030_vm12, %v6379_v48, %v2027_v14  ;;  %v2039_v63 = vmul.f32 %v6381_v53, %v2016_v50  ;;  %6382 = vrcp.f32 %v2019_v40  ;;  %vm2044_vm15 = vweird.f32 %v6381_v53 }
 0x5f0   : > { %v2036_v35 = vsel %vm2033_vm13, %v2035_v58, %v2031_v41  ;;  %vm2045_vm1 = vmor %vm2043_vm0, %vm2044_vm15  ;;  %v2064_v50 = vand.u32 2147483648, %v2019_v40  ;;  %vm2058_vm5 = vweird.f32 %v2019_v40  ;;  %v2062_v38 = vand.u32 2147483647, %v2019_v40 }
 0x5f1   : > { %v2040_v62 = vsub.f32 1.0, %v2039_v63  ;;  %v2037_v6 = vmul.f32 %v7478_v22, %v2036_v35  ;;  %v6907_v35 = vmov 3  }
 0x5f2   : > { %v2065_v14 = vor.u32 1.1754944e-38, %v2064_v50  ;;  %vm2063_vm7 = vcmp.eq.f32.partialorder %v2062_v38, 8.507059e+37 }
 0x5f3   : > { %v2041_v60 = vmul.f32 %v6381_v53, %v2040_v62  ;;  %v2083_v15 = vmul.f32 %v2037_v6, %v1159_v61  ;;  %v1161_v61 = vld [vmem:[%s7508_s21 + $0x10] sm:$0xff] }
 0x5f5   : > { %v6383_v23 = vpop.eup %6382  ;;  %v2042_v25 = vadd.f32 %v6381_v53, %v2041_v60  ;;  %2089 = vperm.xlu0 %6303, %v2083_v15  }
 0x5f6   : > { %v2054_v29 = vmul.f32 %v6383_v23, %v2019_v40  ;;  %vm2059_vm4 = vweird.f32 %v6383_v23 }
 0x5f7   : > { %v2046_v16 = vsel %vm2045_vm1, %v6381_v53, %v2042_v25  ;;  %vm2060_vm6 = vmor %vm2058_vm5, %vm2059_vm4 }
 0x5f8   : > { %v2051_v30 = vsel %vm2048_vm3, %v2050_v26, %v2046_v16  ;;  %v2055_v17 = vsub.f32 1.0, %v2054_v29  ;;  %v1162_v26 = vld [vmem:[%s7508_s21 + $0x18] sm:$0xff] }
 0x5f9   : > { %v2052_v31 = vmul.f32 %v7482_v12, %v2051_v30 }
 0x5fa   : > { %v2056_v0 = vmul.f32 %v6383_v23, %v2055_v17 }
 0x5fb   : > { %v2084_v22 = vmul.f32 %v2052_v31, %v1160_v3 }
 0x5fc   : > { %v2057_v49 = vadd.f32 %v6383_v23, %v2056_v0 }
 0x5fd   : > { %2120 = vperm.xlu1 %6307, %v2084_v22   ;;  %2094 = vperm.xlu2 %6305, %v2084_v22   ;;  %v1709_v43 = vpop.f32.mrf.mxu0 }
 0x5fe   : > { %v1710_v45 = vadd.f32 %v7487_v13, %v1709_v43  ;;  %6306 = vset.pattern.permute.xlu0 %v6905_v44  ;;  %v2061_v12 = vsel %vm2060_vm6, %v6383_v23, %v2057_v49 }
 0x5ff   : > { %2116 = vperm.xlu0 %6306, %v2083_v15   ;;  %v2066_v41 = vsel %vm2063_vm7, %v2065_v14, %v2061_v12 }
 0x600   : > { %v2193_v48 = vpack.c.bf16 %v1710_v45, %v1710_v45  ;;  %v2067_v63 = vmul.f32 %v7490_v18, %v2066_v41 }
 0x602   : > { %v2238_v52 = vsel %vm2198_vm9, %v2193_v48, 0  ;;  %v2085_v62 = vmul.f32 %v2067_v63, %v1161_v61 }
 0x603   : > { %2247 = vmatpush.bf16.msra.mxu0 %v2238_v52 }
 0x605   : > { %6308 = vset.pattern.permute.xlu2 %v6906_v20  ;;  %v1711_v59 = vpop.f32.mrf.mxu0  ;;  %6314 = vset.pattern.permute.xlu1 %v6900_v1 }
 0x606   : > { %v1712_v53 = vadd.f32 %v7487_v13, %v1711_v59  ;;  %2140 = vperm.xlu2 %6308, %v2083_v15  }
 0x607   : > { %6310 = vset.pattern.permute.xlu0 %v6906_v20 }
 0x608   : > { %v2194_v58 = vpack.c.bf16 %v1712_v53, %v1712_v53  ;;  %2144 = vperm.xlu0 %6310, %v2084_v22  }
 0x60a   : > { %v2257_v40 = vsel %vm2198_vm9, %v2194_v58, 0 }
 0x60b   : > { %2266 = vmatpush.bf16.msrb.mxu1 %v2257_v40 }
 0x60e   : > { %6309 = vset.pattern.permute.xlu2 %v6907_v35 }
 0x60f   : > { %2164 = vperm.xlu2 %6309, %v2083_v15  }
 0x610   : > { %6311 = vset.pattern.permute.xlu0 %v6900_v1 }
 0x611   : > { %2099 = vperm.xlu0 %6311, %v2085_v62  }
 0x612   : > { %v2022_v13 = vpop.xlane.xlu0 %2021 }
 0x613   : > { %6384 = vrcp.f32 %v2022_v13  ;;  %v2079_v10 = vand.u32 2147483648, %v2022_v13  ;;  %v2077_v18 = vand.u32 2147483647, %v2022_v13  ;;  %vm2073_vm10 = vweird.f32 %v2022_v13 }
 0x615   : > { %v2080_v1 = vor.u32 1.1754944e-38, %v2079_v10  ;;  %vm2078_vm12 = vcmp.eq.f32.partialorder %v2077_v18, 8.507059e+37 }
 0x617   : > { %2168 = vperm.xlu2 %6309, %v2084_v22   ;;  %v6199_v22 = vld [vmem:[%s7022_s20 + $0x8] sm:$0xff] }
 0x618   : > { %2359 = vmatpush.bf16.msrb.mxu3 %v6199_v22 }
 0x619   : > { %v6385_v6 = vpop.eup %6384  ;;  %6316 = vset.pattern.permute.xlu0 %v6906_v20 }
 0x61a   : > { %v2069_v8 = vmul.f32 %v6385_v6, %v2022_v13  ;;  %vm2074_vm8 = vweird.f32 %v6385_v6 }
 0x61b   : > { %vm2075_vm11 = vmor %vm2073_vm10, %vm2074_vm8 }
 0x61c   : > { %v2070_v60 = vsub.f32 1.0, %v2069_v8 }
 0x61e   : > { %v2071_v23 = vmul.f32 %v6385_v6, %v2070_v60 }
 0x61f   : > { %6312 = vset.pattern.permute.xlu2 %v6905_v44 }
 0x620   : > { %v2072_v25 = vadd.f32 %v6385_v6, %v2071_v23  ;;  %2124 = vperm.xlu2 %6312, %v2085_v62  }
 0x622   : > { %v2076_v15 = vsel %vm2075_vm11, %v6385_v6, %v2072_v25 }
 0x623   : > { %v2081_v29 = vsel %vm2078_vm12, %v2080_v1, %v2076_v15 }
 0x624   : > { %v2082_v16 = vmul.f32 %v7501_v24, %v2081_v29  ;;  %v6198_v24 = vld [vmem:[%s7022_s20] sm:$0xff] }
 0x625   : > { %2360 = vmatpush.bf16.msrb.mxu3 %v6198_v24 }
 0x626   : > { %v2086_v3 = vmul.f32 %v2082_v16, %v1162_v26  ;;  %v6196_v26 = vld [vmem:[%s11695_s16] sm:$0xff] }
 0x628   : > { %6313 = vset.pattern.permute.xlu2 %v6906_v20  ;;  %2152 = vperm.xlu0 %6316, %v2086_v3  }
 0x629   : > { %2104 = vperm.xlu1 %6314, %v2086_v3   ;;  %2148 = vperm.xlu2 %6313, %v2085_v62  }
 0x630   : > { %6319 = vset.pattern.permute.xlu0 %v6907_v35 }
 0x631   : > { %6315 = vset.pattern.permute.xlu1 %v6905_v44  ;;  %6318 = vset.pattern.permute.xlu2 %v6907_v35 }
 0x632   : > { %2128 = vperm.xlu1 %6315, %v2086_v3   ;;  %2176 = vperm.xlu2 %6318, %v2086_v3  }
 0x63a   : > { %6317 = vset.pattern.permute.xlu1 %v6907_v35 }
 0x63b   : > { %2172 = vperm.xlu1 %6317, %v2085_v62  }
 0x657   : > { %v2095_v30 = vpop.permute.xlu2 %2094 }
 0x658   : > { %v2108_v59 = vmul.f32 %v2095_v30, %v7345_v2 }
 0x660   : > { %v2141_v17 = vpop.permute.xlu2 %2140 }
 0x661   : > { %v2155_v44 = vmul.f32 %v2141_v17, %v7364_v46 }
 0x667   : > { %v2090_v31 = vpop.permute.xlu0 %2089 }
 0x668   : > { %v2107_v45 = vmul.f32 %v2090_v31, %v7348_v33 }
 0x669   : > { %v2165_v0 = vpop.permute.xlu2 %2164 }
 0x66a   : > { %v2179_v52 = vmul.f32 %v2165_v0, %v7367_v47 }
 0x66f   : > { %v2121_v49 = vpop.permute.xlu1 %2120 }
 0x670   : > { %v2132_v12 = vmul.f32 %v2121_v49, %v7379_v57 }
 0x671   : > { %v2117_v43 = vpop.permute.xlu0 %2116  ;;  %v2169_v53 = vpop.permute.xlu2 %2168 }
 0x672   : > { %v2131_v48 = vmul.f32 %v2117_v43, %v7351_v34  ;;  %v2136_v41 = vadd.f32 %v2132_v12, %v2108_v59  ;;  %v2180_v34 = vmul.f32 %v2169_v53, %v7376_v56  ;;  %v6334_v43 = vld [vmem:[%s11696_s25] ss:$0 sm:$0xff]  ;;  %s10150_s25 = scalar_lea.vmem [#allocation7], %s5966_s15  ;;  %s12158_s15 = sld [smem:[#allocation28_spill]] }
 0x674   : > { %v2135_v50 = vadd.f32 %v2131_v48, %v2107_v45 }
 0x676   : > { %v2159_v38 = vadd.f32 %v2155_v44, %v2135_v50 }
 0x678   : > { %v2183_v20 = vadd.f32 %v2179_v52, %v2159_v38 }
 0x67a   : > { %v2187_v14 = vpack.c.bf16 %v2183_v20, %v2183_v20  ;;  %v2145_v58 = vpop.permute.xlu0 %2144  ;;  %v2125_v47 = vpop.permute.xlu2 %2124 }
 0x67b   : > { %v2156_v33 = vmul.f32 %v2145_v58, %v7355_v36 }
 0x67c   : > { %6045 = vmatmul.msk.bf16.vlgmr.msra.gmra.mxu2 %vm1851_vm14, %v2187_v14 }
 0x67d   : > { %v2160_v46 = vadd.f32 %v2156_v33, %v2136_v41 }
 0x67f   : > { %v2184_v40 = vadd.f32 %v2180_v34, %v2160_v46 }
 0x681   : > { %v2188_v63 = vpack.c.bf16 %v2184_v40, %v2184_v40 }
 0x683   : > { %6046 = vmatmul.msk.bf16.vlgmr.msra.gmra.mxu3 %vm1851_vm14, %v2188_v63  ;;  %v2100_v57 = vpop.permute.xlu0 %2099  ;;  %v2149_v61 = vpop.permute.xlu2 %2148 }
 0x684   : > { %v2109_v13 = vmul.f32 %v2100_v57, %v7373_v55  ;;  %v2157_v18 = vmul.f32 %v2149_v61, %v7399_v19 }
 0x68c   : > { %v2177_v6 = vpop.permute.xlu2 %2176 }
 0x68d   : > { %v2182_v10 = vmul.f32 %v2177_v6, %v7416_v7 }
 0x693   : > { %6071 = vmatmul.msk.bf16.vlgmr.msrb.gmra.mxu3 %vm1237_vm2, %v7465_v28  ;;  %v2133_v28 = vmul.f32 %v2125_v47, %v7388_v5  ;;  %v6197_v5 = vld [vmem:[%s11695_s16 + $0x8] sm:$0xff] }
 0x694   : > { %2325 = vmatpush.bf16.msrb.mxu2 %v6197_v5 }
 0x698   : > { %2326 = vmatpush.bf16.msrb.mxu2 %v6196_v26 }
 0x69a   : > { %v2153_v36 = vpop.permute.xlu0 %2152 }
 0x69b   : > { %v2105_v2 = vpop.permute.xlu1 %2104  ;;  %v2158_v8 = vmul.f32 %v2153_v36, %v7422_v32 }
 0x69c   : > { %v2110_v62 = vmul.f32 %v2105_v2, %v7393_v11 }
 0x6a3   : > { %6072 = vmatmul.msk.bf16.gmra.mxu3 %vm1237_vm2, %v7496_v39  ;;  %v2137_v39 = vadd.f32 %v2133_v28, %v2109_v13 }
 0x6a4   : > { %v2129_v35 = vpop.permute.xlu1 %2128 }
 0x6a5   : > { %v2134_v56 = vmul.f32 %v2129_v35, %v7403_v21  ;;  %v2161_v21 = vadd.f32 %v2157_v18, %v2137_v39 }
 0x6a7   : > { %v2138_v60 = vadd.f32 %v2134_v56, %v2110_v62  ;;  %v6335_v56 = vld [vmem:[%s11697_s27] ss:$0 sm:$0xff]  ;;  %s12159_s27 = smov %s12158_s15 }
 0x6a9   : > { %v2162_v23 = vadd.f32 %v2158_v8, %v2138_v60 }
 0x6ab   : > { %v2186_v25 = vadd.f32 %v2182_v10, %v2162_v23 }
 0x6ad   : > { %v2190_v11 = vpack.c.bf16 %v2186_v25, %v2186_v25  ;;  %v2173_v1 = vpop.permute.xlu1 %2172 }
 0x6ae   : > { %v2181_v55 = vmul.f32 %v2173_v1, %v7410_v27 }
 0x6af   : > { %6048 = vmatmul.msk.bf16.vlgmr.msrb.gmra.mxu1 %vm1851_vm14, %v2190_v11 }
 0x6b0   : > { %v2185_v32 = vadd.f32 %v2181_v55, %v2161_v21 }
 0x6b2   : > { %v2189_v15 = vpack.c.bf16 %v2185_v32, %v2185_v32 }
 0x6b4   : > { %6047 = vmatmul.msk.bf16.vlgmr.msra.gmra.mxu0 %vm1851_vm14, %v2189_v15 }
 0x6ff   : > { %v2211_v7 = vpop.f32.mrf.mxu2 }
 0x700   : > { %v2276_v29 = vmin.f32 %v2211_v7, 0.0  ;;  %vm2272_vm13 = vcmp.gt.f32.partialorder %v2211_v7, 0.0 }
 0x702   : > { %v2280_v19 = vmul.f32 1.442695, %v2276_v29 }
 0x704   : > { %6386 = vpow2.f32 %v2280_v19 }
 0x706   : > { %v2230_v16 = vpop.f32.mrf.mxu3 }
 0x707   : > { %v2277_v3 = vmin.f32 %v2230_v16, 0.0  ;;  %v2213_v30 = vpop.f32.mrf.mxu2  ;;  %vm2273_vm15 = vcmp.gt.f32.partialorder %v2230_v16, 0.0 }
 0x709   : > { %v2282_v17 = vmul.f32 1.442695, %v2277_v3 }
 0x70a   : > { %v6387_v27 = vpop.eup %6386 }
 0x70b   : > { %6388 = vpow2.f32 %v2282_v17  ;;  %v6049_v22 = vadd.f32 -1.0, %v6387_v27 }
 0x70d   : > { %v2292_v45 = vsel %vm2272_vm13, %v2211_v7, %v6049_v22 }
 0x70e   : > { %v2232_v31 = vpop.f32.mrf.mxu3 }
 0x711   : > { %v6389_v24 = vpop.eup %6388 }
 0x712   : > { %v6050_v0 = vadd.f32 -1.0, %v6389_v24 }
 0x714   : > { %v2293_v48 = vsel %vm2273_vm15, %v2230_v16, %v6050_v0 }
 0x715   : > { %v2296_v44 = vpack.c.bf16 %v2293_v48, %v2292_v45 }
 0x716   : > { %v2362_v49 = vpop.f32.mrf.mxu3 }
 0x717   : > { %v2363_v50 = vadd.f32 %v6334_v43, %v2362_v49  ;;  %6061 = vmatmul.msk.bf16.vlgmr.msrb.gmra.mxu2 %vm1237_vm2, %v2296_v44 }
 0x719   : > { %2456 = vrot.lane.b32.xlu1 %v2363_v50, %s11654_s10 }
 0x71e   : > { %v2364_v52 = vpop.f32.mrf.mxu3 }
 0x71f   : > { %v2365_v38 = vadd.f32 %v6334_v43, %v2364_v52 }
 0x721   : > { %2458 = vrot.lane.b32.xlu2 %v2365_v38, %s11654_s10 }
 0x726   : > { %v2367_v12 = vpop.f32.mrf.mxu3 }
 0x727   : > { %v7559_v20 = vadd.f32 %v6334_v43, %v2367_v12 }
 0x729   : > { %2460 = vrot.lane.b32.xlu0 %v7559_v20, %s11654_s10 }
 0x72c   : > { %v2268_v59 = vpop.f32.mrf.mxu1 }
 0x72d   : > { %v2279_v14 = vmin.f32 %v2268_v59, 0.0  ;;  %vm2275_vm0 = vcmp.gt.f32.partialorder %v2268_v59, 0.0 }
 0x72e   : > { %v2369_v53 = vpop.f32.mrf.mxu3 }
 0x72f   : > { %v2286_v58 = vmul.f32 1.442695, %v2279_v14  ;;  %v7563_v41 = vadd.f32 %v6334_v43, %v2369_v53 }
 0x731   : > { %2462 = vrot.lane.b32.xlu1 %v7563_v41, %s11654_s10  ;;  %v2249_v33 = vpop.f32.mrf.mxu0  ;;  %6390 = vpow2.f32 %v2286_v58 }
 0x732   : > { %v2278_v34 = vmin.f32 %v2249_v33, 0.0  ;;  %vm2274_vm1 = vcmp.gt.f32.partialorder %v2249_v33, 0.0 }
 0x734   : > { %v2284_v46 = vmul.f32 1.442695, %v2278_v34  ;;  %v2270_v40 = vpop.f32.mrf.mxu1 }
 0x736   : > { %6392 = vpow2.f32 %v2284_v46 }
 0x737   : > { %v6391_v63 = vpop.eup %6390 }
 0x738   : > { %v6052_v2 = vadd.f32 -1.0, %v6391_v63 }
 0x739   : > { %v2251_v47 = vpop.f32.mrf.mxu0 }
 0x73a   : > { %v2295_v36 = vsel %vm2275_vm0, %v2268_v59, %v6052_v2 }
 0x73c   : > { %v6393_v57 = vpop.eup %6392 }
 0x73d   : > { %v6051_v61 = vadd.f32 -1.0, %v6393_v57 }
 0x73f   : > { %v2294_v35 = vsel %vm2274_vm1, %v2249_v33, %v6051_v61 }
 0x740   : > { %v2297_v62 = vpack.c.bf16 %v2295_v36, %v2294_v35 }
 0x742   : > { %6062 = vmatmul.msk.bf16.gmra.mxu2 %vm1237_vm2, %v2297_v62 }
 0x77b   : > { %v2459_v44 = vpop.permute.xlu2 %2458 }
 0x78b   : > { %v2457_v30 = vpop.permute.xlu1 %2456 }
 0x79a   : > { %v2328_v13 = vpop.f32.mrf.mxu2 }
 0x79b   : > { %v7569_v6 = vadd.f32 %v6335_v56, %v2328_v13 }
 0x79d   : > { %v2372_v8 = vadd.f32 %v2363_v50, %v7569_v6 }
 0x79f   : > { %v6073_v60 = vmul.f32 -1.442695, %v2372_v8  ;;  %v2461_v8 = vpop.permute.xlu0 %2460 }
 0x7a1   : > { %6394 = vpow2.f32 %v6073_v60 }
 0x7a2   : > { %v2330_v28 = vpop.f32.mrf.mxu2 }
 0x7a3   : > { %v7572_v10 = vadd.f32 %v6335_v56, %v2330_v28 }
 0x7a5   : > { %v2373_v23 = vadd.f32 %v2365_v38, %v7572_v10 }
 0x7a7   : > { %v6395_v39 = vpop.eup %6394  ;;  %v6074_v18 = vmul.f32 -1.442695, %v2373_v23 }
 0x7a8   : > { %v2388_v25 = vadd.f32 1.0, %v6395_v39 }
 0x7a9   : > { %6396 = vpow2.f32 %v6074_v18 }
 0x7aa   : > { %6398 = vrcp.f32 %v2388_v25  ;;  %v2403_v15 = vand.u32 2147483648, %v2388_v25  ;;  %v2401_v26 = vand.u32 2147483647, %v2388_v25  ;;  %vm2397_vm4 = vweird.f32 %v2388_v25 }
 0x7ac   : > { %v2404_v19 = vor.u32 1.1754944e-38, %v2403_v15  ;;  %vm2402_vm6 = vcmp.eq.f32.partialorder %v2401_v26, 8.507059e+37 }
 0x7af   : > { %v6397_v11 = vpop.eup %6396 }
 0x7b0   : > { %v6399_v1 = vpop.eup %6398  ;;  %v2389_v21 = vadd.f32 1.0, %v6397_v11 }
 0x7b1   : > { %v2393_v55 = vmul.f32 %v6399_v1, %v2388_v25  ;;  %vm2398_vm3 = vweird.f32 %v6399_v1 }
 0x7b2   : > { %6400 = vrcp.f32 %v2389_v21  ;;  %vm2399_vm5 = vmor %vm2397_vm4, %vm2398_vm3  ;;  %v2418_v22 = vand.u32 2147483648, %v2389_v21  ;;  %v2416_v0 = vand.u32 2147483647, %v2389_v21  ;;  %vm2412_vm8 = vweird.f32 %v2389_v21 }
 0x7b3   : > { %v2394_v32 = vsub.f32 1.0, %v2393_v55  ;;  %v2463_v55 = vpop.permute.xlu1 %2462 }
 0x7b4   : > { %v2419_v45 = vor.u32 1.1754944e-38, %v2418_v22  ;;  %vm2417_vm11 = vcmp.eq.f32.partialorder %v2416_v0, 8.507059e+37  ;;  %v6201_v0 = vld [vmem:[%s11698_s1 + $0x8] sm:$0xff] }
 0x7b5   : > { %v2395_v5 = vmul.f32 %v6399_v1, %v2394_v32  ;;  %2567 = vmatpush.bf16.msrb.mxu0 %v6201_v0  ;;  %v6723_v0 = vld [vmem:[%s7155_s11 + $0x20] sm:$0xff] }
 0x7b7   : > { %v2396_v7 = vadd.f32 %v6399_v1, %v2395_v5 }
 0x7b8   : > { %v6401_v29 = vpop.eup %6400 }
 0x7b9   : > { %v2400_v16 = vsel %vm2399_vm5, %v6399_v1, %v2396_v7  ;;  %v2408_v3 = vmul.f32 %v6401_v29, %v2389_v21  ;;  %vm2413_vm7 = vweird.f32 %v6401_v29 }
 0x7ba   : > { %v7575_v17 = vsel %vm2402_vm6, %v2404_v19, %v2400_v16  ;;  %vm2414_vm10 = vmor %vm2412_vm8, %vm2413_vm7  ;;  %vm2610_vm6 = vcmp.ge.s32.totalorder %v7429_v51, 16  ;;  %vm2611_vm7 = vcmp.lt.s32.totalorder %v7429_v51, 22  ;;  %vm2639_vm8 = vcmp.ge.s32.totalorder %v7429_v51, 24 }
 0x7bb   : > { %v2468_v27 = vmul.f32 %v2457_v30, %v7575_v17  ;;  %v2409_v31 = vsub.f32 1.0, %v2408_v3 }
 0x7bd   : > { %2476 = vrot.lane.b32.xlu2 %v2468_v27, %s11654_s10  ;;  %v2410_v24 = vmul.f32 %v6401_v29, %v2409_v31 }
 0x7bf   : > { %v2411_v43 = vadd.f32 %v6401_v29, %v2410_v24  ;;  %v2496_v24 = vsub.f32 1.0, %v7575_v17 }
 0x7c1   : > { %v2415_v48 = vsel %vm2414_vm10, %v6401_v29, %v2411_v43  ;;  %v6203_v43 = vld [vmem:[%s11699_s23 + $0x8] sm:$0xff]  ;;  %vm2640_vm10 = vcmp.lt.s32.totalorder %v7429_v51, 30 }
 0x7c2   : > { %v7579_v49 = vsel %vm2417_vm11, %v2419_v45, %v2415_v48  ;;  %v6205_v45 = vld [vmem:[%s7052_s22 + $0x8] sm:$0xff]  ;;  %3365 = vmatpush.bf16.msra.mxu1 %v6203_v43  ;;  %vm7626_vm11 = vmand %vm2610_vm6, %vm2611_vm7  ;;  %v3410_v43 = vpack.c.bf16 %v6723_v0, %v6723_v0  ;;  %vm3252_vm6 = vcmp.eq.s32.totalorder %v7429_v51, 36 }
 0x7c3   : > { %v2469_v50 = vmul.f32 %v2459_v44, %v7579_v49  ;;  %v2520_v44 = vmul.f32 %v7575_v17, %v7309_v54  ;;  %3396 = vmatpush.bf16.msra.mxu2 %v6205_v45 }
 0x7c5   : > { %v2333_v52 = vpop.f32.mrf.mxu2  ;;  %2478 = vrot.lane.b32.xlu0 %v2469_v50, %s11654_s10  ;;  %v2497_v50 = vsub.f32 1.0, %v7579_v49 }
 0x7c6   : > { %v7583_v38 = vadd.f32 %v6335_v56, %v2333_v52 }
 0x7c8   : > { %v2374_v12 = vadd.f32 %v7559_v20, %v7583_v38 }
 0x7ca   : > { %v6075_v59 = vmul.f32 -1.442695, %v2374_v12  ;;  %v2521_v12 = vmul.f32 %v7579_v49, %v7299_v37 }
 0x7cc   : > { %6402 = vpow2.f32 %v6075_v59 }
 0x7cd   : > { %v2335_v14 = vpop.f32.mrf.mxu2 }
 0x7ce   : > { %v2336_v53 = vadd.f32 %v6335_v56, %v2335_v14 }
 0x7d0   : > { %v2375_v58 = vadd.f32 %v7563_v41, %v2336_v53 }
 0x7d2   : > { %v6403_v33 = vpop.eup %6402  ;;  %v6076_v34 = vmul.f32 -1.442695, %v2375_v58 }
 0x7d3   : > { %v2390_v46 = vadd.f32 1.0, %v6403_v33 }
 0x7d4   : > { %6404 = vpow2.f32 %v6076_v34 }
 0x7d5   : > { %6406 = vrcp.f32 %v2390_v46  ;;  %v2433_v61 = vand.u32 2147483648, %v2390_v46  ;;  %v2431_v20 = vand.u32 2147483647, %v2390_v46  ;;  %vm2427_vm13 = vweird.f32 %v2390_v46 }
 0x7d7   : > { %v2434_v41 = vor.u32 1.1754944e-38, %v2433_v61  ;;  %vm2432_vm0 = vcmp.eq.f32.partialorder %v2431_v20, 8.507059e+37  ;;  %v6200_v20 = vld [vmem:[%s11698_s1] sm:$0xff]  ;;  %s6788_s1 = scalar_lea.hbm %s12159_s27, 64 }
 0x7d8   : > { %2568 = vmatpush.bf16.msrb.mxu0 %v6200_v20 }
 0x7da   : > { %v6405_v40 = vpop.eup %6404 }
 0x7db   : > { %v6407_v63 = vpop.eup %6406  ;;  %v2391_v47 = vadd.f32 1.0, %v6405_v40 }
 0x7dc   : > { %v2423_v2 = vmul.f32 %v6407_v63, %v2390_v46  ;;  %vm2428_vm12 = vweird.f32 %v6407_v63 }
 0x7dd   : > { %6408 = vrcp.f32 %v2391_v47  ;;  %vm2429_vm15 = vmor %vm2427_vm13, %vm2428_vm12  ;;  %v2448_v39 = vand.u32 2147483648, %v2391_v47  ;;  %v2446_v25 = vand.u32 2147483647, %v2391_v47  ;;  %vm2442_vm3 = vweird.f32 %v2391_v47 }
 0x7de   : > { %v2424_v57 = vsub.f32 1.0, %v2423_v2  ;;  %vm2581_vm12 = vcmp.lt.s32.totalorder %v7429_v51, 16  ;;  %vm7631_vm13 = vmand %vm2639_vm8, %vm2640_vm10 }
 0x7df   : > { %v2449_v1 = vor.u32 1.1754944e-38, %v2448_v39  ;;  %vm2447_vm5 = vcmp.eq.f32.partialorder %v2446_v25, 8.507059e+37 }
 0x7e0   : > { %v2425_v36 = vmul.f32 %v6407_v63, %v2424_v57 }
 0x7e2   : > { %v2426_v35 = vadd.f32 %v6407_v63, %v2425_v36 }
 0x7e3   : > { %v6409_v62 = vpop.eup %6408 }
 0x7e4   : > { %v2430_v56 = vsel %vm2429_vm15, %v6407_v63, %v2426_v35  ;;  %v2438_v13 = vmul.f32 %v6409_v62, %v2391_v47  ;;  %vm2443_vm1 = vweird.f32 %v6409_v62  ;;  %v6202_v35 = vld [vmem:[%s11699_s23] sm:$0xff]  ;;  %vm2697_vm15 = vcmp.ge.s32.totalorder %v7429_v51, 37 }
 0x7e5   : > { %v2435_v60 = vsel %vm2432_vm0, %v2434_v41, %v2430_v56  ;;  %vm2444_vm4 = vmor %vm2442_vm3, %vm2443_vm1  ;;  %3366 = vmatpush.bf16.msra.mxu1 %v6202_v35  ;;  %v7622_v41 = vld [vmem:[%s11700_s28] ss:$0 sm:$0xff]  ;;  %vm2698_vm0 = vcmp.lt.s32.totalorder %v7429_v51, 39  ;;  %vm2668_vm1 = vcmp.ge.s32.totalorder %v7429_v51, 31  ;;  %vm2669_vm3 = vcmp.lt.s32.totalorder %v7429_v51, 36  ;;  %v6727_v35 = vld [vmem:[%s7155_s11 + $0x60] sm:$0xff] }
 0x7e6   : > { %v2470_v28 = vmul.f32 %v2461_v8, %v2435_v60  ;;  %v2439_v23 = vsub.f32 1.0, %v2438_v13  ;;  %v2498_v54 = vsub.f32 1.0, %v2435_v60  ;;  %v2522_v46 = vmul.f32 %v2435_v60, %v7301_v42  ;;  %s6206_s28 = sshll.u32 %s7090_s0, 5 }
 0x7e8   : > { %2480 = vrot.lane.b32.xlu1 %v2470_v28, %s11654_s10  ;;  %v2440_v18 = vmul.f32 %v6409_v62, %v2439_v23 }
 0x7ea   : > { %v2441_v11 = vadd.f32 %v6409_v62, %v2440_v18 }
 0x7ec   : > { %v2445_v21 = vsel %vm2444_vm4, %v6409_v62, %v2441_v11  ;;  %v6204_v62 = vld [vmem:[%s7052_s22] sm:$0xff]  ;;  %vm7654_vm4 = vmand %vm2697_vm15, %vm2698_vm0  ;;  %vm3504_vm0 = vcmp.lt.s32.totalorder %v7429_v51, 4 }
 0x7ed   : > { %v2450_v32 = vsel %vm2447_vm5, %v2449_v1, %v2445_v21  ;;  %3397 = vmatpush.bf16.msra.mxu2 %v6204_v62  ;;  %vm7658_vm5 = vmand %vm2668_vm1, %vm2669_vm3  ;;  %v3412_v62 = vpack.c.bf16 %v6727_v35, %v6727_v35  ;;  %v7839_v8 = vsel %vm7654_vm4, 1.0, %v11479_v9  ;;  %vm3512_vm3 = vcmask 80896  }
 0x7ee   : > { %v2471_v15 = vmul.f32 %v2463_v55, %v2450_v32  ;;  %v2499_v40 = vsub.f32 1.0, %v2450_v32  ;;  %v2523_v37 = vmul.f32 %v2450_v32, %v7318_v4 }
 0x7f0   : > { %2482 = vrot.lane.b32.xlu2 %v2471_v15, %s11654_s10 }
 0x817   : > { %v2477_v5 = vpop.permute.xlu2 %2476 }
 0x818   : > { %v2488_v26 = vadd.f32 %v2477_v5, %v7569_v6 }
 0x81a   : > { %6410 = vtanh.f32 %v2488_v26 }
 0x820   : > { %v6411_v7 = vpop.eup %6410 }
 0x821   : > { %2504 = vrot.lane.b32.xlu0 %v6411_v7, %s6904_s26 }
 0x837   : > { %v2479_v29 = vpop.permute.xlu0 %2478 }
 0x838   : > { %v2489_v19 = vadd.f32 %v2479_v29, %v7572_v10  ;;  %v6722_v29 = vld [vmem:[%s7155_s11] sm:$0xff] }
 0x83a   : > { %6412 = vtanh.f32 %v2489_v19  ;;  %v3409_v19 = vpack.c.bf16 %v6722_v29, %v6722_v29 }
 0x840   : > { %v6413_v16 = vpop.eup %6412 }
 0x841   : > { %2506 = vrot.lane.b32.xlu1 %v6413_v16, %s6904_s26 }
 0x84a   : > { %v2483_v3 = vpop.permute.xlu2 %2482 }
 0x84b   : > { %v2491_v30 = vadd.f32 %v2483_v3, %v2336_v53 }
 0x84d   : > { %6414 = vtanh.f32 %v2491_v30 }
 0x853   : > { %v6415_v27 = vpop.eup %6414 }
 0x854   : > { %2510 = vrot.lane.b32.xlu0 %v6415_v27, %s6904_s26 }
 0x85a   : > { %v2481_v6 = vpop.permute.xlu1 %2480 }
 0x85b   : > { %v2490_v31 = vadd.f32 %v2481_v6, %v7583_v38 }
 0x85d   : > { %6416 = vtanh.f32 %v2490_v31 }
 0x863   : > { %v6417_v22 = vpop.eup %6416 }
 0x864   : > { %2508 = vrot.lane.b32.xlu2 %v6417_v22, %s6904_s26 }
 0x893   : > { %v2505_v10 = vpop.permute.xlu0 %2504 }
 0x894   : > { %v2516_v48 = vmul.f32 %v2505_v10, %v2496_v24 }
 0x896   : > { %v2524_v38 = vadd.f32 %v2520_v44, %v2516_v48 }
 0x898   : > { %v2528_v53 = vmax.f32 %v2524_v38, 0.0 }
 0x8b3   : > { %v2507_v52 = vpop.permute.xlu1 %2506 }
 0x8b4   : > { %v2517_v59 = vmul.f32 %v2507_v52, %v2497_v50 }
 0x8b6   : > { %v2525_v14 = vadd.f32 %v2521_v12, %v2517_v59 }
 0x8b8   : > { %v2529_v58 = vmax.f32 %v2525_v14, 0.0 }
 0x8ba   : > { %v2532_v33 = vpack.c.bf16 %v2529_v58, %v2528_v53 }
 0x8bc   : > { %2539 = vrot.lane.b32.xlu1 %v2532_v33, %s6904_s26  ;;  %v6724_v33 = vld [vmem:[%s7155_s11 + $0x40] sm:$0xff] }
 0x8be   : > { %v2509_v34 = vpop.permute.xlu2 %2508 }
 0x8bf   : > { %v2518_v17 = vmul.f32 %v2509_v34, %v2498_v54  ;;  %v3411_v34 = vpack.c.bf16 %v6724_v33, %v6724_v33  ;;  %v6725_v54 = vld [vmem:[%s7155_s11 + $0x48] sm:$0xff] }
 0x8c1   : > { %v2526_v47 = vadd.f32 %v2522_v46, %v2518_v17  ;;  %v4015_v17 = vpack.c.bf16 %v6725_v54, %v6725_v54 }
 0x8c3   : > { %v2530_v57 = vmax.f32 %v2526_v47, 0.0 }
 0x8c6   : > { %v2511_v63 = vpop.permute.xlu0 %2510 }
 0x8c7   : > { %v2519_v49 = vmul.f32 %v2511_v63, %v2499_v40 }
 0x8c9   : > { %v2527_v2 = vadd.f32 %v2523_v37, %v2519_v49 }
 0x8cb   : > { %v2531_v61 = vmax.f32 %v2527_v2, 0.0 }
 0x8cd   : > { %v2533_v36 = vpack.c.bf16 %v2531_v61, %v2530_v57 }
 0x8cf   : > { %2541 = vrot.lane.b32.xlu2 %v2533_v36, %s6904_s26  ;;  %v6726_v36 = vld [vmem:[%s7155_s11 + $0x8] sm:$0xff]  ;;  %s5967_s26 = sshll.u32 %s7149_s2, 5 }
 0x8d0   : > { %v4013_v20 = vpack.c.bf16 %v6726_v36, %v6726_v36  ;;  %s10095_s21 = scalar_lea.vmem [#allocation6], %s5967_s26 }
 0x8d1   : > { %s5735_s26 = sshll.u32 %s10095_s21, 4  ;;  %s10601_s26 = int_to_ptr.vmem [resolvable:$true] %s5735_s26 }
 0x929   : > { %v2542_v4 = vpop.permute.xlu2 %2541 }
 0x92e   : > { %v2540_v42 = vpop.permute.xlu1 %2539 }
 0x92f   : > { %6085 = vmatmul.msk.bf16.vlgmr.msrb.gmra.mxu0 %vm1237_vm2, %v2540_v42  ;;  %6111 = vmatmul.msk.bf16.vlgmr.msra.gmra.mxu1 %vm1237_vm2, %v2540_v42 }
 0x930   : > { %6121 = vmatmul.msk.bf16.vlgmr.msra.gmra.mxu2 %vm1237_vm2, %v2540_v42 }
 0x93f   : > { %6086 = vmatmul.msk.bf16.gmra.mxu0 %vm1237_vm2, %v2542_v4  ;;  %6112 = vmatmul.msk.bf16.gmra.mxu1 %vm1237_vm2, %v2542_v4 }
 0x940   : > { %6122 = vmatmul.msk.bf16.gmra.mxu2 %vm1237_vm2, %v2542_v4  ;;  %vm2589_vm2 = vcmask 318464  }
 0x9ac   : > { %v2570_v13 = vpop.f32.mrf.mxu0 }
 0x9ad   : > { %v7636_v60 = vadd.f32 %v7622_v41, %v2570_v13 }
 0x9af   : > { %v2615_v28 = vsel %vm7626_vm11, %v7636_v60, -9e+08  ;;  %v2585_v23 = vsel %vm2581_vm12, %v7636_v60, -9e+08  ;;  %v2644_v39 = vsel %vm7631_vm13, %v7636_v60, -9e+08 }
 0x9b0   : > { %v2619_v18 = vsel %vm2589_vm2, %v2615_v28, -inf  ;;  %v2590_v25 = vsel %vm2589_vm2, %v2585_v23, -inf  ;;  %v2648_v11 = vsel %vm2589_vm2, %v2644_v39, -inf  ;;  %v2702_v26 = vsel %vm7654_vm4, %v7636_v60, -9e+08 }
 0x9b1   : > { %2620 = vmax.xlane.f32.xlu1 %v2619_v18  ;;  %2591 = vmax.xlane.f32.xlu0 %v2590_v25  ;;  %v2673_v7 = vsel %vm7658_vm5, %v7636_v60, -9e+08  ;;  %v2706_v30 = vsel %vm2589_vm2, %v2702_v26, -inf }
 0x9b2   : > { %2649 = vmax.xlane.f32.xlu2 %v2648_v11  ;;  %v2677_v27 = vsel %vm2589_vm2, %v2673_v7, -inf  ;;  %v6728_v11 = vld [vmem:[%s7155_s11 + $0x28] sm:$0xff] }
 0x9b3   : > { %v3399_v55 = vpop.f32.mrf.mxu2 }
 0x9b4   : > { %v3413_v32 = vpack.c.bf16 %v3399_v55, %v3399_v55  ;;  %v2572_v15 = vpop.f32.mrf.mxu0  ;;  %v4014_v55 = vpack.c.bf16 %v6728_v11, %v6728_v11 }
 0x9b5   : > { %v7663_v5 = vadd.f32 %v7622_v41, %v2572_v15 }
 0x9b6   : > { %v7673_v16 = vsel %vm2198_vm9, %v3413_v32, 0  ;;  %v6729_v32 = vld [vmem:[%s7155_s11 + $0x50] sm:$0xff] }
 0x9b7   : > { %3430 = vmatpush.bf16.msra.mxu3 %v7673_v16  ;;  %v2616_v3 = vsel %vm7626_vm11, %v7663_v5, -9e+08  ;;  %v2586_v10 = vsel %vm2581_vm12, %v7663_v5, -9e+08  ;;  %v2645_v24 = vsel %vm7631_vm13, %v7663_v5, -9e+08  ;;  %v4583_v15 = vpack.c.bf16 %v6729_v32, %v6729_v32 }
 0x9b8   : > { %v2622_v6 = vsel %vm2589_vm2, %v2616_v3, -inf  ;;  %v2703_v44 = vsel %vm7654_vm4, %v7663_v5, -9e+08  ;;  %v2593_v50 = vsel %vm2589_vm2, %v2586_v10, -inf  ;;  %v2651_v52 = vsel %vm2589_vm2, %v2645_v24, -inf  ;;  %v6732_v24 = vld [vmem:[%s7155_s11 + $0x30] sm:$0xff] }
 0x9b9   : > { %2707 = vmax.xlane.f32.xlu1 %v2706_v30  ;;  %2678 = vmax.xlane.f32.xlu0 %v2677_v27  ;;  %v2709_v12 = vsel %vm2589_vm2, %v2703_v44, -inf  ;;  %v2674_v53 = vsel %vm7658_vm5, %v7663_v5, -9e+08  ;;  %v6730_v30 = vld [vmem:[%s7155_s11 + $0x10] sm:$0xff]  ;;  %v4582_v0 = vpack.c.bf16 %v6732_v24, %v6732_v24 }
 0x9ba   : > { %6123 = vmatmul.msk.bf16.vlgmr.msra.gmra.mxu3 %vm1851_vm14, %v3409_v19  ;;  %2623 = vmax.xlane.f32.xlu2 %v2622_v6  ;;  %v2680_v63 = vsel %vm2589_vm2, %v2674_v53, -inf  ;;  %v4581_v27 = vpack.c.bf16 %v6730_v30, %v6730_v30  ;;  %v6731_v6 = vld [vmem:[%s7155_s11 + $0x68] sm:$0xff] }
 0x9bb   : > { %v3401_v31 = vpop.f32.mrf.mxu2 }
 0x9bc   : > { %v3414_v22 = vpack.c.bf16 %v3401_v31, %v3401_v31  ;;  %v2575_v48 = vpop.f32.mrf.mxu0  ;;  %v4016_v31 = vpack.c.bf16 %v6731_v6, %v6731_v6 }
 0x9bd   : > { %v7701_v38 = vadd.f32 %v7622_v41, %v2575_v48  ;;  %v6734_v48 = vld [vmem:[%s7155_s11 + $0x18] sm:$0xff] }
 0x9be   : > { %v7691_v45 = vsel %vm2198_vm9, %v3414_v22, 0  ;;  %v5149_v44 = vpack.c.bf16 %v6734_v48, %v6734_v48 }
 0x9bf   : > { %3449 = vmatpush.bf16.msra.mxu0 %v7691_v45  ;;  %v2617_v58 = vsel %vm7626_vm11, %v7701_v38, -9e+08  ;;  %v2587_v40 = vsel %vm2581_vm12, %v7701_v38, -9e+08  ;;  %v2646_v57 = vsel %vm7631_vm13, %v7701_v38, -9e+08 }
 0x9c0   : > { %v2625_v47 = vsel %vm2589_vm2, %v2617_v58, -inf  ;;  %v2596_v37 = vsel %vm2589_vm2, %v2587_v40, -inf  ;;  %v2704_v61 = vsel %vm7654_vm4, %v7701_v38, -9e+08  ;;  %v2675_v13 = vsel %vm7658_vm5, %v7701_v38, -9e+08  ;;  %v7799_v40 = vpop.f32.mrf.mxu1 }
 0x9c1   : > { %2594 = vmax.xlane.f32.xlu1 %v2593_v50  ;;  %2652 = vmax.xlane.f32.xlu0 %v2651_v52  ;;  %v2654_v28 = vsel %vm2589_vm2, %v2646_v57, -inf  ;;  %v2712_v23 = vsel %vm2589_vm2, %v2704_v61, -inf  ;;  %v2683_v18 = vsel %vm2589_vm2, %v2675_v13, -inf  ;;  %v6735_v50 = vld [vmem:[%s7155_s11 + $0x70] sm:$0xff]  ;;  %v7822_v13 = vsel %vm7631_vm13, 1.0, %v11479_v9 }
 0x9c2   : > { %2710 = vmax.xlane.f32.xlu2 %v2709_v12  ;;  %6124 = vmatmul.msk.bf16.vlgmr.msra.gmra.mxu0 %vm1851_vm14, %v3410_v43  ;;  %v6733_v43 = vld [vmem:[%s7155_s11 + $0x58] sm:$0xff]  ;;  %v4584_v52 = vpack.c.bf16 %v6735_v50, %v6735_v50 }
 0x9c3   : > { %4027 = vmatpush.bf16.msrb.mxu0 %v7673_v16  ;;  %v3404_v59 = vpop.f32.mrf.mxu2  ;;  %v6736_v12 = vld [vmem:[%s7155_s11 + $0x38] sm:$0xff] }
 0x9c4   : > { %v3415_v14 = vpack.c.bf16 %v3404_v59, %v3404_v59  ;;  %v2577_v42 = vpop.f32.mrf.mxu0  ;;  %v5150_v59 = vpack.c.bf16 %v6736_v12, %v6736_v12 }
 0x9c5   : > { %v7740_v39 = vadd.f32 %v7622_v41, %v2577_v42 }
 0x9c6   : > { %v3459_v46 = vsel %vm2198_vm9, %v3415_v14, 0  ;;  %v6737_v14 = vld [vmem:[%s7155_s11 + $0x78] sm:$0xff]  ;;  %s11712_s11 = sld [smem:[#allocation27_spill]] }
 0x9c7   : > { %4595 = vmatpush.bf16.msra.mxu0 %v7673_v16  ;;  %3468 = vmatpush.bf16.msrb.mxu1 %v3459_v46  ;;  %v2618_v25 = vsel %vm7626_vm11, %v7740_v39, -9e+08  ;;  %v2588_v41 = vsel %vm2581_vm12, %v7740_v39, -9e+08  ;;  %v2647_v26 = vsel %vm7631_vm13, %v7740_v39, -9e+08  ;;  %v5152_v53 = vpack.c.bf16 %v6737_v14, %v6737_v14 }
 0x9c8   : > { %4059 = vmatpush.bf16.msrb.mxu2 %v3459_v46  ;;  %v2628_v7 = vsel %vm2589_vm2, %v2618_v25, -inf  ;;  %v2599_v29 = vsel %vm2589_vm2, %v2588_v41, -inf  ;;  %v2657_v19 = vsel %vm2589_vm2, %v2647_v26, -inf  ;;  %v2676_v3 = vsel %vm7658_vm5, %v7740_v39, -9e+08 }
 0x9c9   : > { %2681 = vmax.xlane.f32.xlu1 %v2680_v63  ;;  %2626 = vmax.xlane.f32.xlu0 %v2625_v47  ;;  %v2686_v10 = vsel %vm2589_vm2, %v2676_v3, -inf  ;;  %v7804_v47 = vsel %vm7626_vm11, 1.0, %v11479_v9 }
 0x9ca   : > { %6125 = vmatmul.msk.bf16.vlgmr.msrb.gmra.mxu1 %vm1851_vm14, %v3411_v34  ;;  %2597 = vmax.xlane.f32.xlu2 %v2596_v37  ;;  %v7795_v34 = vsel %vm3252_vm6, 1.0, %v11479_v9  ;;  %v7809_v37 = vsel %vm2581_vm12, 1.0, %v11479_v9  ;;  %vm3533_vm6 = vcmp.ge.s32.totalorder %v7429_v51, 6 }
 0x9cb   : > { %4043 = vmatpush.bf16.msra.mxu1 %v7691_v45  ;;  %6141 = vmatmul.msk.bf16.vlgmr.msrb.gmra.mxu2 %vm1851_vm14, %v4015_v17  ;;  %v3406_v49 = vpop.f32.mrf.mxu2  ;;  %v3255_v17 = vmul.f32 %v7795_v34, %v7636_v60 }
 0x9cc   : > { %4627 = vmatpush.bf16.msra.mxu2 %v3459_v46  ;;  %v3416_v2 = vpack.c.bf16 %v3406_v49, %v3406_v49 }
 0x9ce   : > { %v3478_v4 = vsel %vm2198_vm9, %v3416_v2, 0  ;;  %vm3161_vm9 = vcmp.eq.s32.totalorder %v7429_v51, 30  ;;  %v3256_v2 = vmul.f32 %v7795_v34, %v7663_v5 }
 0x9cf   : > { %4611 = vmatpush.bf16.msrb.mxu1 %v7691_v45  ;;  %3487 = vmatpush.bf16.msrb.mxu3 %v3478_v4  ;;  %v7789_v58 = vsel %vm3161_vm9, 1.0, %v11479_v9 }
 0x9d0   : > { %5195 = vmatpush.bf16.msrb.mxu2 %v3459_v46  ;;  %v3164_v33 = vmul.f32 %v7789_v58, %v7636_v60  ;;  %v6099_v46 = vmul.f32 -1.442695, %v3255_v17  ;;  %v3165_v49 = vmul.f32 %v7789_v58, %v7663_v5  ;;  %v6100_v42 = vmul.f32 -1.442695, %v3256_v2 }
 0x9d1   : > { %2655 = vmax.xlane.f32.xlu1 %v2654_v28  ;;  %2713 = vmax.xlane.f32.xlu0 %v2712_v23  ;;  %v7828_v23 = vsel %vm7658_vm5, 1.0, %v11479_v9  ;;  %v3166_v26 = vmul.f32 %v7789_v58, %v7701_v38 }
 0x9d2   : > { %6126 = vmatmul.msk.bf16.vlgmr.msrb.gmra.mxu3 %vm1851_vm14, %v3412_v62  ;;  %6139 = vmatmul.msk.bf16.vlgmr.msrb.gmra.mxu0 %vm1851_vm14, %v4013_v20  ;;  %v6094_v54 = vmul.f32 -1.442695, %v3164_v33  ;;  %v6095_v62 = vmul.f32 -1.442695, %v3165_v49 }
 0x9d3   : > { %4075 = vmatpush.bf16.msra.mxu3 %v3478_v4  ;;  %5163 = vmatpush.bf16.msrb.mxu0 %v7673_v16  ;;  %v2705_v16 = vsel %vm7654_vm4, %v7740_v39, -9e+08 }
 0x9d4   : > { %2684 = vmax.xlane.f32.xlu2 %v2683_v18  ;;  %v2715_v22 = vsel %vm2589_vm2, %v2705_v16, -inf  ;;  %6418 = vpow2.f32 %v6094_v54  ;;  %v7831_v18 = vpop.f32.mrf.mxu1  ;;  %v3257_v54 = vmul.f32 %v7795_v34, %v7701_v38 }
 0x9d5   : > { %6420 = vpow2.f32 %v6099_v46 }
 0x9d7   : > { %4643 = vmatpush.bf16.msrb.mxu3 %v3478_v4 }
 0x9d9   : > { %2629 = vmax.xlane.f32.xlu1 %v2628_v7  ;;  %2600 = vmax.xlane.f32.xlu0 %v2599_v29 }
 0x9da   : > { %6140 = vmatmul.msk.bf16.vlgmr.msra.gmra.mxu1 %vm1851_vm14, %v4014_v55  ;;  %v6419_v63 = vpop.eup %6418 }
 0x9db   : > { %6153 = vmatmul.msk.bf16.vlgmr.msra.gmra.mxu2 %vm1851_vm14, %v4583_v15  ;;  %5179 = vmatpush.bf16.msra.mxu1 %v7691_v45  ;;  %v5151_v45 = vpack.c.bf16 %v6733_v43, %v6733_v43  ;;  %v7817_v35 = vadd.f32 1.0, %v6419_v63 }
 0x9dc   : > { %2658 = vmax.xlane.f32.xlu2 %v2657_v19 }
 0x9dd   : > { %6422 = vrcp.f32 %v7817_v35  ;;  %vm3189_vm7 = vweird.f32 %v7817_v35 }
 0x9de   : > { %6424 = vpow2.f32 %v6095_v62 }
 0x9df   : > { %6426 = vpow2.f32 %v6100_v42 }
 0x9e1   : > { %2716 = vmax.xlane.f32.xlu1 %v2715_v22  ;;  %2687 = vmax.xlane.f32.xlu0 %v2686_v10 }
 0x9e2   : > { %6142 = vmatmul.msk.bf16.vlgmr.msra.gmra.mxu3 %vm1851_vm14, %v4016_v31  ;;  %6151 = vmatmul.msk.bf16.vlgmr.msra.gmra.mxu0 %vm1851_vm14, %v4581_v27  ;;  %v6096_v31 = vmul.f32 -1.442695, %v3166_v26 }
 0x9e3   : > { %5211 = vmatpush.bf16.msra.mxu3 %v3478_v4  ;;  %v6421_v4 = vpop.eup %6420 }
 0x9e4   : > { %v7834_v41 = vadd.f32 1.0, %v6421_v4  ;;  %v7847_v29 = vpop.eup %6422  ;;  %v6101_v4 = vmul.f32 -1.442695, %v3257_v54 }
 0x9e5   : > { %v6425_v1 = vpop.eup %6424  ;;  %v3185_v22 = vmul.f32 %v7847_v29, %v7817_v35  ;;  %vm3190_vm8 = vweird.f32 %v7847_v29 }
 0x9e6   : > { %6428 = vrcp.f32 %v7834_v41  ;;  %v6427_v27 = vpop.eup %6426  ;;  %v7858_v24 = vadd.f32 1.0, %v6425_v1  ;;  %v3286_v33 = vand.u32 2147483648, %v7834_v41  ;;  %v3284_v62 = vand.u32 2147483647, %v7834_v41  ;;  %vm7944_vm13 = vmor %vm3189_vm7, %vm3190_vm8 }
 0x9e7   : > { %6430 = vpow2.f32 %v6096_v31  ;;  %vm3280_vm12 = vweird.f32 %v7834_v41  ;;  %vm3738_vm8 = vcmp.eq.s32.totalorder %v7429_v51, 4 }
 0x9e8   : > { %6432 = vrcp.f32 %v7858_v24  ;;  %v3210_v42 = vand.u32 2147483648, %v7858_v24  ;;  %vm7957_vm15 = vcmp.eq.f32.partialorder %v3284_v62, 8.507059e+37  ;;  %vm3204_vm5 = vweird.f32 %v7858_v24 }
 0x9ea   : > { %6152 = vmatmul.msk.bf16.vlgmr.msrb.gmra.mxu1 %vm1851_vm14, %v4582_v0 }
 0x9eb   : > { %6165 = vmatmul.msk.bf16.vlgmr.msrb.gmra.mxu2 %vm1851_vm14, %v5151_v45 }
 0x9ec   : > { %v7864_v50 = vpop.eup %6428 }
 0x9ed   : > { %vm3281_vm10 = vweird.f32 %v7864_v50 }
 0x9ee   : > { %vm7997_vm4 = vmor %vm3280_vm12, %vm3281_vm10 }
 0x9f2   : > { %6154 = vmatmul.msk.bf16.vlgmr.msrb.gmra.mxu3 %vm1851_vm14, %v4584_v52  ;;  %6163 = vmatmul.msk.bf16.vlgmr.msrb.gmra.mxu0 %vm1851_vm14, %v5149_v44  ;;  %v7862_v44 = vadd.f32 1.0, %v6427_v27  ;;  %v7866_v52 = vpop.f32.mrf.mxu1  ;;  %v3208_v27 = vand.u32 2147483647, %v7858_v24 }
 0x9f4   : > { %6434 = vrcp.f32 %v7862_v44  ;;  %vm3295_vm9 = vweird.f32 %v7862_v44  ;;  %vm8031_vm7 = vcmp.eq.f32.partialorder %v3208_v27, 8.507059e+37 }
 0x9fa   : > { %6164 = vmatmul.msk.bf16.vlgmr.msra.gmra.mxu1 %vm1851_vm14, %v5150_v59 }
 0xa02   : > { %6166 = vmatmul.msk.bf16.vlgmr.msra.gmra.mxu3 %vm1851_vm14, %v5152_v53  ;;  %vm3142_vm14 = vcmp.eq.s32.totalorder %v7429_v51, 24  ;;  %v3195_v53 = vand.u32 2147483648, %v7817_v35 }
 0xa03   : > { %v7843_v15 = vsel %vm3142_vm14, 1.0, %v11479_v9  ;;  %vm3534_vm14 = vcmp.lt.s32.totalorder %v7429_v51, 10 }
 0xa04   : > { %v3145_v3 = vmul.f32 %v7843_v15, %v7636_v60  ;;  %v3146_v30 = vmul.f32 %v7843_v15, %v7663_v5  ;;  %v3147_v0 = vmul.f32 %v7843_v15, %v7701_v38  ;;  %vm8048_vm10 = vmand %vm3533_vm6, %vm3534_vm14 }
 0xa06   : > { %v3149_v45 = vmax.f32 %v3145_v3, 0.0  ;;  %v3150_v48 = vmax.f32 %v3146_v30, 0.0  ;;  %v3151_v63 = vmax.f32 %v3147_v0, 0.0 }
 0xa08   : > { %v7876_v2 = vmul.f32 %v7843_v15, %v3149_v45  ;;  %v7917_v45 = vpop.f32.mrf.mxu1 }
 0xa0a   : > { %11709 = vst [vmem:[#allocation36_spill] sm:$0xff] %v7876_v2 }
 0xa24   : > { %v2621_v57 = vpop.xlane.xlu1 %2620  ;;  %v2592_v61 = vpop.xlane.xlu0 %2591 }
 0xa25   : > { %v2631_v36 = vmul.f32 %v7804_v47, %v2621_v57  ;;  %v2602_v56 = vmul.f32 %v7809_v37, %v2592_v61  ;;  %v2650_v20 = vpop.xlane.xlu2 %2649  ;;  %v3276_v57 = vmul.f32 %v7864_v50, %v7834_v41  ;;  %v7881_v61 = vmul.f32 %v7843_v15, %v3150_v48 }
 0xa26   : > { %v2660_v25 = vmul.f32 %v7822_v13, %v2650_v20 }
 0xa27   : > { %v2635_v28 = vadd.f32 %v2631_v36, %v2602_v56  ;;  %11710 = vst [vmem:[#allocation37_spill] sm:$0xff] %v7881_v61  ;;  %v3193_v56 = vand.u32 2147483647, %v7817_v35  ;;  %v3277_v26 = vsub.f32 1.0, %v3276_v57 }
 0xa29   : > { %v2664_v21 = vadd.f32 %v2660_v25, %v2635_v28  ;;  %v6431_v28 = vpop.eup %6430  ;;  %vm7903_vm11 = vcmp.eq.f32.partialorder %v3193_v56, 8.507059e+37 }
 0xa2a   : > { %v7915_v0 = vadd.f32 1.0, %v6431_v28 }
 0xa2c   : > { %v2708_v11 = vpop.xlane.xlu1 %2707  ;;  %v2679_v55 = vpop.xlane.xlu0 %2678  ;;  %v3225_v35 = vand.u32 2147483648, %v7915_v0 }
 0xa2d   : > { %v2689_v32 = vmul.f32 %v7828_v23, %v2679_v55  ;;  %v2624_v7 = vpop.xlane.xlu2 %2623  ;;  %v2718_v19 = vmul.f32 %v7839_v8, %v2708_v11  ;;  %v7890_v11 = vor.u32 1.1754944e-38, %v3195_v53  ;;  %v7892_v55 = vor.u32 1.1754944e-38, %v3286_v33 }
 0xa2e   : > { %v2632_v46 = vmul.f32 %v7804_v47, %v2624_v7  ;;  %v3301_v7 = vand.u32 2147483648, %v7862_v44  ;;  %v7926_v53 = vmul.f32 %v7843_v15, %v7740_v39 }
 0xa2f   : > { %v2693_v16 = vadd.f32 %v2689_v32, %v2664_v21  ;;  %v7895_v21 = vmul.f32 %v7843_v15, %v3151_v63 }
 0xa30   : > { %v7935_v63 = vor.u32 1.1754944e-38, %v3301_v7 }
 0xa31   : > { %v2722_v6 = vadd.f32 %v2718_v19, %v2693_v16  ;;  %11711 = vst [vmem:[#allocation38_spill] sm:$0xff] %v7895_v21  ;;  %v7900_v19 = vpop.eup %6432 }
 0xa32   : > { %v7909_v31 = vpop.eup %6434  ;;  %v3200_v56 = vmul.f32 %v7900_v19, %v7858_v24  ;;  %vm3205_vm1 = vweird.f32 %v7900_v19 }
 0xa33   : > { %v2726_v10 = vsub.f32 %v7636_v60, %v2722_v6  ;;  %v3186_v60 = vsub.f32 1.0, %v3185_v22  ;;  %v3299_v6 = vand.u32 2147483647, %v7862_v44  ;;  %vm3296_vm12 = vweird.f32 %v7909_v31 }
 0xa34   : > { %v2595_v43 = vpop.xlane.xlu1 %2594  ;;  %v2653_v14 = vpop.xlane.xlu0 %2652 }
 0xa35   : > { %v2730_v12 = vmin.f32 %v2726_v10, 0.0  ;;  %v2603_v59 = vmul.f32 %v7809_v37, %v2595_v43  ;;  %v2711_v49 = vpop.xlane.xlu2 %2710  ;;  %v3187_v20 = vmul.f32 %v7847_v29, %v3186_v60  ;;  %v2661_v25 = vmul.f32 %v7822_v13, %v2653_v14 }
 0xa36   : > { %v7913_v10 = vor.u32 1.1754944e-38, %v3210_v42  ;;  %v2719_v48 = vmul.f32 %v7839_v8, %v2711_v49 }
 0xa37   : > { %v2734_v17 = vmul.f32 1.442695, %v2730_v12  ;;  %v2636_v36 = vadd.f32 %v2632_v46, %v2603_v59  ;;  %v3188_v22 = vadd.f32 %v7847_v29, %v3187_v20  ;;  %v7922_v59 = vld [vmem:[%s11712_s11] ss:$0 sm:$0xff]  ;;  %v3278_v46 = vmul.f32 %v7864_v50, %v3277_v26  ;;  %s10563_s11 = scalar_lea.hbm %s12158_s15, %s6206_s28  ;;  %s5718_s28 = scalar_lea.sflag [#allocation5], %s7149_s2 }
 0xa38   : > { %v3167_v20 = vmul.f32 %v7789_v58, %v7740_v39  ;;  %s5737_s15 = sshll.u32 %s10563_s11, 4  ;;  %s10603_s15 = int_to_ptr.hbm [resolvable:$true] %s5737_s15 }
 0xa39   : > { %6436 = vpow2.f32 %v2734_v17  ;;  %v2665_v16 = vadd.f32 %v2661_v25, %v2636_v36  ;;  %v3192_v28 = vsel %vm7944_vm13, %v7847_v29, %v3188_v22  ;;  %v3291_v25 = vmul.f32 %v7909_v31, %v7862_v44  ;;  %s6782_s11 = sshra.s32 %s10603_s15, 4  ;;  %s6783_s11 = int_to_ptr.hbm [resolvable:$true] %s6782_s11 }
 0xa3a   : > { %6438 = vpow2.f32 %v6101_v4  ;;  %vm3829_vm13 = vcmp.eq.s32.totalorder %v7429_v51, 5  ;;  %s6784_s10 = scalar_lea.hbm %s6783_s11, 32  ;;  %p6789_p0 = scmp.lt.s32.totalorder %s6783_s11, %s12159_s27 }
 0xa3b   : > { %6440 = vrcp.f32 %v7915_v0  ;;  %v3292_v36 = vsub.f32 1.0, %v3291_v25  ;;  %p6785_p6 = scmp.ne.s32.totalorder %s6783_s11, %s6784_s10  ;;  %p6790_p1 = scmp.lt.s32.totalorder %s6788_s1, %s6784_s10 }
 0xa3c   : > { %v2682_v32 = vpop.xlane.xlu1 %2681  ;;  %v2627_v33 = vpop.xlane.xlu0 %2626 }
 0xa3d   : > { %v3432_v1 = vpop.f32.mrf.mxu3  ;;  %v2690_v3 = vmul.f32 %v7828_v23, %v2682_v32  ;;  %v2598_v42 = vpop.xlane.xlu2 %2597  ;;  %p6786_p12 = pnand %p6785_p6, %p7119_p11  ;;  %p6791_p2 = por %p6790_p1, %p6789_p0 }
 0xa3e   : > { %v3493_v12 = vadd.f32 %v3432_v1, %v7799_v40  ;;  %v3152_v1 = vmax.f32 %v7926_v53, 0.0 }
 0xa3f   : > { %v6437_v43 = vpop.eup %6436  ;;  %v2694_v14 = vadd.f32 %v2690_v3, %v2665_v16  ;;  %v3451_v60 = vpop.f32.mrf.mxu0  ;;  %v3279_v16 = vadd.f32 %v7864_v50, %v3278_v46  ;;  %v7977_v3 = vmul.f32 %v7795_v34, %v7740_v39  ;;  %v3197_v46 = vsel %vm7903_vm11, %v7890_v11, %v3192_v28  ;;  %p6787_p13 = pneg %p6786_p12 }
 0xa40   : > { %v7929_v54 = vmul.f32 %v6437_v43, %v7822_v13  ;;  %v7932_v17 = vmul.f32 %v6437_v43, %v7804_v47  ;;  %v7938_v57 = vmul.f32 %v6437_v43, %v7809_v37  ;;  %v7965_v32 = vadd.f32 %v7922_v59, %v3493_v12  ;;  %v6439_v62 = vpop.eup %6438 }
 0xa41   : > { %v2723_v49 = vadd.f32 %v2719_v48, %v2694_v14  ;;  %v3201_v48 = vsub.f32 1.0, %v3200_v56  ;;  %v6097_v12 = vmul.f32 -1.442695, %v3167_v20  ;;  %v2633_v14 = vmul.f32 %v7804_v47, %v2627_v33  ;;  %v8002_v30 = vpop.eup %6440  ;;  %p6792_p3 = pnand %p6791_p2, %p6787_p13 }
 0xa42   : > { %11715 = vst [vmem:[#allocation39_spill] sm:$0xff] %v7929_v54  ;;  %v2906_v4 = vsel %vm2589_vm2, %v7929_v54, 0.0  ;;  %v2826_v7 = vsel %vm2589_vm2, %v7932_v17, 0.0  ;;  %v2746_v29 = vsel %vm2589_vm2, %v7938_v57, 0.0  ;;  %v3508_v56 = vsel %vm3504_vm0, %v7965_v32, -9e+08 }
 0xa43   : > { %11716 = vst [vmem:[#allocation40_spill] sm:$0xff] %v7932_v17  ;;  %v2727_v26 = vsub.f32 %v7663_v5, %v2723_v49  ;;  %2907 = vadd.xlane.f32.xlu1 %v2906_v4  ;;  %2827 = vadd.xlane.f32.xlu0 %v2826_v7  ;;  %v2604_v4 = vmul.f32 %v7809_v37, %v2598_v42  ;;  %vm8055_vm11 = vcmp.eq.f32.partialorder %v3299_v6, 8.507059e+37  ;;  %v8059_v11 = vadd.f32 1.0, %v6439_v62 }
 0xa44   : > { %11717 = vst [vmem:[#allocation41_spill] sm:$0xff] %v7938_v57  ;;  %2747 = vadd.xlane.f32.xlu2 %v2746_v29  ;;  %v2656_v49 = vpop.xlane.xlu1 %2655  ;;  %v7991_v20 = vmul.f32 %v6437_v43, %v7839_v8  ;;  %v3494_v33 = vadd.f32 %v3451_v60, %v7831_v18  ;;  %v8006_v42 = vmul.f32 %v6437_v43, %v7828_v23  ;;  %v2714_v60 = vpop.xlane.xlu0 %2713  ;;  %v3513_v43 = vsel %vm3512_vm3, %v3508_v56, -inf }
 0xa45   : > { %11722 = vst [vmem:[#allocation42_spill] sm:$0xff] %v7965_v32  ;;  %v2731_v5 = vmin.f32 %v2727_v26, 0.0  ;;  %v3434_v22 = vpop.f32.mrf.mxu3  ;;  %v3283_v28 = vsel %vm7997_vm4, %v7864_v50, %v3279_v16  ;;  %v2662_v25 = vmul.f32 %v7822_v13, %v2656_v49  ;;  %v8015_v26 = vmul.f32 %v7789_v58, %v3197_v46 }
 0xa46   : > { %11723 = vst [vmem:[#allocation43_spill] sm:$0xff] %v7991_v20  ;;  %v3293_v50 = vmul.f32 %v7909_v31, %v3292_v36  ;;  %v2637_v16 = vadd.f32 %v2633_v14, %v2604_v4  ;;  %v3066_v22 = vsel %vm2589_vm2, %v7991_v20, 0.0  ;;  %v2986_v49 = vsel %vm2589_vm2, %v8006_v42, 0.0 }
 0xa47   : > { %v2736_v53 = vmul.f32 1.442695, %v2731_v5  ;;  %v3453_v7 = vpop.f32.mrf.mxu0  ;;  %v7985_v29 = vpop.f32.mrf.mxu1  ;;  %11726 = vst [vmem:[#allocation44_spill] sm:$0xff] %v8006_v42  ;;  %v3202_v5 = vmul.f32 %v7900_v19, %v3201_v48  ;;  %v3288_v48 = vsel %vm7957_vm15, %v7892_v55, %v3283_v28  ;;  %v8037_v14 = vadd.f32 %v7922_v59, %v3494_v33  ;;  %vm8091_vm15 = vmor %vm3204_vm5, %vm3205_vm1 }
 0xa48   : > { %11727 = vst [vmem:[#allocation45_spill] sm:$0xff] %v8015_v26  ;;  %v2685_v36 = vpop.xlane.xlu2 %2684  ;;  %v2666_v55 = vadd.f32 %v2662_v25, %v2637_v16  ;;  %v8062_v33 = vmul.f32 %v7795_v34, %v3288_v48  ;;  %v3294_v28 = vadd.f32 %v7909_v31, %v3293_v50  ;;  %v8067_v25 = vmul.f32 %v7843_v15, %v3152_v1  ;;  %vm8108_vm1 = vmor %vm3295_vm9, %vm3296_vm12 }
 0xa49   : > { %6442 = vpow2.f32 %v2736_v53  ;;  %11730 = vst [vmem:[#allocation46_spill] sm:$0xff] %v8037_v14  ;;  %v3215_v53 = vmul.f32 %v8002_v30, %v7915_v0  ;;  %v3203_v7 = vadd.f32 %v7900_v19, %v3202_v5  ;;  %v8074_v6 = vsel %vm3738_vm8, 1.0, %v11479_v9 }
 0xa4a   : > { %6444 = vpow2.f32 %v6097_v12  ;;  %11735 = vst [vmem:[#allocation47_spill] sm:$0xff] %v8062_v33  ;;  %v2691_v62 = vmul.f32 %v7828_v23, %v2685_v36  ;;  %v6102_v50 = vmul.f32 -1.442695, %v7977_v3  ;;  %v3539_v15 = vsel %vm8048_vm10, %v8037_v14, -9e+08 }
 0xa4b   : > { %3514 = vmax.xlane.f32.xlu1 %v3513_v43  ;;  %3067 = vadd.xlane.f32.xlu0 %v3066_v22  ;;  %11736 = vst [vmem:[#allocation48_spill] sm:$0xff] %v8067_v25  ;;  %v3538_v1 = vsel %vm8048_vm10, %v7965_v32, -9e+08  ;;  %v3216_v22 = vsub.f32 1.0, %v3215_v53  ;;  %v3207_v36 = vsel %vm8091_vm15, %v7900_v19, %v3203_v7  ;;  %6446 = vrcp.f32 %v8059_v11 }
 0xa4c   : > { %2987 = vadd.xlane.f32.xlu2 %v2986_v49  ;;  %v8095_v49 = vor.u32 1.1754944e-38, %v3225_v35  ;;  %v2695_v3 = vadd.f32 %v2691_v62, %v2666_v55  ;;  %v3741_v53 = vmul.f32 %v8074_v6, %v7965_v32  ;;  %v8118_v35 = vsel %vm3829_vm13, 1.0, %v11479_v9  ;;  %v2601_v41 = vpop.xlane.xlu0 %2600  ;;  %v2630_v46 = vpop.xlane.xlu1 %2629 }
 0xa4d   : > { %v3298_v19 = vsel %vm8108_vm1, %v7909_v31, %v3294_v28  ;;  %vm3219_vm4 = vweird.f32 %v7915_v0  ;;  %v3316_v44 = vand.u32 2147483648, %v8059_v11  ;;  %v2720_v7 = vmul.f32 %v7839_v8, %v2714_v60 }
 0xa4e   : > { %v8042_v4 = vpop.f32.mrf.mxu2  ;;  %v3545_v62 = vsel %vm3512_vm3, %v3539_v15, -inf  ;;  %v3495_v9 = vadd.f32 %v7985_v29, %v7866_v52  ;;  %v3212_v31 = vsel %vm8031_vm7, %v7913_v10, %v3207_v36  ;;  %v3217_v28 = vmul.f32 %v8002_v30, %v3216_v22 }
 0xa4f   : > { %v8069_v5 = vpop.eup %6442  ;;  %v3472_v12 = vpop.f32.mrf.mxu1  ;;  %v3832_v15 = vmul.f32 %v8118_v35, %v7965_v32  ;;  %vm3220_vm5 = vweird.f32 %v8002_v30  ;;  %6448 = vpow2.f32 %v6102_v50  ;;  %v3742_v29 = vmul.f32 %v8074_v6, %v8037_v14 }
 0xa50   : > { %v8078_v43 = vpop.f32.mrf.mxu0  ;;  %v8099_v48 = vmul.f32 %v8069_v5, %v7804_v47  ;;  %v6445_v55 = vpop.eup %6444  ;;  %v3542_v12 = vsel %vm3512_vm3, %v3538_v1, -inf  ;;  %v2724_v1 = vadd.f32 %v2720_v7, %v2695_v3  ;;  %v3303_v10 = vsel %vm8055_vm11, %v7935_v63, %v3298_v19  ;;  %vm8197_vm6 = vmor %vm3219_vm4, %vm3220_vm5 }
 0xa51   : > { %v11742_v22 = vand.u32 2147483647, %v7915_v0  ;;  %v8153_v3 = vor.u32 1.1754944e-38, %v3316_v44  ;;  %v8157_v7 = vpop.eup %6446  ;;  %v6130_v50 = vmul.f32 -1.442695, %v3741_v53  ;;  %v8165_v63 = vmul.f32 %v8069_v5, %v7809_v37 }
 0xa52   : > { %11739 = vst [vmem:[#allocation49_spill] sm:$0xff] %v8099_v48  ;;  %v2829_v16 = vsel %vm2589_vm2, %v8099_v48, 0.0  ;;  %v8168_v56 = vmul.f32 %v7789_v58, %v3212_v31  ;;  %v8171_v19 = vadd.f32 %v7922_v59, %v3495_v9  ;;  %v3509_v53 = vsel %vm3504_vm0, %v8037_v14, -9e+08 }
 0xa53   : > { %3546 = vmax.xlane.f32.xlu0 %v3545_v62  ;;  %2830 = vadd.xlane.f32.xlu1 %v2829_v16  ;;  %vm8149_vm9 = vcmp.eq.f32.partialorder %v11742_v22, 8.507059e+37  ;;  %v3833_v62 = vmul.f32 %v8118_v35, %v8037_v14  ;;  %11745 = vst [vmem:[#allocation50_spill] sm:$0xff] %v8165_v63  ;;  %v8178_v44 = vmul.f32 %v8069_v5, %v7839_v8  ;;  %v6135_v22 = vmul.f32 -1.442695, %v3832_v15  ;;  %v2659_v15 = vpop.xlane.xlu2 %2658 }
 0xa54   : > { %3543 = vmax.xlane.f32.xlu2 %v3542_v12  ;;  %11746 = vst [vmem:[#allocation51_spill] sm:$0xff] %v8168_v56  ;;  %v4083_v31 = vadd.f32 %v8042_v4, %v7866_v52  ;;  %v8185_v60 = vmul.f32 %v7795_v34, %v3303_v10  ;;  %v6131_v9 = vmul.f32 -1.442695, %v3742_v29  ;;  %v2634_v21 = vmul.f32 %v7804_v47, %v2630_v46 }
 0xa55   : > { %v8139_v24 = vpop.f32.mrf.mxu3  ;;  %11747 = vst [vmem:[#allocation52_spill] sm:$0xff] %v8171_v19  ;;  %v2605_v56 = vmul.f32 %v7809_v37, %v2601_v41  ;;  %v6449_v33 = vpop.eup %6448  ;;  %v6136_v61 = vmul.f32 -1.442695, %v3833_v62  ;;  %v3743_v41 = vmul.f32 %v8074_v6, %v8171_v19  ;;  %v3306_v0 = vmul.f32 %v8157_v7, %v8059_v11 }
 0xa56   : > { %v4063_v25 = vpop.f32.mrf.mxu2  ;;  %11748 = vst [vmem:[#allocation53_spill] sm:$0xff] %v8178_v44  ;;  %v8211_v10 = vadd.f32 %v7922_v59, %v4083_v31  ;;  %v8226_v4 = vmul.f32 %v8069_v5, %v7822_v13  ;;  %vm3311_vm14 = vweird.f32 %v8157_v7  ;;  %vm3310_vm7 = vweird.f32 %v8059_v11 }
 0xa57   : > { %v8155_v25 = vadd.f32 1.0, %v6445_v55  ;;  %v8161_v16 = vpop.f32.mrf.mxu1  ;;  %v3218_v55 = vadd.f32 %v8002_v30, %v3217_v28  ;;  %11749 = vst [vmem:[#allocation54_spill] sm:$0xff] %v8185_v60  ;;  %v3516_v28 = vsel %vm3512_vm3, %v3509_v53, -inf  ;;  %vm8359_vm13 = vmor %vm3310_vm7, %vm3311_vm14 }
 0xa58   : > { %v4031_v12 = vpop.f32.mrf.mxu0  ;;  %11752 = vst [vmem:[#allocation55_spill] sm:$0xff] %v8211_v10 }
 0xa59   : > { %v2728_v12 = vsub.f32 %v7701_v38, %v2724_v1  ;;  %6450 = vrcp.f32 %v8155_v25  ;;  %v2749_v38 = vsel %vm2589_vm2, %v8165_v63, 0.0  ;;  %v3069_v1 = vsel %vm2589_vm2, %v8178_v44, 0.0  ;;  %11753 = vst [vmem:[#allocation56_spill] sm:$0xff] %v8226_v4 }
 0xa5a   : > { %6452 = vpow2.f32 %v6130_v50  ;;  %v3222_v29 = vsel %vm8197_vm6, %v8002_v30, %v3218_v55  ;;  %v3240_v53 = vand.u32 2147483648, %v8155_v25  ;;  %v2688_v30 = vpop.xlane.xlu0 %2687  ;;  %v8218_v55 = vadd.f32 1.0, %v6449_v33 }
 0xa5b   : > { %2750 = vadd.xlane.f32.xlu0 %v2749_v38  ;;  %6454 = vpow2.f32 %v6135_v22  ;;  %v2732_v46 = vmin.f32 %v2728_v12, 0.0  ;;  %3070 = vadd.xlane.f32.xlu1 %v3069_v1  ;;  %v2638_v38 = vadd.f32 %v2634_v21, %v2605_v56  ;;  %v4081_v22 = vadd.f32 %v8078_v43, %v7799_v40 }
 0xa5c   : > { %3517 = vmax.xlane.f32.xlu2 %v3516_v28  ;;  %6456 = vpow2.f32 %v6131_v9  ;;  %v3834_v28 = vmul.f32 %v8118_v35, %v8171_v19  ;;  %v3227_v9 = vsel %vm8149_vm9, %v8095_v49, %v3222_v29  ;;  %v6132_v21 = vmul.f32 -1.442695, %v3743_v41 }
 0xa5d   : > { %v3491_v50 = vpop.f32.mrf.mxu3  ;;  %6458 = vpow2.f32 %v6136_v61  ;;  %v2663_v33 = vmul.f32 %v7822_v13, %v2659_v15  ;;  %v3307_v61 = vsub.f32 1.0, %v3306_v0  ;;  %v2692_v60 = vmul.f32 %v7828_v23, %v2688_v30 }
 0xa5e   : > { %v8213_v62 = vpop.f32.mrf.mxu2  ;;  %v2738_v50 = vmul.f32 1.442695, %v2732_v46  ;;  %v8238_v26 = vor.u32 1.1754944e-38, %v3240_v53  ;;  %v6137_v2 = vmul.f32 -1.442695, %v3834_v28  ;;  %v8241_v49 = vmul.f32 %v7789_v58, %v3227_v9 }
 0xa5f   : > { %v4047_v12 = vpop.f32.mrf.mxu1  ;;  %v8231_v1 = vpop.eup %6450  ;;  %v2667_v36 = vadd.f32 %v2663_v33, %v2638_v38  ;;  %6460 = vrcp.f32 %v8218_v55  ;;  %v8245_v15 = vadd.f32 %v7922_v59, %v4081_v22  ;;  %v2909_v29 = vsel %vm2589_vm2, %v8226_v4, 0.0 }
 0xa60   : > { %v8222_v31 = vpop.f32.mrf.mxu0  ;;  %v6453_v43 = vpop.eup %6452  ;;  %v4315_v12 = vmul.f32 %v8074_v6, %v8211_v10  ;;  %11754 = vst [vmem:[#allocation57_spill] sm:$0xff] %v8241_v49  ;;  %v3540_v0 = vsel %vm8048_vm10, %v8171_v19, -9e+08  ;;  %v8254_v46 = vmul.f32 %v8069_v5, %v7828_v23  ;;  %6462 = vpow2.f32 %v6132_v21 }
 0xa61   : > { %v6455_v41 = vpop.eup %6454  ;;  %11755 = vst [vmem:[#allocation58_spill] sm:$0xff] %v8245_v15  ;;  %v8256_v28 = vadd.f32 1.0, %v6453_v43  ;;  %v2717_v38 = vpop.xlane.xlu1 %2716  ;;  %v3548_v30 = vsel %vm3512_vm3, %v3540_v0, -inf  ;;  %v3230_v22 = vmul.f32 %v8231_v1, %v8155_v25  ;;  %6464 = vpow2.f32 %v2738_v50 }
 0xa62   : > { %11756 = vst [vmem:[#allocation59_spill] sm:$0xff] %v8254_v46  ;;  %v6457_v53 = vpop.eup %6456  ;;  %v6145_v33 = vmul.f32 -1.442695, %v4315_v12  ;;  %v4403_v56 = vmul.f32 %v8118_v35, %v8211_v10  ;;  %v2696_v49 = vadd.f32 %v2692_v60, %v2667_v36  ;;  %v8266_v21 = vadd.f32 1.0, %v6455_v41 }
 0xa63   : > { %11757 = vst [vmem:[#allocation60_spill] sm:$0xff] %v8256_v28  ;;  %v6459_v9 = vpop.eup %6458  ;;  %3549 = vmax.xlane.f32.xlu1 %v3548_v30  ;;  %6466 = vpow2.f32 %v6137_v2  ;;  %v3308_v0 = vmul.f32 %v8157_v7, %v3307_v61  ;;  %v8271_v50 = vadd.f32 1.0, %v6457_v53  ;;  %v4313_v12 = vmul.f32 %v8074_v6, %v8245_v15 }
 0xa64   : > { %2910 = vadd.xlane.f32.xlu2 %v2909_v29  ;;  %11758 = vst [vmem:[#allocation61_spill] sm:$0xff] %v8266_v21  ;;  %v2989_v29 = vsel %vm2589_vm2, %v8254_v46, 0.0  ;;  %v3496_v60 = vadd.f32 %v8139_v24, %v7917_v45  ;;  %v2721_v36 = vmul.f32 %v7839_v8, %v2717_v38  ;;  %6468 = vrcp.f32 %v8256_v28 }
 0xa65   : > { %v8263_v5 = vpop.f32.mrf.mxu3  ;;  %11759 = vst [vmem:[#allocation62_spill] sm:$0xff] %v8271_v50  ;;  %2990 = vadd.xlane.f32.xlu0 %v2989_v29  ;;  %v8281_v2 = vpop.eup %6460  ;;  %v8284_v61 = vadd.f32 1.0, %v6459_v9  ;;  %v3231_v53 = vsub.f32 1.0, %v3230_v22  ;;  %6470 = vpow2.f32 %v6145_v33  ;;  %v6149_v46 = vmul.f32 -1.442695, %v4403_v56 }
 0xa66   : > { %v4631_v43 = vpop.f32.mrf.mxu2  ;;  %v4401_v24 = vmul.f32 %v8118_v35, %v8245_v15  ;;  %v2725_v38 = vadd.f32 %v2721_v36, %v2696_v49  ;;  %v6463_v29 = vpop.eup %6462  ;;  %6472 = vrcp.f32 %v8266_v21  ;;  %v8293_v44 = vadd.f32 %v8157_v7, %v3308_v0 }
 0xa67   : > { %v8278_v41 = vpop.f32.mrf.mxu1  ;;  %11760 = vst [vmem:[#allocation63_spill] sm:$0xff] %v8284_v61  ;;  %v8296_v22 = vpop.eup %6464  ;;  %6474 = vrcp.f32 %v8271_v50  ;;  %v6143_v56 = vmul.f32 -1.442695, %v4313_v12  ;;  %v8300_v33 = vadd.f32 %v7922_v59, %v3496_v60  ;;  %v3510_v49 = vsel %vm3504_vm0, %v8171_v19, -9e+08 }
 0xa68   : > { %v4599_v30 = vpop.f32.mrf.mxu0  ;;  %6476 = vrcp.f32 %v8284_v61  ;;  %v3232_v0 = vmul.f32 %v8231_v1, %v3231_v53  ;;  %vm3235_vm8 = vweird.f32 %v8231_v1  ;;  %v6147_v9 = vmul.f32 -1.442695, %v4401_v24 }
 0xa69   : > { %v4082_v30 = vadd.f32 %v8161_v16, %v7831_v18  ;;  %v6467_v36 = vpop.eup %6466  ;;  %v4651_v16 = vadd.f32 %v8213_v62, %v7866_v52  ;;  %6478 = vpow2.f32 %v6149_v46  ;;  %v2729_v12 = vsub.f32 %v7740_v39, %v2725_v38 }
 0xa6a   : > { %v11761_v4 = vand.u32 2147483647, %v8059_v11  ;;  %v3321_v62 = vmul.f32 %v8281_v2, %v8218_v55  ;;  %v8321_v63 = vpop.eup %6468  ;;  %v8323_v53 = vadd.f32 1.0, %v6463_v29  ;;  %v3519_v39 = vsel %vm3512_vm3, %v3510_v49, -inf }
 0xa6b   : > { %11764 = vst [vmem:[#allocation64_spill] sm:$0xff] %v8321_v63  ;;  %v8326_v46 = vadd.f32 %v7922_v59, %v4082_v30  ;;  %v8331_v24 = vmul.f32 %v8296_v22, %v7804_v47  ;;  %vm3234_vm12 = vweird.f32 %v8155_v25  ;;  %v8334_v38 = vadd.f32 1.0, %v6467_v36 }
 0xa6c   : > { %vm8315_vm11 = vcmp.eq.f32.partialorder %v11761_v4, 8.507059e+37  ;;  %11765 = vst [vmem:[#allocation65_spill] sm:$0xff] %v8323_v53  ;;  %v6471_v4 = vpop.eup %6470  ;;  %6480 = vpow2.f32 %v6143_v56  ;;  %v3835_v29 = vmul.f32 %v8118_v35, %v8300_v33  ;;  %v8345_v14 = vadd.f32 %v7922_v59, %v4651_v16  ;;  %vm8417_vm1 = vmor %vm3234_vm12, %vm3235_vm8 }
 0xa6d   : > { %v4079_v60 = vpop.f32.mrf.mxu3  ;;  %11766 = vst [vmem:[#allocation66_spill] sm:$0xff] %v8326_v46  ;;  %3520 = vmax.xlane.f32.xlu0 %v3519_v39  ;;  %v8342_v49 = vpop.eup %6472  ;;  %v4649_v36 = vadd.f32 %v8222_v31, %v7799_v40  ;;  %v2832_v56 = vsel %vm2589_vm2, %v8331_v24, 0.0  ;;  %v8353_v20 = vmul.f32 %v8296_v22, %v7809_v37  ;;  %6482 = vpow2.f32 %v6147_v9 }
 0xa6e   : > { %v8311_v43 = vpop.f32.mrf.mxu2  ;;  %11767 = vst [vmem:[#allocation67_spill] sm:$0xff] %v8331_v24  ;;  %v3744_v60 = vmul.f32 %v8074_v6, %v8300_v33  ;;  %v8363_v16 = vpop.eup %6474  ;;  %2833 = vadd.xlane.f32.xlu2 %v2832_v56  ;;  %v3313_v31 = vsel %vm8359_vm13, %v8157_v7, %v8293_v44  ;;  %v8370_v24 = vadd.f32 %v8231_v1, %v3232_v0  ;;  %v8374_v11 = vadd.f32 1.0, %v6471_v4 }
 0xa6f   : > { %11768 = vst [vmem:[#allocation68_spill] sm:$0xff] %v8334_v38  ;;  %v4615_v30 = vpop.f32.mrf.mxu1  ;;  %v8372_v42 = vpop.eup %6476  ;;  %v4314_v32 = vmul.f32 %v8074_v6, %v8326_v46  ;;  %v2752_v9 = vsel %vm2589_vm2, %v8353_v20, 0.0  ;;  %6484 = vrcp.f32 %v8323_v53  ;;  %v4402_v44 = vmul.f32 %v8118_v35, %v8326_v46 }
 0xa70   : > { %v8340_v48 = vpop.f32.mrf.mxu0  ;;  %11769 = vst [vmem:[#allocation69_spill] sm:$0xff] %v8342_v49  ;;  %v2733_v30 = vmin.f32 %v2729_v12, 0.0  ;;  %v8382_v12 = vmul.f32 %v8296_v22, %v7822_v13  ;;  %v6479_v56 = vpop.eup %6478  ;;  %v6133_v7 = vmul.f32 -1.442695, %v3744_v60  ;;  %2753 = vadd.xlane.f32.xlu1 %v2752_v9  ;;  %v3322_v0 = vsub.f32 1.0, %v3321_v62 }
 0xa71   : > { %11770 = vst [vmem:[#allocation70_spill] sm:$0xff] %v8345_v14  ;;  %6486 = vrcp.f32 %v8334_v38  ;;  %v6138_v4 = vmul.f32 -1.442695, %v3835_v29  ;;  %v4883_v39 = vmul.f32 %v8074_v6, %v8345_v14  ;;  %v4971_v17 = vmul.f32 %v8118_v35, %v8345_v14 }
 0xa72   : > { %11771 = vst [vmem:[#allocation71_spill] sm:$0xff] %v8353_v20  ;;  %v8391_v20 = vadd.f32 %v7922_v59, %v4649_v36  ;;  %v6481_v54 = vpop.eup %6480  ;;  %v2740_v57 = vmul.f32 1.442695, %v2733_v30  ;;  %v4084_v60 = vadd.f32 %v8263_v5, %v7917_v45  ;;  %v8399_v62 = vmul.f32 %v8296_v22, %v7839_v8 }
 0xa73   : > { %11774 = vst [vmem:[#allocation72_spill] sm:$0xff] %v8363_v16  ;;  %6488 = vrcp.f32 %v8374_v11  ;;  %v6144_v53 = vmul.f32 -1.442695, %v4314_v32  ;;  %v2912_v36 = vsel %vm2589_vm2, %v8382_v12, 0.0  ;;  %v3318_v30 = vsel %vm8315_vm11, %v8153_v3, %v3313_v31  ;;  %v6483_v38 = vpop.eup %6482 }
 0xa74   : > { %11775 = vst [vmem:[#allocation73_spill] sm:$0xff] %v8372_v42  ;;  %v11778_v14 = vand.u32 2147483647, %v8155_v25  ;;  %6490 = vpow2.f32 %v6133_v7  ;;  %v6148_v46 = vmul.f32 -1.442695, %v4402_v44  ;;  %v3323_v3 = vmul.f32 %v8281_v2, %v3322_v0 }
 0xa75   : > { %11776 = vst [vmem:[#allocation74_spill] sm:$0xff] %v8382_v12  ;;  %v4645_v9 = vpop.f32.mrf.mxu3  ;;  %2913 = vadd.xlane.f32.xlu0 %v2912_v36  ;;  %vm3325_vm4 = vweird.f32 %v8218_v55  ;;  %vm3326_vm5 = vweird.f32 %v8281_v2  ;;  %6492 = vpow2.f32 %v6138_v4  ;;  %v4881_v19 = vmul.f32 %v8074_v6, %v8391_v20  ;;  %v8432_v7 = vpop.eup %6484 }
 0xa76   : > { %11777 = vst [vmem:[#allocation75_spill] sm:$0xff] %v8399_v62  ;;  %v5199_v29 = vpop.f32.mrf.mxu2  ;;  %vm8409_vm15 = vcmp.eq.f32.partialorder %v11778_v14, 8.507059e+37  ;;  %v6157_v14 = vmul.f32 -1.442695, %v4883_v39  ;;  %v3237_v25 = vsel %vm8417_vm1, %v8231_v1, %v8370_v24  ;;  %6494 = vpow2.f32 %v2740_v57  ;;  %vm8499_vm6 = vmor %vm3325_vm4, %vm3326_vm5 }
 0xa77   : > { %v8426_v31 = vpop.f32.mrf.mxu1  ;;  %v6161_v44 = vmul.f32 -1.442695, %v4971_v17  ;;  %v8435_v0 = vadd.f32 %v7922_v59, %v4084_v60  ;;  %v3072_v4 = vsel %vm2589_vm2, %v8399_v62, 0.0  ;;  %v8439_v39 = vpop.eup %6486  ;;  %v8441_v36 = vadd.f32 1.0, %v6479_v56 }
 0xa78   : > { %v5167_v29 = vpop.f32.mrf.mxu0  ;;  %11783 = vst [vmem:[#allocation76_spill] sm:$0xff] %v8439_v39  ;;  %6496 = vpow2.f32 %v6144_v53  ;;  %3073 = vadd.xlane.f32.xlu2 %v3072_v4  ;;  %v8447_v1 = vmul.f32 %v8296_v22, %v7828_v23  ;;  %v8449_v17 = vadd.f32 1.0, %v6481_v54  ;;  %v8452_v57 = vadd.f32 %v4645_v9, %v7917_v45 }
 0xa79   : > { %11784 = vst [vmem:[#allocation77_spill] sm:$0xff] %v8441_v36  ;;  %v4969_v29 = vmul.f32 %v8118_v35, %v8391_v20  ;;  %6498 = vpow2.f32 %v6148_v46  ;;  %v3324_v24 = vadd.f32 %v8281_v2, %v3323_v3  ;;  %v8455_v60 = vpop.eup %6488  ;;  %v8457_v56 = vadd.f32 1.0, %v6483_v38 }
 0xa7a   : > { %11785 = vst [vmem:[#allocation78_spill] sm:$0xff] %v8447_v1  ;;  %6500 = vpow2.f32 %v6157_v14  ;;  %v6155_v53 = vmul.f32 -1.442695, %v4881_v19  ;;  %v2992_v32 = vsel %vm2589_vm2, %v8447_v1, 0.0  ;;  %v6491_v4 = vpop.eup %6490  ;;  %v4316_v54 = vmul.f32 %v8074_v6, %v8435_v0 }
 0xa7b   : > { %11786 = vst [vmem:[#allocation79_spill] sm:$0xff] %v8457_v56  ;;  %6502 = vpow2.f32 %v6161_v44  ;;  %v4650_v22 = vadd.f32 %v8278_v41, %v7831_v18  ;;  %2993 = vadd.xlane.f32.xlu1 %v2992_v32  ;;  %v4113_v46 = vsel %vm8048_vm10, %v8245_v15, -9e+08  ;;  %v6493_v9 = vpop.eup %6492  ;;  %v6159_v3 = vmul.f32 -1.442695, %v4969_v29 }
 0xa7c   : > { %6504 = vrcp.f32 %v8441_v36  ;;  %v5217_v14 = vadd.f32 %v8340_v48, %v7799_v40  ;;  %v4117_v19 = vsel %vm3512_vm3, %v4113_v46, -inf  ;;  %v8472_v44 = vpop.eup %6494  ;;  %v3242_v41 = vsel %vm8409_vm15, %v8238_v26, %v3237_v25 }
 0xa7d   : > { %v4647_v38 = vpop.f32.mrf.mxu3  ;;  %6506 = vrcp.f32 %v8449_v17  ;;  %4118 = vmax.xlane.f32.xlu0 %v4117_v19  ;;  %v11787_v32 = vand.u32 2147483647, %v8218_v55  ;;  %v11790_v29 = vand.u32 2147483648, %v8218_v55  ;;  %v8487_v46 = vadd.f32 1.0, %v6491_v4 }
 0xa7e   : > { %v6497_v48 = vpop.eup %6496  ;;  %6508 = vrcp.f32 %v8457_v56  ;;  %v4115_v19 = vsel %vm8048_vm10, %v8211_v10, -9e+08  ;;  %v8493_v26 = vmul.f32 %v7795_v34, %v3318_v30  ;;  %v6146_v4 = vmul.f32 -1.442695, %v4316_v54 }
 0xa7f   : > { %vm8480_vm9 = vcmp.eq.f32.partialorder %v11787_v32, 8.507059e+37  ;;  %v3332_v40 = vor.u32 1.1754944e-38, %v11790_v29  ;;  %11791 = vst [vmem:[#allocation80_spill] sm:$0xff] %v8487_v46  ;;  %v5183_v5 = vpop.f32.mrf.mxu1  ;;  %v6499_v32 = vpop.eup %6498  ;;  %6510 = vpow2.f32 %v6155_v53  ;;  %v8504_v29 = vadd.f32 %v7922_v59, %v4650_v22 }
 0xa80   : > { %11792 = vst [vmem:[#allocation81_spill] sm:$0xff] %v8493_v26  ;;  %v3328_v5 = vsel %vm8499_vm6, %v8281_v2, %v3324_v24  ;;  %v6501_v30 = vpop.eup %6500  ;;  %v8509_v26 = vadd.f32 1.0, %v6493_v9  ;;  %6512 = vpow2.f32 %v6159_v3  ;;  %v8512_v55 = vadd.f32 %v7922_v59, %v5217_v14 }
 0xa81   : > { %v8515_v62 = vmul.f32 %v7789_v58, %v3242_v41  ;;  %v6503_v1 = vpop.eup %6502  ;;  %v8517_v53 = vadd.f32 1.0, %v6497_v48  ;;  %v4404_v54 = vmul.f32 %v8118_v35, %v8435_v0  ;;  %v4123_v22 = vsel %vm3512_vm3, %v4115_v19, -inf }
 0xa82   : > { %11795 = vst [vmem:[#allocation82_spill] sm:$0xff] %v8509_v26  ;;  %v4091_v2 = vsel %vm3504_vm0, %v8211_v10, -9e+08  ;;  %v8525_v24 = vpop.eup %6504  ;;  %6514 = vrcp.f32 %v8487_v46  ;;  %v8528_v9 = vadd.f32 1.0, %v6499_v32  ;;  %4124 = vmax.xlane.f32.xlu2 %v4123_v22  ;;  %v3333_v3 = vsel %vm8480_vm9, %v3332_v40, %v3328_v5 }
 0xa83   : > { %11796 = vst [vmem:[#allocation83_spill] sm:$0xff] %v8515_v62  ;;  %v4099_v58 = vsel %vm3512_vm3, %v4091_v2, -inf  ;;  %v8533_v14 = vpop.eup %6506  ;;  %v8535_v41 = vadd.f32 1.0, %v6501_v30  ;;  %6516 = vpow2.f32 %v6146_v4  ;;  %v4970_v48 = vmul.f32 %v8118_v35, %v8504_v29 }
 0xa84   : > { %11797 = vst [vmem:[#allocation84_spill] sm:$0xff] %v8517_v53  ;;  %v5219_v19 = vadd.f32 %v8311_v43, %v7866_v52  ;;  %4100 = vmax.xlane.f32.xlu1 %v4099_v58  ;;  %v8543_v32 = vpop.eup %6508  ;;  %6518 = vrcp.f32 %v8509_v26  ;;  %v8546_v38 = vadd.f32 1.0, %v6503_v1  ;;  %v5537_v40 = vmul.f32 %v8118_v35, %v8512_v55 }
 0xa85   : > { %11798 = vst [vmem:[#allocation85_spill] sm:$0xff] %v8525_v24  ;;  %v8541_v25 = vpop.f32.mrf.mxu3  ;;  %v8552_v4 = vmul.f32 %v8472_v44, %v7804_v47  ;;  %v6511_v5 = vpop.eup %6510  ;;  %v11804_v30 = vmov 0.0   ;;  %6520 = vrcp.f32 %v8517_v53  ;;  %v6150_v43 = vmul.f32 -1.442695, %v4404_v54 }
 0xa86   : > { %11799 = vst [vmem:[#allocation86_spill] sm:$0xff] %v8528_v9  ;;  %v8557_v52 = vsel %vm3504_vm0, 1.0, %v11804_v30  ;;  %v8561_v22 = vmul.f32 %v7795_v34, %v3333_v3  ;;  %v6513_v1 = vpop.eup %6512  ;;  %6522 = vrcp.f32 %v8528_v9  ;;  %v4089_v47 = vsel %vm3504_vm0, %v8245_v15, -9e+08 }
 0xa87   : > { %11800 = vst [vmem:[#allocation87_spill] sm:$0xff] %v8535_v41  ;;  %v8569_v2 = vmul.f32 %v8472_v44, %v7822_v13  ;;  %v2835_v58 = vsel %vm2589_vm2, %v8552_v4, 0.0  ;;  %6524 = vrcp.f32 %v8535_v41  ;;  %v4882_v34 = vmul.f32 %v8074_v6, %v8504_v29 }
 0xa88   : > { %11801 = vst [vmem:[#allocation88_spill] sm:$0xff] %v8543_v32  ;;  %v6160_v54 = vmul.f32 -1.442695, %v4970_v48  ;;  %v8577_v3 = vadd.f32 %v7922_v59, %v5219_v19  ;;  %2836 = vadd.xlane.f32.xlu0 %v2835_v58  ;;  %v8584_v13 = vsel %vm8048_vm10, 1.0, %v11804_v30  ;;  %6526 = vrcp.f32 %v8546_v38 }
 0xa89   : > { %11802 = vst [vmem:[#allocation89_spill] sm:$0xff] %v8546_v38  ;;  %v6171_v62 = vmul.f32 -1.442695, %v5537_v40  ;;  %v8591_v48 = vadd.f32 1.0, %v6511_v5  ;;  %v8593_v19 = vadd.f32 1.0, %v6513_v1  ;;  %v5449_v58 = vmul.f32 %v8074_v6, %v8512_v55 }
 0xa8a   : > { %11803 = vst [vmem:[#allocation90_spill] sm:$0xff] %v8552_v4  ;;  %v8589_v4 = vadd.f32 %v7922_v59, %v8452_v57  ;;  %v4093_v10 = vsel %vm3512_vm3, %v4089_v47, -inf  ;;  %6528 = vpow2.f32 %v6150_v43  ;;  %v5218_v40 = vadd.f32 %v8426_v31, %v7831_v18 }
 0xa8b   : > { %11805 = vst [vmem:[#allocation91_spill] sm:$0xff] %v8557_v52  ;;  %4094 = vmax.xlane.f32.xlu2 %v4093_v10  ;;  %v2915_v57 = vsel %vm2589_vm2, %v8569_v2, 0.0  ;;  %v8606_v5 = vmul.f32 %v8472_v44, %v7839_v8  ;;  %v8612_v1 = vmul.f32 %v8342_v49, %v8266_v21  ;;  %v6156_v47 = vmul.f32 -1.442695, %v4882_v34 }
 0xa8c   : > { %11806 = vst [vmem:[#allocation92_spill] sm:$0xff] %v8561_v22  ;;  %v8579_v22 = vpop.eup %6514  ;;  %6530 = vpow2.f32 %v6160_v54  ;;  %v5451_v43 = vmul.f32 %v8074_v6, %v8577_v3  ;;  %2916 = vadd.xlane.f32.xlu1 %v2915_v57  ;;  %v8620_v31 = vmul.f32 %v8372_v42, %v8284_v61  ;;  %v5539_v34 = vmul.f32 %v8118_v35, %v8577_v3 }
 0xa8d   : > { %11807 = vst [vmem:[#allocation93_spill] sm:$0xff] %v8569_v2  ;;  %v6517_v15 = vpop.eup %6516  ;;  %v5215_v18 = vpop.f32.mrf.mxu3  ;;  %6532 = vpow2.f32 %v6171_v62  ;;  %v4884_v2 = vmul.f32 %v8074_v6, %v8589_v4  ;;  %v6167_v54 = vmul.f32 -1.442695, %v5449_v58  ;;  %v8633_v57 = vmul.f32 %v8472_v44, %v7809_v37 }
 0xa8e   : > { %11808 = vst [vmem:[#allocation94_spill] sm:$0xff] %v8577_v3  ;;  %v8598_v12 = vpop.eup %6518  ;;  %v8622_v8 = vadd.f32 1.0, %v6517_v15  ;;  %6534 = vrcp.f32 %v8591_v48  ;;  %v4972_v15 = vmul.f32 %v8118_v35, %v8589_v4  ;;  %v8641_v62 = vadd.f32 %v7922_v59, %v5218_v40 }
 0xa8f   : > { %11809 = vst [vmem:[#allocation95_spill] sm:$0xff] %v8584_v13  ;;  %v8608_v30 = vpop.eup %6520  ;;  %6536 = vrcp.f32 %v8593_v19  ;;  %v3075_v52 = vsel %vm2589_vm2, %v8606_v5, 0.0  ;;  %v8647_v58 = vmul.f32 %v8321_v63, %v8256_v28  ;;  %v6169_v37 = vmul.f32 -1.442695, %v5451_v43 }
 0xa90   : > { %11810 = vst [vmem:[#allocation96_spill] sm:$0xff] %v8589_v4  ;;  %v8616_v10 = vpop.eup %6522  ;;  %6538 = vpow2.f32 %v6156_v47  ;;  %v3511_v61 = vsel %vm3504_vm0, %v8300_v33, -9e+08  ;;  %3076 = vadd.xlane.f32.xlu0 %v3075_v52  ;;  %v8655_v40 = vmul.f32 %v8363_v16, %v8271_v50  ;;  %v6173_v47 = vmul.f32 -1.442695, %v5539_v34 }
 0xa91   : > { %11811 = vst [vmem:[#allocation97_spill] sm:$0xff] %v8591_v48  ;;  %v8626_v13 = vpop.eup %6524  ;;  %6540 = vrcp.f32 %v8622_v8  ;;  %v2755_v43 = vsel %vm2589_vm2, %v8633_v57, 0.0  ;;  %v6162_v52 = vmul.f32 -1.442695, %v4972_v15  ;;  %v5450_v21 = vmul.f32 %v8074_v6, %v8641_v62 }
 0xa92   : > { %11812 = vst [vmem:[#allocation98_spill] sm:$0xff] %v8593_v19  ;;  %v8635_v18 = vpop.eup %6526  ;;  %6542 = vpow2.f32 %v6167_v54  ;;  %v5220_v50 = vadd.f32 %v8541_v25, %v7917_v45  ;;  %v3522_v16 = vsel %vm3512_vm3, %v3511_v61, -inf  ;;  %v5538_v34 = vmul.f32 %v8118_v35, %v8641_v62  ;;  %v11826_v54 = vld [vmem:[#allocation66_spill] sm:$0xff] }
 0xa93   : > { %11813 = vst [vmem:[#allocation99_spill] sm:$0xff] %v8598_v12  ;;  %v6529_v42 = vpop.eup %6528  ;;  %2756 = vadd.xlane.f32.xlu2 %v2755_v43  ;;  %6544 = vpow2.f32 %v6169_v37  ;;  %v4090_v15 = vsel %vm3504_vm0, %v11826_v54, -9e+08  ;;  %v8683_v61 = vmul.f32 %v8525_v24, %v8441_v36  ;;  %v11830_v37 = vld [vmem:[#allocation65_spill] sm:$0xff]  ;;  %v6168_v36 = vmul.f32 -1.442695, %v5450_v21 }
 0xa94   : > { %11814 = vst [vmem:[#allocation100_spill] sm:$0xff] %v8606_v5  ;;  %v6158_v5 = vmul.f32 -1.442695, %v4884_v2  ;;  %v6531_v49 = vpop.eup %6530  ;;  %3523 = vmax.xlane.f32.xlu1 %v3522_v16  ;;  %v8689_v16 = vmul.f32 %v8432_v7, %v11830_v37 }
 0xa95   : > { %11815 = vst [vmem:[#allocation101_spill] sm:$0xff] %v8608_v30  ;;  %v6533_v63 = vpop.eup %6532 }
 0xa96   : > { %11816 = vst [vmem:[#allocation102_spill] sm:$0xff] %v8612_v1  ;;  %v8666_v2 = vpop.eup %6534  ;;  %v8668_v1 = vadd.f32 1.0, %v6529_v42  ;;  %v8685_v42 = vadd.f32 1.0, %v6531_v49  ;;  %6546 = vpow2.f32 %v6158_v5  ;;  %v8691_v43 = vadd.f32 1.0, %v6533_v63 }
 0xa97   : > { %11817 = vst [vmem:[#allocation103_spill] sm:$0xff] %v8616_v10  ;;  %v8675_v28 = vpop.eup %6536  ;;  %6548 = vpow2.f32 %v6173_v47  ;;  %v8700_v49 = vadd.f32 %v7922_v59, %v5220_v50  ;;  %v4096_v5 = vsel %vm3512_vm3, %v4090_v15, -inf  ;;  %v6172_v63 = vmul.f32 -1.442695, %v5538_v34 }
 0xa98   : > { %11818 = vst [vmem:[#allocation104_spill] sm:$0xff] %v8620_v31  ;;  %v6539_v25 = vpop.eup %6538  ;;  %v8695_v31 = vmul.f32 %v8472_v44, %v7828_v23  ;;  %6550 = vpow2.f32 %v6162_v52  ;;  %v4114_v23 = vsel %vm8048_vm10, %v11826_v54, -9e+08  ;;  %4097 = vmax.xlane.f32.xlu0 %v4096_v5  ;;  %v8714_v59 = vmul.f32 %v8455_v60, %v8374_v11 }
 0xa99   : > { %11819 = vst [vmem:[#allocation105_spill] sm:$0xff] %v8622_v8  ;;  %6552 = vrcp.f32 %v8668_v1  ;;  %v8720_v47 = vmul.f32 %v8598_v12, %v8509_v26  ;;  %v8722_v52 = vadd.f32 1.0, %v6539_v25  ;;  %v5452_v50 = vmul.f32 %v8074_v6, %v8700_v49  ;;  %v11837_v12 = vld [vmem:[#allocation70_spill] sm:$0xff] }
 0xa9a   : > { %11820 = vst [vmem:[#allocation106_spill] sm:$0xff] %v8626_v13  ;;  %6554 = vrcp.f32 %v8685_v42  ;;  %v2995_v34 = vsel %vm2589_vm2, %v8695_v31, 0.0  ;;  %v4120_v21 = vsel %vm3512_vm3, %v4114_v23, -inf  ;;  %v8734_v25 = vmul.f32 %v8533_v14, %v8449_v17 }
 0xa9b   : > { %11821 = vst [vmem:[#allocation107_spill] sm:$0xff] %v8633_v57  ;;  %v11828_v57 = vld [vmem:[#allocation68_spill] sm:$0xff]  ;;  %6556 = vrcp.f32 %v8691_v43  ;;  %2996 = vadd.xlane.f32.xlu2 %v2995_v34  ;;  %v8746_v23 = vmul.f32 %v8616_v10, %v8528_v9  ;;  %v8750_v34 = vmul.f32 %v8635_v18, %v8546_v38  ;;  %v6170_v38 = vmul.f32 -1.442695, %v5452_v50 }
 0xa9c   : > { %11822 = vst [vmem:[#allocation108_spill] sm:$0xff] %v8635_v18  ;;  %v8679_v45 = vmul.f32 %v8439_v39, %v11828_v57  ;;  %v8697_v57 = vpop.eup %6540  ;;  %v8705_v39 = vmul.f32 %v8543_v32, %v8457_v56  ;;  %6558 = vpow2.f32 %v6168_v36  ;;  %4121 = vmax.xlane.f32.xlu1 %v4120_v21  ;;  %v8742_v32 = vmul.f32 %v8579_v22, %v8487_v46 }
 0xa9d   : > { %11823 = vst [vmem:[#allocation109_spill] sm:$0xff] %v8641_v62  ;;  %v6543_v24 = vpop.eup %6542  ;;  %6560 = vpow2.f32 %v6172_v63  ;;  %v3541_v18 = vsel %vm8048_vm10, %v8300_v33, -9e+08  ;;  %v4683_v50 = vsel %vm8048_vm10, %v11837_v12, -9e+08  ;;  %v3793_v51 = vsub.f32 1.0, %v8689_v16 }
 0xa9e   : > { %11824 = vst [vmem:[#allocation110_spill] sm:$0xff] %v8666_v2  ;;  %v6545_v44 = vpop.eup %6544  ;;  %v8727_v5 = vadd.f32 1.0, %v6543_v24  ;;  %v4659_v24 = vsel %vm3504_vm0, %v11837_v12, -9e+08  ;;  %6562 = vrcp.f32 %v8722_v52 }
 0xa9f   : > { %11825 = vst [vmem:[#allocation111_spill] sm:$0xff] %v8668_v1  ;;  %v6547_v15 = vpop.eup %6546  ;;  %v8752_v26 = vadd.f32 1.0, %v6545_v44  ;;  %v4667_v44 = vsel %vm3512_vm3, %v4659_v24, -inf }
 0xaa0   : > { %11827 = vst [vmem:[#allocation66_spill] sm:$0xff] %v8675_v28  ;;  %v6549_v56 = vpop.eup %6548  ;;  %v8762_v46 = vadd.f32 1.0, %v6547_v15  ;;  %6564 = vrcp.f32 %v8727_v5  ;;  %v8779_v15 = vmul.f32 %v8675_v28, %v8593_v19  ;;  %4668 = vmax.xlane.f32.xlu0 %v4667_v44  ;;  %v8793_v19 = vmul.f32 %v8666_v2, %v8591_v48  ;;  %v11882_v28 = vld [vmem:[#allocation73_spill] sm:$0xff] }
 0xaa1   : > { %11829 = vst [vmem:[#allocation112_spill] sm:$0xff] %v8685_v42  ;;  %v6551_v36 = vpop.eup %6550  ;;  %6566 = vrcp.f32 %v8752_v26  ;;  %v3551_v44 = vsel %vm3512_vm3, %v3541_v18, -inf  ;;  %v4116_v18 = vsel %vm8048_vm10, %v8435_v0, -9e+08 }
 0xaa2   : > { %11831 = vst [vmem:[#allocation65_spill] sm:$0xff] %v8691_v43  ;;  %v8754_v63 = vpop.eup %6552  ;;  %v8781_v10 = vadd.f32 1.0, %v6551_v36  ;;  %6568 = vrcp.f32 %v8762_v46 }
 0xaa3   : > { %11832 = vst [vmem:[#allocation113_spill] sm:$0xff] %v8697_v57  ;;  %v8764_v9 = vpop.eup %6554  ;;  %v8797_v36 = vmul.f32 %v8754_v63, %v8668_v1  ;;  %6570 = vpow2.f32 %v6170_v38  ;;  %3552 = vmax.xlane.f32.xlu2 %v3551_v44  ;;  %v4681_v1 = vsel %vm8048_vm10, %v8391_v20, -9e+08 }
 0xaa4   : > { %11833 = vst [vmem:[#allocation114_spill] sm:$0xff] %v8700_v49  ;;  %v8771_v21 = vpop.eup %6556  ;;  %6572 = vrcp.f32 %v8781_v10 }
 0xaa5   : > { %11834 = vst [vmem:[#allocation115_spill] sm:$0xff] %v8705_v39  ;;  %v8759_v39 = vmul.f32 %v8608_v30, %v8517_v53  ;;  %v8775_v53 = vmul.f32 %v8626_v13, %v8535_v41  ;;  %v6559_v24 = vpop.eup %6558  ;;  %v8789_v41 = vadd.f32 1.0, %v6549_v56  ;;  %v5540_v56 = vmul.f32 %v8118_v35, %v8700_v49 }
 0xaa6   : > { %11835 = vst [vmem:[#allocation116_spill] sm:$0xff] %v8722_v52  ;;  %v6561_v13 = vpop.eup %6560  ;;  %v4691_v30 = vsel %vm3512_vm3, %v4683_v50, -inf  ;;  %v8826_v50 = vmul.f32 %v8771_v21, %v8691_v43 }
 0xaa7   : > { %11836 = vst [vmem:[#allocation117_spill] sm:$0xff] %v8727_v5  ;;  %4692 = vmax.xlane.f32.xlu1 %v4691_v30  ;;  %6574 = vrcp.f32 %v8789_v41  ;;  %v8828_v44 = vadd.f32 1.0, %v6561_v13  ;;  %v6174_v43 = vmul.f32 -1.442695, %v5540_v56  ;;  %v4126_v30 = vsel %vm3512_vm3, %v4116_v18, -inf }
 0xaa8   : > { %11838 = vst [vmem:[#allocation70_spill] sm:$0xff] %v8746_v23  ;;  %4127 = vmax.xlane.f32.xlu0 %v4126_v30  ;;  %v4682_v13 = vsel %vm8048_vm10, %v8504_v29, -9e+08  ;;  %v4092_v30 = vsel %vm3504_vm0, %v8435_v0, -9e+08 }
 0xaa9   : > { %11839 = vst [vmem:[#allocation118_spill] sm:$0xff] %v8750_v34  ;;  %v5251_v18 = vsel %vm8048_vm10, %v8577_v3, -9e+08 }
 0xaaa   : > { %11840 = vst [vmem:[#allocation119_spill] sm:$0xff] %v8752_v26  ;;  %v8808_v26 = vpop.eup %6562 }
 0xaab   : > { %11841 = vst [vmem:[#allocation120_spill] sm:$0xff] %v8754_v63  ;;  %v8812_v63 = vadd.f32 1.0, %v6559_v24  ;;  %v8817_v38 = vpop.eup %6564  ;;  %v4657_v24 = vsel %vm3504_vm0, %v8391_v20, -9e+08 }
 0xaac   : > { %11842 = vst [vmem:[#allocation121_spill] sm:$0xff] %v8759_v39  ;;  %v8803_v39 = vmul.f32 %v8764_v9, %v8685_v42  ;;  %v8821_v42 = vmul.f32 %v8697_v57, %v8622_v8  ;;  %v8838_v8 = vpop.eup %6566 }
 0xaad   : > { %11843 = vst [vmem:[#allocation122_spill] sm:$0xff] %v8762_v46  ;;  %6576 = vrcp.f32 %v8812_v63 }
 0xaae   : > { %11844 = vst [vmem:[#allocation123_spill] sm:$0xff] %v8764_v9  ;;  %v3763_v9 = vsub.f32 1.0, %v8647_v58  ;;  %v5249_v58 = vsel %vm8048_vm10, %v8512_v55, -9e+08  ;;  %6578 = vrcp.f32 %v8828_v44 }
 0xaaf   : > { %11845 = vst [vmem:[#allocation124_spill] sm:$0xff] %v8771_v21  ;;  %v8846_v21 = vpop.eup %6568  ;;  %6580 = vpow2.f32 %v6174_v43  ;;  %v5226_v43 = vsel %vm3504_vm0, %v8641_v62, -9e+08 }
 0xab0   : > { %11846 = vst [vmem:[#allocation125_spill] sm:$0xff] %v8775_v53  ;;  %v6571_v56 = vpop.eup %6570 }
 0xab1   : > { %11847 = vst [vmem:[#allocation126_spill] sm:$0xff] %v8779_v15 }
 0xab2   : > { %11848 = vst [vmem:[#allocation127_spill] sm:$0xff] %v8781_v10 }
 0xab3   : > { %11849 = vst [vmem:[#allocation128_spill] sm:$0xff] %v8789_v41  ;;  %v8842_v41 = vmul.f32 %v8808_v26, %v8722_v52  ;;  %v8882_v52 = vmul.f32 %v8846_v21, %v8762_v46  ;;  %v11870_v46 = vld [vmem:[#allocation102_spill] sm:$0xff] }
 0xab4   : > { %11850 = vst [vmem:[#allocation129_spill] sm:$0xff] %v8793_v19 }
 0xab5   : > { %11851 = vst [vmem:[#allocation130_spill] sm:$0xff] %v8797_v36  ;;  %v8850_v36 = vmul.f32 %v8817_v38, %v8727_v5  ;;  %v4685_v5 = vsel %vm3512_vm3, %v4681_v1, -inf  ;;  %v5253_v1 = vsel %vm3512_vm3, %v5249_v58, -inf  ;;  %v5259_v58 = vsel %vm3512_vm3, %v5251_v18, -inf }
 0xab6   : > { %11852 = vst [vmem:[#allocation131_spill] sm:$0xff] %v8803_v39  ;;  %4686 = vmax.xlane.f32.xlu2 %v4685_v5  ;;  %v3778_v39 = vsub.f32 1.0, %v8655_v40  ;;  %v4102_v40 = vsel %vm3512_vm3, %v4092_v30, -inf  ;;  %v8915_v18 = vsel %vm3512_vm3, %v5226_v43, -inf }
 0xab7   : > { %11853 = vst [vmem:[#allocation132_spill] sm:$0xff] %v8808_v26  ;;  %v8884_v26 = vadd.f32 1.0, %v6571_v56  ;;  %v5225_v56 = vsel %vm3504_vm0, %v8512_v55, -9e+08 }
 0xab8   : > { %11854 = vst [vmem:[#allocation133_spill] sm:$0xff] %v8812_v63  ;;  %v4660_v63 = vsel %vm3504_vm0, %v8589_v4, -9e+08  ;;  %v8927_v43 = vsel %vm3512_vm3, %v5225_v56, -inf }
 0xab9   : > { %11855 = vst [vmem:[#allocation134_spill] sm:$0xff] %v8817_v38  ;;  %v8863_v38 = vpop.eup %6572  ;;  %6582 = vrcp.f32 %v8884_v26 }
 0xaba   : > { %11856 = vst [vmem:[#allocation135_spill] sm:$0xff] %v8821_v42  ;;  %v8894_v5 = vmul.f32 %v8863_v38, %v8781_v10  ;;  %v11871_v10 = vsub.f32 1.0, %v11870_v46  ;;  %v5227_v46 = vsel %vm3504_vm0, %v8577_v3, -9e+08 }
 0xabb   : > { %11857 = vst [vmem:[#allocation136_spill] sm:$0xff] %v8826_v50  ;;  %v11864_v50 = vld [vmem:[#allocation64_spill] sm:$0xff] }
 0xabc   : > { %11858 = vst [vmem:[#allocation137_spill] sm:$0xff] %v8828_v44  ;;  %v3764_v44 = vmul.f32 %v11864_v50, %v3763_v9  ;;  %v4658_v9 = vsel %vm3504_vm0, %v8504_v29, -9e+08  ;;  %vm3767_vm14 = vweird.f32 %v11864_v50 }
 0xabd   : > { %11859 = vst [vmem:[#allocation138_spill] sm:$0xff] %v8838_v8  ;;  %v4661_v8 = vsel %vm3512_vm3, %v4657_v24, -inf  ;;  %v4688_v24 = vsel %vm3512_vm3, %v4682_v13, -inf  ;;  %v8898_v13 = vsel %vm3512_vm3, %v4660_v63, -inf  ;;  %v4664_v63 = vsel %vm3512_vm3, %v4658_v9, -inf  ;;  %v11878_v9 = vld [vmem:[#allocation61_spill] sm:$0xff] }
 0xabe   : > { %11860 = vst [vmem:[#allocation139_spill] sm:$0xff] %v8842_v41  ;;  %4662 = vmax.xlane.f32.xlu1 %v4661_v8  ;;  %v11875_v41 = vld [vmem:[#allocation72_spill] sm:$0xff]  ;;  %4689 = vmax.xlane.f32.xlu0 %v4688_v24  ;;  %v5250_v24 = vsel %vm8048_vm10, %v8641_v62, -9e+08  ;;  %v3863_v48 = vand.u32 2147483648, %v11878_v9  ;;  %vm3857_vm15 = vweird.f32 %v11878_v9 }
 0xabf   : > { %11861 = vst [vmem:[#allocation140_spill] sm:$0xff] %v8846_v21  ;;  %v3779_v57 = vmul.f32 %v11875_v41, %v3778_v39  ;;  %v4684_v39 = vsel %vm8048_vm10, %v8589_v4, -9e+08  ;;  %4103 = vmax.xlane.f32.xlu2 %v4102_v40  ;;  %vm3782_vm12 = vweird.f32 %v11875_v41  ;;  %v8957_v40 = vpop.xlane.xlu1 %2907  ;;  %v11904_v4 = vld [vmem:[#allocation41_spill] sm:$0xff] }
 0xac0   : > { %11862 = vst [vmem:[#allocation141_spill] sm:$0xff] %v8850_v36  ;;  %v8875_v36 = vpop.eup %6574  ;;  %6584 = vrcp.f32 %v8957_v40 }
 0xac1   : > { %11863 = vst [vmem:[#allocation142_spill] sm:$0xff] %v8863_v38  ;;  %v8901_v8 = vpop.eup %6576  ;;  %v11872_v38 = vld [vmem:[#allocation69_spill] sm:$0xff]  ;;  %v3780_v42 = vadd.f32 %v11875_v41, %v3779_v57  ;;  %v11889_v57 = vld [vmem:[#allocation63_spill] sm:$0xff] }
 0xac2   : > { %11865 = vst [vmem:[#allocation64_spill] sm:$0xff] %v8875_v36  ;;  %v3765_v36 = vadd.f32 %v11864_v50, %v3764_v44  ;;  %v3855_v21 = vmul.f32 %v11872_v38, %v11871_v10  ;;  %v8911_v30 = vpop.eup %6578  ;;  %vm3858_vm11 = vweird.f32 %v11872_v38 }
 0xac3   : > { %11866 = vst [vmem:[#allocation143_spill] sm:$0xff] %v8882_v52  ;;  %v6581_v44 = vpop.eup %6580  ;;  %vm8961_vm1 = vmor %vm3857_vm15, %vm3858_vm11 }
 0xac4   : > { %11867 = vst [vmem:[#allocation144_spill] sm:$0xff] %v8884_v26  ;;  %v3856_v56 = vadd.f32 %v11872_v38, %v3855_v21  ;;  %v11879_v26 = vld [vmem:[#allocation62_spill] sm:$0xff]  ;;  %v8955_v2 = vadd.f32 1.0, %v6581_v44  ;;  %v8972_v44 = vpop.xlane.xlu2 %2747 }
 0xac5   : > { %11868 = vst [vmem:[#allocation145_spill] sm:$0xff] %v8894_v5  ;;  %vm3781_vm4 = vweird.f32 %v11879_v26  ;;  %v2767_v34 = vand.u32 2147483647, %v8972_v44 }
 0xac6   : > { %11869 = vst [vmem:[#allocation146_spill] sm:$0xff] %v8901_v8  ;;  %v11874_v8 = vld [vmem:[#allocation60_spill] sm:$0xff]  ;;  %5254 = vmax.xlane.f32.xlu1 %v5253_v1  ;;  %v3785_v1 = vand.u32 2147483647, %v11879_v26  ;;  %vm8982_vm9 = vmor %vm3781_vm4, %vm3782_vm12  ;;  %5260 = vmax.xlane.f32.xlu0 %v5259_v58  ;;  %vm2763_vm4 = vweird.f32 %v8972_v44 }
 0xac7   : > { %11873 = vst [vmem:[#allocation102_spill] sm:$0xff] %v8911_v30  ;;  %v3772_v52 = vand.u32 2147483648, %v11874_v8  ;;  %vm3766_vm7 = vweird.f32 %v11874_v8  ;;  %v3770_v10 = vand.u32 2147483647, %v11874_v8  ;;  %v3861_v30 = vand.u32 2147483647, %v11878_v9  ;;  %v8970_v9 = vpop.xlane.xlu0 %2827  ;;  %4665 = vmax.xlane.f32.xlu2 %v4664_v63 }
 0xac8   : > { %vm8937_vm8 = vmor %vm3766_vm7, %vm3767_vm14  ;;  %11883 = vst [vmem:[#allocation69_spill] sm:$0xff] %v8955_v2  ;;  %6586 = vrcp.f32 %v8970_v9  ;;  %v3784_v27 = vsel %vm8982_vm9, %v11875_v41, %v3780_v42  ;;  %vm3786_vm6 = vcmp.eq.f32.partialorder %v3785_v1, 8.507059e+37  ;;  %vm2923_vm7 = vweird.f32 %v8957_v40 }
 0xac9   : > { %v3769_v8 = vsel %vm8937_vm8, %v11864_v50, %v3765_v36  ;;  %v3773_v5 = vor.u32 1.1754944e-38, %v3772_v52  ;;  %vm3771_vm13 = vcmp.eq.f32.partialorder %v3770_v10, 8.507059e+37  ;;  %v3787_v36 = vand.u32 2147483648, %v11879_v26  ;;  %v11880_v50 = vld [vmem:[#allocation104_spill] sm:$0xff]  ;;  %v8967_v10 = vpop.eup %6582 }
 0xaca   : > { %v11881_v21 = vsub.f32 1.0, %v11880_v50  ;;  %11886 = vst [vmem:[#allocation60_spill] sm:$0xff] %v8967_v10  ;;  %vm3862_vm5 = vcmp.eq.f32.partialorder %v3861_v30, 8.507059e+37  ;;  %v5228_v50 = vsel %vm3504_vm0, %v8700_v49, -9e+08  ;;  %6588 = vrcp.f32 %v8972_v44 }
 0xacb   : > { %v3774_v52 = vsel %vm3771_vm13, %v3773_v5, %v3769_v8  ;;  %v5252_v5 = vsel %vm8048_vm10, %v8700_v49, -9e+08  ;;  %v3860_v8 = vsel %vm8961_vm1, %v11872_v38, %v3856_v56  ;;  %v3788_v38 = vor.u32 1.1754944e-38, %v3787_v36 }
 0xacc   : > { %v3870_v15 = vmul.f32 %v11882_v28, %v11881_v21  ;;  %v3864_v21 = vor.u32 1.1754944e-38, %v3863_v48  ;;  %vm3873_vm10 = vweird.f32 %v11882_v28  ;;  %v3878_v10 = vand.u32 2147483648, %v11889_v57 }
 0xacd   : > { %v5235_v48 = vsel %vm3512_vm3, %v5227_v46, -inf  ;;  %v9002_v26 = vsel %vm3512_vm3, %v4684_v39, -inf  ;;  %v3789_v41 = vsel %vm3786_vm6, %v3788_v38, %v3784_v27  ;;  %vm3872_vm0 = vweird.f32 %v11889_v57  ;;  %v9019_v46 = vpop.eup %6584 }
 0xace   : > { %v8995_v30 = vadd.f32 %v11882_v28, %v3870_v15  ;;  %v3865_v56 = vsel %vm3862_vm5, %v3864_v21, %v3860_v8  ;;  %6590 = vrcp.f32 %v8955_v2  ;;  %v9007_v42 = vsel %vm3512_vm3, %v5252_v5, -inf  ;;  %vm9015_vm14 = vmor %vm3872_vm0, %vm3873_vm10  ;;  %4671 = vmax.xlane.f32.xlu1 %v8898_v13  ;;  %v3515_v5 = vpop.xlane.xlu1 %3514  ;;  %5230 = vmax.xlane.f32.xlu0 %v8927_v43 }
 0xacf   : > { %v9010_v15 = vsel %vm3512_vm3, %v5250_v24, -inf  ;;  %v9013_v58 = vmul.f32 %v8074_v6, %v3774_v52  ;;  %v9023_v39 = vsel %vm3512_vm3, %v5228_v50, -inf  ;;  %v9026_v63 = vmul.f32 %v8118_v35, %v3865_v56  ;;  %v6587_v52 = vpop.eup %6586  ;;  %v9045_v38 = vpop.xlane.xlu0 %3067  ;;  %5236 = vmax.xlane.f32.xlu2 %v5235_v48 }
 0xad0   : > { %v3876_v36 = vand.u32 2147483647, %v11889_v57  ;;  %v2919_v1 = vmul.f32 %v9019_v46, %v8957_v40  ;;  %v9036_v13 = vmul.f32 %v8074_v6, %v3789_v41  ;;  %v9038_v8 = vor.u32 1.1754944e-38, %v3878_v10  ;;  %v6589_v21 = vpop.eup %6588  ;;  %v9047_v56 = vpop.xlane.xlu2 %2987 }
 0xad1   : > { %11890 = vst [vmem:[#allocation72_spill] sm:$0xff] %v9013_v58  ;;  %v9041_v50 = vmul.f32 %v8432_v7, %v3793_v51  ;;  %v2839_v27 = vmul.f32 %v6587_v52, %v8970_v9  ;;  %v2927_v10 = vand.u32 2147483647, %v8957_v40  ;;  %v2759_v2 = vmul.f32 %v6589_v21, %v8972_v44 }
 0xad2   : > { %11893 = vst [vmem:[#allocation61_spill] sm:$0xff] %v9026_v63  ;;  %v2920_v41 = vsub.f32 1.0, %v2919_v1  ;;  %6592 = vrcp.f32 %v9045_v38  ;;  %v2929_v51 = vand.u32 2147483648, %v8957_v40  ;;  %v2847_v63 = vand.u32 2147483647, %v8970_v9 }
 0xad3   : > { %11894 = vst [vmem:[#allocation62_spill] sm:$0xff] %v9036_v13  ;;  %v2840_v13 = vsub.f32 1.0, %v2839_v27  ;;  %v2849_v58 = vand.u32 2147483648, %v8970_v9  ;;  %vm2924_vm8 = vweird.f32 %v9019_v46  ;;  %v2760_v1 = vsub.f32 1.0, %v2759_v2 }
 0xad4   : > { %v9058_v62 = vpop.eup %6590  ;;  %v2921_v57 = vmul.f32 %v9019_v46, %v2920_v41  ;;  %6594 = vrcp.f32 %v9047_v56  ;;  %vm2844_vm11 = vweird.f32 %v6587_v52  ;;  %v2769_v27 = vand.u32 2147483648, %v8972_v44  ;;  %vm9069_vm15 = vmor %vm2923_vm7, %vm2924_vm8 }
 0xad5   : > { %11895 = vst [vmem:[#allocation104_spill] sm:$0xff] %v9058_v62  ;;  %v2841_v24 = vmul.f32 %v6587_v52, %v2840_v13  ;;  %vm2843_vm12 = vweird.f32 %v8970_v9  ;;  %v2761_v43 = vmul.f32 %v6589_v21, %v2760_v1  ;;  %vm2764_vm13 = vweird.f32 %v6589_v21  ;;  %v11912_v9 = vld [vmem:[#allocation42_spill] sm:$0xff] }
 0xad6   : > { %v2922_v19 = vadd.f32 %v9019_v46, %v2921_v57  ;;  %vm9073_vm1 = vcmp.eq.f32.partialorder %v2927_v10, 8.507059e+37  ;;  %v2930_v13 = vor.u32 1.1754944e-38, %v2929_v51  ;;  %5233 = vmax.xlane.f32.xlu1 %v8915_v18  ;;  %vm9079_vm5 = vcmp.eq.f32.partialorder %v3876_v36, 8.507059e+37  ;;  %vm2845_vm9 = vmor %vm2843_vm12, %vm2844_vm11  ;;  %5239 = vmax.xlane.f32.xlu0 %v9023_v39 }
 0xad7   : > { %v2842_v62 = vadd.f32 %v6587_v52, %v2841_v24  ;;  %vm2848_vm10 = vcmp.eq.f32.partialorder %v2847_v63, 8.507059e+37  ;;  %v2850_v57 = vor.u32 1.1754944e-38, %v2849_v58  ;;  %v2762_v10 = vadd.f32 %v6589_v21, %v2761_v43  ;;  %vm2765_vm6 = vmor %vm2763_vm4, %vm2764_vm13  ;;  %v9092_v36 = vpop.xlane.xlu0 %3546  ;;  %v11902_v63 = vld [vmem:[#allocation91_spill] sm:$0xff]  ;;  %v9097_v43 = vpop.xlane.xlu1 %2830  ;;  %4695 = vmax.xlane.f32.xlu2 %v9002_v26 }
 0xad8   : > { %v9083_v48 = vpop.eup %6592  ;;  %v2926_v40 = vsel %vm9069_vm15, %v9019_v46, %v2922_v19  ;;  %vm2768_vm0 = vcmp.eq.f32.partialorder %v2767_v34, 8.507059e+37  ;;  %v2770_v18 = vor.u32 1.1754944e-38, %v2769_v27  ;;  %v3544_v51 = vpop.xlane.xlu2 %3543  ;;  %v3525_v58 = vmul.f32 %v11902_v63, %v3515_v5 }
 0xad9   : > { %v2846_v24 = vsel %vm2845_vm9, %v6587_v52, %v2842_v62  ;;  %v3079_v44 = vmul.f32 %v9083_v48, %v9045_v38  ;;  %v2931_v19 = vsel %vm9073_vm1, %v2930_v13, %v2926_v40  ;;  %v2766_v41 = vsel %vm2765_vm6, %v6589_v21, %v2762_v10  ;;  %v11903_v62 = vld [vmem:[#allocation40_spill] sm:$0xff]  ;;  %v11905_v40 = vld [vmem:[#allocation39_spill] sm:$0xff] }
 0xada   : > { %v6595_v1 = vpop.eup %6594  ;;  %v2851_v46 = vsel %vm2848_vm10, %v2850_v57, %v2846_v24  ;;  %v2771_v34 = vsel %vm2768_vm0, %v2770_v18, %v2766_v41  ;;  %vm3083_vm7 = vweird.f32 %v9045_v38  ;;  %v3087_v2 = vand.u32 2147483647, %v9045_v38  ;;  %v11906_v10 = vld [vmem:[#allocation95_spill] sm:$0xff]  ;;  %v11911_v41 = vld [vmem:[#allocation76_spill] sm:$0xff] }
 0xadb   : > { %v2852_v52 = vmul.f32 %v2851_v46, %v11903_v62  ;;  %v3080_v27 = vsub.f32 1.0, %v3079_v44  ;;  %v2999_v49 = vmul.f32 %v6595_v1, %v9047_v56  ;;  %v2772_v53 = vmul.f32 %v2771_v34, %v11904_v4 }
 0xadc   : > { %6596 = vrcp.f32 %v9097_v43  ;;  %vm3084_vm8 = vweird.f32 %v9083_v48  ;;  %v3089_v21 = vand.u32 2147483648, %v9045_v38  ;;  %vm3797_vm11 = vweird.f32 %v8432_v7 }
 0xadd   : > { %v3081_v5 = vmul.f32 %v9083_v48, %v3080_v27  ;;  %v3000_v13 = vsub.f32 1.0, %v2999_v49  ;;  %v2932_v57 = vmul.f32 %v2931_v19, %v11905_v40  ;;  %v2898_v39 = vadd.f32 %v2852_v52, %v2772_v53  ;;  %vm9122_vm15 = vmor %vm3083_vm7, %vm3084_vm8  ;;  %v11916_v53 = vld [vmem:[#allocation43_spill] sm:$0xff] }
 0xade   : > { %v3009_v4 = vand.u32 2147483648, %v9047_v56  ;;  %v3554_v24 = vmul.f32 %v11906_v10, %v3544_v51  ;;  %vm3004_vm12 = vweird.f32 %v6595_v1  ;;  %v3007_v46 = vand.u32 2147483647, %v9047_v56  ;;  %5263 = vmax.xlane.f32.xlu1 %v9007_v42 }
 0xadf   : > { %v3082_v18 = vadd.f32 %v9083_v48, %v3081_v5  ;;  %v3001_v44 = vmul.f32 %v6595_v1, %v3000_v13  ;;  %vm3796_vm13 = vweird.f32 %v11830_v37  ;;  %v2978_v49 = vadd.f32 %v2932_v57, %v2898_v39  ;;  %v9143_v16 = vpop.xlane.xlu0 %2750  ;;  %v9153_v27 = vpop.xlane.xlu1 %3070  ;;  %5257 = vmax.xlane.f32.xlu2 %v9010_v15 }
 0xae0   : > { %v3558_v26 = vadd.f32 %v3554_v24, %v3525_v58  ;;  %v11909_v51 = vsel %vm9015_vm14, %v11882_v28, %v8995_v30  ;;  %v11910_v19 = vsub.f32 1.0, %v8679_v45  ;;  %vm3003_vm1 = vweird.f32 %v9047_v56  ;;  %v3518_v58 = vpop.xlane.xlu2 %3517  ;;  %vm9180_vm9 = vmor %vm3796_vm13, %vm3797_vm11 }
 0xae1   : > { %v9134_v42 = vsel %vm9079_vm5, %v9038_v8, %v11909_v51  ;;  %v3086_v62 = vsel %vm9122_vm15, %v9083_v48, %v3082_v18  ;;  %v3002_v52 = vadd.f32 %v6595_v1, %v3001_v44  ;;  %v9147_v28 = vadd.f32 %v8432_v7, %v9041_v50  ;;  %vm3005_vm14 = vmor %vm3003_vm1, %vm3004_vm12  ;;  %v11915_v44 = vld [vmem:[#allocation68_spill] sm:$0xff] }
 0xae2   : > { %v3885_v38 = vmul.f32 %v11911_v41, %v11910_v19  ;;  %v9149_v30 = vpop.eup %6596  ;;  %v3090_v8 = vor.u32 1.1754944e-38, %v3089_v21  ;;  %v3010_v45 = vor.u32 1.1754944e-38, %v3009_v4  ;;  %v3562_v34 = vsub.f32 %v11912_v9, %v3558_v26  ;;  %v11913_v21 = vld [vmem:[#allocation44_spill] sm:$0xff] }
 0xae3   : > { %6598 = vrcp.f32 %v9143_v16  ;;  %vm3088_vm4 = vcmp.eq.f32.partialorder %v3087_v2, 8.507059e+37  ;;  %v3006_v56 = vsel %vm3005_vm14, %v6595_v1, %v3002_v52  ;;  %vm3008_vm5 = vcmp.eq.f32.partialorder %v3007_v46, 8.507059e+37 }
 0xae4   : > { %v2854_v48 = vmul.f32 %v9149_v30, %v9097_v43  ;;  %v3091_v50 = vsel %vm3088_vm4, %v3090_v8, %v3086_v62  ;;  %v3011_v5 = vsel %vm3008_vm5, %v3010_v45, %v3006_v56  ;;  %v3566_v13 = vmin.f32 %v3562_v34, 0.0 }
 0xae5   : > { %6600 = vrcp.f32 %v9153_v27  ;;  %v3012_v40 = vmul.f32 %v3011_v5, %v11913_v21  ;;  %v11914_v39 = vand.u32 2147483648, %v11830_v37  ;;  %v9165_v24 = vadd.f32 %v11911_v41, %v3885_v38 }
 0xae6   : > { %v2855_v57 = vsub.f32 1.0, %v2854_v48  ;;  %v3555_v1 = vmul.f32 %v11906_v10, %v9092_v36  ;;  %v3570_v2 = vmul.f32 1.442695, %v3566_v13  ;;  %v3526_v18 = vmul.f32 %v11902_v63, %v3518_v58 }
 0xae7   : > { %v9162_v4 = vor.u32 1.1754944e-38, %v11914_v39  ;;  %v3092_v26 = vmul.f32 %v3091_v50, %v11916_v53  ;;  %v3058_v51 = vadd.f32 %v3012_v40, %v2978_v49  ;;  %v2862_v62 = vand.u32 2147483647, %v9097_v43  ;;  %v11919_v50 = vld [vmem:[#allocation46_spill] sm:$0xff] }
 0xae8   : > { %v2856_v19 = vmul.f32 %v9149_v30, %v2855_v57  ;;  %v2864_v38 = vand.u32 2147483648, %v9097_v43  ;;  %v3559_v8 = vadd.f32 %v3555_v1, %v3526_v18  ;;  %6602 = vpow2.f32 %v3570_v2  ;;  %v9189_v9 = vpop.xlane.xlu2 %2910  ;;  %v9210_v18 = vpop.xlane.xlu0 %2990 }
 0xae9   : > { %v6599_v52 = vpop.eup %6598  ;;  %v9186_v58 = vadd.f32 %v3092_v26, %v3058_v51  ;;  %vm2859_vm10 = vweird.f32 %v9149_v30  ;;  %6604 = vrcp.f32 %v9189_v9  ;;  %vm2858_vm6 = vweird.f32 %v9097_v43 }
 0xaea   : > { %v2774_v45 = vmul.f32 %v6599_v52, %v9143_v16  ;;  %v2857_v48 = vadd.f32 %v9149_v30, %v2856_v19  ;;  %v3563_v5 = vsub.f32 %v11919_v50, %v3559_v8  ;;  %vm9202_vm0 = vcmp.eq.f32.partialorder %v2862_v62, 8.507059e+37  ;;  %vm9212_vm7 = vmor %vm2858_vm6, %vm2859_vm10 }
 0xaeb   : > { %v9195_v56 = vpop.eup %6600  ;;  %v2782_v40 = vand.u32 2147483647, %v9143_v16  ;;  %v2865_v57 = vor.u32 1.1754944e-38, %v2864_v38  ;;  %v2784_v1 = vand.u32 2147483648, %v9143_v16  ;;  %v3102_v26 = vand.u32 2147483647, %v9153_v27  ;;  %v3550_v38 = vpop.xlane.xlu1 %3549 }
 0xaec   : > { %v3094_v21 = vmul.f32 %v9195_v56, %v9153_v27  ;;  %v2775_v39 = vsub.f32 1.0, %v2774_v45  ;;  %v3567_v2 = vmin.f32 %v3563_v5, 0.0  ;;  %vm2778_vm8 = vweird.f32 %v9143_v16 }
 0xaed   : > { %6606 = vrcp.f32 %v9210_v18  ;;  %v2861_v51 = vsel %vm9212_vm7, %v9149_v30, %v2857_v48  ;;  %vm2779_vm11 = vweird.f32 %v6599_v52  ;;  %vm3098_vm12 = vweird.f32 %v9153_v27 }
 0xaee   : > { %v3095_v43 = vsub.f32 1.0, %v3094_v21  ;;  %v2776_v19 = vmul.f32 %v6599_v52, %v2775_v39  ;;  %v3572_v62 = vmul.f32 1.442695, %v3567_v2  ;;  %v6603_v8 = vpop.eup %6602  ;;  %v3104_v50 = vand.u32 2147483648, %v9153_v27  ;;  %vm2780_vm14 = vmor %vm2778_vm8, %vm2779_vm11 }
 0xaef   : > { %vm9225_vm13 = vcmp.eq.f32.partialorder %v2782_v40, 8.507059e+37  ;;  %v6605_v21 = vpop.eup %6604  ;;  %v2785_v46 = vor.u32 1.1754944e-38, %v2784_v1  ;;  %vm2938_vm15 = vweird.f32 %v9189_v9  ;;  %v2866_v30 = vsel %vm9202_vm0, %v2865_v57, %v2861_v51 }
 0xaf0   : > { %v3096_v45 = vmul.f32 %v9195_v56, %v3095_v43  ;;  %v2777_v36 = vadd.f32 %v6599_v52, %v2776_v19  ;;  %6608 = vpow2.f32 %v3572_v62  ;;  %vm3099_vm1 = vweird.f32 %v9195_v56  ;;  %v11930_v19 = vld [vmem:[#allocation49_spill] sm:$0xff]  ;;  %v3521_v34 = vpop.xlane.xlu0 %3520 }
 0xaf1   : > { %v2934_v48 = vmul.f32 %v6605_v21, %v9189_v9  ;;  %v2942_v40 = vand.u32 2147483647, %v9189_v9  ;;  %vm9238_vm4 = vcmp.eq.f32.partialorder %v3102_v26, 8.507059e+37  ;;  %v3556_v2 = vmul.f32 %v11906_v10, %v3550_v38  ;;  %vm9265_vm10 = vmor %vm3098_vm12, %vm3099_vm1 }
 0xaf2   : > { %v2781_v1 = vsel %vm2780_vm14, %v6599_v52, %v2777_v36  ;;  %v9244_v13 = vmul.f32 %v6603_v8, %v11906_v10  ;;  %v9247_v57 = vmul.f32 %v6603_v8, %v11902_v63  ;;  %v3097_v16 = vadd.f32 %v9195_v56, %v3096_v45  ;;  %v11931_v52 = vld [vmem:[#allocation50_spill] sm:$0xff] }
 0xaf3   : > { %v6607_v53 = vpop.eup %6606  ;;  %v2786_v43 = vsel %vm9225_vm13, %v2785_v46, %v2781_v1  ;;  %v2935_v51 = vsub.f32 1.0, %v2934_v48  ;;  %v2944_v26 = vand.u32 2147483648, %v9189_v9  ;;  %v2867_v62 = vmul.f32 %v2866_v30, %v11930_v19  ;;  %v9271_v19 = vpop.xlane.xlu2 %2833 }
 0xaf4   : > { %11928 = vst [vmem:[#allocation73_spill] sm:$0xff] %v9244_v13  ;;  %v2787_v36 = vmul.f32 %v2786_v43, %v11931_v52  ;;  %v3014_v38 = vmul.f32 %v6607_v53, %v9210_v18  ;;  %v3022_v49 = vand.u32 2147483647, %v9210_v18  ;;  %vm2939_vm5 = vweird.f32 %v6605_v21 }
 0xaf5   : > { %11929 = vst [vmem:[#allocation63_spill] sm:$0xff] %v9247_v57  ;;  %v2936_v8 = vmul.f32 %v6605_v21, %v2935_v51  ;;  %v3662_v45 = vsel %vm3512_vm3, %v9244_v13, 0.0  ;;  %v3582_v46 = vsel %vm3512_vm3, %v9247_v57, 0.0  ;;  %v3024_v43 = vand.u32 2147483648, %v9210_v18  ;;  %vm2940_vm0 = vmor %vm2938_vm15, %vm2939_vm5 }
 0xaf6   : > { %v6609_v5 = vpop.eup %6608  ;;  %v2899_v48 = vadd.f32 %v2867_v62, %v2787_v36  ;;  %v3015_v1 = vsub.f32 1.0, %v3014_v38  ;;  %3663 = vadd.xlane.f32.xlu1 %v3662_v45  ;;  %3583 = vadd.xlane.f32.xlu0 %v3582_v46  ;;  %v3527_v51 = vmul.f32 %v11902_v63, %v3521_v34  ;;  %v3101_v52 = vsel %vm9265_vm10, %v9195_v56, %v3097_v16  ;;  %v9280_v36 = vpop.xlane.xlu1 %2753  ;;  %v11936_v46 = vld [vmem:[#allocation56_spill] sm:$0xff] }
 0xaf7   : > { %v2937_v57 = vadd.f32 %v6605_v21, %v2936_v8  ;;  %v2945_v27 = vor.u32 1.1754944e-38, %v2944_v26  ;;  %6610 = vrcp.f32 %v9271_v19  ;;  %vm3019_vm6 = vweird.f32 %v6607_v53  ;;  %v11935_v26 = vld [vmem:[#allocation52_spill] sm:$0xff] }
 0xaf8   : > { %v3016_v13 = vmul.f32 %v6607_v53, %v3015_v1  ;;  %v3560_v62 = vadd.f32 %v3556_v2, %v3527_v51  ;;  %v9283_v34 = vmul.f32 %v6609_v5, %v11906_v10  ;;  %v3105_v38 = vor.u32 1.1754944e-38, %v3104_v50 }
 0xaf9   : > { %v2941_v45 = vsel %vm2940_vm0, %v6605_v21, %v2937_v57  ;;  %vm2943_vm7 = vcmp.eq.f32.partialorder %v2942_v40, 8.507059e+37  ;;  %6612 = vrcp.f32 %v9280_v36  ;;  %vm3018_vm8 = vweird.f32 %v9210_v18 }
 0xafa   : > { %11934 = vst [vmem:[#allocation91_spill] sm:$0xff] %v9283_v34  ;;  %v3017_v56 = vadd.f32 %v6607_v53, %v3016_v13  ;;  %v2946_v16 = vsel %vm2943_vm7, %v2945_v27, %v2941_v45  ;;  %v3564_v8 = vsub.f32 %v11935_v26, %v3560_v62  ;;  %v3106_v9 = vsel %vm9238_vm4, %v3105_v38, %v3101_v52  ;;  %vm3020_vm11 = vmor %vm3018_vm8, %vm3019_vm6  ;;  %v9294_v13 = vpop.xlane.xlu0 %2913  ;;  %v11939_v27 = vld [vmem:[#allocation59_spill] sm:$0xff] }
 0xafb   : > { %v3025_v2 = vor.u32 1.1754944e-38, %v3024_v43  ;;  %v2947_v30 = vmul.f32 %v2946_v16, %v11936_v46  ;;  %vm3023_vm12 = vcmp.eq.f32.partialorder %v3022_v49, 8.507059e+37  ;;  %v3665_v40 = vsel %vm3512_vm3, %v9283_v34, 0.0  ;;  %v11938_v43 = vld [vmem:[#allocation53_spill] sm:$0xff] }
 0xafc   : > { %v3021_v50 = vsel %vm3020_vm11, %v6607_v53, %v3017_v56  ;;  %v3568_v21 = vmin.f32 %v3564_v8, 0.0  ;;  %3666 = vadd.xlane.f32.xlu2 %v3665_v40  ;;  %v9297_v39 = vmul.f32 %v6609_v5, %v11902_v63  ;;  %6614 = vrcp.f32 %v9294_v13  ;;  %v9308_v56 = vpop.xlane.xlu2 %3073 }
 0xafd   : > { %v6611_v18 = vpop.eup %6610  ;;  %v3026_v57 = vsel %vm3023_vm12, %v3025_v2, %v3021_v50  ;;  %v2979_v51 = vadd.f32 %v2947_v30, %v2899_v48  ;;  %v3107_v52 = vmul.f32 %v3106_v9, %v11938_v43  ;;  %v2797_v45 = vand.u32 2147483647, %v9280_v36 }
 0xafe   : > { %11937 = vst [vmem:[#allocation40_spill] sm:$0xff] %v9297_v39  ;;  %v3027_v53 = vmul.f32 %v3026_v57, %v11939_v27  ;;  %v3574_v49 = vmul.f32 1.442695, %v3568_v21  ;;  %v2869_v62 = vmul.f32 %v6611_v18, %v9271_v19  ;;  %vm2873_vm13 = vweird.f32 %v9271_v19  ;;  %v9319_v40 = vpop.xlane.xlu1 %2993 }
 0xaff   : > { %v6613_v38 = vpop.eup %6612  ;;  %v2877_v48 = vand.u32 2147483647, %v9271_v19  ;;  %v3585_v5 = vsel %vm3512_vm3, %v9297_v39, 0.0  ;;  %v2879_v8 = vand.u32 2147483648, %v9271_v19  ;;  %vm2793_vm15 = vweird.f32 %v9280_v36 }
 0xb00   : > { %v3059_v16 = vadd.f32 %v3027_v53, %v2979_v51  ;;  %6616 = vpow2.f32 %v3574_v49  ;;  %v2789_v26 = vmul.f32 %v6613_v38, %v9280_v36  ;;  %3586 = vadd.xlane.f32.xlu1 %v3585_v5  ;;  %v2799_v9 = vand.u32 2147483648, %v9280_v36 }
 0xb01   : > { %v2870_v2 = vsub.f32 1.0, %v2869_v62  ;;  %6618 = vrcp.f32 %v9308_v56  ;;  %v2957_v50 = vand.u32 2147483647, %v9294_v13  ;;  %v2959_v21 = vand.u32 2147483648, %v9294_v13 }
 0xb02   : > { %v9315_v46 = vadd.f32 %v3107_v52, %v3059_v16  ;;  %v2790_v30 = vsub.f32 1.0, %v2789_v26  ;;  %v6615_v57 = vpop.eup %6614  ;;  %vm9321_vm1 = vcmp.eq.f32.partialorder %v2797_v45, 8.507059e+37  ;;  %vm2874_vm14 = vweird.f32 %v6611_v18  ;;  %v9331_v49 = vpop.xlane.xlu0 %4118  ;;  %v11947_v52 = vld [vmem:[#allocation71_spill] sm:$0xff] }
 0xb03   : > { %v2871_v43 = vmul.f32 %v6611_v18, %v2870_v2  ;;  %6620 = vrcp.f32 %v9319_v40  ;;  %vm2794_vm4 = vweird.f32 %v6613_v38  ;;  %vm9326_vm5 = vcmp.eq.f32.partialorder %v2877_v48, 8.507059e+37  ;;  %vm2875_vm6 = vmor %vm2873_vm13, %vm2874_vm14 }
 0xb04   : > { %v2791_v27 = vmul.f32 %v6613_v38, %v2790_v30  ;;  %v2949_v53 = vmul.f32 %v6615_v57, %v9294_v13  ;;  %v2800_v62 = vor.u32 1.1754944e-38, %v2799_v9  ;;  %v2880_v45 = vor.u32 1.1754944e-38, %v2879_v8  ;;  %vm2795_vm7 = vmor %vm2793_vm15, %vm2794_vm4 }
 0xb05   : > { %v2872_v5 = vadd.f32 %v6611_v18, %v2871_v43  ;;  %vm2953_vm10 = vweird.f32 %v9294_v13  ;;  %vm9336_vm0 = vcmp.eq.f32.partialorder %v2957_v50, 8.507059e+37  ;;  %v2960_v30 = vor.u32 1.1754944e-38, %v2959_v21 }
 0xb06   : > { %v6617_v16 = vpop.eup %6616  ;;  %v2792_v26 = vadd.f32 %v6613_v38, %v2791_v27  ;;  %v2950_v2 = vsub.f32 1.0, %v2949_v53  ;;  %vm2954_vm8 = vweird.f32 %v6615_v57  ;;  %v3037_v9 = vand.u32 2147483647, %v9319_v40  ;;  %v4101_v34 = vpop.xlane.xlu1 %4100 }
 0xb07   : > { %v9340_v1 = vpop.eup %6618  ;;  %v2876_v8 = vsel %vm2875_vm6, %v6611_v18, %v2872_v5  ;;  %vm3113_vm11 = vweird.f32 %v9308_v56  ;;  %v9350_v27 = vmul.f32 %v6617_v16, %v11906_v10  ;;  %vm3888_vm12 = vweird.f32 %v11911_v41  ;;  %v11946_v18 = vld [vmem:[#allocation67_spill] sm:$0xff]  ;;  %vm2955_vm15 = vmor %vm2953_vm10, %vm2954_vm8 }
 0xb08   : > { %v2796_v19 = vsel %vm2795_vm7, %v6613_v38, %v2792_v26  ;;  %v2881_v50 = vsel %vm9326_vm5, %v2880_v45, %v2876_v8  ;;  %v2951_v43 = vmul.f32 %v6615_v57, %v2950_v2  ;;  %v3039_v5 = vand.u32 2147483648, %v9319_v40  ;;  %v4125_v26 = vpop.xlane.xlu2 %4124 }
 0xb09   : > { %v6621_v21 = vpop.eup %6620  ;;  %v2801_v36 = vsel %vm9321_vm1, %v2800_v62, %v2796_v19  ;;  %v2882_v53 = vmul.f32 %v2881_v50, %v11946_v18  ;;  %v3109_v38 = vmul.f32 %v9340_v1, %v9308_v56  ;;  %v3119_v39 = vand.u32 2147483648, %v9308_v56 }
 0xb0a   : > { %v2802_v45 = vmul.f32 %v2801_v36, %v11947_v52  ;;  %v2952_v2 = vadd.f32 %v6615_v57, %v2951_v43  ;;  %v3029_v8 = vmul.f32 %v6621_v21, %v9319_v40  ;;  %vm3887_vm13 = vweird.f32 %v11915_v44 }
 0xb0b   : > { %v3110_v51 = vsub.f32 1.0, %v3109_v38  ;;  %vm3114_vm1 = vweird.f32 %v9340_v1  ;;  %v4107_v62 = vmul.f32 %v11902_v63, %v4101_v34  ;;  %v4131_v19 = vmul.f32 %v11906_v10, %v4125_v26  ;;  %vm9408_vm8 = vmor %vm3887_vm13, %vm3888_vm12 }
 0xb0c   : > { %v11948_v50 = vand.u32 2147483647, %v11830_v37  ;;  %v2900_v36 = vadd.f32 %v2882_v53, %v2802_v45  ;;  %v2956_v18 = vsel %vm2955_vm15, %v6615_v57, %v2952_v2  ;;  %v3030_v52 = vsub.f32 1.0, %v3029_v8  ;;  %v11951_v37 = vld [vmem:[#allocation74_spill] sm:$0xff]  ;;  %v9385_v53 = vpop.xlane.xlu0 %2836  ;;  %v11952_v2 = vld [vmem:[#allocation55_spill] sm:$0xff]  ;;  %vm3115_vm6 = vmor %vm3113_vm11, %vm3114_vm1 }
 0xb0d   : > { %v3668_v13 = vsel %vm3512_vm3, %v9350_v27, 0.0  ;;  %v2961_v38 = vsel %vm9336_vm0, %v2960_v30, %v2956_v18  ;;  %v3111_v3 = vmul.f32 %v9340_v1, %v3110_v51  ;;  %v4135_v34 = vadd.f32 %v4131_v19, %v4107_v62 }
 0xb0e   : > { %vm9371_vm14 = vcmp.eq.f32.partialorder %v11948_v50, 8.507059e+37  ;;  %3669 = vadd.xlane.f32.xlu0 %v3668_v13  ;;  %v9381_v26 = vmul.f32 %v6617_v16, %v11902_v63  ;;  %v2962_v50 = vmul.f32 %v2961_v38, %v11951_v37  ;;  %v3031_v23 = vmul.f32 %v6621_v21, %v3030_v52 }
 0xb0f   : > { %vm3034_vm4 = vweird.f32 %v6621_v21  ;;  %v3117_v57 = vand.u32 2147483647, %v9308_v56  ;;  %v3112_v45 = vadd.f32 %v9340_v1, %v3111_v3  ;;  %v4139_v48 = vsub.f32 %v11952_v2, %v4135_v34 }
 0xb10   : > { %v3588_v30 = vsel %vm3512_vm3, %v9381_v26, 0.0  ;;  %6622 = vrcp.f32 %v9385_v53  ;;  %v2980_v8 = vadd.f32 %v2962_v50, %v2900_v36  ;;  %v3032_v16 = vadd.f32 %v6621_v21, %v3031_v23  ;;  %v4095_v18 = vpop.xlane.xlu2 %4094 }
 0xb11   : > { %vm3033_vm5 = vweird.f32 %v9319_v40  ;;  %vm3038_vm10 = vcmp.eq.f32.partialorder %v3037_v9, 8.507059e+37  ;;  %3589 = vadd.xlane.f32.xlu2 %v3588_v30  ;;  %v3040_v3 = vor.u32 1.1754944e-38, %v3039_v5  ;;  %v3116_v51 = vsel %vm3115_vm6, %v9340_v1, %v3112_v45  ;;  %v9400_v40 = vpop.xlane.xlu1 %2916  ;;  %v11960_v45 = vld [vmem:[#allocation75_spill] sm:$0xff] }
 0xb12   : > { %vm3035_vm0 = vmor %vm3033_vm5, %vm3034_vm4  ;;  %v3120_v62 = vor.u32 1.1754944e-38, %v3119_v39  ;;  %v4143_v19 = vmin.f32 %v4139_v48, 0.0  ;;  %vm3118_vm7 = vcmp.eq.f32.partialorder %v3117_v57, 8.507059e+37  ;;  %v4129_v23 = vmul.f32 %v11906_v10, %v9331_v49  ;;  %v11955_v39 = vld [vmem:[#allocation78_spill] sm:$0xff] }
 0xb13   : > { %v3036_v52 = vsel %vm3035_vm0, %v6621_v21, %v3032_v16  ;;  %v4105_v9 = vmul.f32 %v11902_v63, %v4095_v18  ;;  %6624 = vrcp.f32 %v9400_v40  ;;  %v11956_v49 = vsel %vm9180_vm9, %v8432_v7, %v9147_v28 }
 0xb14   : > { %v3041_v36 = vsel %vm3038_vm10, %v3040_v3, %v3036_v52  ;;  %v3121_v56 = vsel %vm3118_vm7, %v3120_v62, %v3116_v51  ;;  %v4149_v13 = vmul.f32 1.442695, %v4143_v19  ;;  %v3804_v5 = vsel %vm9371_vm14, %v9162_v4, %v11956_v49 }
 0xb15   : > { %v3042_v21 = vmul.f32 %v3041_v36, %v11955_v39  ;;  %v3890_v38 = vsel %vm9408_vm8, %v11911_v41, %v9165_v24  ;;  %v11957_v34 = vsub.f32 1.0, %v8714_v59  ;;  %v4133_v57 = vadd.f32 %v4129_v23, %v4105_v9  ;;  %v9438_v41 = vpop.xlane.xlu0 %3076  ;;  %v11961_v24 = vld [vmem:[#allocation58_spill] sm:$0xff] }
 0xb16   : > { %v9428_v50 = vpop.eup %6622  ;;  %v11958_v15 = vand.u32 2147483647, %v11915_v44  ;;  %v11959_v7 = vand.u32 2147483648, %v11915_v44  ;;  %v4374_v4 = vand.u32 2147483648, %v8374_v11  ;;  %v3122_v2 = vmul.f32 %v3121_v56, %v11960_v45  ;;  %v11963_v44 = vld [vmem:[#allocation85_spill] sm:$0xff] }
 0xb17   : > { %v4366_v37 = vmul.f32 %v8455_v60, %v11957_v34  ;;  %v3060_v43 = vadd.f32 %v3042_v21, %v2980_v8  ;;  %6626 = vpow2.f32 %v4149_v13  ;;  %v2884_v59 = vmul.f32 %v9428_v50, %v9385_v53 }
 0xb18   : > { %vm3892_vm11 = vcmp.eq.f32.partialorder %v11958_v15, 8.507059e+37  ;;  %v3894_v28 = vor.u32 1.1754944e-38, %v11959_v7  ;;  %v4137_v48 = vsub.f32 %v11961_v24, %v4133_v57  ;;  %6628 = vrcp.f32 %v9438_v41  ;;  %v9451_v52 = vpop.xlane.xlu2 %2756 }
 0xb19   : > { %v11962_v16 = vsub.f32 1.0, %v8683_v61  ;;  %v9445_v51 = vadd.f32 %v3122_v2, %v3060_v43  ;;  %v2885_v8 = vsub.f32 1.0, %v2884_v59  ;;  %v4367_v62 = vadd.f32 %v8455_v60, %v4366_v37  ;;  %v9449_v19 = vpop.eup %6624  ;;  %v9464_v56 = vpop.xlane.xlu1 %3523 }
 0xb1a   : > { %v3895_v30 = vsel %vm3892_vm11, %v3894_v28, %v3890_v38  ;;  %vm4369_vm9 = vweird.f32 %v8455_v60  ;;  %v4141_v18 = vmin.f32 %v4137_v48, 0.0  ;;  %v9455_v23 = vmul.f32 %v8118_v35, %v9134_v42  ;;  %v11969_v38 = vld [vmem:[#allocation77_spill] sm:$0xff] }
 0xb1b   : > { %v4454_v3 = vmul.f32 %v11963_v44, %v11962_v16  ;;  %v9458_v61 = vmul.f32 %v8074_v6, %v3804_v5  ;;  %vm4368_vm12 = vweird.f32 %v8374_v11  ;;  %v2964_v9 = vmul.f32 %v9449_v19, %v9400_v40 }
 0xb1c   : > { %v2886_v36 = vmul.f32 %v9428_v50, %v2885_v8  ;;  %v9467_v13 = vmul.f32 %v8118_v35, %v3895_v30  ;;  %v11964_v1 = vand.u32 2147483647, %v8374_v11  ;;  %v4145_v39 = vmul.f32 1.442695, %v4141_v18  ;;  %vm9475_vm15 = vmor %vm4368_vm12, %vm4369_vm9 }
 0xb1d   : > { %v4375_v49 = vor.u32 1.1754944e-38, %v4374_v4  ;;  %v9480_v5 = vadd.f32 %v11963_v44, %v4454_v3  ;;  %v6627_v37 = vpop.eup %6626  ;;  %v2965_v57 = vsub.f32 1.0, %v2964_v9  ;;  %v2892_v15 = vand.u32 2147483647, %v9385_v53  ;;  %v4098_v59 = vpop.xlane.xlu0 %4097 }
 0xb1e   : > { %vm9471_vm13 = vcmp.eq.f32.partialorder %v11964_v1, 8.507059e+37  ;;  %6630 = vrcp.f32 %v9451_v52  ;;  %v4371_v11 = vsel %vm9475_vm15, %v8455_v60, %v4367_v62  ;;  %v9488_v7 = vpop.eup %6628  ;;  %v2972_v28 = vand.u32 2147483647, %v9400_v40 }
 0xb1f   : > { %v2894_v4 = vand.u32 2147483648, %v9385_v53  ;;  %6632 = vpow2.f32 %v4145_v39  ;;  %v2887_v45 = vadd.f32 %v9428_v50, %v2886_v36  ;;  %vm2889_vm1 = vweird.f32 %v9428_v50 }
 0xb20   : > { %v3124_v2 = vmul.f32 %v9488_v7, %v9438_v41  ;;  %v2966_v60 = vmul.f32 %v9449_v19, %v2965_v57  ;;  %vm2888_vm14 = vweird.f32 %v9385_v53  ;;  %v9502_v48 = vsel %vm9471_vm13, %v4375_v49, %v4371_v11  ;;  %v9526_v36 = vpop.xlane.xlu2 %2996 }
 0xb21   : > { %vm2968_vm4 = vweird.f32 %v9400_v40  ;;  %v2974_v16 = vand.u32 2147483648, %v9400_v40  ;;  %vm9507_vm5 = vcmp.eq.f32.partialorder %v2892_v15, 8.507059e+37  ;;  %v9512_v8 = vmul.f32 %v6627_v37, %v11906_v10  ;;  %vm9519_vm0 = vmor %vm2888_vm14, %vm2889_vm1  ;;  %v4122_v49 = vpop.xlane.xlu1 %4121 }
 0xb22   : > { %vm2969_vm10 = vweird.f32 %v9449_v19  ;;  %vm9515_vm6 = vcmp.eq.f32.partialorder %v2972_v28, 8.507059e+37  ;;  %v2895_v18 = vor.u32 1.1754944e-38, %v2894_v4  ;;  %v9524_v9 = vmul.f32 %v6627_v37, %v11902_v63 }
 0xb23   : > { %v2891_v42 = vsel %vm9519_vm0, %v9428_v50, %v2887_v45  ;;  %v3125_v39 = vsub.f32 1.0, %v3124_v2  ;;  %v4243_v21 = vsel %vm3512_vm3, %v9512_v8, 0.0  ;;  %6634 = vrcp.f32 %v9526_v36  ;;  %vm9554_vm9 = vmor %vm2968_vm4, %vm2969_vm10 }
 0xb24   : > { %v6631_v1 = vpop.eup %6630  ;;  %vm4457_vm7 = vweird.f32 %v11963_v44  ;;  %v2967_v37 = vadd.f32 %v9449_v19, %v2966_v60  ;;  %4244 = vadd.xlane.f32.xlu2 %v4243_v21  ;;  %v4163_v11 = vsel %vm3512_vm3, %v9524_v9, 0.0  ;;  %v4106_v50 = vmul.f32 %v11902_v63, %v4098_v59 }
 0xb25   : > { %v6633_v57 = vpop.eup %6632  ;;  %v2804_v15 = vmul.f32 %v6631_v1, %v9451_v52  ;;  %v2975_v28 = vor.u32 1.1754944e-38, %v2974_v16  ;;  %v3134_v45 = vand.u32 2147483648, %v9438_v41  ;;  %4164 = vadd.xlane.f32.xlu1 %v4163_v11  ;;  %v4130_v2 = vmul.f32 %v11906_v10, %v4122_v49  ;;  %v4669_v34 = vpop.xlane.xlu0 %4668 }
 0xb26   : > { %vm4456_vm8 = vweird.f32 %v11969_v38  ;;  %vm3128_vm11 = vweird.f32 %v9438_v41  ;;  %v2812_v62 = vand.u32 2147483647, %v9451_v52  ;;  %v2814_v21 = vand.u32 2147483648, %v9451_v52 }
 0xb27   : > { %v2805_v60 = vsub.f32 1.0, %v2804_v15  ;;  %v9548_v30 = vmul.f32 %v6633_v57, %v11906_v10  ;;  %v2896_v16 = vsel %vm9507_vm5, %v2895_v18, %v2891_v42  ;;  %v3528_v49 = vmul.f32 %v11902_v63, %v9464_v56  ;;  %vm9598_vm5 = vmor %vm4456_vm8, %vm4457_vm7 }
 0xb28   : > { %v3126_v15 = vmul.f32 %v9488_v7, %v3125_v39  ;;  %v9564_v11 = vmul.f32 %v6633_v57, %v11902_v63  ;;  %v2971_v40 = vsel %vm9554_vm9, %v9449_v19, %v2967_v37  ;;  %vm2809_vm12 = vweird.f32 %v6631_v1  ;;  %v3553_v57 = vpop.xlane.xlu2 %3552 }
 0xb29   : > { %v2806_v24 = vmul.f32 %v6631_v1, %v2805_v60  ;;  %v4134_v43 = vadd.f32 %v4130_v2, %v4106_v50  ;;  %v6635_v4 = vpop.eup %6634  ;;  %vm3129_vm13 = vweird.f32 %v9488_v7  ;;  %vm2808_vm15 = vweird.f32 %v9451_v52  ;;  %v11981_v52 = vld [vmem:[#allocation90_spill] sm:$0xff]  ;;  %v4693_v60 = vpop.xlane.xlu1 %4692 }
 0xb2a   : > { %11978 = vst [vmem:[#allocation41_spill] sm:$0xff] %v9564_v11  ;;  %v4237_v56 = vsel %vm3512_vm3, %v9548_v30, 0.0  ;;  %v4157_v3 = vsel %vm3512_vm3, %v9564_v11, 0.0  ;;  %vm9575_vm1 = vcmp.eq.f32.partialorder %v2812_v62, 8.507059e+37  ;;  %v2815_v19 = vor.u32 1.1754944e-38, %v2814_v21  ;;  %vm2810_vm14 = vmor %vm2808_vm15, %vm2809_vm12 }
 0xb2b   : > { %v2807_v18 = vadd.f32 %v6631_v1, %v2806_v24  ;;  %v3044_v39 = vmul.f32 %v6635_v4, %v9526_v36  ;;  %4238 = vadd.xlane.f32.xlu0 %v4237_v56  ;;  %v2976_v37 = vsel %vm9515_vm6, %v2975_v28, %v2971_v40  ;;  %v2897_v50 = vmul.f32 %v2896_v16, %v11981_v52  ;;  %v11982_v40 = vld [vmem:[#allocation107_spill] sm:$0xff]  ;;  %vm9607_vm10 = vmor %vm3128_vm11, %vm3129_vm13 }
 0xb2c   : > { %v3127_v2 = vadd.f32 %v9488_v7, %v3126_v15  ;;  %v3557_v24 = vmul.f32 %v11906_v10, %v3553_v57  ;;  %v4138_v59 = vsub.f32 %v11826_v54, %v4134_v43  ;;  %v3054_v11 = vand.u32 2147483648, %v9526_v36  ;;  %4158 = vadd.xlane.f32.xlu2 %v4157_v3  ;;  %v11985_v43 = vld [vmem:[#allocation93_spill] sm:$0xff] }
 0xb2d   : > { %v2811_v62 = vsel %vm2810_vm14, %v6631_v1, %v2807_v18  ;;  %v3045_v21 = vsub.f32 1.0, %v3044_v39  ;;  %v4699_v28 = vmul.f32 %v11906_v10, %v4693_v60  ;;  %v4675_v16 = vmul.f32 %v11902_v63, %v4669_v34  ;;  %v4128_v42 = vpop.xlane.xlu0 %4127 }
 0xb2e   : > { %v2816_v53 = vsel %vm9575_vm1, %v2815_v19, %v2811_v62  ;;  %v3561_v15 = vadd.f32 %v3557_v24, %v3528_v49  ;;  %vm3049_vm4 = vweird.f32 %v6635_v4  ;;  %v3052_v1 = vand.u32 2147483647, %v9526_v36 }
 0xb2f   : > { %v2817_v56 = vmul.f32 %v2816_v53, %v11982_v40  ;;  %v3046_v52 = vmul.f32 %v6635_v4, %v3045_v21  ;;  %v2977_v3 = vmul.f32 %v2976_v37, %v11985_v43  ;;  %v3135_v49 = vor.u32 1.1754944e-38, %v3134_v45  ;;  %v11994_v43 = vld [vmem:[#allocation100_spill] sm:$0xff] }
 0xb30   : > { %v3565_v18 = vsub.f32 %v8300_v33, %v3561_v15  ;;  %v4459_v19 = vsel %vm9598_vm5, %v11963_v44, %v9480_v5  ;;  %v3131_v39 = vsel %vm9607_vm10, %v9488_v7, %v3127_v2  ;;  %vm3048_vm6 = vweird.f32 %v9526_v36  ;;  %v4687_v44 = vpop.xlane.xlu2 %4686 }
 0xb31   : > { %v2901_v57 = vadd.f32 %v2897_v50, %v2817_v56  ;;  %v3047_v37 = vadd.f32 %v6635_v4, %v3046_v52  ;;  %v4142_v60 = vmin.f32 %v4138_v59, 0.0  ;;  %vm3050_vm0 = vmor %vm3048_vm6, %vm3049_vm4  ;;  %v3055_v24 = vor.u32 1.1754944e-38, %v3054_v11  ;;  %v4663_v7 = vpop.xlane.xlu1 %4662  ;;  %v11991_v56 = vld [vmem:[#allocation115_spill] sm:$0xff] }
 0xb32   : > { %v4703_v45 = vadd.f32 %v4699_v28, %v4675_v16  ;;  %v3569_v62 = vmin.f32 %v3565_v18, 0.0  ;;  %v11988_v33 = vand.u32 2147483647, %v9438_v41  ;;  %vm3053_vm8 = vcmp.eq.f32.partialorder %v3052_v1, 8.507059e+37  ;;  %v11993_v1 = vld [vmem:[#allocation88_spill] sm:$0xff] }
 0xb33   : > { %v2981_v21 = vadd.f32 %v2977_v3, %v2901_v57  ;;  %v3051_v53 = vsel %vm3050_vm0, %v6635_v4, %v3047_v37  ;;  %v4697_v50 = vmul.f32 %v11906_v10, %v4687_v44  ;;  %v4673_v2 = vmul.f32 %v11902_v63, %v4663_v7 }
 0xb34   : > { %vm3133_vm7 = vcmp.eq.f32.partialorder %v11988_v33, 8.507059e+37  ;;  %v3056_v15 = vsel %vm3053_vm8, %v3055_v24, %v3051_v53  ;;  %v3576_v40 = vmul.f32 1.442695, %v3569_v62  ;;  %v11989_v11 = vand.u32 2147483648, %v11969_v38 }
 0xb35   : > { %v3136_v5 = vsel %vm3133_vm7, %v3135_v49, %v3131_v39  ;;  %v3057_v36 = vmul.f32 %v3056_v15, %v8695_v31  ;;  %v11990_v41 = vsub.f32 1.0, %v8734_v25  ;;  %v4147_v4 = vmul.f32 1.442695, %v4142_v60  ;;  %v4690_v18 = vpop.xlane.xlu0 %4689 }
 0xb36   : > { %v4463_v59 = vor.u32 1.1754944e-38, %v11989_v11  ;;  %v4707_v16 = vsub.f32 %v11837_v12, %v4703_v45  ;;  %6636 = vpow2.f32 %v3576_v40  ;;  %v11992_v52 = vsub.f32 1.0, %v11991_v56 }
 0xb37   : > { %v4336_v28 = vmul.f32 %v8533_v14, %v11990_v41  ;;  %v3137_v3 = vmul.f32 %v3136_v5, %v11994_v43  ;;  %v3061_v31 = vadd.f32 %v3057_v36, %v2981_v21  ;;  %v4701_v34 = vadd.f32 %v4697_v50, %v4673_v2  ;;  %v12012_v2 = vld [vmem:[#allocation37_spill] sm:$0xff] }
 0xb38   : > { %v4424_v54 = vmul.f32 %v11993_v1, %v11992_v52  ;;  %v3808_v49 = vsub.f32 1.0, %v8742_v32  ;;  %v9638_v25 = vmul.f32 %v8074_v6, %v9502_v48  ;;  %v11995_v39 = vand.u32 2147483647, %v11969_v38  ;;  %v4104_v62 = vpop.xlane.xlu2 %4103 }
 0xb39   : > { %vm4338_vm9 = vweird.f32 %v8449_v17  ;;  %vm4339_vm12 = vweird.f32 %v8533_v14  ;;  %v9644_v12 = vadd.f32 %v3137_v3, %v3061_v31  ;;  %v4705_v57 = vsub.f32 %v8391_v20, %v4701_v34  ;;  %v11999_v20 = vld [vmem:[#allocation79_spill] sm:$0xff]  ;;  %v9660_v44 = vpop.xlane.xlu1 %5254 }
 0xb3a   : > { %vm4461_vm11 = vcmp.eq.f32.partialorder %v11995_v39, 8.507059e+37  ;;  %v4337_v60 = vadd.f32 %v8533_v14, %v4336_v28  ;;  %v11996_v32 = vand.u32 2147483647, %v8449_v17  ;;  %6638 = vpow2.f32 %v4147_v4  ;;  %vm9670_vm14 = vmor %vm4338_vm9, %vm4339_vm12 }
 0xb3b   : > { %v4464_v37 = vsel %vm4461_vm11, %v4463_v59, %v4459_v19  ;;  %v4711_v38 = vmin.f32 %v4707_v16, 0.0  ;;  %v4425_v48 = vadd.f32 %v11993_v1, %v4424_v54  ;;  %vm4427_vm15 = vweird.f32 %v11993_v1 }
 0xb3c   : > { %vm9650_vm13 = vcmp.eq.f32.partialorder %v11996_v32, 8.507059e+37  ;;  %v4709_v45 = vmin.f32 %v4705_v57, 0.0  ;;  %v4344_v33 = vand.u32 2147483648, %v8449_v17  ;;  %vm4426_vm1 = vweird.f32 %v11999_v20  ;;  %v6637_v21 = vpop.eup %6636 }
 0xb3d   : > { %v3809_v19 = vmul.f32 %v8579_v22, %v3808_v49  ;;  %v4132_v53 = vmul.f32 %v11906_v10, %v4128_v42  ;;  %v4108_v5 = vmul.f32 %v11902_v63, %v4104_v62  ;;  %v9664_v15 = vmul.f32 %v8118_v35, %v4464_v37  ;;  %vm9683_vm4 = vmor %vm4426_vm1, %vm4427_vm15  ;;  %v5261_v54 = vpop.xlane.xlu0 %5260  ;;  %v12007_v37 = vld [vmem:[#allocation36_spill] sm:$0xff] }
 0xb3e   : > { %v4432_v7 = vand.u32 2147483648, %v11999_v20  ;;  %v4713_v50 = vmul.f32 1.442695, %v4709_v45  ;;  %v9676_v42 = vmul.f32 %v6637_v21, %v11906_v10  ;;  %v4341_v36 = vsel %vm9670_vm14, %v8533_v14, %v4337_v60  ;;  %v12009_v45 = vld [vmem:[#allocation99_spill] sm:$0xff] }
 0xb3f   : > { %v4430_v17 = vand.u32 2147483647, %v11999_v20  ;;  %v4717_v11 = vmul.f32 1.442695, %v4711_v38  ;;  %v4136_v59 = vadd.f32 %v4132_v53, %v4108_v5  ;;  %v9689_v41 = vmul.f32 %v6637_v21, %v11902_v63 }
 0xb40   : > { %v4429_v28 = vsel %vm9683_vm4, %v11993_v1, %v4425_v48  ;;  %6640 = vpow2.f32 %v4713_v50  ;;  %v3671_v14 = vsel %vm3512_vm3, %v9676_v42, 0.0  ;;  %v3810_v4 = vadd.f32 %v8579_v22, %v3809_v19  ;;  %v6639_v16 = vpop.eup %6638  ;;  %v12004_v1 = vld [vmem:[#allocation80_spill] sm:$0xff]  ;;  %v4666_v32 = vpop.xlane.xlu2 %4665  ;;  %v12011_v50 = vld [vmem:[#allocation45_spill] sm:$0xff] }
 0xb41   : > { %vm3812_vm5 = vweird.f32 %v8579_v22  ;;  %v4140_v56 = vsub.f32 %v8435_v0, %v4136_v59  ;;  %3672 = vadd.xlane.f32.xlu1 %v3671_v14  ;;  %v3591_v52 = vsel %vm3512_vm3, %v9689_v41, 0.0  ;;  %v4345_v43 = vor.u32 1.1754944e-38, %v4344_v33  ;;  %v9724_v19 = vpop.xlane.xlu1 %4671 }
 0xb42   : > { %v4433_v3 = vor.u32 1.1754944e-38, %v4432_v7  ;;  %3592 = vadd.xlane.f32.xlu0 %v3591_v52  ;;  %vm4431_vm10 = vcmp.eq.f32.partialorder %v4430_v17, 8.507059e+37  ;;  %vm3811_vm6 = vweird.f32 %v12004_v1  ;;  %v3815_v31 = vand.u32 2147483647, %v12004_v1  ;;  %v12010_v7 = vld [vmem:[#allocation82_spill] sm:$0xff] }
 0xb43   : > { %v3817_v34 = vand.u32 2147483648, %v12004_v1  ;;  %6642 = vpow2.f32 %v4717_v11  ;;  %v4144_v49 = vmin.f32 %v4140_v56, 0.0  ;;  %v4346_v0 = vsel %vm9650_vm13, %v4345_v43, %v4341_v36  ;;  %vm9708_vm0 = vmor %vm3811_vm6, %vm3812_vm5 }
 0xb44   : > { %v4434_v39 = vsel %vm4431_vm10, %v4433_v3, %v4429_v28  ;;  %v3157_v60 = vadd.f32 %v12007_v37, %v9186_v58  ;;  %v9715_v38 = vmul.f32 %v6639_v16, %v11906_v10  ;;  %v3814_v48 = vsel %vm9708_vm0, %v8579_v22, %v3810_v4 }
 0xb45   : > { %v12008_v24 = vsub.f32 1.0, %v8720_v47  ;;  %v4698_v33 = vmul.f32 %v11906_v10, %v4690_v18  ;;  %v4151_v20 = vmul.f32 1.442695, %v4144_v49  ;;  %v4674_v21 = vmul.f32 %v11902_v63, %v4666_v32  ;;  %v5231_v56 = vpop.xlane.xlu0 %5230 }
 0xb46   : > { %v9728_v58 = vmul.f32 %v6639_v16, %v11902_v63  ;;  %v9730_v53 = vpop.eup %6640  ;;  %v9733_v5 = vmul.f32 %v8074_v6, %v4346_v0  ;;  %v9736_v22 = vmul.f32 %v8118_v35, %v4434_v39  ;;  %vm3816_vm7 = vcmp.eq.f32.partialorder %v3815_v31, 8.507059e+37  ;;  %v12014_v0 = vld [vmem:[#allocation47_spill] sm:$0xff] }
 0xb47   : > { %v3900_v62 = vmul.f32 %v12009_v45, %v12008_v24  ;;  %v3818_v47 = vor.u32 1.1754944e-38, %v3817_v34  ;;  %6644 = vpow2.f32 %v4151_v20  ;;  %v4702_v18 = vadd.f32 %v4698_v33, %v4674_v21 }
 0xb48   : > { %v9740_v40 = vmul.f32 %v9730_v53, %v11906_v10  ;;  %vm3902_vm8 = vweird.f32 %v12010_v7  ;;  %v3248_v36 = vadd.f32 %v12011_v50, %v3157_v60  ;;  %v3158_v17 = vadd.f32 %v12012_v2, %v9315_v46  ;;  %v5237_v60 = vpop.xlane.xlu2 %5236 }
 0xb49   : > { %v4240_v11 = vsel %vm3512_vm3, %v9715_v38, 0.0  ;;  %v3819_v59 = vsel %vm3816_vm7, %v3818_v47, %v3814_v48  ;;  %v6643_v28 = vpop.eup %6642  ;;  %v4706_v14 = vsub.f32 %v8504_v29, %v4702_v18  ;;  %v4160_v4 = vsel %vm3512_vm3, %v9728_v58, 0.0  ;;  %v12013_v29 = vld [vmem:[#allocation121_spill] sm:$0xff]  ;;  %v9772_v33 = vpop.xlane.xlu1 %5233 }
 0xb4a   : > { %4241 = vadd.xlane.f32.xlu1 %v4240_v11  ;;  %v4805_v16 = vsel %vm3512_vm3, %v9740_v40, 0.0  ;;  %v3901_v52 = vadd.f32 %v12009_v45, %v3900_v62  ;;  %v5265_v46 = vmul.f32 %v11906_v10, %v9660_v44  ;;  %4161 = vadd.xlane.f32.xlu0 %v4160_v4  ;;  %v5241_v43 = vmul.f32 %v11902_v63, %v5231_v56  ;;  %v12015_v44 = vld [vmem:[#allocation51_spill] sm:$0xff]  ;;  %v12023_v56 = vld [vmem:[#allocation54_spill] sm:$0xff] }
 0xb4b   : > { %4806 = vadd.xlane.f32.xlu2 %v4805_v16  ;;  %vm3903_vm11 = vweird.f32 %v12009_v45  ;;  %v4350_v3 = vsub.f32 1.0, %v12013_v29  ;;  %v4710_v1 = vmin.f32 %v4706_v14, 0.0  ;;  %v9760_v31 = vmul.f32 %v8074_v6, %v3819_v59  ;;  %v12020_v59 = vld [vmem:[#allocation70_spill] sm:$0xff] }
 0xb4c   : > { %v3906_v34 = vand.u32 2147483647, %v12010_v7  ;;  %v3908_v49 = vand.u32 2147483648, %v12010_v7  ;;  %v9765_v39 = vadd.f32 %v12014_v0, %v3248_v36  ;;  %v3249_v57 = vadd.f32 %v12015_v44, %v3158_v17  ;;  %vm9782_vm9 = vmor %vm3902_vm8, %vm3903_vm11  ;;  %v12019_v36 = vld [vmem:[#allocation101_spill] sm:$0xff]  ;;  %v12025_v0 = vld [vmem:[#allocation84_spill] sm:$0xff] }
 0xb4d   : > { %v5269_v37 = vadd.f32 %v5265_v46, %v5241_v43  ;;  %v9769_v32 = vmul.f32 %v6643_v28, %v11906_v10  ;;  %v6645_v48 = vpop.eup %6644  ;;  %v5267_v24 = vmul.f32 %v11906_v10, %v5261_v54  ;;  %v4715_v62 = vmul.f32 1.442695, %v4710_v1  ;;  %v5240_v29 = vpop.xlane.xlu0 %5239 }
 0xb4e   : > { %v5243_v20 = vmul.f32 %v11902_v63, %v5237_v60  ;;  %v9776_v21 = vmul.f32 %v6643_v28, %v11902_v63  ;;  %v9788_v54 = vmul.f32 %v6645_v48, %v11902_v63  ;;  %v3905_v50 = vsel %vm9782_vm9, %v12009_v45, %v3901_v52  ;;  %v12022_v28 = vld [vmem:[#allocation103_spill] sm:$0xff]  ;;  %v12024_v45 = vld [vmem:[#allocation94_spill] sm:$0xff]  ;;  %3343 = vst.msk [vmem:[%s10095_s21] sm:$0xff] %vm2589_vm2, %v9765_v39 }
 0xb4f   : > { %v5273_v18 = vsub.f32 %v8512_v55, %v5269_v37  ;;  %v4351_v2 = vmul.f32 %v12019_v36, %v4350_v3  ;;  %6646 = vpow2.f32 %v4715_v62  ;;  %v3909_v11 = vor.u32 1.1754944e-38, %v3908_v49 }
 0xb50   : > { %12018 = vst [vmem:[#allocation39_spill] sm:$0xff] %v9788_v54  ;;  %v5271_v17 = vadd.f32 %v5267_v24, %v5243_v20  ;;  %v12021_v7 = vsub.f32 1.0, %v12020_v59  ;;  %v4811_v55 = vsel %vm3512_vm3, %v9769_v32, 0.0  ;;  %v4166_v16 = vsel %vm3512_vm3, %v9788_v54, 0.0  ;;  %v4696_v24 = vpop.xlane.xlu2 %4695 }
 0xb51   : > { %v5277_v4 = vmin.f32 %v5273_v18, 0.0  ;;  %vm3907_vm12 = vcmp.eq.f32.partialorder %v3906_v34, 8.507059e+37  ;;  %v9802_v46 = vadd.f32 %v12023_v56, %v3249_v57  ;;  %v4731_v43 = vsel %vm3512_vm3, %v9776_v21, 0.0 }
 0xb52   : > { %v4439_v14 = vmul.f32 %v12022_v28, %v12021_v7  ;;  %v5275_v52 = vsub.f32 %v12024_v45, %v5271_v17  ;;  %4812 = vadd.xlane.f32.xlu1 %v4811_v55  ;;  %v9807_v3 = vsel %vm3907_vm12, %v3909_v11, %v3905_v50  ;;  %4732 = vadd.xlane.f32.xlu0 %v4731_v43  ;;  %vm4353_vm13 = vweird.f32 %v12025_v0  ;;  %v5264_v50 = vpop.xlane.xlu1 %5263 }
 0xb53   : > { %v5281_v1 = vmul.f32 1.442695, %v5277_v4  ;;  %4167 = vadd.xlane.f32.xlu2 %v4166_v16  ;;  %v4352_v49 = vadd.f32 %v12019_v36, %v4351_v2  ;;  %vm4354_vm15 = vweird.f32 %v12019_v36  ;;  %v4357_v44 = vand.u32 2147483647, %v12025_v0  ;;  %v12031_v4 = vld [vmem:[#allocation125_spill] sm:$0xff]  ;;  %v12032_v16 = vld [vmem:[#allocation38_spill] sm:$0xff] }
 0xb54   : > { %v5279_v34 = vmin.f32 %v5275_v52, 0.0  ;;  %v4359_v57 = vand.u32 2147483648, %v12025_v0  ;;  %v4440_v37 = vadd.f32 %v12022_v28, %v4439_v14  ;;  %v5244_v60 = vmul.f32 %v11902_v63, %v5240_v29  ;;  %vm9837_vm4 = vmor %vm4353_vm13, %vm4354_vm15  ;;  %3344 = vst.msk [vmem:[%s10095_s21 + $0x8] sm:$0xff] %vm2589_vm2, %v9802_v46  ;;  %v12092_v46 = vld [vmem:[#allocation73_spill] sm:$0xff] }
 0xb55   : > { %6648 = vpow2.f32 %v5281_v1  ;;  %v9818_v62 = vmul.f32 %v9730_v53, %v11902_v63  ;;  %vm4442_vm1 = vweird.f32 %v12022_v28  ;;  %v6647_v20 = vpop.eup %6646  ;;  %v4676_v47 = vmul.f32 %v11902_v63, %v9724_v19  ;;  %v12028_v53 = vld [vmem:[#allocation86_spill] sm:$0xff]  ;;  %v12035_v1 = vld [vmem:[#allocation96_spill] sm:$0xff] }
 0xb56   : > { %v5285_v18 = vmul.f32 1.442695, %v5279_v34  ;;  %v4700_v2 = vmul.f32 %v11906_v10, %v4696_v24  ;;  %v9825_v17 = vmul.f32 %v6645_v48, %v11906_v10  ;;  %v5268_v11 = vmul.f32 %v11906_v10, %v5264_v50 }
 0xb57   : > { %v9829_v59 = vmul.f32 %v6647_v20, %v11902_v63  ;;  %vm4441_vm14 = vweird.f32 %v12028_v53  ;;  %v4447_v7 = vand.u32 2147483648, %v12028_v53  ;;  %v4445_v48 = vand.u32 2147483647, %v12028_v53 }
 0xb58   : > { %12026 = vst [vmem:[#allocation95_spill] sm:$0xff] %v9825_v17  ;;  %6650 = vpow2.f32 %v5285_v18  ;;  %v4704_v14 = vadd.f32 %v4700_v2, %v4676_v47  ;;  %v4933_v55 = vsub.f32 1.0, %v12031_v4  ;;  %v3159_v56 = vadd.f32 %v12032_v16, %v9445_v51  ;;  %vm9851_vm5 = vmor %vm4441_vm14, %vm4442_vm1  ;;  %v12036_v47 = vld [vmem:[#allocation114_spill] sm:$0xff]  ;;  %v5258_v4 = vpop.xlane.xlu2 %5257 }
 0xb59   : > { %12027 = vst [vmem:[#allocation76_spill] sm:$0xff] %v9829_v59  ;;  %v5272_v45 = vadd.f32 %v5268_v11, %v5244_v60  ;;  %v4725_v52 = vsel %vm3512_vm3, %v9818_v62, 0.0  ;;  %v4728_v43 = vsel %vm3512_vm3, %v9829_v59, 0.0  ;;  %v4246_v34 = vsel %vm3512_vm3, %v9825_v17, 0.0 }
 0xb5a   : > { %v4708_v0 = vsub.f32 %v12035_v1, %v4704_v14  ;;  %4726 = vadd.xlane.f32.xlu1 %v4725_v52  ;;  %v4356_v51 = vsel %vm9837_vm4, %v12019_v36, %v4352_v49  ;;  %v4444_v60 = vsel %vm9851_vm5, %v12022_v28, %v4440_v37  ;;  %4247 = vadd.xlane.f32.xlu0 %v4246_v34  ;;  %vm4358_vm10 = vcmp.eq.f32.partialorder %v4357_v44, 8.507059e+37  ;;  %v12038_v14 = vld [vmem:[#allocation106_spill] sm:$0xff]  ;;  %v12039_v36 = vld [vmem:[#allocation57_spill] sm:$0xff]  ;;  %v12043_v1 = vld [vmem:[#allocation87_spill] sm:$0xff] }
 0xb5b   : > { %v6649_v24 = vpop.eup %6648  ;;  %v5276_v18 = vsub.f32 %v12036_v47, %v5272_v45  ;;  %4729 = vadd.xlane.f32.xlu2 %v4728_v43  ;;  %v4360_v50 = vor.u32 1.1754944e-38, %v4359_v57  ;;  %v4448_v2 = vor.u32 1.1754944e-38, %v4447_v7  ;;  %vm4446_vm6 = vcmp.eq.f32.partialorder %v4445_v48, 8.507059e+37  ;;  %v12040_v37 = vld [vmem:[#allocation129_spill] sm:$0xff]  ;;  %v12045_v47 = vld [vmem:[#allocation118_spill] sm:$0xff] }
 0xb5c   : > { %v4712_v11 = vmin.f32 %v4708_v0, 0.0  ;;  %v9866_v53 = vmul.f32 %v6649_v24, %v11906_v10  ;;  %v4934_v19 = vmul.f32 %v12038_v14, %v4933_v55  ;;  %v3250_v49 = vadd.f32 %v12039_v36, %v3159_v56  ;;  %v12044_v34 = vld [vmem:[#allocation81_spill] sm:$0xff] }
 0xb5d   : > { %v4361_v16 = vsel %vm4358_vm10, %v4360_v50, %v4356_v51  ;;  %v4449_v28 = vsel %vm4446_vm6, %v4448_v2, %v4444_v60  ;;  %v4903_v52 = vsub.f32 1.0, %v12040_v37  ;;  %v5242_v44 = vmul.f32 %v11902_v63, %v9772_v33  ;;  %v12047_v50 = vld [vmem:[#allocation108_spill] sm:$0xff] }
 0xb5e   : > { %12037 = vst [vmem:[#allocation42_spill] sm:$0xff] %v9866_v53  ;;  %v9871_v45 = vpop.eup %6650  ;;  %v4719_v57 = vmul.f32 1.442695, %v4712_v11  ;;  %v5266_v7 = vmul.f32 %v11906_v10, %v5258_v4  ;;  %v9877_v43 = vmul.f32 %v6647_v20, %v11906_v10  ;;  %v5280_v48 = vmin.f32 %v5276_v18, 0.0  ;;  %v12048_v11 = vld [vmem:[#allocation109_spill] sm:$0xff]  ;;  %v12050_v37 = vld [vmem:[#allocation48_spill] sm:$0xff] }
 0xb5f   : > { %v5373_v55 = vsel %vm3512_vm3, %v9866_v53, 0.0  ;;  %v9883_v56 = vmul.f32 %v9871_v45, %v11902_v63  ;;  %vm4937_vm0 = vweird.f32 %v12038_v14  ;;  %v9887_v33 = vadd.f32 %v12038_v14, %v4934_v19  ;;  %v12070_v53 = vld [vmem:[#allocation98_spill] sm:$0xff] }
 0xb60   : > { %12041 = vst [vmem:[#allocation44_spill] sm:$0xff] %v9877_v43  ;;  %6652 = vpow2.f32 %v4719_v57  ;;  %v5270_v29 = vadd.f32 %v5266_v7, %v5242_v44  ;;  %v4940_v0 = vand.u32 2147483647, %v12043_v1  ;;  %v9891_v20 = vadd.f32 %v12044_v34, %v3250_v49  ;;  %v12049_v49 = vld [vmem:[#allocation110_spill] sm:$0xff] }
 0xb61   : > { %12042 = vst [vmem:[#allocation68_spill] sm:$0xff] %v9883_v56  ;;  %v5299_v51 = vsel %vm3512_vm3, %v9883_v56, 0.0  ;;  %v9897_v60 = vmul.f32 %v8118_v35, %v9807_v3  ;;  %v12046_v18 = vsub.f32 1.0, %v12045_v47  ;;  %v4808_v19 = vsel %vm3512_vm3, %v9877_v43, 0.0  ;;  %v12088_v56 = vld [vmem:[#allocation139_spill] sm:$0xff] }
 0xb62   : > { %v5274_v36 = vsub.f32 %v12048_v11, %v5270_v29  ;;  %5374 = vadd.xlane.f32.xlu1 %v5373_v55  ;;  %vm4936_vm7 = vweird.f32 %v12043_v1  ;;  %v4904_v4 = vmul.f32 %v12049_v49, %v4903_v52  ;;  %v3160_v44 = vadd.f32 %v12050_v37, %v9644_v12  ;;  %4809 = vadd.xlane.f32.xlu0 %v4808_v19  ;;  %v12063_v55 = vld [vmem:[#allocation97_spill] sm:$0xff] }
 0xb63   : > { %v5022_v2 = vmul.f32 %v12047_v50, %v12046_v18  ;;  %v5287_v57 = vmul.f32 1.442695, %v5280_v48  ;;  %5300 = vadd.xlane.f32.xlu2 %v5299_v51  ;;  %v9910_v3 = vmul.f32 %v8074_v6, %v4361_v16  ;;  %v9913_v7 = vmul.f32 %v8118_v35, %v4449_v28  ;;  %vm9917_vm8 = vmor %vm4936_vm7, %vm4937_vm0  ;;  %v12055_v48 = vld [vmem:[#allocation89_spill] sm:$0xff]  ;;  %v12059_v18 = vld [vmem:[#allocation66_spill] sm:$0xff]  ;;  %3345 = vst.msk [vmem:[%s10095_s21 + $0x10] sm:$0xff] %vm2589_vm2, %v9891_v20 }
 0xb64   : > { %v5278_v29 = vmin.f32 %v5274_v36, 0.0  ;;  %v4939_v12 = vsel %vm9917_vm8, %v12038_v14, %v9887_v33  ;;  %vm9925_vm11 = vcmp.eq.f32.partialorder %v4940_v0, 8.507059e+37  ;;  %v4942_v16 = vand.u32 2147483648, %v12043_v1  ;;  %v12057_v33 = vld [vmem:[#allocation126_spill] sm:$0xff]  ;;  %v12062_v36 = vld [vmem:[#allocation135_spill] sm:$0xff] }
 0xb65   : > { %v5023_v28 = vadd.f32 %v12047_v50, %v5022_v2  ;;  %vm5024_vm9 = vweird.f32 %v12055_v48  ;;  %vm5025_vm12 = vweird.f32 %v12047_v50  ;;  %vm4907_vm13 = vweird.f32 %v12049_v49 }
 0xb66   : > { %v6653_v34 = vpop.eup %6652  ;;  %v5283_v51 = vmul.f32 1.442695, %v5278_v29  ;;  %v9935_v47 = vmul.f32 %v6649_v24, %v11902_v63  ;;  %v4905_v14 = vadd.f32 %v12049_v49, %v4904_v4  ;;  %v12058_v0 = vsub.f32 1.0, %v12057_v33  ;;  %vm9959_vm15 = vmor %vm5024_vm9, %vm5025_vm12  ;;  %v12066_v33 = vld [vmem:[#allocation83_spill] sm:$0xff] }
 0xb67   : > { %6654 = vpow2.f32 %v5287_v57  ;;  %v9942_v1 = vmul.f32 %v6653_v34, %v11906_v10  ;;  %v9945_v2 = vmul.f32 %v6653_v34, %v11902_v63  ;;  %v4380_v19 = vsub.f32 1.0, %v12062_v36  ;;  %v12078_v34 = vld [vmem:[#allocation105_spill] sm:$0xff] }
 0xb68   : > { %12056 = vst [vmem:[#allocation43_spill] sm:$0xff] %v9935_v47  ;;  %v4992_v11 = vmul.f32 %v12059_v18, %v12058_v0  ;;  %6656 = vpow2.f32 %v5283_v51  ;;  %v5028_v37 = vand.u32 2147483647, %v12055_v48  ;;  %v5030_v24 = vand.u32 2147483648, %v12055_v48 }
 0xb69   : > { %12060 = vst [vmem:[#allocation46_spill] sm:$0xff] %v9942_v1  ;;  %v4912_v4 = vand.u32 2147483648, %v12063_v55  ;;  %v4814_v29 = vsel %vm3512_vm3, %v9942_v1, 0.0  ;;  %v4734_v57 = vsel %vm3512_vm3, %v9945_v2, 0.0  ;;  %vm4906_vm1 = vweird.f32 %v12063_v55 }
 0xb6a   : > { %12061 = vst [vmem:[#allocation49_spill] sm:$0xff] %v9945_v2  ;;  %v4910_v51 = vand.u32 2147483647, %v12063_v55  ;;  %v3251_v0 = vadd.f32 %v12066_v33, %v3160_v44  ;;  %v5293_v36 = vsel %vm3512_vm3, %v9935_v47, 0.0  ;;  %4735 = vadd.xlane.f32.xlu1 %v4734_v57  ;;  %vm9970_vm14 = vmor %vm4906_vm1, %vm4907_vm13  ;;  %v4993_v48 = vadd.f32 %v12059_v18, %v4992_v11  ;;  %v12069_v57 = vld [vmem:[#allocation113_spill] sm:$0xff] }
 0xb6b   : > { %vm4995_vm4 = vweird.f32 %v12059_v18  ;;  %5294 = vadd.xlane.f32.xlu0 %v5293_v36  ;;  %4815 = vadd.xlane.f32.xlu2 %v4814_v29  ;;  %v4943_v1 = vor.u32 1.1754944e-38, %v4942_v16  ;;  %v5027_v44 = vsel %vm9959_vm15, %v12047_v50, %v5023_v28  ;;  %v4909_v55 = vsel %vm9970_vm14, %v12049_v49, %v4905_v14  ;;  %v9987_v29 = vpop.xlane.xlu1 %3663  ;;  %v9989_v16 = vpop.xlane.xlu0 %3583 }
 0xb6c   : > { %v4381_v33 = vmul.f32 %v12069_v57, %v4380_v19  ;;  %v5031_v2 = vor.u32 1.1754944e-38, %v5030_v24  ;;  %v4913_v47 = vor.u32 1.1754944e-38, %v4912_v4  ;;  %vm4994_vm5 = vweird.f32 %v12070_v53  ;;  %v12075_v24 = vld [vmem:[#allocation120_spill] sm:$0xff] }
 0xb6d   : > { %v5000_v11 = vand.u32 2147483648, %v12070_v53  ;;  %v9985_v43 = vpop.eup %6654  ;;  %v4944_v50 = vsel %vm9925_vm11, %v4943_v1, %v4939_v12  ;;  %vm5029_vm10 = vcmp.eq.f32.partialorder %v5028_v37, 8.507059e+37  ;;  %vm4911_vm6 = vcmp.eq.f32.partialorder %v4910_v51, 8.507059e+37  ;;  %vm9995_vm0 = vmor %vm4994_vm5, %vm4995_vm4  ;;  %v12073_v1 = vld [vmem:[#allocation130_spill] sm:$0xff] }
 0xb6e   : > { %v4998_v49 = vand.u32 2147483647, %v12070_v53  ;;  %v6657_v28 = vpop.eup %6656  ;;  %6658 = vrcp.f32 %v9987_v29  ;;  %v5032_v14 = vsel %vm5029_vm10, %v5031_v2, %v5027_v44  ;;  %v4914_v19 = vsel %vm4911_vm6, %v4913_v47, %v4909_v55 }
 0xb6f   : > { %v4997_v52 = vsel %vm9995_vm0, %v12059_v18, %v4993_v48  ;;  %6660 = vrcp.f32 %v9989_v16  ;;  %v4382_v12 = vadd.f32 %v12069_v57, %v4381_v33  ;;  %vm4384_vm7 = vweird.f32 %v12069_v57  ;;  %v12080_v48 = vld [vmem:[#allocation92_spill] sm:$0xff] }
 0xb70   : > { %v12074_v37 = vsub.f32 1.0, %v12073_v1  ;;  %v10012_v53 = vmul.f32 %v9985_v43, %v11902_v63  ;;  %v10015_v47 = vmul.f32 %v6657_v28, %v11906_v10  ;;  %v5001_v2 = vor.u32 1.1754944e-38, %v5000_v11 }
 0xb71   : > { %v4389_v18 = vand.u32 2147483648, %v12078_v34  ;;  %v10019_v51 = vmul.f32 %v6657_v28, %v11902_v63  ;;  %vm4999_vm8 = vcmp.eq.f32.partialorder %v4998_v49, 8.507059e+37  ;;  %vm4383_vm11 = vweird.f32 %v12078_v34 }
 0xb72   : > { %v4469_v4 = vmul.f32 %v12075_v24, %v12074_v37  ;;  %12076 = vst [vmem:[#allocation50_spill] sm:$0xff] %v10012_v53  ;;  %v4387_v36 = vand.u32 2147483647, %v12078_v34  ;;  %v10024_v44 = vadd.f32 %v12080_v48, %v3251_v0  ;;  %v5302_v55 = vsel %vm3512_vm3, %v10012_v53, 0.0  ;;  %vm10030_vm9 = vmor %vm4383_vm11, %vm4384_vm7 }
 0xb73   : > { %12077 = vst [vmem:[#allocation52_spill] sm:$0xff] %v10015_v47  ;;  %v5376_v33 = vsel %vm3512_vm3, %v10015_v47, 0.0  ;;  %v5002_v11 = vsel %vm4999_vm8, %v5001_v2, %v4997_v52  ;;  %5303 = vadd.xlane.f32.xlu0 %v5302_v55  ;;  %v5296_v63 = vsel %vm3512_vm3, %v10019_v51, 0.0  ;;  %v4386_v0 = vsel %vm10030_vm9, %v12069_v57, %v4382_v12  ;;  %v10043_v52 = vpop.xlane.xlu2 %3666 }
 0xb74   : > { %12079 = vst [vmem:[#allocation56_spill] sm:$0xff] %v10019_v51  ;;  %5377 = vadd.xlane.f32.xlu2 %v5376_v33  ;;  %v10040_v49 = vadd.f32 %v12075_v24, %v4469_v4  ;;  %vm4472_vm12 = vweird.f32 %v12075_v24  ;;  %v6659_v28 = vpop.eup %6658  ;;  %5297 = vadd.xlane.f32.xlu1 %v5296_v63  ;;  %v10046_v1 = vmul.f32 %v8074_v6, %v4944_v50  ;;  %v4390_v34 = vor.u32 1.1754944e-38, %v4389_v18  ;;  %v12084_v4 = vld [vmem:[#allocation111_spill] sm:$0xff] }
 0xb75   : > { %v10049_v37 = vmul.f32 %v8118_v35, %v5032_v14  ;;  %v10052_v2 = vmul.f32 %v8074_v6, %v4914_v19  ;;  %v6661_v57 = vpop.eup %6660  ;;  %v3675_v12 = vmul.f32 %v6659_v28, %v9987_v29  ;;  %6662 = vrcp.f32 %v10043_v52  ;;  %3346 = vst.msk [vmem:[%s10095_s21 + $0x18] sm:$0xff] %vm2589_vm2, %v10024_v44  ;;  %v12125_v14 = vld [vmem:[#allocation140_spill] sm:$0xff] }
 0xb76   : > { %vm4388_vm13 = vcmp.eq.f32.partialorder %v4387_v36, 8.507059e+37  ;;  %vm4471_vm15 = vweird.f32 %v12084_v4  ;;  %v3595_v48 = vmul.f32 %v6661_v57, %v9989_v16  ;;  %v10059_v50 = vmul.f32 %v8118_v35, %v5002_v11  ;;  %v10070_v36 = vpop.xlane.xlu1 %3586 }
 0xb77   : > { %12083 = vst [vmem:[#allocation53_spill] sm:$0xff] %v10052_v2  ;;  %v10061_v55 = vsel %vm4388_vm13, %v4390_v34, %v4386_v0  ;;  %vm10065_vm1 = vmor %vm4471_vm15, %vm4472_vm12  ;;  %v3676_v18 = vsub.f32 1.0, %v3675_v12  ;;  %v4918_v63 = vsub.f32 1.0, %v12088_v56  ;;  %v3683_v0 = vand.u32 2147483647, %v9987_v29 }
 0xb78   : > { %12085 = vst [vmem:[#allocation59_spill] sm:$0xff] %v10059_v50  ;;  %v3685_v34 = vand.u32 2147483648, %v9987_v29  ;;  %v3596_v53 = vsub.f32 1.0, %v3595_v48  ;;  %6664 = vrcp.f32 %v10070_v36  ;;  %vm3680_vm14 = vweird.f32 %v6659_v28 }
 0xb79   : > { %v3677_v19 = vmul.f32 %v6659_v28, %v3676_v18  ;;  %v3603_v12 = vand.u32 2147483647, %v9989_v16  ;;  %v3605_v47 = vand.u32 2147483648, %v9989_v16  ;;  %vm3600_vm4 = vweird.f32 %v6661_v57  ;;  %v12091_v18 = vld [vmem:[#allocation132_spill] sm:$0xff] }
 0xb7a   : > { %v3597_v51 = vmul.f32 %v6661_v57, %v3596_v53  ;;  %v10086_v33 = vmul.f32 %v9871_v45, %v11906_v10  ;;  %v10090_v56 = vmul.f32 %v9985_v43, %v11906_v10  ;;  %vm3679_vm5 = vweird.f32 %v9987_v29 }
 0xb7b   : > { %v6663_v48 = vpop.eup %6662  ;;  %v3678_v11 = vadd.f32 %v6659_v28, %v3677_v19  ;;  %vm3599_vm10 = vweird.f32 %v9989_v16  ;;  %v4919_v59 = vmul.f32 %v12091_v18, %v4918_v63  ;;  %vm3681_vm6 = vmor %vm3679_vm5, %vm3680_vm14  ;;  %v3686_v10 = vor.u32 1.1754944e-38, %v3685_v34 }
 0xb7c   : > { %12089 = vst [vmem:[#allocation67_spill] sm:$0xff] %v10086_v33  ;;  %v3598_v45 = vadd.f32 %v6661_v57, %v3597_v51  ;;  %v3690_v43 = vmul.f32 %v6663_v48, %v10043_v52  ;;  %v5379_v29 = vsel %vm3512_vm3, %v10086_v33, 0.0  ;;  %vm3684_vm0 = vcmp.eq.f32.partialorder %v3683_v0, 8.507059e+37  ;;  %vm3601_vm7 = vmor %vm3599_vm10, %vm3600_vm4 }
 0xb7d   : > { %12090 = vst [vmem:[#allocation71_spill] sm:$0xff] %v10090_v56  ;;  %v3682_v16 = vsel %vm3681_vm6, %v6659_v28, %v3678_v11  ;;  %v3606_v53 = vor.u32 1.1754944e-38, %v3605_v47  ;;  %5380 = vadd.xlane.f32.xlu0 %v5379_v29  ;;  %v5382_v39 = vsel %vm3512_vm3, %v10090_v56, 0.0  ;;  %vm3604_vm8 = vcmp.eq.f32.partialorder %v3603_v12, 8.507059e+37  ;;  %v12093_v29 = vld [vmem:[#allocation63_spill] sm:$0xff]  ;;  %v12094_v12 = vld [vmem:[#allocation116_spill] sm:$0xff] }
 0xb7e   : > { %v6665_v51 = vpop.eup %6664  ;;  %v3687_v19 = vsel %vm3684_vm0, %v3686_v10, %v3682_v16  ;;  %v3602_v63 = vsel %vm3601_vm7, %v6661_v57, %v3598_v45  ;;  %v3691_v34 = vsub.f32 1.0, %v3690_v43  ;;  %5383 = vadd.xlane.f32.xlu1 %v5382_v39  ;;  %v3700_v0 = vand.u32 2147483648, %v10043_v52  ;;  %v12095_v39 = vld [vmem:[#allocation72_spill] sm:$0xff] }
 0xb7f   : > { %v3688_v28 = vmul.f32 %v3687_v19, %v12092_v46  ;;  %v3607_v11 = vsel %vm3604_vm8, %v3606_v53, %v3602_v63  ;;  %v3610_v47 = vmul.f32 %v6665_v51, %v10070_v36  ;;  %vm3695_vm3 = vweird.f32 %v6663_v48 }
 0xb80   : > { %v3608_v56 = vmul.f32 %v3607_v11, %v12093_v29  ;;  %v3692_v33 = vmul.f32 %v6663_v48, %v3691_v34  ;;  %v3698_v20 = vand.u32 2147483647, %v10043_v52  ;;  %vm3980_vm11 = vcmask 73728  }
 0xb81   : > { %v3611_v57 = vsub.f32 1.0, %v3610_v47  ;;  %vm4921_vm9 = vweird.f32 %v12094_v12  ;;  %vm4922_vm12 = vweird.f32 %v12091_v18  ;;  %v3618_v10 = vand.u32 2147483647, %v10070_v36  ;;  %v10127_v34 = vpop.xlane.xlu0 %3669 }
 0xb82   : > { %v3734_v44 = vadd.f32 %v3688_v28, %v3608_v56  ;;  %v3693_v45 = vadd.f32 %v6663_v48, %v3692_v33  ;;  %vm3694_vm2 = vweird.f32 %v10043_v52  ;;  %vm3615_vm13 = vweird.f32 %v6665_v51  ;;  %v12096_v52 = vld [vmem:[#allocation61_spill] sm:$0xff]  ;;  %vm10159_vm6 = vmor %vm4921_vm9, %vm4922_vm12 }
 0xb83   : > { %v3612_v43 = vmul.f32 %v6665_v51, %v3611_v57  ;;  %v3620_v16 = vand.u32 2147483648, %v10070_v36  ;;  %vm3696_vm15 = vmor %vm3694_vm2, %vm3695_vm3  ;;  %v3701_v53 = vor.u32 1.1754944e-38, %v3700_v0  ;;  %vm3699_vm14 = vcmp.eq.f32.partialorder %v3698_v20, 8.507059e+37  ;;  %v12100_v57 = vld [vmem:[#allocation131_spill] sm:$0xff] }
 0xb84   : > { %v3825_v19 = vadd.f32 %v12095_v39, %v3734_v44  ;;  %v3697_v63 = vsel %vm3696_vm15, %v6663_v48, %v3693_v45  ;;  %v4920_v46 = vadd.f32 %v12091_v18, %v4919_v59  ;;  %vm3614_vm4 = vweird.f32 %v10070_v36  ;;  %v10143_v20 = vpop.xlane.xlu2 %3589  ;;  %v12102_v45 = vld [vmem:[#allocation123_spill] sm:$0xff] }
 0xb85   : > { %v3613_v56 = vadd.f32 %v6665_v51, %v3612_v43  ;;  %v3702_v33 = vsel %vm3699_vm14, %v3701_v53, %v3697_v63  ;;  %6666 = vrcp.f32 %v10127_v34  ;;  %vm10133_vm5 = vmor %vm3614_vm4, %vm3615_vm13  ;;  %v12099_v48 = vand.u32 2147483648, %v12084_v4 }
 0xb86   : > { %v3916_v28 = vadd.f32 %v12096_v52, %v3825_v19  ;;  %v4925_v0 = vand.u32 2147483647, %v12094_v12  ;;  %v4927_v59 = vand.u32 2147483648, %v12094_v12  ;;  %vm3619_vm10 = vcmp.eq.f32.partialorder %v3618_v10, 8.507059e+37  ;;  %v12107_v12 = vld [vmem:[#allocation112_spill] sm:$0xff] }
 0xb87   : > { %v4478_v47 = vor.u32 1.1754944e-38, %v12099_v48  ;;  %v3617_v36 = vsel %vm10133_vm5, %v6665_v51, %v3613_v56  ;;  %v3621_v29 = vor.u32 1.1754944e-38, %v3620_v16  ;;  %v12101_v44 = vsub.f32 1.0, %v12100_v57  ;;  %v12103_v51 = vld [vmem:[#allocation91_spill] sm:$0xff] }
 0xb88   : > { %v3924_v53 = vrot.slane %v3916_v28, 1  ;;  %v3925_v39 = vrot.slane %v3916_v28, 2  ;;  %v3926_v19 = vrot.slane %v3916_v28, 3  ;;  %3981 = vst.msk [vmem:[%s10150_s25] sm:$0x1] %vm3980_vm11, %v3916_v28  ;;  %v3703_v10 = vmul.f32 %v3702_v33, %v12103_v51  ;;  %v12106_v33 = vld [vmem:[#allocation40_spill] sm:$0xff] }
 0xb89   : > { %v5007_v43 = vmul.f32 %v12102_v45, %v12101_v44  ;;  %v3927_v63 = vrot.slane %v3916_v28, 4  ;;  %v3622_v56 = vsel %vm3619_vm10, %v3621_v29, %v3617_v36  ;;  %v4924_v52 = vsel %vm10159_vm6, %v12091_v18, %v4920_v46  ;;  %v12108_v29 = vld [vmem:[#allocation141_spill] sm:$0xff] }
 0xb8a   : > { %vm5010_vm0 = vweird.f32 %v12102_v45  ;;  %v3928_v11 = vrot.slane %v3916_v28, 5  ;;  %3982 = vst.msk [vmem:[%s10150_s25 + $0x4] sm:$0x1] %vm3980_vm11, %v3924_v53  ;;  %v3623_v48 = vmul.f32 %v3622_v56, %v12106_v33  ;;  %6668 = vrcp.f32 %v10143_v20 }
 0xb8b   : > { %v5013_v57 = vand.u32 2147483647, %v12107_v12  ;;  %v10172_v44 = vpop.eup %6666  ;;  %v3929_v36 = vrot.slane %v3916_v28, 6  ;;  %3983 = vst.msk [vmem:[%s10150_s25 + $0x8] sm:$0x1] %vm3980_vm11, %v3925_v39  ;;  %v5008_v18 = vadd.f32 %v12102_v45, %v5007_v43  ;;  %v5015_v46 = vand.u32 2147483648, %v12107_v12 }
 0xb8c   : > { %v5471_v51 = vsub.f32 1.0, %v12108_v29  ;;  %v3930_v16 = vrot.slane %v3916_v28, 7  ;;  %3984 = vst.msk [vmem:[%s10150_s25 + $0xc] sm:$0x1] %vm3980_vm11, %v3926_v19  ;;  %v3735_v53 = vadd.f32 %v3703_v10, %v3623_v48  ;;  %v3705_v56 = vmul.f32 %v10172_v44, %v10127_v34  ;;  %v12111_v28 = vld [vmem:[#allocation62_spill] sm:$0xff] }
 0xb8d   : > { %v4928_v33 = vor.u32 1.1754944e-38, %v4927_v59  ;;  %3985 = vst.msk [vmem:[%s10150_s25 + $0x10] sm:$0x1] %vm3980_vm11, %v3927_v63  ;;  %v10187_v39 = vmul.f32 %v8074_v6, %v10061_v55  ;;  %v12110_v43 = vand.u32 2147483647, %v12084_v4  ;;  %vm4926_vm8 = vcmp.eq.f32.partialorder %v4925_v0, 8.507059e+37 }
 0xb8e   : > { %vm5009_vm3 = vweird.f32 %v12107_v12  ;;  %3986 = vst.msk [vmem:[%s10150_s25 + $0x14] sm:$0x1] %vm3980_vm11, %v3928_v11  ;;  %v3826_v19 = vadd.f32 %v12111_v28, %v3735_v53  ;;  %v3706_v10 = vsub.f32 1.0, %v3705_v56  ;;  %v12112_v59 = vsel %vm10065_vm1, %v12075_v24, %v10040_v49  ;;  %v12117_v49 = vld [vmem:[#allocation134_spill] sm:$0xff] }
 0xb8f   : > { %12109 = vst [vmem:[#allocation74_spill] sm:$0xff] %v10187_v39  ;;  %vm4476_vm7 = vcmp.eq.f32.partialorder %v12110_v43, 8.507059e+37  ;;  %v10202_v55 = vsel %vm4926_vm8, %v4928_v33, %v4924_v52  ;;  %vm10206_vm9 = vmor %vm5009_vm3, %vm5010_vm0  ;;  %vm10215_vm12 = vcmp.eq.f32.partialorder %v5013_v57, 8.507059e+37  ;;  %v5016_v24 = vor.u32 1.1754944e-38, %v5015_v46  ;;  %v12119_v46 = vld [vmem:[#allocation117_spill] sm:$0xff]  ;;  %v12120_v43 = vld [vmem:[#allocation136_spill] sm:$0xff] }
 0xb90   : > { %v10200_v63 = vsel %vm4476_vm7, %v4478_v47, %v12112_v59  ;;  %3987 = vst.msk [vmem:[%s10150_s25 + $0x18] sm:$0x1] %vm3980_vm11, %v3929_v36  ;;  %v5012_v0 = vsel %vm10206_vm9, %v12102_v45, %v5008_v18  ;;  %v5472_v47 = vmul.f32 %v12117_v49, %v5471_v51  ;;  %v6669_v52 = vpop.eup %6668  ;;  %v3917_v11 = vadd.f32 %v9455_v23, %v3826_v19  ;;  %v12118_v45 = vld [vmem:[#allocation143_spill] sm:$0xff]  ;;  %v12122_v19 = vld [vmem:[#allocation124_spill] sm:$0xff] }
 0xb91   : > { %3988 = vst.msk [vmem:[%s10150_s25 + $0x1c] sm:$0x1] %vm3980_vm11, %v3930_v16  ;;  %v3707_v48 = vmul.f32 %v10172_v44, %v3706_v10  ;;  %v3713_v12 = vand.u32 2147483647, %v10127_v34  ;;  %vm5475_vm1 = vweird.f32 %v12117_v49  ;;  %v4948_v57 = vsub.f32 1.0, %v12118_v45 }
 0xb92   : > { %vm3710_vm2 = vweird.f32 %v10172_v44  ;;  %v3715_v36 = vand.u32 2147483648, %v10127_v34  ;;  %v3625_v18 = vmul.f32 %v6669_v52, %v10143_v20  ;;  %v5478_v29 = vand.u32 2147483647, %v12119_v46  ;;  %3989 = vst.msk [vmem:[%s10150_s25 + $0x20] sm:$0x1] %vm3980_vm11, %v3917_v11 }
 0xb93   : > { %v3931_v51 = vrot.slane %v3917_v11, 1  ;;  %v3932_v16 = vrot.slane %v3917_v11, 2  ;;  %v3933_v23 = vrot.slane %v3917_v11, 3  ;;  %v10235_v53 = vsel %vm10215_vm12, %v5016_v24, %v5012_v0 }
 0xb94   : > { %vm5474_vm13 = vweird.f32 %v12119_v46  ;;  %v3934_v56 = vrot.slane %v3917_v11, 4  ;;  %v3708_v33 = vadd.f32 %v10172_v44, %v3707_v48  ;;  %vm3709_vm15 = vweird.f32 %v10127_v34 }
 0xb95   : > { %v12121_v28 = vsub.f32 1.0, %v12120_v43  ;;  %v3935_v59 = vrot.slane %v3917_v11, 5  ;;  %3990 = vst.msk [vmem:[%s10150_s25 + $0x24] sm:$0x1] %vm3980_vm11, %v3931_v51  ;;  %vm10247_vm14 = vmor %vm3709_vm15, %vm3710_vm2  ;;  %vm3714_vm4 = vcmp.eq.f32.partialorder %v3713_v12, 8.507059e+37  ;;  %v3626_v0 = vsub.f32 1.0, %v3625_v18 }
 0xb96   : > { %v4949_v24 = vmul.f32 %v12125_v14, %v4948_v57  ;;  %v3936_v34 = vrot.slane %v3917_v11, 6  ;;  %3991 = vst.msk [vmem:[%s10150_s25 + $0x28] sm:$0x1] %vm3980_vm11, %v3932_v16  ;;  %v3712_v48 = vsel %vm10247_vm14, %v10172_v44, %v3708_v33  ;;  %v3716_v45 = vor.u32 1.1754944e-38, %v3715_v36  ;;  %v12126_v44 = vld [vmem:[#allocation65_spill] sm:$0xff]  ;;  %vm10289_vm9 = vmor %vm5474_vm13, %vm5475_vm1 }
 0xb97   : > { %v5560_v10 = vmul.f32 %v12122_v19, %v12121_v28  ;;  %v3635_v51 = vand.u32 2147483648, %v10143_v20  ;;  %v3937_v43 = vrot.slane %v3917_v11, 7  ;;  %3992 = vst.msk [vmem:[%s10150_s25 + $0x2c] sm:$0x1] %vm3980_vm11, %v3933_v23  ;;  %v3627_v28 = vmul.f32 %v6669_v52, %v3626_v0 }
 0xb98   : > { %vm3630_vm5 = vweird.f32 %v6669_v52  ;;  %v3633_v12 = vand.u32 2147483647, %v10143_v20  ;;  %3993 = vst.msk [vmem:[%s10150_s25 + $0x30] sm:$0x1] %vm3980_vm11, %v3934_v56  ;;  %v3717_v57 = vsel %vm3714_vm4, %v3716_v45, %v3712_v48  ;;  %v5473_v18 = vadd.f32 %v12117_v49, %v5472_v47  ;;  %v12131_v48 = vld [vmem:[#allocation142_spill] sm:$0xff] }
 0xb99   : > { %v5480_v16 = vand.u32 2147483648, %v12119_v46  ;;  %vm5562_vm10 = vweird.f32 %v12126_v44  ;;  %3994 = vst.msk [vmem:[%s10150_s25 + $0x34] sm:$0x1] %vm3980_vm11, %v3935_v59  ;;  %v3628_v36 = vadd.f32 %v6669_v52, %v3627_v28  ;;  %vm3629_vm6 = vweird.f32 %v10143_v20  ;;  %v10279_v20 = vpop.xlane.xlu2 %4244 }
 0xb9a   : > { %vm5563_vm0 = vweird.f32 %v12122_v19  ;;  %v5566_v11 = vand.u32 2147483647, %v12126_v44  ;;  %3995 = vst.msk [vmem:[%s10150_s25 + $0x38] sm:$0x1] %vm3980_vm11, %v3936_v34  ;;  %vm3631_vm7 = vmor %vm3629_vm6, %vm3630_vm5  ;;  %v3636_v23 = vor.u32 1.1754944e-38, %v3635_v51  ;;  %v5561_v56 = vadd.f32 %v12122_v19, %v5560_v10  ;;  %v10282_v34 = vpop.xlane.xlu1 %4164  ;;  %v12132_v51 = vld [vmem:[#allocation133_spill] sm:$0xff] }
 0xb9b   : > { %v5568_v47 = vand.u32 2147483648, %v12126_v44  ;;  %vm4952_vm8 = vweird.f32 %v12125_v14  ;;  %3996 = vst.msk [vmem:[%s10150_s25 + $0x3c] sm:$0x1] %vm3980_vm11, %v3937_v43  ;;  %v3718_v33 = vmul.f32 %v3717_v57, %v9350_v27  ;;  %v3632_v59 = vsel %vm3631_vm7, %v6669_v52, %v3628_v36  ;;  %v12129_v27 = vld [vmem:[#allocation145_spill] sm:$0xff]  ;;  %v12133_v43 = vld [vmem:[#allocation146_spill] sm:$0xff]  ;;  %vm10304_vm12 = vmor %vm5562_vm10, %vm5563_vm0 }
 0xb9c   : > { %vm3634_vm3 = vcmp.eq.f32.partialorder %v3633_v12, 8.507059e+37  ;;  %v4950_v4 = vadd.f32 %v12125_v14, %v4949_v24  ;;  %6670 = vrcp.f32 %v10279_v20  ;;  %v12130_v52 = vsub.f32 1.0, %v12129_v27  ;;  %v12136_v12 = vld [vmem:[#allocation122_spill] sm:$0xff] }
 0xb9d   : > { %v3637_v0 = vsel %vm3634_vm3, %v3636_v23, %v3632_v59  ;;  %v5485_v24 = vmul.f32 %v12133_v43, %v12132_v51  ;;  %6672 = vrcp.f32 %v10282_v34  ;;  %vm4951_vm1 = vweird.f32 %v12136_v12 }
 0xb9e   : > { %v5037_v45 = vmul.f32 %v12131_v48, %v12130_v52  ;;  %v3638_v28 = vmul.f32 %v3637_v0, %v9381_v26  ;;  %v4957_v57 = vand.u32 2147483648, %v12136_v12  ;;  %v5477_v36 = vsel %vm10289_vm9, %v12117_v49, %v5473_v18  ;;  %vm10315_vm13 = vmor %vm4951_vm1, %vm4952_vm8  ;;  %v12139_v18 = vld [vmem:[#allocation127_spill] sm:$0xff] }
 0xb9f   : > { %vm5479_vm2 = vcmp.eq.f32.partialorder %v5478_v29, 8.507059e+37  ;;  %v5481_v26 = vor.u32 1.1754944e-38, %v5480_v16  ;;  %v4955_v44 = vand.u32 2147483647, %v12136_v12  ;;  %v5565_v0 = vsel %vm10304_vm12, %v12122_v19, %v5561_v56 }
 0xba0   : > { %v3736_v59 = vadd.f32 %v3718_v33, %v3638_v28  ;;  %v5569_v27 = vor.u32 1.1754944e-38, %v5568_v47  ;;  %v4954_v49 = vsel %vm10315_vm13, %v12125_v14, %v4950_v4  ;;  %v10327_v29 = vadd.f32 %v12131_v48, %v5037_v45  ;;  %v10332_v33 = vpop.xlane.xlu0 %4238 }
 0xba1   : > { %vm5040_vm15 = vweird.f32 %v12131_v48  ;;  %v5045_v16 = vand.u32 2147483648, %v12139_v18  ;;  %v5486_v10 = vsub.f32 1.0, %v5485_v24  ;;  %v10334_v28 = vsel %vm5479_vm2, %v5481_v26, %v5477_v36  ;;  %v10355_v12 = vpop.xlane.xlu2 %4158 }
 0xba2   : > { %v3827_v52 = vadd.f32 %v9458_v61, %v3736_v59  ;;  %vm5567_vm14 = vcmp.eq.f32.partialorder %v5566_v11, 8.507059e+37  ;;  %v4958_v19 = vor.u32 1.1754944e-38, %v4957_v57  ;;  %v10336_v56 = vpop.eup %6670  ;;  %6674 = vrcp.f32 %v10332_v33  ;;  %v12142_v59 = vld [vmem:[#allocation137_spill] sm:$0xff] }
 0xba3   : > { %v10339_v14 = vsel %vm5567_vm14, %v5569_v27, %v5565_v0  ;;  %vm4956_vm4 = vcmp.eq.f32.partialorder %v4955_v44, 8.507059e+37  ;;  %vm5039_vm5 = vweird.f32 %v12139_v18  ;;  %v6673_v47 = vpop.eup %6672  ;;  %v4280_v61 = vmul.f32 %v10336_v56, %v10279_v20  ;;  %v12143_v0 = vld [vmem:[#allocation102_spill] sm:$0xff] }
 0xba4   : > { %v3918_v4 = vadd.f32 %v9467_v13, %v3827_v52  ;;  %v10345_v45 = vsel %vm4956_vm4, %v4958_v19, %v4954_v49  ;;  %vm10349_vm10 = vmor %vm5039_vm5, %vm5040_vm15  ;;  %v5043_v24 = vand.u32 2147483647, %v12139_v18  ;;  %v4200_v46 = vmul.f32 %v6673_v47, %v10282_v34 }
 0xba5   : > { %v10361_v57 = vor.u32 1.1754944e-38, %v5045_v16  ;;  %v5487_v36 = vmul.f32 %v12133_v43, %v5486_v10  ;;  %v5573_v27 = vmul.f32 %v12143_v0, %v12142_v59  ;;  %v4208_v52 = vand.u32 2147483647, %v10282_v34 }
 0xba6   : > { %v3938_v26 = vrot.slane %v3918_v4, 1  ;;  %v3939_v23 = vrot.slane %v3918_v4, 2  ;;  %v3940_v44 = vrot.slane %v3918_v4, 3  ;;  %3997 = vst.msk [vmem:[%s10150_s25 + $0x40] sm:$0x1] %vm3980_vm11, %v3918_v4  ;;  %v3941_v49 = vrot.slane %v3918_v4, 4 }
 0xba7   : > { %v4201_v18 = vsub.f32 1.0, %v4200_v46  ;;  %v4288_v19 = vand.u32 2147483647, %v10279_v20  ;;  %v3942_v16 = vrot.slane %v3918_v4, 5  ;;  %v4210_v10 = vand.u32 2147483648, %v10282_v34 }
 0xba8   : > { %3998 = vst.msk [vmem:[%s10150_s25 + $0x44] sm:$0x1] %vm3980_vm11, %v3938_v26  ;;  %v4281_v13 = vsub.f32 1.0, %v4280_v61  ;;  %6676 = vrcp.f32 %v10355_v12  ;;  %vm10374_vm6 = vcmp.eq.f32.partialorder %v5043_v24, 8.507059e+37  ;;  %vm5490_vm0 = vweird.f32 %v12133_v43  ;;  %v10379_v46 = vpop.eup %6674 }
 0xba9   : > { %v3943_v17 = vrot.slane %v3918_v4, 6  ;;  %3999 = vst.msk [vmem:[%s10150_s25 + $0x48] sm:$0x1] %vm3980_vm11, %v3939_v23  ;;  %v4202_v54 = vmul.f32 %v6673_v47, %v4201_v18  ;;  %vm4205_vm7 = vweird.f32 %v6673_v47  ;;  %v4290_v26 = vand.u32 2147483648, %v10279_v20 }
 0xbaa   : > { %v3944_v61 = vrot.slane %v3918_v4, 7  ;;  %4000 = vst.msk [vmem:[%s10150_s25 + $0x4c] sm:$0x1] %vm3980_vm11, %v3940_v44  ;;  %v4282_v24 = vmul.f32 %v10336_v56, %v4281_v13  ;;  %vm4285_vm8 = vweird.f32 %v10336_v56  ;;  %v4250_v50 = vmul.f32 %v10379_v46, %v10332_v33 }
 0xbab   : > { %vm5489_vm3 = vweird.f32 %v12132_v51  ;;  %4001 = vst.msk [vmem:[%s10150_s25 + $0x50] sm:$0x1] %vm3980_vm11, %v3941_v49  ;;  %v4203_v23 = vadd.f32 %v6673_v47, %v4202_v54  ;;  %vm4204_vm9 = vweird.f32 %v10282_v34  ;;  %vm4284_vm12 = vweird.f32 %v10279_v20 }
 0xbac   : > { %v5574_v4 = vsub.f32 1.0, %v5573_v27  ;;  %4002 = vst.msk [vmem:[%s10150_s25 + $0x54] sm:$0x1] %vm3980_vm11, %v3942_v16  ;;  %vm4206_vm1 = vmor %vm4204_vm9, %vm4205_vm7  ;;  %v4211_v13 = vor.u32 1.1754944e-38, %v4210_v10  ;;  %v4283_v44 = vadd.f32 %v10336_v56, %v4282_v24  ;;  %vm4289_vm2 = vcmp.eq.f32.partialorder %v4288_v19, 8.507059e+37 }
 0xbad   : > { %v4251_v18 = vsub.f32 1.0, %v4250_v50  ;;  %4003 = vst.msk [vmem:[%s10150_s25 + $0x58] sm:$0x1] %vm3980_vm11, %v3943_v17  ;;  %v4207_v2 = vsel %vm4206_vm1, %v6673_v47, %v4203_v23  ;;  %vm4209_vm13 = vcmp.eq.f32.partialorder %v4208_v52, 8.507059e+37  ;;  %vm4286_vm15 = vmor %vm4284_vm12, %vm4285_vm8  ;;  %v4291_v54 = vor.u32 1.1754944e-38, %v4290_v26 }
 0xbae   : > { %v4260_v34 = vand.u32 2147483648, %v10332_v33  ;;  %v6677_v20 = vpop.eup %6676  ;;  %4004 = vst.msk [vmem:[%s10150_s25 + $0x5c] sm:$0x1] %vm3980_vm11, %v3944_v61  ;;  %v4212_v27 = vsel %vm4209_vm13, %v4211_v13, %v4207_v2  ;;  %v4287_v49 = vsel %vm4286_vm15, %v10336_v56, %v4283_v44  ;;  %vm4255_vm14 = vweird.f32 %v10379_v46 }
 0xbaf   : > { %v4252_v16 = vmul.f32 %v10379_v46, %v4251_v18  ;;  %v4213_v17 = vmul.f32 %v4212_v27, %v9524_v9  ;;  %v4292_v50 = vsel %vm4289_vm2, %v4291_v54, %v4287_v49  ;;  %v4170_v47 = vmul.f32 %v6677_v20, %v10355_v12 }
 0xbb0   : > { %v10411_v52 = vadd.f32 %v12133_v43, %v5487_v36  ;;  %v4293_v19 = vmul.f32 %v4292_v50, %v9512_v8  ;;  %vm4254_vm4 = vweird.f32 %v10332_v33  ;;  %v4258_v2 = vand.u32 2147483647, %v10332_v33 }
 0xbb1   : > { %v4253_v10 = vadd.f32 %v10379_v46, %v4252_v16  ;;  %vm10417_vm5 = vmor %vm4254_vm4, %vm4255_vm14  ;;  %v4171_v26 = vsub.f32 1.0, %v4170_v47  ;;  %v12148_v9 = vsel %vm10349_vm10, %v12131_v48, %v10327_v29  ;;  %v5493_v36 = vand.u32 2147483647, %v12132_v51 }
 0xbb2   : > { %v10429_v8 = vsel %vm10374_vm6, %v10361_v57, %v12148_v9  ;;  %v5575_v61 = vmul.f32 %v12143_v0, %v5574_v4  ;;  %v4311_v33 = vadd.f32 %v4293_v19, %v4213_v17  ;;  %v4261_v23 = vor.u32 1.1754944e-38, %v4260_v34  ;;  %vm10443_vm10 = vmor %vm5489_vm3, %vm5490_vm0 }
 0xbb3   : > { %v4257_v24 = vsel %vm10417_vm5, %v10379_v46, %v4253_v10  ;;  %v5495_v11 = vand.u32 2147483648, %v12132_v51  ;;  %v4172_v13 = vmul.f32 %v6677_v20, %v4171_v26  ;;  %vm4175_vm7 = vweird.f32 %v6677_v20  ;;  %v12155_v10 = vld [vmem:[#allocation119_spill] sm:$0xff]  ;;  %v12157_v26 = vld [vmem:[#allocation41_spill] sm:$0xff] }
 0xbb4   : > { %v4178_v48 = vand.u32 2147483647, %v10355_v12  ;;  %v4180_v39 = vand.u32 2147483648, %v10355_v12  ;;  %v4399_v57 = vadd.f32 %v9638_v25, %v4311_v33  ;;  %vm4259_vm6 = vcmp.eq.f32.partialorder %v4258_v2, 8.507059e+37  ;;  %v12156_v2 = vld [vmem:[#allocation138_spill] sm:$0xff] }
 0xbb5   : > { %v5492_v46 = vsel %vm10443_vm10, %v12133_v43, %v10411_v52  ;;  %vm5578_vm8 = vweird.f32 %v12143_v0  ;;  %v4262_v4 = vsel %vm4259_vm6, %v4261_v23, %v4257_v24  ;;  %v4173_v44 = vadd.f32 %v6677_v20, %v4172_v13  ;;  %v10470_v47 = vpop.xlane.xlu0 %3592 }
 0xbb6   : > { %vm4174_vm9 = vweird.f32 %v10355_v12  ;;  %v5576_v51 = vadd.f32 %v12143_v0, %v5575_v61  ;;  %v4487_v18 = vadd.f32 %v9664_v15, %v4399_v57  ;;  %v5496_v25 = vor.u32 1.1754944e-38, %v5495_v11  ;;  %v10464_v12 = vpop.xlane.xlu1 %3672 }
 0xbb7   : > { %vm10456_vm0 = vmor %vm4174_vm9, %vm4175_vm7  ;;  %vm5577_vm3 = vweird.f32 %v12142_v59  ;;  %v5583_v43 = vand.u32 2147483648, %v12142_v59  ;;  %vm4179_vm12 = vcmp.eq.f32.partialorder %v4178_v48, 8.507059e+37  ;;  %v4181_v27 = vor.u32 1.1754944e-38, %v4180_v39 }
 0xbb8   : > { %v4177_v34 = vsel %vm10456_vm0, %v6677_v20, %v4173_v44  ;;  %v5581_v49 = vand.u32 2147483647, %v12142_v59  ;;  %v4507_v15 = vrot.slane %v4487_v18, 1  ;;  %v4508_v16 = vrot.slane %v4487_v18, 2  ;;  %4565 = vst.msk [vmem:[%s10150_s25 + $0x41] sm:$0x1] %vm3980_vm11, %v4487_v18  ;;  %vm10474_vm1 = vmor %vm5577_vm3, %vm5578_vm8 }
 0xbb9   : > { %v4509_v17 = vrot.slane %v4487_v18, 3  ;;  %v4263_v50 = vmul.f32 %v4262_v4, %v9548_v30  ;;  %v4510_v52 = vrot.slane %v4487_v18, 4  ;;  %v4182_v19 = vsel %vm4179_vm12, %v4181_v27, %v4177_v34 }
 0xbba   : > { %v5580_v59 = vsel %vm10474_vm1, %v12143_v0, %v5576_v51  ;;  %v5500_v56 = vmul.f32 %v12156_v2, %v12155_v10  ;;  %v4511_v30 = vrot.slane %v4487_v18, 5  ;;  %4566 = vst.msk [vmem:[%s10150_s25 + $0x45] sm:$0x1] %vm3980_vm11, %v4507_v15  ;;  %v4183_v9 = vmul.f32 %v4182_v19, %v12157_v26  ;;  %v12160_v51 = vld [vmem:[#allocation128_spill] sm:$0xff] }
 0xbbb   : > { %6678 = vrcp.f32 %v10464_v12  ;;  %v5584_v61 = vor.u32 1.1754944e-38, %v5583_v43  ;;  %v4512_v33 = vrot.slane %v4487_v18, 6  ;;  %4567 = vst.msk [vmem:[%s10150_s25 + $0x49] sm:$0x1] %vm3980_vm11, %v4508_v16  ;;  %vm5494_vm2 = vcmp.eq.f32.partialorder %v5493_v36, 8.507059e+37 }
 0xbbc   : > { %6680 = vrcp.f32 %v10470_v47  ;;  %vm5582_vm13 = vcmp.eq.f32.partialorder %v5581_v49, 8.507059e+37  ;;  %v4513_v0 = vrot.slane %v4487_v18, 7  ;;  %4568 = vst.msk [vmem:[%s10150_s25 + $0x4d] sm:$0x1] %vm3980_vm11, %v4509_v17  ;;  %v4309_v24 = vadd.f32 %v4263_v50, %v4183_v9  ;;  %v12161_v18 = vld [vmem:[#allocation64_spill] sm:$0xff] }
 0xbbd   : > { %v5497_v23 = vsel %vm5494_vm2, %v5496_v25, %v5492_v46  ;;  %v5585_v11 = vsel %vm5582_vm13, %v5584_v61, %v5580_v59  ;;  %4569 = vst.msk [vmem:[%s10150_s25 + $0x51] sm:$0x1] %vm3980_vm11, %v4510_v52  ;;  %v10496_v13 = vmul.f32 %v8118_v35, %v10200_v63  ;;  %v10500_v48 = vmul.f32 %v8074_v6, %v10202_v55 }
 0xbbe   : > { %v10504_v36 = vmul.f32 %v8118_v35, %v10235_v53  ;;  %v5501_v39 = vsub.f32 1.0, %v5500_v56  ;;  %4570 = vst.msk [vmem:[%s10150_s25 + $0x55] sm:$0x1] %vm3980_vm11, %v4511_v30  ;;  %v4397_v29 = vadd.f32 %v9733_v5, %v4309_v24  ;;  %v10511_v57 = vmul.f32 %v8074_v6, %v10334_v28  ;;  %v10523_v53 = vpop.xlane.xlu1 %4241 }
 0xbbf   : > { %v10515_v63 = vmul.f32 %v8118_v35, %v10339_v14  ;;  %v10519_v55 = vmul.f32 %v8074_v6, %v10345_v45  ;;  %4571 = vst.msk [vmem:[%s10150_s25 + $0x59] sm:$0x1] %vm3980_vm11, %v4512_v33  ;;  %v10527_v46 = vmul.f32 %v8118_v35, %v10429_v8  ;;  %v10530_v5 = vmul.f32 %v8074_v6, %v5497_v23  ;;  %v10542_v8 = vpop.xlane.xlu0 %4161  ;;  %v10588_v23 = vpop.xlane.xlu2 %4806 }
 0xbc0   : > { %v10533_v28 = vmul.f32 %v8118_v35, %v5585_v11  ;;  %v5508_v14 = vand.u32 2147483647, %v12155_v10  ;;  %4572 = vst.msk [vmem:[%s10150_s25 + $0x5d] sm:$0x1] %vm3980_vm11, %v4513_v0  ;;  %v4485_v45 = vadd.f32 %v9736_v22, %v4397_v29  ;;  %6682 = vrcp.f32 %v10523_v53 }
 0xbc1   : > { %v10536_v4 = vpop.eup %6678  ;;  %v5510_v44 = vand.u32 2147483648, %v12155_v10  ;;  %v10547_v54 = vmul.f32 %v12161_v18, %v12160_v51  ;;  %v3728_v34 = vand.u32 2147483647, %v10464_v12  ;;  %6684 = vrcp.f32 %v10542_v8 }
 0xbc2   : > { %v10549_v25 = vpop.eup %6680  ;;  %v3720_v43 = vmul.f32 %v10536_v4, %v10464_v12  ;;  %v10556_v22 = vmul.f32 %v12156_v2, %v5501_v39  ;;  %v4493_v27 = vrot.slane %v4485_v45, 1  ;;  %v4494_v49 = vrot.slane %v4485_v45, 2  ;;  %4549 = vst.msk [vmem:[%s10150_s25 + $0x1] sm:$0x1] %vm3980_vm11, %v4485_v45 }
 0xbc3   : > { %v4495_v15 = vrot.slane %v4485_v45, 3  ;;  %v3730_v16 = vand.u32 2147483648, %v10464_v12  ;;  %v4496_v17 = vrot.slane %v4485_v45, 4  ;;  %v3648_v20 = vand.u32 2147483647, %v10470_v47 }
 0xbc4   : > { %v3721_v50 = vsub.f32 1.0, %v3720_v43  ;;  %v3650_v52 = vand.u32 2147483648, %v10470_v47  ;;  %v4497_v19 = vrot.slane %v4485_v45, 5  ;;  %4550 = vst.msk [vmem:[%s10150_s25 + $0x5] sm:$0x1] %vm3980_vm11, %v4493_v27  ;;  %vm3724_vm15 = vweird.f32 %v10464_v12 }
 0xbc5   : > { %v3640_v59 = vmul.f32 %v10549_v25, %v10470_v47  ;;  %v5589_v56 = vsub.f32 1.0, %v10547_v54  ;;  %v4498_v30 = vrot.slane %v4485_v45, 6  ;;  %4551 = vst.msk [vmem:[%s10150_s25 + $0x9] sm:$0x1] %vm3980_vm11, %v4494_v49  ;;  %vm3725_vm14 = vweird.f32 %v10536_v4 }
 0xbc6   : > { %v3722_v26 = vmul.f32 %v10536_v4, %v3721_v50  ;;  %vm10579_vm4 = vcmp.eq.f32.partialorder %v3728_v34, 8.507059e+37  ;;  %v10583_v61 = vpop.eup %6682  ;;  %v4499_v33 = vrot.slane %v4485_v45, 7  ;;  %4552 = vst.msk [vmem:[%s10150_s25 + $0xd] sm:$0x1] %vm3980_vm11, %v4495_v15  ;;  %v3731_v0 = vor.u32 1.1754944e-38, %v3730_v16  ;;  %vm3726_vm10 = vmor %vm3724_vm15, %vm3725_vm14  ;;  %v10616_v15 = vpop.xlane.xlu1 %4812 }
 0xbc7   : > { %v3641_v24 = vsub.f32 1.0, %v3640_v59  ;;  %vm3644_vm5 = vweird.f32 %v10470_v47  ;;  %v10590_v11 = vpop.eup %6684  ;;  %4553 = vst.msk [vmem:[%s10150_s25 + $0x11] sm:$0x1] %vm3980_vm11, %v4496_v17  ;;  %vm10595_vm7 = vcmp.eq.f32.partialorder %v3648_v20, 8.507059e+37  ;;  %v3651_v45 = vor.u32 1.1754944e-38, %v3650_v52 }
 0xbc8   : > { %v3723_v39 = vadd.f32 %v10536_v4, %v3722_v26  ;;  %v4265_v43 = vmul.f32 %v10583_v61, %v10523_v53  ;;  %4554 = vst.msk [vmem:[%s10150_s25 + $0x15] sm:$0x1] %vm3980_vm11, %v4497_v19  ;;  %vm3645_vm6 = vweird.f32 %v10549_v25  ;;  %v4273_v27 = vand.u32 2147483647, %v10523_v53  ;;  %v10643_v26 = vpop.xlane.xlu0 %4732 }
 0xbc9   : > { %v3642_v34 = vmul.f32 %v10549_v25, %v3641_v24  ;;  %v4185_v49 = vmul.f32 %v10590_v11, %v10542_v8  ;;  %vm5505_vm8 = vweird.f32 %v12156_v2  ;;  %4555 = vst.msk [vmem:[%s10150_s25 + $0x19] sm:$0x1] %vm3980_vm11, %v4498_v30  ;;  %v4275_v17 = vand.u32 2147483648, %v10523_v53  ;;  %vm10635_vm0 = vmor %vm3644_vm5, %vm3645_vm6 }
 0xbca   : > { %v3727_v16 = vsel %vm3726_vm10, %v10536_v4, %v3723_v39  ;;  %v4266_v12 = vsub.f32 1.0, %v4265_v43  ;;  %6686 = vrcp.f32 %v10588_v23  ;;  %4556 = vst.msk [vmem:[%s10150_s25 + $0x1d] sm:$0x1] %vm3980_vm11, %v4499_v33  ;;  %v4193_v19 = vand.u32 2147483647, %v10542_v8 }
 0xbcb   : > { %v3732_v50 = vsel %vm10579_vm4, %v3731_v0, %v3727_v16  ;;  %v3643_v20 = vadd.f32 %v10549_v25, %v3642_v34  ;;  %v4186_v52 = vsub.f32 1.0, %v4185_v49  ;;  %vm5504_vm9 = vweird.f32 %v12155_v10 }
 0xbcc   : > { %v4267_v59 = vmul.f32 %v10583_v61, %v4266_v12  ;;  %vm4270_vm3 = vweird.f32 %v10583_v61  ;;  %v4195_v30 = vand.u32 2147483648, %v10542_v8  ;;  %6688 = vrcp.f32 %v10616_v15 }
 0xbcd   : > { %6795 = shalt.err (!%p6792_p3)
}
 0xbce   : > { %s6908_s3 = smov 128   ;;  %s6909_s5 = smov 8   ;;  %v3733_v47 = vmul.f32 %v3732_v50, %v9676_v42  ;;  %v3647_v9 = vsel %vm10635_vm0, %v10549_v25, %v3643_v20  ;;  %v4187_v33 = vmul.f32 %v10590_v11, %v4186_v52  ;;  %vm4190_vm12 = vweird.f32 %v10590_v11  ;;  %vm10700_vm5 = vmor %vm5504_vm9, %vm5505_vm8 }
 0xbcf   : > { %6211 = dma.vmem_to_hbm [thread:$0]  (%p7119_p11), %s10601_s26, 512, %s10603_s15, %s5718_s28, %s6908_s3, %s6908_s3, %s6909_s5   ;;  %v3652_v0 = vsel %vm10595_vm7, %v3651_v45, %v3647_v9  ;;  %v4268_v24 = vadd.f32 %v10583_v61, %v4267_v59  ;;  %vm4269_vm1 = vweird.f32 %v10523_v53  ;;  %v4276_v39 = vor.u32 1.1754944e-38, %v4275_v17  ;;  %v10682_v17 = vpop.xlane.xlu2 %4167 }
 0xbd0   : > { %v3653_v43 = vmul.f32 %v3652_v0, %v9689_v41  ;;  %vm4271_vm2 = vmor %vm4269_vm1, %vm4270_vm3  ;;  %v4188_v42 = vadd.f32 %v10590_v11, %v4187_v33  ;;  %vm4189_vm13 = vweird.f32 %v10542_v8  ;;  %6690 = vrcp.f32 %v10643_v26  ;;  %v10671_v25 = vpop.eup %6686  ;;  %s12234_s5 = sld [smem:[#allocation29_spill]]  ;;  %s6208_s3 = sshll.u32 %s7090_s0, 7 }
 0xbd1   : > { %v4272_v29 = vsel %vm4271_vm2, %v10583_v61, %v4268_v24  ;;  %vm4274_vm15 = vcmp.eq.f32.partialorder %v4273_v27, 8.507059e+37  ;;  %vm4191_vm14 = vmor %vm4189_vm13, %vm4190_vm12  ;;  %v4196_v45 = vor.u32 1.1754944e-38, %v4195_v30  ;;  %v10676_v53 = vadd.f32 %v12156_v2, %v10556_v22  ;;  %s5753_s0 = sshll.u32 %s10150_s25, 4  ;;  %s5723_s26 = scalar_lea.sflag [#allocation8], %s7149_s2  ;;  %s5754_s0 = int_to_ptr.vmem [resolvable:$true] %s5753_s0 }
 0xbd2   : > { %v3737_v41 = vadd.f32 %v3733_v47, %v3653_v43  ;;  %v4277_v34 = vsel %vm4274_vm15, %v4276_v39, %v4272_v29  ;;  %v4192_v49 = vsel %vm4191_vm14, %v10590_v11, %v4188_v42  ;;  %vm4194_vm4 = vcmp.eq.f32.partialorder %v4193_v19, 8.507059e+37  ;;  %v10679_v16 = vpop.eup %6688  ;;  %v10725_v43 = vpop.xlane.xlu1 %4726 }
 0xbd3   : > { %v4278_v8 = vmul.f32 %v4277_v34, %v9715_v38  ;;  %v4197_v12 = vsel %vm4194_vm4, %v4196_v45, %v4192_v49  ;;  %v10686_v61 = vor.u32 1.1754944e-38, %v5510_v44  ;;  %v5596_v27 = vand.u32 2147483647, %v12160_v51  ;;  %v12171_v44 = vld [vmem:[#allocation144_spill] sm:$0xff] }
 0xbd4   : > { %v3828_v22 = vadd.f32 %v9760_v31, %v3737_v41  ;;  %v4198_v50 = vmul.f32 %v4197_v12, %v9728_v58  ;;  %v4818_v11 = vmul.f32 %v10671_v25, %v10588_v23  ;;  %v4848_v20 = vmul.f32 %v10679_v16, %v10616_v15 }
 0xbd5   : > { %6692 = vrcp.f32 %v10682_v17  ;;  %v10707_v58 = vmul.f32 %v12161_v18, %v5589_v56  ;;  %v5598_v31 = vand.u32 2147483648, %v12160_v51  ;;  %v5523_v52 = vand.u32 2147483647, %v12171_v44 }
 0xbd6   : > { %v10711_v19 = vpop.eup %6690  ;;  %v3919_v4 = vadd.f32 %v9897_v60, %v3828_v22  ;;  %v4310_v59 = vadd.f32 %v4278_v8, %v4198_v50  ;;  %v4849_v30 = vsub.f32 1.0, %v4848_v20  ;;  %v5507_v47 = vsel %vm10700_vm5, %v12156_v2, %v10676_v53  ;;  %s5752_s10 = scalar_lea.hbm %s12234_s5, %s6208_s3  ;;  %s6816_s11 = scalar_lea.hbm %s12234_s5, 256 }
 0xbd7   : > { %v4826_v54 = vand.u32 2147483647, %v10588_v23  ;;  %v4828_v56 = vand.u32 2147483648, %v10588_v23  ;;  %v4856_v9 = vand.u32 2147483647, %v10616_v15  ;;  %v4768_v33 = vmul.f32 %v10711_v19, %v10643_v26  ;;  %s5755_s1 = sshll.u32 %s5752_s10, 4  ;;  %s5756_s1 = int_to_ptr.hbm [resolvable:$true] %s5755_s1 }
 0xbd8   : > { %v3945_v0 = vrot.slane %v3919_v4, 1  ;;  %v3946_v24 = vrot.slane %v3919_v4, 2  ;;  %v3947_v60 = vrot.slane %v3919_v4, 3  ;;  %4005 = vst.msk [vmem:[%s10150_s25 + $0x60] sm:$0x1] %vm3980_vm11, %v3919_v4  ;;  %v4819_v39 = vsub.f32 1.0, %v4818_v11 }
 0xbd9   : > { %v3948_v42 = vrot.slane %v3919_v4, 4  ;;  %v4398_v29 = vadd.f32 %v9910_v3, %v4310_v59  ;;  %v4858_v45 = vand.u32 2147483648, %v10616_v15  ;;  %v4776_v41 = vand.u32 2147483647, %v10643_v26  ;;  %s6810_s15 = sshra.s32 %s5756_s1, 4  ;;  %s6811_s15 = int_to_ptr.hbm [resolvable:$true] %s6810_s15 }
 0xbda   : > { %v3949_v34 = vrot.slane %v3919_v4, 5  ;;  %4006 = vst.msk [vmem:[%s10150_s25 + $0x64] sm:$0x1] %vm3980_vm11, %v3945_v0  ;;  %v4850_v49 = vmul.f32 %v10679_v16, %v4849_v30  ;;  %vm4853_vm7 = vweird.f32 %v10679_v16  ;;  %v4769_v8 = vsub.f32 1.0, %v4768_v33  ;;  %s6812_s28 = scalar_lea.hbm %s6811_s15, 128  ;;  %p6817_p5 = scmp.lt.s32.totalorder %s6811_s15, %s12234_s5 }
 0xbdb   : > { %v10734_v12 = vpop.eup %6692  ;;  %v3950_v22 = vrot.slane %v3919_v4, 6  ;;  %4007 = vst.msk [vmem:[%s10150_s25 + $0x68] sm:$0x1] %vm3980_vm11, %v3946_v24  ;;  %v10739_v3 = vadd.f32 %v9913_v7, %v4398_v29  ;;  %v4778_v50 = vand.u32 2147483648, %v10643_v26  ;;  %6694 = vrcp.f32 %v10725_v43  ;;  %p6813_p4 = scmp.ne.s32.totalorder %s6811_s15, %s6812_s28  ;;  %p6818_p10 = scmp.lt.s32.totalorder %s6816_s11, %s6812_s28 }
 0xbdc   : > { %vm10745_vm10 = vcmp.eq.f32.partialorder %v5508_v14, 8.507059e+37  ;;  %v3951_v20 = vrot.slane %v3919_v4, 7  ;;  %4008 = vst.msk [vmem:[%s10150_s25 + $0x6c] sm:$0x1] %vm3980_vm11, %v3947_v60  ;;  %v4820_v59 = vmul.f32 %v10671_v25, %v4819_v39  ;;  %v4851_v30 = vadd.f32 %v10679_v16, %v4850_v49 }
 0xbdd   : > { %v4770_v7 = vmul.f32 %v10711_v19, %v4769_v8  ;;  %4009 = vst.msk [vmem:[%s10150_s25 + $0x70] sm:$0x1] %vm3980_vm11, %v3948_v42  ;;  %vm4852_vm6 = vweird.f32 %v10616_v15  ;;  %vm10757_vm8 = vcmp.eq.f32.partialorder %v4856_v9, 8.507059e+37  ;;  %vm4773_vm9 = vweird.f32 %v10711_v19  ;;  %v10788_v42 = vpop.xlane.xlu0 %4247  ;;  %p6814_p7 = pnand %p6813_p4, %p7119_p11  ;;  %p6819_p9 = por %p6818_p10, %p6817_p5 }
 0xbde   : > { %v4215_v14 = vmul.f32 %v10734_v12, %v10682_v17  ;;  %4010 = vst.msk [vmem:[%s10150_s25 + $0x74] sm:$0x1] %vm3980_vm11, %v3949_v34  ;;  %v4500_v4 = vrot.slane %v10739_v3, 1  ;;  %vm4823_vm0 = vweird.f32 %v10671_v25  ;;  %vm4854_vm3 = vmor %vm4852_vm6, %vm4853_vm7  ;;  %v4859_v33 = vor.u32 1.1754944e-38, %v4858_v45 }
 0xbdf   : > { %vm4772_vm12 = vweird.f32 %v10643_v26  ;;  %4011 = vst.msk [vmem:[%s10150_s25 + $0x78] sm:$0x1] %vm3980_vm11, %v3950_v22  ;;  %v4501_v15 = vrot.slane %v10739_v3, 2  ;;  %v4855_v9 = vsel %vm4854_vm3, %v10679_v16, %v4851_v30  ;;  %v4771_v0 = vadd.f32 %v10711_v19, %v4770_v7  ;;  %p6815_p8 = pneg %p6814_p7 }
 0xbe0   : > { %vm10776_vm1 = vcmp.eq.f32.partialorder %v4776_v41, 8.507059e+37  ;;  %4012 = vst.msk [vmem:[%s10150_s25 + $0x7c] sm:$0x1] %vm3980_vm11, %v3951_v20  ;;  %v4502_v60 = vrot.slane %v10739_v3, 3  ;;  %v4821_v39 = vadd.f32 %v10671_v25, %v4820_v59  ;;  %v4860_v26 = vsel %vm10757_vm8, %v4859_v33, %v4855_v9  ;;  %vm4774_vm2 = vmor %vm4772_vm12, %vm4773_vm9  ;;  %v12189_v9 = vld [vmem:[#allocation39_spill] sm:$0xff] }
 0xbe1   : > { %v4779_v16 = vor.u32 1.1754944e-38, %v4778_v50  ;;  %v10790_v29 = vpop.eup %6694  ;;  %v4503_v45 = vrot.slane %v10739_v3, 4  ;;  %4557 = vst.msk [vmem:[%s10150_s25 + $0x21] sm:$0x1] %vm3980_vm11, %v10739_v3  ;;  %v4861_v41 = vmul.f32 %v4860_v26, %v9769_v32  ;;  %v4775_v34 = vsel %vm4774_vm2, %v10711_v19, %v4771_v0  ;;  %p6820_p6 = pnand %p6819_p9, %p6815_p8 }
 0xbe2   : > { %v4216_v49 = vsub.f32 1.0, %v4215_v14  ;;  %v4504_v8 = vrot.slane %v10739_v3, 5  ;;  %4558 = vst.msk [vmem:[%s10150_s25 + $0x25] sm:$0x1] %vm3980_vm11, %v4500_v4  ;;  %vm4822_vm13 = vweird.f32 %v10588_v23  ;;  %v4738_v50 = vmul.f32 %v10790_v29, %v10725_v43 }
 0xbe3   : > { %v4780_v22 = vsel %vm10776_vm1, %v4779_v16, %v4775_v34  ;;  %v4505_v20 = vrot.slane %v10739_v3, 6  ;;  %4559 = vst.msk [vmem:[%s10150_s25 + $0x29] sm:$0x1] %vm3980_vm11, %v4501_v15  ;;  %vm10811_vm15 = vmor %vm4822_vm13, %vm4823_vm0  ;;  %6696 = vrcp.f32 %v10788_v42  ;;  %v5525_v59 = vand.u32 2147483648, %v12171_v44 }
 0xbe4   : > { %v4781_v19 = vmul.f32 %v4780_v22, %v9776_v21  ;;  %v4506_v30 = vrot.slane %v10739_v3, 7  ;;  %4560 = vst.msk [vmem:[%s10150_s25 + $0x2d] sm:$0x1] %vm3980_vm11, %v4502_v60  ;;  %v4825_v7 = vsel %vm10811_vm15, %v10671_v25, %v4821_v39  ;;  %v4739_v10 = vsub.f32 1.0, %v4738_v50 }
 0xbe5   : > { %v10832_v21 = vsel %vm10745_vm10, %v10686_v61, %v5507_v47  ;;  %4561 = vst.msk [vmem:[%s10150_s25 + $0x31] sm:$0x1] %vm3980_vm11, %v4503_v45  ;;  %vm4827_vm14 = vcmp.eq.f32.partialorder %v4826_v54, 8.507059e+37  ;;  %v4829_v25 = vor.u32 1.1754944e-38, %v4828_v56  ;;  %v4217_v38 = vmul.f32 %v10734_v12, %v4216_v49  ;;  %v10847_v61 = vpop.xlane.xlu2 %4729  ;;  %v10849_v47 = vpop.xlane.xlu1 %5374 }
 0xbe6   : > { %v4879_v3 = vadd.f32 %v4861_v41, %v4781_v19  ;;  %4562 = vst.msk [vmem:[%s10150_s25 + $0x35] sm:$0x1] %vm3980_vm11, %v4504_v8  ;;  %vm4219_vm4 = vweird.f32 %v10682_v17  ;;  %v4740_v2 = vmul.f32 %v10790_v29, %v4739_v10  ;;  %vm4743_vm5 = vweird.f32 %v10790_v29  ;;  %v10884_v16 = vpop.xlane.xlu0 %4809 }
 0xbe7   : > { %v4748_v53 = vand.u32 2147483648, %v10725_v43  ;;  %4563 = vst.msk [vmem:[%s10150_s25 + $0x39] sm:$0x1] %vm3980_vm11, %v4505_v20  ;;  %v4830_v23 = vsel %vm4827_vm14, %v4829_v25, %v4825_v7  ;;  %v4746_v56 = vand.u32 2147483647, %v10725_v43  ;;  %6698 = vrcp.f32 %v10847_v61 }
 0xbe8   : > { %v4967_v54 = vadd.f32 %v10046_v1, %v4879_v3  ;;  %4564 = vst.msk [vmem:[%s10150_s25 + $0x3d] sm:$0x1] %vm3980_vm11, %v4506_v30  ;;  %v4223_v11 = vand.u32 2147483647, %v10682_v17  ;;  %v4225_v14 = vand.u32 2147483648, %v10682_v17  ;;  %v4741_v4 = vadd.f32 %v10790_v29, %v4740_v2 }
 0xbe9   : > { %vm4742_vm7 = vweird.f32 %v10725_v43  ;;  %vm5593_vm10 = vweird.f32 %v12161_v18  ;;  %v10863_v33 = vpop.eup %6696  ;;  %v4218_v15 = vadd.f32 %v10734_v12, %v4217_v38  ;;  %vm4220_vm6 = vweird.f32 %v10734_v12  ;;  %v12184_v38 = vld [vmem:[#allocation53_spill] sm:$0xff] }
 0xbea   : > { %v5055_v1 = vadd.f32 %v10049_v37, %v4967_v54  ;;  %vm10870_vm8 = vmor %vm4742_vm7, %vm4743_vm5  ;;  %6700 = vrcp.f32 %v10849_v47  ;;  %v4831_v43 = vmul.f32 %v4830_v23, %v9740_v40  ;;  %v4749_v24 = vor.u32 1.1754944e-38, %v4748_v53 }
 0xbeb   : > { %v4745_v0 = vsel %vm10870_vm8, %v10790_v29, %v4741_v4  ;;  %v4295_v37 = vmul.f32 %v10863_v33, %v10788_v42  ;;  %vm5592_vm9 = vweird.f32 %v12160_v51  ;;  %vm4747_vm0 = vcmp.eq.f32.partialorder %v4746_v56, 8.507059e+37  ;;  %vm10890_vm3 = vmor %vm4219_vm4, %vm4220_vm6 }
 0xbec   : > { %v5075_v60 = vrot.slane %v5055_v1, 1  ;;  %v5076_v39 = vrot.slane %v5055_v1, 2  ;;  %v5077_v26 = vrot.slane %v5055_v1, 3  ;;  %5133 = vst.msk [vmem:[%s10150_s25 + $0x42] sm:$0x1] %vm3980_vm11, %v5055_v1  ;;  %v5078_v40 = vrot.slane %v5055_v1, 4  ;;  %vm10947_vm14 = vmor %vm5592_vm9, %vm5593_vm10 }
 0xbed   : > { %v4226_v45 = vor.u32 1.1754944e-38, %v4225_v14  ;;  %v4750_v41 = vsel %vm4747_vm0, %v4749_v24, %v4745_v0  ;;  %v4303_v34 = vand.u32 2147483647, %v10788_v42  ;;  %v10895_v49 = vpop.eup %6698  ;;  %v5079_v8 = vrot.slane %v5055_v1, 5 }
 0xbee   : > { %5134 = vst.msk [vmem:[%s10150_s25 + $0x46] sm:$0x1] %vm3980_vm11, %v5075_v60  ;;  %v4222_v22 = vsel %vm10890_vm3, %v10734_v12, %v4218_v15  ;;  %v4751_v17 = vmul.f32 %v4750_v41, %v9818_v62  ;;  %v4296_v50 = vsub.f32 1.0, %v4295_v37  ;;  %v5080_v20 = vrot.slane %v5055_v1, 6 }
 0xbef   : > { %5135 = vst.msk [vmem:[%s10150_s25 + $0x4a] sm:$0x1] %vm3980_vm11, %v5076_v39  ;;  %v4305_v32 = vand.u32 2147483648, %v10788_v42  ;;  %v4753_v19 = vmul.f32 %v10895_v49, %v10847_v61  ;;  %6702 = vrcp.f32 %v10884_v16  ;;  %v5081_v7 = vrot.slane %v5055_v1, 7 }
 0xbf0   : > { %v10909_v30 = vpop.eup %6700  ;;  %5136 = vst.msk [vmem:[%s10150_s25 + $0x4e] sm:$0x1] %vm3980_vm11, %v5077_v26  ;;  %v4877_v12 = vadd.f32 %v4831_v43, %v4751_v17  ;;  %v4297_v62 = vmul.f32 %v10863_v33, %v4296_v50  ;;  %vm4300_vm12 = vweird.f32 %v10863_v33  ;;  %vm4224_vm1 = vcmp.eq.f32.partialorder %v4223_v11, 8.507059e+37  ;;  %v12185_v11 = vld [vmem:[#allocation59_spill] sm:$0xff]  ;;  %v10975_v50 = vpop.xlane.xlu0 %5294 }
 0xbf1   : > { %5137 = vst.msk [vmem:[%s10150_s25 + $0x52] sm:$0x1] %vm3980_vm11, %v5078_v40  ;;  %vm4299_vm2 = vweird.f32 %v10788_v42  ;;  %v4754_v10 = vsub.f32 1.0, %v4753_v19  ;;  %v10920_v25 = vadd.f32 %v12161_v18, %v10707_v58  ;;  %v4227_v3 = vsel %vm4224_vm1, %v4226_v45, %v4222_v22  ;;  %v10965_v40 = vpop.xlane.xlu2 %5300  ;;  %v12190_v45 = vld [vmem:[#allocation95_spill] sm:$0xff] }
 0xbf2   : > { %5138 = vst.msk [vmem:[%s10150_s25 + $0x56] sm:$0x1] %vm3980_vm11, %v5079_v8  ;;  %v4965_v2 = vadd.f32 %v12184_v38, %v4877_v12  ;;  %v4298_v53 = vadd.f32 %v10863_v33, %v4297_v62  ;;  %v5386_v23 = vmul.f32 %v10909_v30, %v10849_v47  ;;  %vm4301_vm13 = vmor %vm4299_vm2, %vm4300_vm12  ;;  %v4306_v54 = vor.u32 1.1754944e-38, %v4305_v32 }
 0xbf3   : > { %5139 = vst.msk [vmem:[%s10150_s25 + $0x5a] sm:$0x1] %vm3980_vm11, %v5080_v20  ;;  %v4755_v42 = vmul.f32 %v10895_v49, %v4754_v10  ;;  %v10933_v58 = vmul.f32 %v8074_v6, %v10832_v21  ;;  %v10937_v56 = vor.u32 1.1754944e-38, %v5598_v31  ;;  %vm4304_vm15 = vcmp.eq.f32.partialorder %v4303_v34, 8.507059e+37  ;;  %v12188_v21 = vld [vmem:[#allocation60_spill] sm:$0xff] }
 0xbf4   : > { %5140 = vst.msk [vmem:[%s10150_s25 + $0x5e] sm:$0x1] %vm3980_vm11, %v5081_v7  ;;  %v5053_v14 = vadd.f32 %v12185_v11, %v4965_v2  ;;  %v4302_v4 = vsel %vm4301_vm13, %v10863_v33, %v4298_v53  ;;  %v10953_v15 = vmul.f32 %v12188_v21, %v12171_v44  ;;  %v4228_v43 = vmul.f32 %v4227_v3, %v12189_v9  ;;  %v11020_v11 = vpop.xlane.xlu1 %4735 }
 0xbf5   : > { %v10955_v31 = vpop.eup %6702  ;;  %v4307_v0 = vsel %vm4304_vm15, %v4306_v54, %v4302_v4  ;;  %v4761_v33 = vand.u32 2147483647, %v10847_v61  ;;  %v5595_v24 = vsel %vm10947_vm14, %v12161_v18, %v10920_v25  ;;  %v5387_v26 = vsub.f32 1.0, %v5386_v23 }
 0xbf6   : > { %v5061_v37 = vrot.slane %v5053_v14, 1  ;;  %v5062_v60 = vrot.slane %v5053_v14, 2  ;;  %v5063_v39 = vrot.slane %v5053_v14, 3  ;;  %5117 = vst.msk [vmem:[%s10150_s25 + $0x2] sm:$0x1] %vm3980_vm11, %v5053_v14  ;;  %v5064_v29 = vrot.slane %v5053_v14, 4 }
 0xbf7   : > { %v4308_v41 = vmul.f32 %v4307_v0, %v12190_v45  ;;  %v4756_v34 = vadd.f32 %v10895_v49, %v4755_v42  ;;  %vm4758_vm4 = vweird.f32 %v10895_v49  ;;  %v5065_v8 = vrot.slane %v5053_v14, 5 }
 0xbf8   : > { %5118 = vst.msk [vmem:[%s10150_s25 + $0x6] sm:$0x1] %vm3980_vm11, %v5061_v37  ;;  %v4763_v22 = vand.u32 2147483648, %v10847_v61  ;;  %v4833_v17 = vmul.f32 %v10955_v31, %v10884_v16  ;;  %vm10979_vm5 = vcmp.eq.f32.partialorder %v5596_v27, 8.507059e+37  ;;  %v5516_v32 = vsub.f32 1.0, %v10953_v15 }
 0xbf9   : > { %v5066_v19 = vrot.slane %v5053_v14, 6  ;;  %5119 = vst.msk [vmem:[%s10150_s25 + $0xa] sm:$0x1] %vm3980_vm11, %v5062_v60  ;;  %v4312_v7 = vadd.f32 %v4308_v41, %v4228_v43  ;;  %vm4757_vm7 = vweird.f32 %v10847_v61  ;;  %vm5390_vm10 = vweird.f32 %v10849_v47  ;;  %v12197_v61 = vld [vmem:[#allocation74_spill] sm:$0xff]  ;;  %v11035_v60 = vpop.xlane.xlu2 %4815 }
 0xbfa   : > { %v5067_v12 = vrot.slane %v5053_v14, 7  ;;  %5120 = vst.msk [vmem:[%s10150_s25 + $0xe] sm:$0x1] %vm3980_vm11, %v5063_v39  ;;  %vm10992_vm6 = vmor %vm4757_vm7, %vm4758_vm4  ;;  %vm10996_vm8 = vcmp.eq.f32.partialorder %v4761_v33, 8.507059e+37  ;;  %v5388_v62 = vmul.f32 %v10909_v30, %v5387_v26  ;;  %v4834_v10 = vsub.f32 1.0, %v4833_v17 }
 0xbfb   : > { %5121 = vst.msk [vmem:[%s10150_s25 + $0x12] sm:$0x1] %vm3980_vm11, %v5064_v29  ;;  %v4400_v3 = vadd.f32 %v12197_v61, %v4312_v7  ;;  %v4760_v38 = vsel %vm10992_vm6, %v10895_v49, %v4756_v34  ;;  %v4843_v2 = vand.u32 2147483648, %v10884_v16  ;;  %6704 = vrcp.f32 %v10975_v50  ;;  %v12198_v29 = vld [vmem:[#allocation76_spill] sm:$0xff] }
 0xbfc   : > { %5122 = vst.msk [vmem:[%s10150_s25 + $0x16] sm:$0x1] %vm3980_vm11, %v5065_v8  ;;  %v4764_v53 = vor.u32 1.1754944e-38, %v4763_v22  ;;  %v4835_v23 = vmul.f32 %v10955_v31, %v4834_v10  ;;  %vm4838_vm9 = vweird.f32 %v10955_v31  ;;  %v4841_v54 = vand.u32 2147483647, %v10884_v16  ;;  %v12201_v22 = vld [vmem:[#allocation44_spill] sm:$0xff] }
 0xbfd   : > { %5123 = vst.msk [vmem:[%s10150_s25 + $0x1a] sm:$0x1] %vm3980_vm11, %v5066_v19  ;;  %v4488_v42 = vadd.f32 %v10496_v13, %v4400_v3  ;;  %vm5391_vm0 = vweird.f32 %v10909_v30  ;;  %v5396_v49 = vand.u32 2147483648, %v10849_v47  ;;  %vm4837_vm3 = vweird.f32 %v10884_v16  ;;  %v12202_v19 = vld [vmem:[#allocation69_spill] sm:$0xff]  ;;  %v12203_v7 = vld [vmem:[#allocation104_spill] sm:$0xff] }
 0xbfe   : > { %5124 = vst.msk [vmem:[%s10150_s25 + $0x1e] sm:$0x1] %vm3980_vm11, %v5067_v12  ;;  %v4765_v14 = vsel %vm10996_vm8, %v4764_v53, %v4760_v38  ;;  %v5389_v4 = vadd.f32 %v10909_v30, %v5388_v62  ;;  %v4836_v15 = vadd.f32 %v10955_v31, %v4835_v23  ;;  %6706 = vrcp.f32 %v11020_v11  ;;  %vm4839_vm12 = vmor %vm4837_vm3, %vm4838_vm9 }
 0xbff   : > { %v4514_v13 = vrot.slane %v4488_v42, 1  ;;  %v4515_v9 = vrot.slane %v4488_v42, 2  ;;  %v4516_v43 = vrot.slane %v4488_v42, 3  ;;  %4573 = vst.msk [vmem:[%s10150_s25 + $0x61] sm:$0x1] %vm3980_vm11, %v4488_v42  ;;  %v4844_v16 = vor.u32 1.1754944e-38, %v4843_v2  ;;  %vm11046_vm2 = vmor %vm5390_vm10, %vm5391_vm0 }
 0xc00   : > { %v4517_v0 = vrot.slane %v4488_v42, 4  ;;  %v5394_v33 = vand.u32 2147483647, %v10849_v47  ;;  %v4840_v37 = vsel %vm4839_vm12, %v10955_v31, %v4836_v15  ;;  %vm4842_vm1 = vcmp.eq.f32.partialorder %v4841_v54, 8.507059e+37 }
 0xc01   : > { %v11037_v39 = vpop.eup %6704  ;;  %v4518_v26 = vrot.slane %v4488_v42, 5  ;;  %4574 = vst.msk [vmem:[%s10150_s25 + $0x65] sm:$0x1] %vm3980_vm11, %v4514_v13  ;;  %v4766_v45 = vmul.f32 %v4765_v14, %v12198_v29  ;;  %v4845_v31 = vsel %vm4842_vm1, %v4844_v16, %v4840_v37  ;;  %v11058_v34 = vsel %vm10979_vm5, %v10937_v56, %v5595_v24  ;;  %v11128_v37 = vpop.xlane.xlu0 %5303 }
 0xc02   : > { %v4519_v8 = vrot.slane %v4488_v42, 6  ;;  %4575 = vst.msk [vmem:[%s10150_s25 + $0x69] sm:$0x1] %vm3980_vm11, %v4515_v9  ;;  %v5393_v47 = vsel %vm11046_vm2, %v10909_v30, %v5389_v4  ;;  %v4846_v17 = vmul.f32 %v4845_v31, %v12201_v22  ;;  %v5306_v1 = vmul.f32 %v11037_v39, %v10975_v50  ;;  %v12207_v31 = vld [vmem:[#allocation43_spill] sm:$0xff] }
 0xc03   : > { %vm5520_vm13 = vweird.f32 %v12188_v21  ;;  %v4520_v18 = vrot.slane %v4488_v42, 7  ;;  %4576 = vst.msk [vmem:[%s10150_s25 + $0x6d] sm:$0x1] %vm3980_vm11, %v4516_v43  ;;  %v5397_v25 = vor.u32 1.1754944e-38, %v5396_v49  ;;  %6708 = vrcp.f32 %v11035_v60 }
 0xc04   : > { %v5517_v56 = vmul.f32 %v12188_v21, %v5516_v32  ;;  %v11073_v24 = vpop.eup %6706  ;;  %4577 = vst.msk [vmem:[%s10150_s25 + $0x71] sm:$0x1] %vm3980_vm11, %v4517_v0  ;;  %vm5395_vm15 = vcmp.eq.f32.partialorder %v5394_v33, 8.507059e+37  ;;  %v4878_v30 = vadd.f32 %v4846_v17, %v4766_v45  ;;  %v5307_v20 = vsub.f32 1.0, %v5306_v1 }
 0xc05   : > { %vm5519_vm14 = vweird.f32 %v12171_v44  ;;  %v11080_v12 = vmul.f32 %v12203_v7, %v12202_v19  ;;  %4578 = vst.msk [vmem:[%s10150_s25 + $0x75] sm:$0x1] %vm3980_vm11, %v4518_v26  ;;  %v5398_v51 = vsel %vm5395_vm15, %v5397_v25, %v5393_v47  ;;  %6710 = vrcp.f32 %v10965_v40 }
 0xc06   : > { %v5314_v32 = vand.u32 2147483647, %v10975_v50  ;;  %v4783_v27 = vmul.f32 %v11073_v24, %v11020_v11  ;;  %4579 = vst.msk [vmem:[%s10150_s25 + $0x79] sm:$0x1] %vm3980_vm11, %v4519_v8  ;;  %v4966_v62 = vadd.f32 %v10500_v48, %v4878_v30  ;;  %v5308_v10 = vmul.f32 %v11037_v39, %v5307_v20  ;;  %v12204_v48 = vld [vmem:[#allocation42_spill] sm:$0xff]  ;;  %vm11146_vm9 = vmor %vm5519_vm14, %vm5520_vm13 }
 0xc07   : > { %v5316_v61 = vand.u32 2147483648, %v10975_v50  ;;  %v11095_v3 = vor.u32 1.1754944e-38, %v5525_v59  ;;  %4580 = vst.msk [vmem:[%s10150_s25 + $0x7d] sm:$0x1] %vm3980_vm11, %v4520_v18  ;;  %vm5311_vm4 = vweird.f32 %v11037_v39  ;;  %v11101_v2 = vadd.f32 %v12188_v21, %v5517_v56  ;;  %v11163_v56 = vpop.xlane.xlu2 %5377 }
 0xc08   : > { %v4784_v38 = vsub.f32 1.0, %v4783_v27  ;;  %v5611_v53 = vand.u32 2147483647, %v12202_v19  ;;  %v5399_v23 = vmul.f32 %v5398_v51, %v12204_v48  ;;  %v5054_v54 = vadd.f32 %v10504_v36, %v4966_v62 }
 0xc09   : > { %v5309_v42 = vadd.f32 %v11037_v39, %v5308_v10  ;;  %v5604_v59 = vsub.f32 1.0, %v11080_v12  ;;  %v11108_v49 = vpop.eup %6708  ;;  %vm5310_vm5 = vweird.f32 %v10975_v50  ;;  %vm11111_vm7 = vcmp.eq.f32.partialorder %v5314_v32, 8.507059e+37  ;;  %v11121_v50 = vpop.xlane.xlu1 %5297 }
 0xc0a   : > { %v4785_v4 = vmul.f32 %v11073_v24, %v4784_v38  ;;  %vm4787_vm10 = vweird.f32 %v11020_v11  ;;  %v5068_v15 = vrot.slane %v5054_v54, 1  ;;  %v5069_v13 = vrot.slane %v5054_v54, 2  ;;  %5125 = vst.msk [vmem:[%s10150_s25 + $0x22] sm:$0x1] %vm3980_vm11, %v5054_v54  ;;  %vm5312_vm6 = vmor %vm5310_vm5, %vm5311_vm4 }
 0xc0b   : > { %v5070_v36 = vrot.slane %v5054_v54, 3  ;;  %v5317_v9 = vor.u32 1.1754944e-38, %v5316_v61  ;;  %v11123_v43 = vpop.eup %6710  ;;  %v5071_v16 = vrot.slane %v5054_v54, 4  ;;  %v5313_v0 = vsel %vm5312_vm6, %v11037_v39, %v5309_v42 }
 0xc0c   : > { %vm4788_vm8 = vweird.f32 %v11073_v24  ;;  %v4793_v33 = vand.u32 2147483648, %v11020_v11  ;;  %v5072_v26 = vrot.slane %v5054_v54, 5  ;;  %5126 = vst.msk [vmem:[%s10150_s25 + $0x26] sm:$0x1] %vm3980_vm11, %v5068_v15  ;;  %v4786_v45 = vadd.f32 %v11073_v24, %v4785_v4 }
 0xc0d   : > { %v5318_v29 = vsel %vm11111_vm7, %v5317_v9, %v5313_v0  ;;  %v4863_v41 = vmul.f32 %v11108_v49, %v11035_v60  ;;  %v5073_v39 = vrot.slane %v5054_v54, 6  ;;  %5127 = vst.msk [vmem:[%s10150_s25 + $0x2a] sm:$0x1] %vm3980_vm11, %v5069_v13  ;;  %v4791_v47 = vand.u32 2147483647, %v11020_v11  ;;  %vm11158_vm0 = vmor %vm4787_vm10, %vm4788_vm8  ;;  %v12214_v9 = vld [vmem:[#allocation49_spill] sm:$0xff]  ;;  %v11214_v0 = vpop.xlane.xlu0 %5380 }
 0xc0e   : > { %v5319_v8 = vmul.f32 %v5318_v29, %v12207_v31  ;;  %6712 = vrcp.f32 %v11121_v50  ;;  %v5074_v17 = vrot.slane %v5054_v54, 7  ;;  %5128 = vst.msk [vmem:[%s10150_s25 + $0x2e] sm:$0x1] %vm3980_vm11, %v5070_v36  ;;  %v5336_v1 = vmul.f32 %v11123_v43, %v10965_v40 }
 0xc0f   : > { %v4864_v25 = vsub.f32 1.0, %v4863_v41  ;;  %6714 = vrcp.f32 %v11128_v37  ;;  %5129 = vst.msk [vmem:[%s10150_s25 + $0x32] sm:$0x1] %vm3980_vm11, %v5071_v16  ;;  %v4790_v20 = vsel %vm11158_vm0, %v11073_v24, %v4786_v45  ;;  %v4794_v12 = vor.u32 1.1754944e-38, %v4793_v33 }
 0xc10   : > { %v5445_v30 = vadd.f32 %v5399_v23, %v5319_v8  ;;  %v5522_v11 = vsel %vm11146_vm9, %v12188_v21, %v11101_v2  ;;  %5130 = vst.msk [vmem:[%s10150_s25 + $0x36] sm:$0x1] %vm3980_vm11, %v5072_v26  ;;  %vm4868_vm3 = vweird.f32 %v11108_v49  ;;  %v4871_v32 = vand.u32 2147483647, %v11035_v60 }
 0xc11   : > { %v4865_v51 = vmul.f32 %v11108_v49, %v4864_v25  ;;  %v4873_v27 = vand.u32 2147483648, %v11035_v60  ;;  %5131 = vst.msk [vmem:[%s10150_s25 + $0x3a] sm:$0x1] %vm3980_vm11, %v5073_v39  ;;  %vm4792_vm12 = vcmp.eq.f32.partialorder %v4791_v47, 8.507059e+37  ;;  %6716 = vrcp.f32 %v11163_v56  ;;  %v12215_v39 = vld [vmem:[#allocation46_spill] sm:$0xff]  ;;  %v11257_v42 = vpop.xlane.xlu1 %5383 }
 0xc12   : > { %v5533_v24 = vadd.f32 %v10511_v57, %v5445_v30  ;;  %v11185_v62 = vmul.f32 %v12203_v7, %v5604_v59  ;;  %5132 = vst.msk [vmem:[%s10150_s25 + $0x3e] sm:$0x1] %vm3980_vm11, %v5074_v17  ;;  %v5337_v10 = vsub.f32 1.0, %v5336_v1  ;;  %v4795_v61 = vsel %vm4792_vm12, %v4794_v12, %v4790_v20 }
 0xc13   : > { %v4866_v38 = vadd.f32 %v11108_v49, %v4865_v51  ;;  %vm4867_vm1 = vweird.f32 %v11035_v60  ;;  %v5344_v23 = vand.u32 2147483647, %v10965_v40  ;;  %v5346_v57 = vand.u32 2147483648, %v10965_v40 }
 0xc14   : > { %v11191_v48 = vpop.eup %6712  ;;  %v5621_v54 = vadd.f32 %v10515_v63, %v5533_v24  ;;  %vm11198_vm2 = vmor %vm4867_vm1, %vm4868_vm3  ;;  %v5613_v59 = vand.u32 2147483648, %v12202_v19  ;;  %vm5340_vm13 = vweird.f32 %v10965_v40  ;;  %vm4872_vm15 = vcmp.eq.f32.partialorder %v4871_v32, 8.507059e+37 }
 0xc15   : > { %v11203_v14 = vpop.eup %6714  ;;  %v4870_v60 = vsel %vm11198_vm2, %v11108_v49, %v4866_v38  ;;  %v4874_v4 = vor.u32 1.1754944e-38, %v4873_v27  ;;  %v5321_v63 = vmul.f32 %v11191_v48, %v11121_v50  ;;  %v4796_v16 = vmul.f32 %v4795_v61, %v12214_v9 }
 0xc16   : > { %v5629_v15 = vrot.slane %v5621_v54, 1  ;;  %v5630_v13 = vrot.slane %v5621_v54, 2  ;;  %v5631_v36 = vrot.slane %v5621_v54, 3  ;;  %5685 = vst.msk [vmem:[%s10150_s25 + $0x3] sm:$0x1] %vm3980_vm11, %v5621_v54  ;;  %v5338_v33 = vmul.f32 %v11123_v43, %v5337_v10 }
 0xc17   : > { %v5632_v26 = vrot.slane %v5621_v54, 4  ;;  %v4875_v49 = vsel %vm4872_vm15, %v4874_v4, %v4870_v60  ;;  %v5329_v29 = vand.u32 2147483647, %v11121_v50  ;;  %v11218_v45 = vpop.eup %6716  ;;  %v5633_v41 = vrot.slane %v5621_v54, 5 }
 0xc18   : > { %5686 = vst.msk [vmem:[%s10150_s25 + $0x7] sm:$0x1] %vm3980_vm11, %v5629_v15  ;;  %v4876_v31 = vmul.f32 %v4875_v49, %v12215_v39  ;;  %v5351_v8 = vmul.f32 %v11203_v14, %v11128_v37  ;;  %v5322_v47 = vsub.f32 1.0, %v5321_v63  ;;  %v5634_v17 = vrot.slane %v5621_v54, 6 }
 0xc19   : > { %5687 = vst.msk [vmem:[%s10150_s25 + $0xb] sm:$0x1] %vm3980_vm11, %v5630_v13  ;;  %v5331_v1 = vand.u32 2147483648, %v11121_v50  ;;  %v5401_v18 = vmul.f32 %v11218_v45, %v11163_v56  ;;  %6718 = vrcp.f32 %v11214_v0  ;;  %vm11231_vm14 = vcmp.eq.f32.partialorder %v5344_v23, 8.507059e+37 }
 0xc1a   : > { %v5635_v30 = vrot.slane %v5621_v54, 7  ;;  %5688 = vst.msk [vmem:[%s10150_s25 + $0xf] sm:$0x1] %vm3980_vm11, %v5631_v36  ;;  %v4880_v20 = vadd.f32 %v4876_v31, %v4796_v16  ;;  %v5323_v12 = vmul.f32 %v11191_v48, %v5322_v47  ;;  %vm5326_vm4 = vweird.f32 %v11191_v48 }
 0xc1b   : > { %v5339_v51 = vadd.f32 %v11123_v43, %v5338_v33  ;;  %vm5341_vm5 = vweird.f32 %v11123_v43  ;;  %5689 = vst.msk [vmem:[%s10150_s25 + $0x13] sm:$0x1] %vm3980_vm11, %v5632_v26  ;;  %vm5325_vm7 = vweird.f32 %v11121_v50  ;;  %v5402_v32 = vsub.f32 1.0, %v5401_v18 }
 0xc1c   : > { %5690 = vst.msk [vmem:[%s10150_s25 + $0x17] sm:$0x1] %vm3980_vm11, %v5633_v41  ;;  %v4968_v27 = vadd.f32 %v10519_v55, %v4880_v20  ;;  %v5352_v24 = vsub.f32 1.0, %v5351_v8  ;;  %v5324_v10 = vadd.f32 %v11191_v48, %v5323_v12  ;;  %vm11248_vm10 = vcmp.eq.f32.partialorder %v5329_v29, 8.507059e+37  ;;  %vm5327_vm6 = vmor %vm5325_vm7, %vm5326_vm4 }
 0xc1d   : > { %5691 = vst.msk [vmem:[%s10150_s25 + $0x1b] sm:$0x1] %vm3980_vm11, %v5634_v17  ;;  %v5332_v38 = vor.u32 1.1754944e-38, %v5331_v1  ;;  %v5403_v23 = vmul.f32 %v11218_v45, %v5402_v32  ;;  %v5409_v50 = vand.u32 2147483647, %v11163_v56  ;;  %v5411_v54 = vand.u32 2147483648, %v11163_v56  ;;  %vm11263_vm8 = vmor %vm5340_vm13, %vm5341_vm5 }
 0xc1e   : > { %5692 = vst.msk [vmem:[%s10150_s25 + $0x1f] sm:$0x1] %vm3980_vm11, %v5635_v30  ;;  %v5056_v60 = vadd.f32 %v10527_v46, %v4968_v27  ;;  %v5328_v4 = vsel %vm5327_vm6, %v11191_v48, %v5324_v10  ;;  %vm5406_vm0 = vweird.f32 %v11218_v45  ;;  %6720 = vrcp.f32 %v11257_v42  ;;  %v12223_v17 = vld [vmem:[#allocation52_spill] sm:$0xff] }
 0xc1f   : > { %v11273_v63 = vpop.eup %6718  ;;  %v5343_v15 = vsel %vm11263_vm8, %v11123_v43, %v5339_v51  ;;  %v5333_v13 = vsel %vm11248_vm10, %v5332_v38, %v5328_v4  ;;  %v5404_v36 = vadd.f32 %v11218_v45, %v5403_v23  ;;  %vm5405_vm3 = vweird.f32 %v11163_v56  ;;  %v12222_v56 = vld [vmem:[#allocation56_spill] sm:$0xff] }
 0xc20   : > { %v5082_v46 = vrot.slane %v5056_v60, 1  ;;  %v5083_v48 = vrot.slane %v5056_v60, 2  ;;  %v5084_v9 = vrot.slane %v5056_v60, 3  ;;  %5141 = vst.msk [vmem:[%s10150_s25 + $0x62] sm:$0x1] %vm3980_vm11, %v5056_v60  ;;  %v5353_v16 = vmul.f32 %v11203_v14, %v5352_v24  ;;  %vm5407_vm12 = vmor %vm5405_vm3, %vm5406_vm0 }
 0xc21   : > { %v5347_v33 = vor.u32 1.1754944e-38, %v5346_v57  ;;  %v5085_v26 = vrot.slane %v5056_v60, 4  ;;  %vm5410_vm1 = vcmp.eq.f32.partialorder %v5409_v50, 8.507059e+37  ;;  %v5412_v43 = vor.u32 1.1754944e-38, %v5411_v54 }
 0xc22   : > { %v5086_v49 = vrot.slane %v5056_v60, 5  ;;  %5142 = vst.msk [vmem:[%s10150_s25 + $0x66] sm:$0x1] %vm3980_vm11, %v5082_v46  ;;  %v5334_v29 = vmul.f32 %v5333_v13, %v12222_v56  ;;  %v5408_v41 = vsel %vm5407_vm12, %v11218_v45, %v5404_v36  ;;  %v5416_v39 = vmul.f32 %v11273_v63, %v11214_v0 }
 0xc23   : > { %v5348_v40 = vsel %vm11231_vm14, %v5347_v33, %v5343_v15  ;;  %v5087_v57 = vrot.slane %v5056_v60, 6  ;;  %5143 = vst.msk [vmem:[%s10150_s25 + $0x6a] sm:$0x1] %vm3980_vm11, %v5083_v48  ;;  %vm5356_vm2 = vweird.f32 %v11203_v14  ;;  %v5413_v31 = vsel %vm5410_vm1, %v5412_v43, %v5408_v41  ;;  %v12229_v48 = vld [vmem:[#allocation67_spill] sm:$0xff] }
 0xc24   : > { %vm5608_vm13 = vweird.f32 %v12203_v7  ;;  %v11299_v8 = vpop.eup %6720  ;;  %v5088_v47 = vrot.slane %v5056_v60, 7  ;;  %5144 = vst.msk [vmem:[%s10150_s25 + $0x6e] sm:$0x1] %vm3980_vm11, %v5084_v9  ;;  %v5354_v45 = vadd.f32 %v11203_v14, %v5353_v16  ;;  %v5414_v1 = vmul.f32 %v5413_v31, %v12223_v17  ;;  %v12233_v41 = vld [vmem:[#allocation71_spill] sm:$0xff] }
 0xc25   : > { %v5417_v18 = vsub.f32 1.0, %v5416_v39  ;;  %5145 = vst.msk [vmem:[%s10150_s25 + $0x72] sm:$0x1] %vm3980_vm11, %v5085_v26  ;;  %v5424_v25 = vand.u32 2147483647, %v11214_v0  ;;  %v5426_v30 = vand.u32 2147483648, %v11214_v0  ;;  %v11317_v12 = vadd.f32 %v12203_v7, %v11185_v62 }
 0xc26   : > { %vm11311_vm15 = vcmp.eq.f32.partialorder %v5523_v52, 8.507059e+37  ;;  %vm5607_vm14 = vweird.f32 %v12202_v19  ;;  %v5431_v51 = vmul.f32 %v11299_v8, %v11257_v42  ;;  %5146 = vst.msk [vmem:[%s10150_s25 + $0x76] sm:$0x1] %vm3980_vm11, %v5086_v49  ;;  %vm5355_vm4 = vweird.f32 %v11128_v37  ;;  %v12226_v52 = vld [vmem:[#allocation68_spill] sm:$0xff] }
 0xc27   : > { %v5446_v32 = vadd.f32 %v5414_v1, %v5334_v29  ;;  %v5418_v44 = vmul.f32 %v11273_v63, %v5417_v18  ;;  %vm5421_vm5 = vweird.f32 %v11273_v63  ;;  %v5349_v27 = vmul.f32 %v5348_v40, %v12226_v52  ;;  %5147 = vst.msk [vmem:[%s10150_s25 + $0x7a] sm:$0x1] %vm3980_vm11, %v5087_v57  ;;  %vm11332_vm7 = vmor %vm5355_vm4, %vm5356_vm2 }
 0xc28   : > { %v5359_v24 = vand.u32 2147483647, %v11128_v37  ;;  %v5361_v10 = vand.u32 2147483648, %v11128_v37  ;;  %v5432_v61 = vsub.f32 1.0, %v5431_v51  ;;  %5148 = vst.msk [vmem:[%s10150_s25 + $0x7e] sm:$0x1] %vm3980_vm11, %v5088_v47  ;;  %v5358_v38 = vsel %vm11332_vm7, %v11203_v14, %v5354_v45  ;;  %vm11371_vm2 = vmor %vm5607_vm14, %vm5608_vm13 }
 0xc29   : > { %v5534_v23 = vadd.f32 %v10530_v5, %v5446_v32  ;;  %v5419_v50 = vadd.f32 %v11273_v63, %v5418_v44  ;;  %vm5420_vm10 = vweird.f32 %v11214_v0  ;;  %vm5425_vm8 = vcmp.eq.f32.partialorder %v5424_v25, 8.507059e+37 }
 0xc2a   : > { %vm5422_vm6 = vmor %vm5420_vm10, %vm5421_vm5  ;;  %v5427_v54 = vor.u32 1.1754944e-38, %v5426_v30  ;;  %v5433_v55 = vmul.f32 %v11299_v8, %v5432_v61  ;;  %v5441_v37 = vand.u32 2147483648, %v11257_v42  ;;  %vm5436_vm0 = vweird.f32 %v11299_v8 }
 0xc2b   : > { %v5622_v60 = vadd.f32 %v10533_v28, %v5534_v23  ;;  %v5423_v4 = vsel %vm5422_vm6, %v11273_v63, %v5419_v50  ;;  %v5439_v5 = vand.u32 2147483647, %v11257_v42  ;;  %vm5360_vm3 = vcmp.eq.f32.partialorder %v5359_v24, 8.507059e+37 }
 0xc2c   : > { %v5362_v14 = vor.u32 1.1754944e-38, %v5361_v10  ;;  %v5428_v0 = vsel %vm5425_vm8, %v5427_v54, %v5423_v4  ;;  %v5434_v15 = vadd.f32 %v11299_v8, %v5433_v55  ;;  %vm5435_vm12 = vweird.f32 %v11257_v42 }
 0xc2d   : > { %v5636_v13 = vrot.slane %v5622_v60, 1  ;;  %v5637_v36 = vrot.slane %v5622_v60, 2  ;;  %v5638_v46 = vrot.slane %v5622_v60, 3  ;;  %5693 = vst.msk [vmem:[%s10150_s25 + $0x23] sm:$0x1] %vm3980_vm11, %v5622_v60  ;;  %v5639_v63 = vrot.slane %v5622_v60, 4  ;;  %vm5437_vm1 = vmor %vm5435_vm12, %vm5436_vm0 }
 0xc2e   : > { %v5363_v28 = vsel %vm5360_vm3, %v5362_v14, %v5358_v38  ;;  %v5429_v9 = vmul.f32 %v5428_v0, %v12229_v48  ;;  %v5442_v16 = vor.u32 1.1754944e-38, %v5441_v37  ;;  %v5640_v33 = vrot.slane %v5622_v60, 5 }
 0xc2f   : > { %5694 = vst.msk [vmem:[%s10150_s25 + $0x27] sm:$0x1] %vm3980_vm11, %v5636_v13  ;;  %v5527_v42 = vsel %vm11311_vm15, %v11095_v3, %v5522_v11  ;;  %v5438_v43 = vsel %vm5437_vm1, %v11299_v8, %v5434_v15  ;;  %vm5440_vm4 = vcmp.eq.f32.partialorder %v5439_v5, 8.507059e+37  ;;  %v5641_v22 = vrot.slane %v5622_v60, 6  ;;  %v12232_v11 = vld [vmem:[#allocation50_spill] sm:$0xff] }
 0xc30   : > { %5695 = vst.msk [vmem:[%s10150_s25 + $0x2b] sm:$0x1] %vm3980_vm11, %v5637_v36  ;;  %v5447_v21 = vadd.f32 %v5429_v9, %v5349_v27  ;;  %v5610_v3 = vsel %vm11371_vm2, %v12203_v7, %v11317_v12  ;;  %v5443_v2 = vsel %vm5440_vm4, %v5442_v16, %v5438_v43  ;;  %v5364_v49 = vmul.f32 %v5363_v28, %v12232_v11 }
 0xc31   : > { %v5642_v56 = vrot.slane %v5622_v60, 7  ;;  %5696 = vst.msk [vmem:[%s10150_s25 + $0x2f] sm:$0x1] %vm3980_vm11, %v5638_v46  ;;  %v5614_v29 = vor.u32 1.1754944e-38, %v5613_v59  ;;  %v5444_v39 = vmul.f32 %v5443_v2, %v12233_v41  ;;  %v5619_v40 = vmul.f32 %v8118_v35, %v11058_v34 }
 0xc32   : > { %5697 = vst.msk [vmem:[%s10150_s25 + $0x33] sm:$0x1] %vm3980_vm11, %v5639_v63  ;;  %v5535_v7 = vadd.f32 %v10933_v58, %v5447_v21  ;;  %vm5612_vm9 = vcmp.eq.f32.partialorder %v5611_v53, 8.507059e+37  ;;  %v5532_v57 = vmul.f32 %v8074_v6, %v5527_v42 }
 0xc33   : > { %5698 = vst.msk [vmem:[%s10150_s25 + $0x37] sm:$0x1] %vm3980_vm11, %v5640_v33  ;;  %v5615_v31 = vsel %vm5612_vm9, %v5614_v29, %v5610_v3  ;;  %v5448_v59 = vadd.f32 %v5444_v39, %v5364_v49 }
 0xc34   : > { %5699 = vst.msk [vmem:[%s10150_s25 + $0x3b] sm:$0x1] %vm3980_vm11, %v5641_v22  ;;  %v5623_v8 = vadd.f32 %v5619_v40, %v5535_v7  ;;  %v5620_v6 = vmul.f32 %v8118_v35, %v5615_v31 }
 0xc35   : > { %5700 = vst.msk [vmem:[%s10150_s25 + $0x3f] sm:$0x1] %vm3980_vm11, %v5642_v56  ;;  %v5536_v58 = vadd.f32 %v5532_v57, %v5448_v59 }
 0xc36   : > { %v5643_v34 = vrot.slane %v5623_v8, 1  ;;  %v5644_v19 = vrot.slane %v5623_v8, 2  ;;  %v5645_v53 = vrot.slane %v5623_v8, 3  ;;  %5701 = vst.msk [vmem:[%s10150_s25 + $0x43] sm:$0x1] %vm3980_vm11, %v5623_v8  ;;  %v5646_v47 = vrot.slane %v5623_v8, 4 }
 0xc37   : > { %v5647_v45 = vrot.slane %v5623_v8, 5  ;;  %v5624_v17 = vadd.f32 %v5620_v6, %v5536_v58  ;;  %v5648_v1 = vrot.slane %v5623_v8, 6  ;;  %v5649_v18 = vrot.slane %v5623_v8, 7 }
 0xc38   : > { %5702 = vst.msk [vmem:[%s10150_s25 + $0x47] sm:$0x1] %vm3980_vm11, %v5643_v34 }
 0xc39   : > { %5703 = vst.msk [vmem:[%s10150_s25 + $0x4b] sm:$0x1] %vm3980_vm11, %v5644_v19  ;;  %v5650_v35 = vrot.slane %v5624_v17, 1  ;;  %v5651_v25 = vrot.slane %v5624_v17, 2  ;;  %v5652_v30 = vrot.slane %v5624_v17, 3  ;;  %v5653_v20 = vrot.slane %v5624_v17, 4 }
 0xc3a   : > { %5704 = vst.msk [vmem:[%s10150_s25 + $0x4f] sm:$0x1] %vm3980_vm11, %v5645_v53  ;;  %v5654_v12 = vrot.slane %v5624_v17, 5  ;;  %v5655_v51 = vrot.slane %v5624_v17, 6  ;;  %v5656_v32 = vrot.slane %v5624_v17, 7 }
 0xc3b   : > { %5705 = vst.msk [vmem:[%s10150_s25 + $0x53] sm:$0x1] %vm3980_vm11, %v5646_v47 }
 0xc3c   : > { %5706 = vst.msk [vmem:[%s10150_s25 + $0x57] sm:$0x1] %vm3980_vm11, %v5647_v45 }
 0xc3d   : > { %5707 = vst.msk [vmem:[%s10150_s25 + $0x5b] sm:$0x1] %vm3980_vm11, %v5648_v1 }
 0xc3e   : > { %5708 = vst.msk [vmem:[%s10150_s25 + $0x5f] sm:$0x1] %vm3980_vm11, %v5649_v18 }
 0xc3f   : > { %5709 = vst.msk [vmem:[%s10150_s25 + $0x63] sm:$0x1] %vm3980_vm11, %v5624_v17 }
 0xc40   : > { %5710 = vst.msk [vmem:[%s10150_s25 + $0x67] sm:$0x1] %vm3980_vm11, %v5650_v35 }
 0xc41   : > { %5711 = vst.msk [vmem:[%s10150_s25 + $0x6b] sm:$0x1] %vm3980_vm11, %v5651_v25 }
 0xc42   : > { %5712 = vst.msk [vmem:[%s10150_s25 + $0x6f] sm:$0x1] %vm3980_vm11, %v5652_v30 }
 0xc43   : > { %5713 = vst.msk [vmem:[%s10150_s25 + $0x73] sm:$0x1] %vm3980_vm11, %v5653_v20 }
 0xc44   : > { %5714 = vst.msk [vmem:[%s10150_s25 + $0x77] sm:$0x1] %vm3980_vm11, %v5654_v12 }
 0xc45   : > { %5715 = vst.msk [vmem:[%s10150_s25 + $0x7b] sm:$0x1] %vm3980_vm11, %v5655_v51 }
 0xc46   : > { %5716 = vst.msk [vmem:[%s10150_s25 + $0x7f] sm:$0x1] %vm3980_vm11, %v5656_v32 }
 0xc47   : > { %6823 = shalt.err (!%p6820_p6)
}
 0xc48   : > { %s6910_s3 = smov 4   ;;  %s12235_s10 = smov 64  }
 0xc49   : > { %6212 = dma.vmem_to_hbm [thread:$0]  (%p7119_p11), %s5754_s0, 2048, %s5756_s1, %s5723_s26, %s12235_s10, %s12235_s10, %s6910_s3  }
 0xc4a PF: > { %s12236_s2 = sld [smem:[#allocation30_spill]]  ;;  %p12239_p13 = scmp.ge.s32.totalorder %s6866_s18, 2 }
 0xc4b   : > { %s12237_s25 = sld [smem:[#allocation35_spill]] }
 0xc50   : > { %s5770_s6 = sand.u32 1, %s12236_s2  }
 0xc51   : > { %p12238_p12 = scmp.ne.s32.totalorder %s12237_s25, 0  ;;  %s5771_s15 = scalar_lea.sflag [#allocation5], %s5770_s6 }
 0xc53   : > { %p6220_p0 = pnand %p12239_p13, %p12238_p12 }
 0xc55   : > { %p6221_p1 = pneg %p6220_p0 }
 0xc57   : > { %6845 = dma.done.wait (%p6221_p1), %s5771_s15, 512  }
 0xc58   : > { %6847 = vsyncadd (%p6221_p1), %s5771_s15, 4294966784  ;;  %s5781_s28 = scalar_lea.sflag [#allocation8], %s5770_s6 }
 0xc59   : > { %6849 = dma.done.wait (%p6221_p1), %s5781_s28, 2048  }
 0xc5a   : > { %6851 = vsyncadd (%p6221_p1), %s5781_s28, 4294965248  ;;  %s12240_s18 = sld [smem:[#allocation32_spill]]  ;;  %s12243_s28 = smov %s6858_s4 }
 0xc5b   : > { %s12241_s21 = sld [smem:[#allocation31_spill]] }
 0xc5c   : > { %s12242_s15 = sld [smem:[#allocation33_spill]] }
 0xc60   : > { %p80_p11 = scmp.ge.s32.totalorder %s12240_s18, 4  }
 0xc61   : > { %s12244_s4 = smov %s12241_s21 }
 0xc62   :  { %82 = sbr.rel (!%p80_p11) target bundleno = 60 (0x3c), region = 246 }
 0xc67   :  { %5787 = vsyncpa [#allocation4], 1 }
 0xc68   :  { %5789 = vsyncpa [#allocation4 + $0x1], 1 }
 0xc69   :  { %5790 = vsyncpa [#allocation5], 1 }
 0xc6a   :  { %5792 = vsyncpa [#allocation5 + $0x1], 1 }
 0xc6b   :  { %5793 = vsyncpa [#allocation8], 1 }
 0xc6c   :  { %5795 = vsyncpa [#allocation8 + $0x1], 1 }

</bundles_post_ra>
